<compile_context>
chip_gen: v6e
topology: v6e:2x2x1
jax: 0.10.0
libtpu: 0.0.40
codegen_flags: <defaults>
</compile_context>

<pallas_src>
import functools

import jax
import jax.numpy as jnp
from jax import lax
from jax.experimental import pallas as pl
from jax.experimental.pallas import tpu as pltpu


def _round_up(n, m):
    return ((n + m - 1) // m) * m


def _sigmoid(z):
    # EUP-friendly sigmoid (single tanh), avoids the multi-op f32 divide.
    return 0.5 * jnp.tanh(0.5 * z) + 0.5


def lstm_encoder_kernel(xw0_ref,   # (T, B, 4*Hp)  precomputed x @ W_ih0^T + b0
                        whh0_ref,  # (Hp, 4*Hp)    layer-0 recurrent weight (transposed)
                        w1_ref,    # (2*Hp, 4*Hp)  fused [W_ih1^T ; W_hh1^T]
                        b1_ref,    # (1, 4*Hp)
                        wfc_ref,   # (Hp, OUTp)
                        bfc_ref,   # (1, OUTp)
                        out_ref):  # (B, OUTp)
    T, B, G = xw0_ref.shape
    Hp = G // 4

    # Weights stay resident for the whole loop.
    whh0 = whh0_ref[...]
    w1 = w1_ref[...]
    b1 = b1_ref[...]

    def act(gates, c):
        # PyTorch gate order [i, f, g, o]; all slices are 128-lane aligned.
        i = _sigmoid(gates[:, 0 * Hp:1 * Hp])
        f = _sigmoid(gates[:, 1 * Hp:2 * Hp])
        g = jnp.tanh(gates[:, 2 * Hp:3 * Hp])
        o = _sigmoid(gates[:, 3 * Hp:4 * Hp])
        c_new = f * c + i * g
        h_new = o * jnp.tanh(c_new)
        return h_new, c_new

    def step(t, carry):
        h0, c0, h1, c1 = carry
        # Layer 0: only the recurrent matmul is on the serial chain.
        g0 = xw0_ref[t] + jnp.dot(h0, whh0, preferred_element_type=jnp.float32)
        h0, c0 = act(g0, c0)
        # Layer 1: single fused gate matmul over the concatenated (lane-aligned)
        # [h0, h1] activation.
        hcat = jnp.concatenate([h0, h1], axis=-1)            # (B, 2*Hp)
        g1 = jnp.dot(hcat, w1, preferred_element_type=jnp.float32) + b1
        h1, c1 = act(g1, c1)
        return h0, c0, h1, c1

    z = jnp.zeros((B, Hp), jnp.float32)
    _, _, h1, _ = lax.fori_loop(0, T, step, (z, z, z, z), unroll=True)

    # tanh(fc(hn[-1])) -- lane-dense (B, OUTp) store; wrapper slices to OUT.
    out_ref[...] = jnp.tanh(
        jnp.dot(h1, wfc_ref[...], preferred_element_type=jnp.float32)
        + bfc_ref[...])


def _pad_gate_dim(w, H, Hp):
    """Leading dim is 4*H in gate order [i,f,g,o]; zero-pad each gate to Hp."""
    pad = ((0, Hp - H),) + ((0, 0),) * (w.ndim - 1)
    return jnp.concatenate(
        [jnp.pad(w[g * H:(g + 1) * H], pad) for g in range(4)], axis=0)


def _prepare_params(params, H, Hp, OUT, OUTp):
    (wih0, whh0, bih0, bhh0,
     wih1, whh1, bih1, bhh1,
     wfc, bfc) = params

    wih0_p = _pad_gate_dim(wih0, H, Hp)                                   # (4Hp, IN)
    whh0_p = jnp.pad(_pad_gate_dim(whh0, H, Hp), ((0, 0), (0, Hp - H)))   # (4Hp, Hp)
    wih1_p = jnp.pad(_pad_gate_dim(wih1, H, Hp), ((0, 0), (0, Hp - H)))   # (4Hp, Hp)
    whh1_p = jnp.pad(_pad_gate_dim(whh1, H, Hp), ((0, 0), (0, Hp - H)))   # (4Hp, Hp)
    b0_p = _pad_gate_dim(bih0 + bhh0, H, Hp)                              # (4Hp,)
    b1_p = _pad_gate_dim(bih1 + bhh1, H, Hp)                              # (4Hp,)
    wfc_p = jnp.pad(wfc, ((0, OUTp - OUT), (0, Hp - H)))                  # (OUTp, Hp)
    bfc_p = jnp.pad(bfc, (0, OUTp - OUT))                                 # (OUTp,)

    return dict(
        wih0T=wih0_p.T,                                       # (IN, 4Hp)
        whh0T=whh0_p.T,                                       # (Hp, 4Hp)
        b0=b0_p[None, :],                                     # (1, 4Hp)
        w1cat=jnp.concatenate([wih1_p.T, whh1_p.T], axis=0),  # (2Hp, 4Hp)
        b1=b1_p[None, :],                                     # (1, 4Hp)
        wfcT=wfc_p.T,                                         # (Hp, OUTp)
        bfc=bfc_p[None, :],                                   # (1, OUTp)
    )


@functools.partial(jax.jit, static_argnames=("hidden_size", "output_dim"))
def lstm_encoder(x, params, *, hidden_size, output_dim):
    """x: (B, T, IN) batch_first like PyTorch. Returns (B, output_dim)."""
    B, T, IN = x.shape
    H, OUT = hidden_size, output_dim
    Hp, OUTp = _round_up(H, 128), _round_up(OUT, 128)

    p = _prepare_params(params, H, Hp, OUT, OUTp)

    # Hoisted, time-parallel layer-0 input projection (cuDNN-style split),
    # laid out time-major so the kernel reads one (B, 4Hp) slab per step.
    xw0 = jnp.einsum("bti,ig->tbg", x, p["wih0T"],
                     precision=jax.lax.Precision.HIGHEST) + p["b0"]   # (T, B, 4Hp)

    vmem = pl.BlockSpec(memory_space=pltpu.MemorySpace.VMEM)
    out_p = pl.pallas_call(
        lstm_encoder_kernel,
        out_shape=jax.ShapeDtypeStruct((B, OUTp), jnp.float32),
        in_specs=[vmem] * 6,
        out_specs=vmem,
    )(xw0, p["whh0T"], p["w1cat"], p["b1"], p["wfcT"], p["bfc"])
    return out_p[:, :OUT]


def ref_forward(x, params):
    """Pure-JAX reference matching PyTorch LSTMEncoder.forward."""
    (wih0, whh0, bih0, bhh0, wih1, whh1, bih1, bhh1, wfc, bfc) = params
    B, T, _ = x.shape
    H = whh0.shape[1]
    h0 = c0 = h1 = c1 = jnp.zeros((B, H), jnp.float32)

    def cell(inp, h, c, wih, whh, b):
        g = inp @ wih.T + h @ whh.T + b
        i, f, gg, o = g[:, :H], g[:, H:2 * H], g[:, 2 * H:3 * H], g[:, 3 * H:]
        c = jax.nn.sigmoid(f) * c + jax.nn.sigmoid(i) * jnp.tanh(gg)
        h = jax.nn.sigmoid(o) * jnp.tanh(c)
        return h, c

    for t in range(T):
        h0, c0 = cell(x[:, t], h0, c0, wih0, whh0, bih0 + bhh0)
        h1, c1 = cell(h0, h1, c1, wih1, whh1, bih1 + bhh1)
    return jnp.tanh(h1 @ wfc.T + bfc)


def init_params(key, input_size=2, hidden_size=64, output_dim=40):
    """Synthetic init mimicking PyTorch's U(-1/sqrt(H), 1/sqrt(H)), raw torch layout."""
    H = hidden_size
    k = 1.0 / jnp.sqrt(jnp.float32(H))
    keys = jax.random.split(key, 10)

    def u(kk, shape):
        return jax.random.uniform(kk, shape, jnp.float32, minval=-k, maxval=k)

    wih0 = u(keys[0], (4 * H, input_size))
    whh0 = u(keys[1], (4 * H, H))
    bih0 = u(keys[2], (4 * H,))
    bhh0 = u(keys[3], (4 * H,))
    wih1 = u(keys[4], (4 * H, H))
    whh1 = u(keys[5], (4 * H, H))
    bih1 = u(keys[6], (4 * H,))
    bhh1 = u(keys[7], (4 * H,))
    wfc = u(keys[8], (output_dim, H))
    bfc = u(keys[9], (output_dim,))
    return (wih0, whh0, bih0, bhh0, wih1, whh1, bih1, bhh1, wfc, bfc)


if __name__ == "__main__":
    B, T, IN, H, OUT = 2, 8, 2, 64, 40

    key = jax.random.PRNGKey(0)
    kx, kp = jax.random.split(key)
    x = jax.random.normal(kx, (B, T, IN), jnp.float32)
    params = init_params(kp, input_size=IN, hidden_size=H, output_dim=OUT)

    out = lstm_encoder(x, params, hidden_size=H, output_dim=OUT)
    out = jax.block_until_ready(out)

    ref = ref_forward(x, params)
    assert out.shape == (B, OUT)
    assert jnp.allclose(out, ref, atol=1e-5, rtol=1e-5), (
        f"max abs err {jnp.max(jnp.abs(out - ref))}")

    print("KERNEL_OK")
</pallas_src>

<mosaic_0001>
module attributes {stable_mosaic.version = 11 : i64} {
  func.func @lstm_encoder_kernel(%arg0: memref<8x2x512xf32, #tpu.memory_space<vmem>>, %arg1: memref<128x512xf32, #tpu.memory_space<vmem>>, %arg2: memref<256x512xf32, #tpu.memory_space<vmem>>, %arg3: memref<1x512xf32, #tpu.memory_space<vmem>>, %arg4: memref<128x128xf32, #tpu.memory_space<vmem>>, %arg5: memref<1x128xf32, #tpu.memory_space<vmem>>, %arg6: memref<2x128xf32, #tpu.memory_space<vmem>>) attributes {dimension_semantics = [], scalar_prefetch = 0 : i64, scratch_operands = 0 : i64, tpu.core_type = #tpu.core_type<tc>} {
    %c0 = arith.constant 0 : index
    %c0_0 = arith.constant 0 : index
    %0 = vector.load %arg1[%c0, %c0_0] : memref<128x512xf32, #tpu.memory_space<vmem>>, vector<128x512xf32>
    %c0_1 = arith.constant 0 : index
    %c0_2 = arith.constant 0 : index
    %1 = vector.load %arg2[%c0_1, %c0_2] : memref<256x512xf32, #tpu.memory_space<vmem>>, vector<256x512xf32>
    %c0_3 = arith.constant 0 : index
    %c0_4 = arith.constant 0 : index
    %2 = vector.load %arg3[%c0_3, %c0_4] : memref<1x512xf32, #tpu.memory_space<vmem>>, vector<1x512xf32>
    %cst = arith.constant 0.000000e+00 : f32
    %3 = vector.broadcast %cst : f32 to vector<2x128xf32>
    %c0_i32 = arith.constant 0 : i32
    %4 = arith.index_cast %c0_i32 : i32 to index
    %c0_5 = arith.constant 0 : index
    %c0_6 = arith.constant 0 : index
    %5 = vector.load %arg0[%4, %c0_5, %c0_6] : memref<8x2x512xf32, #tpu.memory_space<vmem>>, vector<1x2x512xf32>
    %6 = vector.shape_cast %5 : vector<1x2x512xf32> to vector<2x512xf32>
    %cst_7 = arith.constant dense<0.000000e+00> : vector<2x512xf32>
    %7 = tpu.matmul %3, %0, %cst_7 {dimension_numbers = #tpu.dot_dimension_numbers<[1], [0], [0], [1], [0, 0, 1, 1], [], []>} : vector<2x128xf32>, vector<128x512xf32>, vector<2x512xf32> -> vector<2x512xf32>
    %8 = arith.addf %6, %7 : vector<2x512xf32>
    %9 = vector.extract_strided_slice %8 {offsets = [0, 0], sizes = [2, 128], strides = [1, 1]} : vector<2x512xf32> to vector<2x128xf32>
    %cst_8 = arith.constant 5.000000e-01 : f32
    %10 = vector.broadcast %cst_8 : f32 to vector<2x128xf32>
    %11 = arith.mulf %10, %9 : vector<2x128xf32>
    %12 = math.tanh %11 : vector<2x128xf32>
    %cst_9 = arith.constant 5.000000e-01 : f32
    %13 = vector.broadcast %cst_9 : f32 to vector<2x128xf32>
    %14 = arith.mulf %13, %12 : vector<2x128xf32>
    %cst_10 = arith.constant 5.000000e-01 : f32
    %15 = vector.broadcast %cst_10 : f32 to vector<2x128xf32>
    %16 = arith.addf %14, %15 : vector<2x128xf32>
    %17 = vector.extract_strided_slice %8 {offsets = [0, 128], sizes = [2, 128], strides = [1, 1]} : vector<2x512xf32> to vector<2x128xf32>
    %cst_11 = arith.constant 5.000000e-01 : f32
    %18 = vector.broadcast %cst_11 : f32 to vector<2x128xf32>
    %19 = arith.mulf %18, %17 : vector<2x128xf32>
    %20 = math.tanh %19 : vector<2x128xf32>
    %cst_12 = arith.constant 5.000000e-01 : f32
    %21 = vector.broadcast %cst_12 : f32 to vector<2x128xf32>
    %22 = arith.mulf %21, %20 : vector<2x128xf32>
    %cst_13 = arith.constant 5.000000e-01 : f32
    %23 = vector.broadcast %cst_13 : f32 to vector<2x128xf32>
    %24 = arith.addf %22, %23 : vector<2x128xf32>
    %25 = vector.extract_strided_slice %8 {offsets = [0, 256], sizes = [2, 128], strides = [1, 1]} : vector<2x512xf32> to vector<2x128xf32>
    %26 = math.tanh %25 : vector<2x128xf32>
    %27 = vector.extract_strided_slice %8 {offsets = [0, 384], sizes = [2, 128], strides = [1, 1]} : vector<2x512xf32> to vector<2x128xf32>
    %cst_14 = arith.constant 5.000000e-01 : f32
    %28 = vector.broadcast %cst_14 : f32 to vector<2x128xf32>
    %29 = arith.mulf %28, %27 : vector<2x128xf32>
    %30 = math.tanh %29 : vector<2x128xf32>
    %cst_15 = arith.constant 5.000000e-01 : f32
    %31 = vector.broadcast %cst_15 : f32 to vector<2x128xf32>
    %32 = arith.mulf %31, %30 : vector<2x128xf32>
    %cst_16 = arith.constant 5.000000e-01 : f32
    %33 = vector.broadcast %cst_16 : f32 to vector<2x128xf32>
    %34 = arith.addf %32, %33 : vector<2x128xf32>
    %35 = arith.mulf %24, %3 : vector<2x128xf32>
    %36 = arith.mulf %16, %26 : vector<2x128xf32>
    %37 = arith.addf %35, %36 : vector<2x128xf32>
    %38 = math.tanh %37 : vector<2x128xf32>
    %39 = arith.mulf %34, %38 : vector<2x128xf32>
    %40 = tpu.concatenate %39, %3 in 1 : vector<2x128xf32>, vector<2x128xf32> -> vector<2x256xf32>
    %cst_17 = arith.constant dense<0.000000e+00> : vector<2x512xf32>
    %41 = tpu.matmul %40, %1, %cst_17 {dimension_numbers = #tpu.dot_dimension_numbers<[1], [0], [0], [1], [0, 0, 1, 1], [], []>} : vector<2x256xf32>, vector<256x512xf32>, vector<2x512xf32> -> vector<2x512xf32>
    %42 = vector.broadcast %2 : vector<1x512xf32> to vector<2x512xf32>
    %43 = arith.addf %41, %42 : vector<2x512xf32>
    %44 = vector.extract_strided_slice %43 {offsets = [0, 0], sizes = [2, 128], strides = [1, 1]} : vector<2x512xf32> to vector<2x128xf32>
    %cst_18 = arith.constant 5.000000e-01 : f32
    %45 = vector.broadcast %cst_18 : f32 to vector<2x128xf32>
    %46 = arith.mulf %45, %44 : vector<2x128xf32>
    %47 = math.tanh %46 : vector<2x128xf32>
    %cst_19 = arith.constant 5.000000e-01 : f32
    %48 = vector.broadcast %cst_19 : f32 to vector<2x128xf32>
    %49 = arith.mulf %48, %47 : vector<2x128xf32>
    %cst_20 = arith.constant 5.000000e-01 : f32
    %50 = vector.broadcast %cst_20 : f32 to vector<2x128xf32>
    %51 = arith.addf %49, %50 : vector<2x128xf32>
    %52 = vector.extract_strided_slice %43 {offsets = [0, 128], sizes = [2, 128], strides = [1, 1]} : vector<2x512xf32> to vector<2x128xf32>
    %cst_21 = arith.constant 5.000000e-01 : f32
    %53 = vector.broadcast %cst_21 : f32 to vector<2x128xf32>
    %54 = arith.mulf %53, %52 : vector<2x128xf32>
    %55 = math.tanh %54 : vector<2x128xf32>
    %cst_22 = arith.constant 5.000000e-01 : f32
    %56 = vector.broadcast %cst_22 : f32 to vector<2x128xf32>
    %57 = arith.mulf %56, %55 : vector<2x128xf32>
    %cst_23 = arith.constant 5.000000e-01 : f32
    %58 = vector.broadcast %cst_23 : f32 to vector<2x128xf32>
    %59 = arith.addf %57, %58 : vector<2x128xf32>
    %60 = vector.extract_strided_slice %43 {offsets = [0, 256], sizes = [2, 128], strides = [1, 1]} : vector<2x512xf32> to vector<2x128xf32>
    %61 = math.tanh %60 : vector<2x128xf32>
    %62 = vector.extract_strided_slice %43 {offsets = [0, 384], sizes = [2, 128], strides = [1, 1]} : vector<2x512xf32> to vector<2x128xf32>
    %cst_24 = arith.constant 5.000000e-01 : f32
    %63 = vector.broadcast %cst_24 : f32 to vector<2x128xf32>
    %64 = arith.mulf %63, %62 : vector<2x128xf32>
    %65 = math.tanh %64 : vector<2x128xf32>
    %cst_25 = arith.constant 5.000000e-01 : f32
    %66 = vector.broadcast %cst_25 : f32 to vector<2x128xf32>
    %67 = arith.mulf %66, %65 : vector<2x128xf32>
    %cst_26 = arith.constant 5.000000e-01 : f32
    %68 = vector.broadcast %cst_26 : f32 to vector<2x128xf32>
    %69 = arith.addf %67, %68 : vector<2x128xf32>
    %70 = arith.mulf %59, %3 : vector<2x128xf32>
    %71 = arith.mulf %51, %61 : vector<2x128xf32>
    %72 = arith.addf %70, %71 : vector<2x128xf32>
    %73 = math.tanh %72 : vector<2x128xf32>
    %74 = arith.mulf %69, %73 : vector<2x128xf32>
    %c1_i32 = arith.constant 1 : i32
    %75 = arith.index_cast %c1_i32 : i32 to index
    %c0_27 = arith.constant 0 : index
    %c0_28 = arith.constant 0 : index
    %76 = vector.load %arg0[%75, %c0_27, %c0_28] : memref<8x2x512xf32, #tpu.memory_space<vmem>>, vector<1x2x512xf32>
    %77 = vector.shape_cast %76 : vector<1x2x512xf32> to vector<2x512xf32>
    %cst_29 = arith.constant dense<0.000000e+00> : vector<2x512xf32>
    %78 = tpu.matmul %39, %0, %cst_29 {dimension_numbers = #tpu.dot_dimension_numbers<[1], [0], [0], [1], [0, 0, 1, 1], [], []>} : vector<2x128xf32>, vector<128x512xf32>, vector<2x512xf32> -> vector<2x512xf32>
    %79 = arith.addf %77, %78 : vector<2x512xf32>
    %80 = vector.extract_strided_slice %79 {offsets = [0, 0], sizes = [2, 128], strides = [1, 1]} : vector<2x512xf32> to vector<2x128xf32>
    %cst_30 = arith.constant 5.000000e-01 : f32
    %81 = vector.broadcast %cst_30 : f32 to vector<2x128xf32>
    %82 = arith.mulf %81, %80 : vector<2x128xf32>
    %83 = math.tanh %82 : vector<2x128xf32>
    %cst_31 = arith.constant 5.000000e-01 : f32
    %84 = vector.broadcast %cst_31 : f32 to vector<2x128xf32>
    %85 = arith.mulf %84, %83 : vector<2x128xf32>
    %cst_32 = arith.constant 5.000000e-01 : f32
    %86 = vector.broadcast %cst_32 : f32 to vector<2x128xf32>
    %87 = arith.addf %85, %86 : vector<2x128xf32>
    %88 = vector.extract_strided_slice %79 {offsets = [0, 128], sizes = [2, 128], strides = [1, 1]} : vector<2x512xf32> to vector<2x128xf32>
    %cst_33 = arith.constant 5.000000e-01 : f32
    %89 = vector.broadcast %cst_33 : f32 to vector<2x128xf32>
    %90 = arith.mulf %89, %88 : vector<2x128xf32>
    %91 = math.tanh %90 : vector<2x128xf32>
    %cst_34 = arith.constant 5.000000e-01 : f32
    %92 = vector.broadcast %cst_34 : f32 to vector<2x128xf32>
    %93 = arith.mulf %92, %91 : vector<2x128xf32>
    %cst_35 = arith.constant 5.000000e-01 : f32
    %94 = vector.broadcast %cst_35 : f32 to vector<2x128xf32>
    %95 = arith.addf %93, %94 : vector<2x128xf32>
    %96 = vector.extract_strided_slice %79 {offsets = [0, 256], sizes = [2, 128], strides = [1, 1]} : vector<2x512xf32> to vector<2x128xf32>
    %97 = math.tanh %96 : vector<2x128xf32>
    %98 = vector.extract_strided_slice %79 {offsets = [0, 384], sizes = [2, 128], strides = [1, 1]} : vector<2x512xf32> to vector<2x128xf32>
    %cst_36 = arith.constant 5.000000e-01 : f32
    %99 = vector.broadcast %cst_36 : f32 to vector<2x128xf32>
    %100 = arith.mulf %99, %98 : vector<2x128xf32>
    %101 = math.tanh %100 : vector<2x128xf32>
    %cst_37 = arith.constant 5.000000e-01 : f32
    %102 = vector.broadcast %cst_37 : f32 to vector<2x128xf32>
    %103 = arith.mulf %102, %101 : vector<2x128xf32>
    %cst_38 = arith.constant 5.000000e-01 : f32
    %104 = vector.broadcast %cst_38 : f32 to vector<2x128xf32>
    %105 = arith.addf %103, %104 : vector<2x128xf32>
    %106 = arith.mulf %95, %37 : vector<2x128xf32>
    %107 = arith.mulf %87, %97 : vector<2x128xf32>
    %108 = arith.addf %106, %107 : vector<2x128xf32>
    %109 = math.tanh %108 : vector<2x128xf32>
    %110 = arith.mulf %105, %109 : vector<2x128xf32>
    %111 = tpu.concatenate %110, %74 in 1 : vector<2x128xf32>, vector<2x128xf32> -> vector<2x256xf32>
    %cst_39 = arith.constant dense<0.000000e+00> : vector<2x512xf32>
    %112 = tpu.matmul %111, %1, %cst_39 {dimension_numbers = #tpu.dot_dimension_numbers<[1], [0], [0], [1], [0, 0, 1, 1], [], []>} : vector<2x256xf32>, vector<256x512xf32>, vector<2x512xf32> -> vector<2x512xf32>
    %113 = vector.broadcast %2 : vector<1x512xf32> to vector<2x512xf32>
    %114 = arith.addf %112, %113 : vector<2x512xf32>
    %115 = vector.extract_strided_slice %114 {offsets = [0, 0], sizes = [2, 128], strides = [1, 1]} : vector<2x512xf32> to vector<2x128xf32>
    %cst_40 = arith.constant 5.000000e-01 : f32
    %116 = vector.broadcast %cst_40 : f32 to vector<2x128xf32>
    %117 = arith.mulf %116, %115 : vector<2x128xf32>
    %118 = math.tanh %117 : vector<2x128xf32>
    %cst_41 = arith.constant 5.000000e-01 : f32
    %119 = vector.broadcast %cst_41 : f32 to vector<2x128xf32>
    %120 = arith.mulf %119, %118 : vector<2x128xf32>
    %cst_42 = arith.constant 5.000000e-01 : f32
    %121 = vector.broadcast %cst_42 : f32 to vector<2x128xf32>
    %122 = arith.addf %120, %121 : vector<2x128xf32>
    %123 = vector.extract_strided_slice %114 {offsets = [0, 128], sizes = [2, 128], strides = [1, 1]} : vector<2x512xf32> to vector<2x128xf32>
    %cst_43 = arith.constant 5.000000e-01 : f32
    %124 = vector.broadcast %cst_43 : f32 to vector<2x128xf32>
    %125 = arith.mulf %124, %123 : vector<2x128xf32>
    %126 = math.tanh %125 : vector<2x128xf32>
    %cst_44 = arith.constant 5.000000e-01 : f32
    %127 = vector.broadcast %cst_44 : f32 to vector<2x128xf32>
    %128 = arith.mulf %127, %126 : vector<2x128xf32>
    %cst_45 = arith.constant 5.000000e-01 : f32
    %129 = vector.broadcast %cst_45 : f32 to vector<2x128xf32>
    %130 = arith.addf %128, %129 : vector<2x128xf32>
    %131 = vector.extract_strided_slice %114 {offsets = [0, 256], sizes = [2, 128], strides = [1, 1]} : vector<2x512xf32> to vector<2x128xf32>
    %132 = math.tanh %131 : vector<2x128xf32>
    %133 = vector.extract_strided_slice %114 {offsets = [0, 384], sizes = [2, 128], strides = [1, 1]} : vector<2x512xf32> to vector<2x128xf32>
    %cst_46 = arith.constant 5.000000e-01 : f32
    %134 = vector.broadcast %cst_46 : f32 to vector<2x128xf32>
    %135 = arith.mulf %134, %133 : vector<2x128xf32>
    %136 = math.tanh %135 : vector<2x128xf32>
    %cst_47 = arith.constant 5.000000e-01 : f32
    %137 = vector.broadcast %cst_47 : f32 to vector<2x128xf32>
    %138 = arith.mulf %137, %136 : vector<2x128xf32>
    %cst_48 = arith.constant 5.000000e-01 : f32
    %139 = vector.broadcast %cst_48 : f32 to vector<2x128xf32>
    %140 = arith.addf %138, %139 : vector<2x128xf32>
    %141 = arith.mulf %130, %72 : vector<2x128xf32>
    %142 = arith.mulf %122, %132 : vector<2x128xf32>
    %143 = arith.addf %141, %142 : vector<2x128xf32>
    %144 = math.tanh %143 : vector<2x128xf32>
    %145 = arith.mulf %140, %144 : vector<2x128xf32>
    %c2_i32 = arith.constant 2 : i32
    %146 = arith.index_cast %c2_i32 : i32 to index
    %c0_49 = arith.constant 0 : index
    %c0_50 = arith.constant 0 : index
    %147 = vector.load %arg0[%146, %c0_49, %c0_50] : memref<8x2x512xf32, #tpu.memory_space<vmem>>, vector<1x2x512xf32>
    %148 = vector.shape_cast %147 : vector<1x2x512xf32> to vector<2x512xf32>
    %cst_51 = arith.constant dense<0.000000e+00> : vector<2x512xf32>
    %149 = tpu.matmul %110, %0, %cst_51 {dimension_numbers = #tpu.dot_dimension_numbers<[1], [0], [0], [1], [0, 0, 1, 1], [], []>} : vector<2x128xf32>, vector<128x512xf32>, vector<2x512xf32> -> vector<2x512xf32>
    %150 = arith.addf %148, %149 : vector<2x512xf32>
    %151 = vector.extract_strided_slice %150 {offsets = [0, 0], sizes = [2, 128], strides = [1, 1]} : vector<2x512xf32> to vector<2x128xf32>
    %cst_52 = arith.constant 5.000000e-01 : f32
    %152 = vector.broadcast %cst_52 : f32 to vector<2x128xf32>
    %153 = arith.mulf %152, %151 : vector<2x128xf32>
    %154 = math.tanh %153 : vector<2x128xf32>
    %cst_53 = arith.constant 5.000000e-01 : f32
    %155 = vector.broadcast %cst_53 : f32 to vector<2x128xf32>
    %156 = arith.mulf %155, %154 : vector<2x128xf32>
    %cst_54 = arith.constant 5.000000e-01 : f32
    %157 = vector.broadcast %cst_54 : f32 to vector<2x128xf32>
    %158 = arith.addf %156, %157 : vector<2x128xf32>
    %159 = vector.extract_strided_slice %150 {offsets = [0, 128], sizes = [2, 128], strides = [1, 1]} : vector<2x512xf32> to vector<2x128xf32>
    %cst_55 = arith.constant 5.000000e-01 : f32
    %160 = vector.broadcast %cst_55 : f32 to vector<2x128xf32>
    %161 = arith.mulf %160, %159 : vector<2x128xf32>
    %162 = math.tanh %161 : vector<2x128xf32>
    %cst_56 = arith.constant 5.000000e-01 : f32
    %163 = vector.broadcast %cst_56 : f32 to vector<2x128xf32>
    %164 = arith.mulf %163, %162 : vector<2x128xf32>
    %cst_57 = arith.constant 5.000000e-01 : f32
    %165 = vector.broadcast %cst_57 : f32 to vector<2x128xf32>
    %166 = arith.addf %164, %165 : vector<2x128xf32>
    %167 = vector.extract_strided_slice %150 {offsets = [0, 256], sizes = [2, 128], strides = [1, 1]} : vector<2x512xf32> to vector<2x128xf32>
    %168 = math.tanh %167 : vector<2x128xf32>
    %169 = vector.extract_strided_slice %150 {offsets = [0, 384], sizes = [2, 128], strides = [1, 1]} : vector<2x512xf32> to vector<2x128xf32>
    %cst_58 = arith.constant 5.000000e-01 : f32
    %170 = vector.broadcast %cst_58 : f32 to vector<2x128xf32>
    %171 = arith.mulf %170, %169 : vector<2x128xf32>
    %172 = math.tanh %171 : vector<2x128xf32>
    %cst_59 = arith.constant 5.000000e-01 : f32
    %173 = vector.broadcast %cst_59 : f32 to vector<2x128xf32>
    %174 = arith.mulf %173, %172 : vector<2x128xf32>
    %cst_60 = arith.constant 5.000000e-01 : f32
    %175 = vector.broadcast %cst_60 : f32 to vector<2x128xf32>
    %176 = arith.addf %174, %175 : vector<2x128xf32>
    %177 = arith.mulf %166, %108 : vector<2x128xf32>
    %178 = arith.mulf %158, %168 : vector<2x128xf32>
    %179 = arith.addf %177, %178 : vector<2x128xf32>
    %180 = math.tanh %179 : vector<2x128xf32>
    %181 = arith.mulf %176, %180 : vector<2x128xf32>
    %182 = tpu.concatenate %181, %145 in 1 : vector<2x128xf32>, vector<2x128xf32> -> vector<2x256xf32>
    %cst_61 = arith.constant dense<0.000000e+00> : vector<2x512xf32>
    %183 = tpu.matmul %182, %1, %cst_61 {dimension_numbers = #tpu.dot_dimension_numbers<[1], [0], [0], [1], [0, 0, 1, 1], [], []>} : vector<2x256xf32>, vector<256x512xf32>, vector<2x512xf32> -> vector<2x512xf32>
    %184 = vector.broadcast %2 : vector<1x512xf32> to vector<2x512xf32>
    %185 = arith.addf %183, %184 : vector<2x512xf32>
    %186 = vector.extract_strided_slice %185 {offsets = [0, 0], sizes = [2, 128], strides = [1, 1]} : vector<2x512xf32> to vector<2x128xf32>
    %cst_62 = arith.constant 5.000000e-01 : f32
    %187 = vector.broadcast %cst_62 : f32 to vector<2x128xf32>
    %188 = arith.mulf %187, %186 : vector<2x128xf32>
    %189 = math.tanh %188 : vector<2x128xf32>
    %cst_63 = arith.constant 5.000000e-01 : f32
    %190 = vector.broadcast %cst_63 : f32 to vector<2x128xf32>
    %191 = arith.mulf %190, %189 : vector<2x128xf32>
    %cst_64 = arith.constant 5.000000e-01 : f32
    %192 = vector.broadcast %cst_64 : f32 to vector<2x128xf32>
    %193 = arith.addf %191, %192 : vector<2x128xf32>
    %194 = vector.extract_strided_slice %185 {offsets = [0, 128], sizes = [2, 128], strides = [1, 1]} : vector<2x512xf32> to vector<2x128xf32>
    %cst_65 = arith.constant 5.000000e-01 : f32
    %195 = vector.broadcast %cst_65 : f32 to vector<2x128xf32>
    %196 = arith.mulf %195, %194 : vector<2x128xf32>
    %197 = math.tanh %196 : vector<2x128xf32>
    %cst_66 = arith.constant 5.000000e-01 : f32
    %198 = vector.broadcast %cst_66 : f32 to vector<2x128xf32>
    %199 = arith.mulf %198, %197 : vector<2x128xf32>
    %cst_67 = arith.constant 5.000000e-01 : f32
    %200 = vector.broadcast %cst_67 : f32 to vector<2x128xf32>
    %201 = arith.addf %199, %200 : vector<2x128xf32>
    %202 = vector.extract_strided_slice %185 {offsets = [0, 256], sizes = [2, 128], strides = [1, 1]} : vector<2x512xf32> to vector<2x128xf32>
    %203 = math.tanh %202 : vector<2x128xf32>
    %204 = vector.extract_strided_slice %185 {offsets = [0, 384], sizes = [2, 128], strides = [1, 1]} : vector<2x512xf32> to vector<2x128xf32>
    %cst_68 = arith.constant 5.000000e-01 : f32
    %205 = vector.broadcast %cst_68 : f32 to vector<2x128xf32>
    %206 = arith.mulf %205, %204 : vector<2x128xf32>
    %207 = math.tanh %206 : vector<2x128xf32>
    %cst_69 = arith.constant 5.000000e-01 : f32
    %208 = vector.broadcast %cst_69 : f32 to vector<2x128xf32>
    %209 = arith.mulf %208, %207 : vector<2x128xf32>
    %cst_70 = arith.constant 5.000000e-01 : f32
    %210 = vector.broadcast %cst_70 : f32 to vector<2x128xf32>
    %211 = arith.addf %209, %210 : vector<2x128xf32>
    %212 = arith.mulf %201, %143 : vector<2x128xf32>
    %213 = arith.mulf %193, %203 : vector<2x128xf32>
    %214 = arith.addf %212, %213 : vector<2x128xf32>
    %215 = math.tanh %214 : vector<2x128xf32>
    %216 = arith.mulf %211, %215 : vector<2x128xf32>
    %c3_i32 = arith.constant 3 : i32
    %217 = arith.index_cast %c3_i32 : i32 to index
    %c0_71 = arith.constant 0 : index
    %c0_72 = arith.constant 0 : index
    %218 = vector.load %arg0[%217, %c0_71, %c0_72] : memref<8x2x512xf32, #tpu.memory_space<vmem>>, vector<1x2x512xf32>
    %219 = vector.shape_cast %218 : vector<1x2x512xf32> to vector<2x512xf32>
    %cst_73 = arith.constant dense<0.000000e+00> : vector<2x512xf32>
    %220 = tpu.matmul %181, %0, %cst_73 {dimension_numbers = #tpu.dot_dimension_numbers<[1], [0], [0], [1], [0, 0, 1, 1], [], []>} : vector<2x128xf32>, vector<128x512xf32>, vector<2x512xf32> -> vector<2x512xf32>
    %221 = arith.addf %219, %220 : vector<2x512xf32>
    %222 = vector.extract_strided_slice %221 {offsets = [0, 0], sizes = [2, 128], strides = [1, 1]} : vector<2x512xf32> to vector<2x128xf32>
    %cst_74 = arith.constant 5.000000e-01 : f32
    %223 = vector.broadcast %cst_74 : f32 to vector<2x128xf32>
    %224 = arith.mulf %223, %222 : vector<2x128xf32>
    %225 = math.tanh %224 : vector<2x128xf32>
    %cst_75 = arith.constant 5.000000e-01 : f32
    %226 = vector.broadcast %cst_75 : f32 to vector<2x128xf32>
    %227 = arith.mulf %226, %225 : vector<2x128xf32>
    %cst_76 = arith.constant 5.000000e-01 : f32
    %228 = vector.broadcast %cst_76 : f32 to vector<2x128xf32>
    %229 = arith.addf %227, %228 : vector<2x128xf32>
    %230 = vector.extract_strided_slice %221 {offsets = [0, 128], sizes = [2, 128], strides = [1, 1]} : vector<2x512xf32> to vector<2x128xf32>
    %cst_77 = arith.constant 5.000000e-01 : f32
    %231 = vector.broadcast %cst_77 : f32 to vector<2x128xf32>
    %232 = arith.mulf %231, %230 : vector<2x128xf32>
    %233 = math.tanh %232 : vector<2x128xf32>
    %cst_78 = arith.constant 5.000000e-01 : f32
    %234 = vector.broadcast %cst_78 : f32 to vector<2x128xf32>
    %235 = arith.mulf %234, %233 : vector<2x128xf32>
    %cst_79 = arith.constant 5.000000e-01 : f32
    %236 = vector.broadcast %cst_79 : f32 to vector<2x128xf32>
    %237 = arith.addf %235, %236 : vector<2x128xf32>
    %238 = vector.extract_strided_slice %221 {offsets = [0, 256], sizes = [2, 128], strides = [1, 1]} : vector<2x512xf32> to vector<2x128xf32>
    %239 = math.tanh %238 : vector<2x128xf32>
    %240 = vector.extract_strided_slice %221 {offsets = [0, 384], sizes = [2, 128], strides = [1, 1]} : vector<2x512xf32> to vector<2x128xf32>
    %cst_80 = arith.constant 5.000000e-01 : f32
    %241 = vector.broadcast %cst_80 : f32 to vector<2x128xf32>
    %242 = arith.mulf %241, %240 : vector<2x128xf32>
    %243 = math.tanh %242 : vector<2x128xf32>
    %cst_81 = arith.constant 5.000000e-01 : f32
    %244 = vector.broadcast %cst_81 : f32 to vector<2x128xf32>
    %245 = arith.mulf %244, %243 : vector<2x128xf32>
    %cst_82 = arith.constant 5.000000e-01 : f32
    %246 = vector.broadcast %cst_82 : f32 to vector<2x128xf32>
    %247 = arith.addf %245, %246 : vector<2x128xf32>
    %248 = arith.mulf %237, %179 : vector<2x128xf32>
    %249 = arith.mulf %229, %239 : vector<2x128xf32>
    %250 = arith.addf %248, %249 : vector<2x128xf32>
    %251 = math.tanh %250 : vector<2x128xf32>
    %252 = arith.mulf %247, %251 : vector<2x128xf32>
    %253 = tpu.concatenate %252, %216 in 1 : vector<2x128xf32>, vector<2x128xf32> -> vector<2x256xf32>
    %cst_83 = arith.constant dense<0.000000e+00> : vector<2x512xf32>
    %254 = tpu.matmul %253, %1, %cst_83 {dimension_numbers = #tpu.dot_dimension_numbers<[1], [0], [0], [1], [0, 0, 1, 1], [], []>} : vector<2x256xf32>, vector<256x512xf32>, vector<2x512xf32> -> vector<2x512xf32>
    %255 = vector.broadcast %2 : vector<1x512xf32> to vector<2x512xf32>
    %256 = arith.addf %254, %255 : vector<2x512xf32>
    %257 = vector.extract_strided_slice %256 {offsets = [0, 0], sizes = [2, 128], strides = [1, 1]} : vector<2x512xf32> to vector<2x128xf32>
    %cst_84 = arith.constant 5.000000e-01 : f32
    %258 = vector.broadcast %cst_84 : f32 to vector<2x128xf32>
    %259 = arith.mulf %258, %257 : vector<2x128xf32>
    %260 = math.tanh %259 : vector<2x128xf32>
    %cst_85 = arith.constant 5.000000e-01 : f32
    %261 = vector.broadcast %cst_85 : f32 to vector<2x128xf32>
    %262 = arith.mulf %261, %260 : vector<2x128xf32>
    %cst_86 = arith.constant 5.000000e-01 : f32
    %263 = vector.broadcast %cst_86 : f32 to vector<2x128xf32>
    %264 = arith.addf %262, %263 : vector<2x128xf32>
    %265 = vector.extract_strided_slice %256 {offsets = [0, 128], sizes = [2, 128], strides = [1, 1]} : vector<2x512xf32> to vector<2x128xf32>
    %cst_87 = arith.constant 5.000000e-01 : f32
    %266 = vector.broadcast %cst_87 : f32 to vector<2x128xf32>
    %267 = arith.mulf %266, %265 : vector<2x128xf32>
    %268 = math.tanh %267 : vector<2x128xf32>
    %cst_88 = arith.constant 5.000000e-01 : f32
    %269 = vector.broadcast %cst_88 : f32 to vector<2x128xf32>
    %270 = arith.mulf %269, %268 : vector<2x128xf32>
    %cst_89 = arith.constant 5.000000e-01 : f32
    %271 = vector.broadcast %cst_89 : f32 to vector<2x128xf32>
    %272 = arith.addf %270, %271 : vector<2x128xf32>
    %273 = vector.extract_strided_slice %256 {offsets = [0, 256], sizes = [2, 128], strides = [1, 1]} : vector<2x512xf32> to vector<2x128xf32>
    %274 = math.tanh %273 : vector<2x128xf32>
    %275 = vector.extract_strided_slice %256 {offsets = [0, 384], sizes = [2, 128], strides = [1, 1]} : vector<2x512xf32> to vector<2x128xf32>
    %cst_90 = arith.constant 5.000000e-01 : f32
    %276 = vector.broadcast %cst_90 : f32 to vector<2x128xf32>
    %277 = arith.mulf %276, %275 : vector<2x128xf32>
    %278 = math.tanh %277 : vector<2x128xf32>
    %cst_91 = arith.constant 5.000000e-01 : f32
    %279 = vector.broadcast %cst_91 : f32 to vector<2x128xf32>
    %280 = arith.mulf %279, %278 : vector<2x128xf32>
    %cst_92 = arith.constant 5.000000e-01 : f32
    %281 = vector.broadcast %cst_92 : f32 to vector<2x128xf32>
    %282 = arith.addf %280, %281 : vector<2x128xf32>
    %283 = arith.mulf %272, %214 : vector<2x128xf32>
    %284 = arith.mulf %264, %274 : vector<2x128xf32>
    %285 = arith.addf %283, %284 : vector<2x128xf32>
    %286 = math.tanh %285 : vector<2x128xf32>
    %287 = arith.mulf %282, %286 : vector<2x128xf32>
    %c4_i32 = arith.constant 4 : i32
    %288 = arith.index_cast %c4_i32 : i32 to index
    %c0_93 = arith.constant 0 : index
    %c0_94 = arith.constant 0 : index
    %289 = vector.load %arg0[%288, %c0_93, %c0_94] : memref<8x2x512xf32, #tpu.memory_space<vmem>>, vector<1x2x512xf32>
    %290 = vector.shape_cast %289 : vector<1x2x512xf32> to vector<2x512xf32>
    %cst_95 = arith.constant dense<0.000000e+00> : vector<2x512xf32>
    %291 = tpu.matmul %252, %0, %cst_95 {dimension_numbers = #tpu.dot_dimension_numbers<[1], [0], [0], [1], [0, 0, 1, 1], [], []>} : vector<2x128xf32>, vector<128x512xf32>, vector<2x512xf32> -> vector<2x512xf32>
    %292 = arith.addf %290, %291 : vector<2x512xf32>
    %293 = vector.extract_strided_slice %292 {offsets = [0, 0], sizes = [2, 128], strides = [1, 1]} : vector<2x512xf32> to vector<2x128xf32>
    %cst_96 = arith.constant 5.000000e-01 : f32
    %294 = vector.broadcast %cst_96 : f32 to vector<2x128xf32>
    %295 = arith.mulf %294, %293 : vector<2x128xf32>
    %296 = math.tanh %295 : vector<2x128xf32>
    %cst_97 = arith.constant 5.000000e-01 : f32
    %297 = vector.broadcast %cst_97 : f32 to vector<2x128xf32>
    %298 = arith.mulf %297, %296 : vector<2x128xf32>
    %cst_98 = arith.constant 5.000000e-01 : f32
    %299 = vector.broadcast %cst_98 : f32 to vector<2x128xf32>
    %300 = arith.addf %298, %299 : vector<2x128xf32>
    %301 = vector.extract_strided_slice %292 {offsets = [0, 128], sizes = [2, 128], strides = [1, 1]} : vector<2x512xf32> to vector<2x128xf32>
    %cst_99 = arith.constant 5.000000e-01 : f32
    %302 = vector.broadcast %cst_99 : f32 to vector<2x128xf32>
    %303 = arith.mulf %302, %301 : vector<2x128xf32>
    %304 = math.tanh %303 : vector<2x128xf32>
    %cst_100 = arith.constant 5.000000e-01 : f32
    %305 = vector.broadcast %cst_100 : f32 to vector<2x128xf32>
    %306 = arith.mulf %305, %304 : vector<2x128xf32>
    %cst_101 = arith.constant 5.000000e-01 : f32
    %307 = vector.broadcast %cst_101 : f32 to vector<2x128xf32>
    %308 = arith.addf %306, %307 : vector<2x128xf32>
    %309 = vector.extract_strided_slice %292 {offsets = [0, 256], sizes = [2, 128], strides = [1, 1]} : vector<2x512xf32> to vector<2x128xf32>
    %310 = math.tanh %309 : vector<2x128xf32>
    %311 = vector.extract_strided_slice %292 {offsets = [0, 384], sizes = [2, 128], strides = [1, 1]} : vector<2x512xf32> to vector<2x128xf32>
    %cst_102 = arith.constant 5.000000e-01 : f32
    %312 = vector.broadcast %cst_102 : f32 to vector<2x128xf32>
    %313 = arith.mulf %312, %311 : vector<2x128xf32>
    %314 = math.tanh %313 : vector<2x128xf32>
    %cst_103 = arith.constant 5.000000e-01 : f32
    %315 = vector.broadcast %cst_103 : f32 to vector<2x128xf32>
    %316 = arith.mulf %315, %314 : vector<2x128xf32>
    %cst_104 = arith.constant 5.000000e-01 : f32
    %317 = vector.broadcast %cst_104 : f32 to vector<2x128xf32>
    %318 = arith.addf %316, %317 : vector<2x128xf32>
    %319 = arith.mulf %308, %250 : vector<2x128xf32>
    %320 = arith.mulf %300, %310 : vector<2x128xf32>
    %321 = arith.addf %319, %320 : vector<2x128xf32>
    %322 = math.tanh %321 : vector<2x128xf32>
    %323 = arith.mulf %318, %322 : vector<2x128xf32>
    %324 = tpu.concatenate %323, %287 in 1 : vector<2x128xf32>, vector<2x128xf32> -> vector<2x256xf32>
    %cst_105 = arith.constant dense<0.000000e+00> : vector<2x512xf32>
    %325 = tpu.matmul %324, %1, %cst_105 {dimension_numbers = #tpu.dot_dimension_numbers<[1], [0], [0], [1], [0, 0, 1, 1], [], []>} : vector<2x256xf32>, vector<256x512xf32>, vector<2x512xf32> -> vector<2x512xf32>
    %326 = vector.broadcast %2 : vector<1x512xf32> to vector<2x512xf32>
    %327 = arith.addf %325, %326 : vector<2x512xf32>
    %328 = vector.extract_strided_slice %327 {offsets = [0, 0], sizes = [2, 128], strides = [1, 1]} : vector<2x512xf32> to vector<2x128xf32>
    %cst_106 = arith.constant 5.000000e-01 : f32
    %329 = vector.broadcast %cst_106 : f32 to vector<2x128xf32>
    %330 = arith.mulf %329, %328 : vector<2x128xf32>
    %331 = math.tanh %330 : vector<2x128xf32>
    %cst_107 = arith.constant 5.000000e-01 : f32
    %332 = vector.broadcast %cst_107 : f32 to vector<2x128xf32>
    %333 = arith.mulf %332, %331 : vector<2x128xf32>
    %cst_108 = arith.constant 5.000000e-01 : f32
    %334 = vector.broadcast %cst_108 : f32 to vector<2x128xf32>
    %335 = arith.addf %333, %334 : vector<2x128xf32>
    %336 = vector.extract_strided_slice %327 {offsets = [0, 128], sizes = [2, 128], strides = [1, 1]} : vector<2x512xf32> to vector<2x128xf32>
    %cst_109 = arith.constant 5.000000e-01 : f32
    %337 = vector.broadcast %cst_109 : f32 to vector<2x128xf32>
    %338 = arith.mulf %337, %336 : vector<2x128xf32>
    %339 = math.tanh %338 : vector<2x128xf32>
    %cst_110 = arith.constant 5.000000e-01 : f32
    %340 = vector.broadcast %cst_110 : f32 to vector<2x128xf32>
    %341 = arith.mulf %340, %339 : vector<2x128xf32>
    %cst_111 = arith.constant 5.000000e-01 : f32
    %342 = vector.broadcast %cst_111 : f32 to vector<2x128xf32>
    %343 = arith.addf %341, %342 : vector<2x128xf32>
    %344 = vector.extract_strided_slice %327 {offsets = [0, 256], sizes = [2, 128], strides = [1, 1]} : vector<2x512xf32> to vector<2x128xf32>
    %345 = math.tanh %344 : vector<2x128xf32>
    %346 = vector.extract_strided_slice %327 {offsets = [0, 384], sizes = [2, 128], strides = [1, 1]} : vector<2x512xf32> to vector<2x128xf32>
    %cst_112 = arith.constant 5.000000e-01 : f32
    %347 = vector.broadcast %cst_112 : f32 to vector<2x128xf32>
    %348 = arith.mulf %347, %346 : vector<2x128xf32>
    %349 = math.tanh %348 : vector<2x128xf32>
    %cst_113 = arith.constant 5.000000e-01 : f32
    %350 = vector.broadcast %cst_113 : f32 to vector<2x128xf32>
    %351 = arith.mulf %350, %349 : vector<2x128xf32>
    %cst_114 = arith.constant 5.000000e-01 : f32
    %352 = vector.broadcast %cst_114 : f32 to vector<2x128xf32>
    %353 = arith.addf %351, %352 : vector<2x128xf32>
    %354 = arith.mulf %343, %285 : vector<2x128xf32>
    %355 = arith.mulf %335, %345 : vector<2x128xf32>
    %356 = arith.addf %354, %355 : vector<2x128xf32>
    %357 = math.tanh %356 : vector<2x128xf32>
    %358 = arith.mulf %353, %357 : vector<2x128xf32>
    %c5_i32 = arith.constant 5 : i32
    %359 = arith.index_cast %c5_i32 : i32 to index
    %c0_115 = arith.constant 0 : index
    %c0_116 = arith.constant 0 : index
    %360 = vector.load %arg0[%359, %c0_115, %c0_116] : memref<8x2x512xf32, #tpu.memory_space<vmem>>, vector<1x2x512xf32>
    %361 = vector.shape_cast %360 : vector<1x2x512xf32> to vector<2x512xf32>
    %cst_117 = arith.constant dense<0.000000e+00> : vector<2x512xf32>
    %362 = tpu.matmul %323, %0, %cst_117 {dimension_numbers = #tpu.dot_dimension_numbers<[1], [0], [0], [1], [0, 0, 1, 1], [], []>} : vector<2x128xf32>, vector<128x512xf32>, vector<2x512xf32> -> vector<2x512xf32>
    %363 = arith.addf %361, %362 : vector<2x512xf32>
    %364 = vector.extract_strided_slice %363 {offsets = [0, 0], sizes = [2, 128], strides = [1, 1]} : vector<2x512xf32> to vector<2x128xf32>
    %cst_118 = arith.constant 5.000000e-01 : f32
    %365 = vector.broadcast %cst_118 : f32 to vector<2x128xf32>
    %366 = arith.mulf %365, %364 : vector<2x128xf32>
    %367 = math.tanh %366 : vector<2x128xf32>
    %cst_119 = arith.constant 5.000000e-01 : f32
    %368 = vector.broadcast %cst_119 : f32 to vector<2x128xf32>
    %369 = arith.mulf %368, %367 : vector<2x128xf32>
    %cst_120 = arith.constant 5.000000e-01 : f32
    %370 = vector.broadcast %cst_120 : f32 to vector<2x128xf32>
    %371 = arith.addf %369, %370 : vector<2x128xf32>
    %372 = vector.extract_strided_slice %363 {offsets = [0, 128], sizes = [2, 128], strides = [1, 1]} : vector<2x512xf32> to vector<2x128xf32>
    %cst_121 = arith.constant 5.000000e-01 : f32
    %373 = vector.broadcast %cst_121 : f32 to vector<2x128xf32>
    %374 = arith.mulf %373, %372 : vector<2x128xf32>
    %375 = math.tanh %374 : vector<2x128xf32>
    %cst_122 = arith.constant 5.000000e-01 : f32
    %376 = vector.broadcast %cst_122 : f32 to vector<2x128xf32>
    %377 = arith.mulf %376, %375 : vector<2x128xf32>
    %cst_123 = arith.constant 5.000000e-01 : f32
    %378 = vector.broadcast %cst_123 : f32 to vector<2x128xf32>
    %379 = arith.addf %377, %378 : vector<2x128xf32>
    %380 = vector.extract_strided_slice %363 {offsets = [0, 256], sizes = [2, 128], strides = [1, 1]} : vector<2x512xf32> to vector<2x128xf32>
    %381 = math.tanh %380 : vector<2x128xf32>
    %382 = vector.extract_strided_slice %363 {offsets = [0, 384], sizes = [2, 128], strides = [1, 1]} : vector<2x512xf32> to vector<2x128xf32>
    %cst_124 = arith.constant 5.000000e-01 : f32
    %383 = vector.broadcast %cst_124 : f32 to vector<2x128xf32>
    %384 = arith.mulf %383, %382 : vector<2x128xf32>
    %385 = math.tanh %384 : vector<2x128xf32>
    %cst_125 = arith.constant 5.000000e-01 : f32
    %386 = vector.broadcast %cst_125 : f32 to vector<2x128xf32>
    %387 = arith.mulf %386, %385 : vector<2x128xf32>
    %cst_126 = arith.constant 5.000000e-01 : f32
    %388 = vector.broadcast %cst_126 : f32 to vector<2x128xf32>
    %389 = arith.addf %387, %388 : vector<2x128xf32>
    %390 = arith.mulf %379, %321 : vector<2x128xf32>
    %391 = arith.mulf %371, %381 : vector<2x128xf32>
    %392 = arith.addf %390, %391 : vector<2x128xf32>
    %393 = math.tanh %392 : vector<2x128xf32>
    %394 = arith.mulf %389, %393 : vector<2x128xf32>
    %395 = tpu.concatenate %394, %358 in 1 : vector<2x128xf32>, vector<2x128xf32> -> vector<2x256xf32>
    %cst_127 = arith.constant dense<0.000000e+00> : vector<2x512xf32>
    %396 = tpu.matmul %395, %1, %cst_127 {dimension_numbers = #tpu.dot_dimension_numbers<[1], [0], [0], [1], [0, 0, 1, 1], [], []>} : vector<2x256xf32>, vector<256x512xf32>, vector<2x512xf32> -> vector<2x512xf32>
    %397 = vector.broadcast %2 : vector<1x512xf32> to vector<2x512xf32>
    %398 = arith.addf %396, %397 : vector<2x512xf32>
    %399 = vector.extract_strided_slice %398 {offsets = [0, 0], sizes = [2, 128], strides = [1, 1]} : vector<2x512xf32> to vector<2x128xf32>
    %cst_128 = arith.constant 5.000000e-01 : f32
    %400 = vector.broadcast %cst_128 : f32 to vector<2x128xf32>
    %401 = arith.mulf %400, %399 : vector<2x128xf32>
    %402 = math.tanh %401 : vector<2x128xf32>
    %cst_129 = arith.constant 5.000000e-01 : f32
    %403 = vector.broadcast %cst_129 : f32 to vector<2x128xf32>
    %404 = arith.mulf %403, %402 : vector<2x128xf32>
    %cst_130 = arith.constant 5.000000e-01 : f32
    %405 = vector.broadcast %cst_130 : f32 to vector<2x128xf32>
    %406 = arith.addf %404, %405 : vector<2x128xf32>
    %407 = vector.extract_strided_slice %398 {offsets = [0, 128], sizes = [2, 128], strides = [1, 1]} : vector<2x512xf32> to vector<2x128xf32>
    %cst_131 = arith.constant 5.000000e-01 : f32
    %408 = vector.broadcast %cst_131 : f32 to vector<2x128xf32>
    %409 = arith.mulf %408, %407 : vector<2x128xf32>
    %410 = math.tanh %409 : vector<2x128xf32>
    %cst_132 = arith.constant 5.000000e-01 : f32
    %411 = vector.broadcast %cst_132 : f32 to vector<2x128xf32>
    %412 = arith.mulf %411, %410 : vector<2x128xf32>
    %cst_133 = arith.constant 5.000000e-01 : f32
    %413 = vector.broadcast %cst_133 : f32 to vector<2x128xf32>
    %414 = arith.addf %412, %413 : vector<2x128xf32>
    %415 = vector.extract_strided_slice %398 {offsets = [0, 256], sizes = [2, 128], strides = [1, 1]} : vector<2x512xf32> to vector<2x128xf32>
    %416 = math.tanh %415 : vector<2x128xf32>
    %417 = vector.extract_strided_slice %398 {offsets = [0, 384], sizes = [2, 128], strides = [1, 1]} : vector<2x512xf32> to vector<2x128xf32>
    %cst_134 = arith.constant 5.000000e-01 : f32
    %418 = vector.broadcast %cst_134 : f32 to vector<2x128xf32>
    %419 = arith.mulf %418, %417 : vector<2x128xf32>
    %420 = math.tanh %419 : vector<2x128xf32>
    %cst_135 = arith.constant 5.000000e-01 : f32
    %421 = vector.broadcast %cst_135 : f32 to vector<2x128xf32>
    %422 = arith.mulf %421, %420 : vector<2x128xf32>
    %cst_136 = arith.constant 5.000000e-01 : f32
    %423 = vector.broadcast %cst_136 : f32 to vector<2x128xf32>
    %424 = arith.addf %422, %423 : vector<2x128xf32>
    %425 = arith.mulf %414, %356 : vector<2x128xf32>
    %426 = arith.mulf %406, %416 : vector<2x128xf32>
    %427 = arith.addf %425, %426 : vector<2x128xf32>
    %428 = math.tanh %427 : vector<2x128xf32>
    %429 = arith.mulf %424, %428 : vector<2x128xf32>
    %c6_i32 = arith.constant 6 : i32
    %430 = arith.index_cast %c6_i32 : i32 to index
    %c0_137 = arith.constant 0 : index
    %c0_138 = arith.constant 0 : index
    %431 = vector.load %arg0[%430, %c0_137, %c0_138] : memref<8x2x512xf32, #tpu.memory_space<vmem>>, vector<1x2x512xf32>
    %432 = vector.shape_cast %431 : vector<1x2x512xf32> to vector<2x512xf32>
    %cst_139 = arith.constant dense<0.000000e+00> : vector<2x512xf32>
    %433 = tpu.matmul %394, %0, %cst_139 {dimension_numbers = #tpu.dot_dimension_numbers<[1], [0], [0], [1], [0, 0, 1, 1], [], []>} : vector<2x128xf32>, vector<128x512xf32>, vector<2x512xf32> -> vector<2x512xf32>
    %434 = arith.addf %432, %433 : vector<2x512xf32>
    %435 = vector.extract_strided_slice %434 {offsets = [0, 0], sizes = [2, 128], strides = [1, 1]} : vector<2x512xf32> to vector<2x128xf32>
    %cst_140 = arith.constant 5.000000e-01 : f32
    %436 = vector.broadcast %cst_140 : f32 to vector<2x128xf32>
    %437 = arith.mulf %436, %435 : vector<2x128xf32>
    %438 = math.tanh %437 : vector<2x128xf32>
    %cst_141 = arith.constant 5.000000e-01 : f32
    %439 = vector.broadcast %cst_141 : f32 to vector<2x128xf32>
    %440 = arith.mulf %439, %438 : vector<2x128xf32>
    %cst_142 = arith.constant 5.000000e-01 : f32
    %441 = vector.broadcast %cst_142 : f32 to vector<2x128xf32>
    %442 = arith.addf %440, %441 : vector<2x128xf32>
    %443 = vector.extract_strided_slice %434 {offsets = [0, 128], sizes = [2, 128], strides = [1, 1]} : vector<2x512xf32> to vector<2x128xf32>
    %cst_143 = arith.constant 5.000000e-01 : f32
    %444 = vector.broadcast %cst_143 : f32 to vector<2x128xf32>
    %445 = arith.mulf %444, %443 : vector<2x128xf32>
    %446 = math.tanh %445 : vector<2x128xf32>
    %cst_144 = arith.constant 5.000000e-01 : f32
    %447 = vector.broadcast %cst_144 : f32 to vector<2x128xf32>
    %448 = arith.mulf %447, %446 : vector<2x128xf32>
    %cst_145 = arith.constant 5.000000e-01 : f32
    %449 = vector.broadcast %cst_145 : f32 to vector<2x128xf32>
    %450 = arith.addf %448, %449 : vector<2x128xf32>
    %451 = vector.extract_strided_slice %434 {offsets = [0, 256], sizes = [2, 128], strides = [1, 1]} : vector<2x512xf32> to vector<2x128xf32>
    %452 = math.tanh %451 : vector<2x128xf32>
    %453 = vector.extract_strided_slice %434 {offsets = [0, 384], sizes = [2, 128], strides = [1, 1]} : vector<2x512xf32> to vector<2x128xf32>
    %cst_146 = arith.constant 5.000000e-01 : f32
    %454 = vector.broadcast %cst_146 : f32 to vector<2x128xf32>
    %455 = arith.mulf %454, %453 : vector<2x128xf32>
    %456 = math.tanh %455 : vector<2x128xf32>
    %cst_147 = arith.constant 5.000000e-01 : f32
    %457 = vector.broadcast %cst_147 : f32 to vector<2x128xf32>
    %458 = arith.mulf %457, %456 : vector<2x128xf32>
    %cst_148 = arith.constant 5.000000e-01 : f32
    %459 = vector.broadcast %cst_148 : f32 to vector<2x128xf32>
    %460 = arith.addf %458, %459 : vector<2x128xf32>
    %461 = arith.mulf %450, %392 : vector<2x128xf32>
    %462 = arith.mulf %442, %452 : vector<2x128xf32>
    %463 = arith.addf %461, %462 : vector<2x128xf32>
    %464 = math.tanh %463 : vector<2x128xf32>
    %465 = arith.mulf %460, %464 : vector<2x128xf32>
    %466 = tpu.concatenate %465, %429 in 1 : vector<2x128xf32>, vector<2x128xf32> -> vector<2x256xf32>
    %cst_149 = arith.constant dense<0.000000e+00> : vector<2x512xf32>
    %467 = tpu.matmul %466, %1, %cst_149 {dimension_numbers = #tpu.dot_dimension_numbers<[1], [0], [0], [1], [0, 0, 1, 1], [], []>} : vector<2x256xf32>, vector<256x512xf32>, vector<2x512xf32> -> vector<2x512xf32>
    %468 = vector.broadcast %2 : vector<1x512xf32> to vector<2x512xf32>
    %469 = arith.addf %467, %468 : vector<2x512xf32>
    %470 = vector.extract_strided_slice %469 {offsets = [0, 0], sizes = [2, 128], strides = [1, 1]} : vector<2x512xf32> to vector<2x128xf32>
    %cst_150 = arith.constant 5.000000e-01 : f32
    %471 = vector.broadcast %cst_150 : f32 to vector<2x128xf32>
    %472 = arith.mulf %471, %470 : vector<2x128xf32>
    %473 = math.tanh %472 : vector<2x128xf32>
    %cst_151 = arith.constant 5.000000e-01 : f32
    %474 = vector.broadcast %cst_151 : f32 to vector<2x128xf32>
    %475 = arith.mulf %474, %473 : vector<2x128xf32>
    %cst_152 = arith.constant 5.000000e-01 : f32
    %476 = vector.broadcast %cst_152 : f32 to vector<2x128xf32>
    %477 = arith.addf %475, %476 : vector<2x128xf32>
    %478 = vector.extract_strided_slice %469 {offsets = [0, 128], sizes = [2, 128], strides = [1, 1]} : vector<2x512xf32> to vector<2x128xf32>
    %cst_153 = arith.constant 5.000000e-01 : f32
    %479 = vector.broadcast %cst_153 : f32 to vector<2x128xf32>
    %480 = arith.mulf %479, %478 : vector<2x128xf32>
    %481 = math.tanh %480 : vector<2x128xf32>
    %cst_154 = arith.constant 5.000000e-01 : f32
    %482 = vector.broadcast %cst_154 : f32 to vector<2x128xf32>
    %483 = arith.mulf %482, %481 : vector<2x128xf32>
    %cst_155 = arith.constant 5.000000e-01 : f32
    %484 = vector.broadcast %cst_155 : f32 to vector<2x128xf32>
    %485 = arith.addf %483, %484 : vector<2x128xf32>
    %486 = vector.extract_strided_slice %469 {offsets = [0, 256], sizes = [2, 128], strides = [1, 1]} : vector<2x512xf32> to vector<2x128xf32>
    %487 = math.tanh %486 : vector<2x128xf32>
    %488 = vector.extract_strided_slice %469 {offsets = [0, 384], sizes = [2, 128], strides = [1, 1]} : vector<2x512xf32> to vector<2x128xf32>
    %cst_156 = arith.constant 5.000000e-01 : f32
    %489 = vector.broadcast %cst_156 : f32 to vector<2x128xf32>
    %490 = arith.mulf %489, %488 : vector<2x128xf32>
    %491 = math.tanh %490 : vector<2x128xf32>
    %cst_157 = arith.constant 5.000000e-01 : f32
    %492 = vector.broadcast %cst_157 : f32 to vector<2x128xf32>
    %493 = arith.mulf %492, %491 : vector<2x128xf32>
    %cst_158 = arith.constant 5.000000e-01 : f32
    %494 = vector.broadcast %cst_158 : f32 to vector<2x128xf32>
    %495 = arith.addf %493, %494 : vector<2x128xf32>
    %496 = arith.mulf %485, %427 : vector<2x128xf32>
    %497 = arith.mulf %477, %487 : vector<2x128xf32>
    %498 = arith.addf %496, %497 : vector<2x128xf32>
    %499 = math.tanh %498 : vector<2x128xf32>
    %500 = arith.mulf %495, %499 : vector<2x128xf32>
    %c7_i32 = arith.constant 7 : i32
    %501 = arith.index_cast %c7_i32 : i32 to index
    %c0_159 = arith.constant 0 : index
    %c0_160 = arith.constant 0 : index
    %502 = vector.load %arg0[%501, %c0_159, %c0_160] : memref<8x2x512xf32, #tpu.memory_space<vmem>>, vector<1x2x512xf32>
    %503 = vector.shape_cast %502 : vector<1x2x512xf32> to vector<2x512xf32>
    %cst_161 = arith.constant dense<0.000000e+00> : vector<2x512xf32>
    %504 = tpu.matmul %465, %0, %cst_161 {dimension_numbers = #tpu.dot_dimension_numbers<[1], [0], [0], [1], [0, 0, 1, 1], [], []>} : vector<2x128xf32>, vector<128x512xf32>, vector<2x512xf32> -> vector<2x512xf32>
    %505 = arith.addf %503, %504 : vector<2x512xf32>
    %506 = vector.extract_strided_slice %505 {offsets = [0, 0], sizes = [2, 128], strides = [1, 1]} : vector<2x512xf32> to vector<2x128xf32>
    %cst_162 = arith.constant 5.000000e-01 : f32
    %507 = vector.broadcast %cst_162 : f32 to vector<2x128xf32>
    %508 = arith.mulf %507, %506 : vector<2x128xf32>
    %509 = math.tanh %508 : vector<2x128xf32>
    %cst_163 = arith.constant 5.000000e-01 : f32
    %510 = vector.broadcast %cst_163 : f32 to vector<2x128xf32>
    %511 = arith.mulf %510, %509 : vector<2x128xf32>
    %cst_164 = arith.constant 5.000000e-01 : f32
    %512 = vector.broadcast %cst_164 : f32 to vector<2x128xf32>
    %513 = arith.addf %511, %512 : vector<2x128xf32>
    %514 = vector.extract_strided_slice %505 {offsets = [0, 128], sizes = [2, 128], strides = [1, 1]} : vector<2x512xf32> to vector<2x128xf32>
    %cst_165 = arith.constant 5.000000e-01 : f32
    %515 = vector.broadcast %cst_165 : f32 to vector<2x128xf32>
    %516 = arith.mulf %515, %514 : vector<2x128xf32>
    %517 = math.tanh %516 : vector<2x128xf32>
    %cst_166 = arith.constant 5.000000e-01 : f32
    %518 = vector.broadcast %cst_166 : f32 to vector<2x128xf32>
    %519 = arith.mulf %518, %517 : vector<2x128xf32>
    %cst_167 = arith.constant 5.000000e-01 : f32
    %520 = vector.broadcast %cst_167 : f32 to vector<2x128xf32>
    %521 = arith.addf %519, %520 : vector<2x128xf32>
    %522 = vector.extract_strided_slice %505 {offsets = [0, 256], sizes = [2, 128], strides = [1, 1]} : vector<2x512xf32> to vector<2x128xf32>
    %523 = math.tanh %522 : vector<2x128xf32>
    %524 = vector.extract_strided_slice %505 {offsets = [0, 384], sizes = [2, 128], strides = [1, 1]} : vector<2x512xf32> to vector<2x128xf32>
    %cst_168 = arith.constant 5.000000e-01 : f32
    %525 = vector.broadcast %cst_168 : f32 to vector<2x128xf32>
    %526 = arith.mulf %525, %524 : vector<2x128xf32>
    %527 = math.tanh %526 : vector<2x128xf32>
    %cst_169 = arith.constant 5.000000e-01 : f32
    %528 = vector.broadcast %cst_169 : f32 to vector<2x128xf32>
    %529 = arith.mulf %528, %527 : vector<2x128xf32>
    %cst_170 = arith.constant 5.000000e-01 : f32
    %530 = vector.broadcast %cst_170 : f32 to vector<2x128xf32>
    %531 = arith.addf %529, %530 : vector<2x128xf32>
    %532 = arith.mulf %521, %463 : vector<2x128xf32>
    %533 = arith.mulf %513, %523 : vector<2x128xf32>
    %534 = arith.addf %532, %533 : vector<2x128xf32>
    %535 = math.tanh %534 : vector<2x128xf32>
    %536 = arith.mulf %531, %535 : vector<2x128xf32>
    %537 = tpu.concatenate %536, %500 in 1 : vector<2x128xf32>, vector<2x128xf32> -> vector<2x256xf32>
    %cst_171 = arith.constant dense<0.000000e+00> : vector<2x512xf32>
    %538 = tpu.matmul %537, %1, %cst_171 {dimension_numbers = #tpu.dot_dimension_numbers<[1], [0], [0], [1], [0, 0, 1, 1], [], []>} : vector<2x256xf32>, vector<256x512xf32>, vector<2x512xf32> -> vector<2x512xf32>
    %539 = vector.broadcast %2 : vector<1x512xf32> to vector<2x512xf32>
    %540 = arith.addf %538, %539 : vector<2x512xf32>
    %541 = vector.extract_strided_slice %540 {offsets = [0, 0], sizes = [2, 128], strides = [1, 1]} : vector<2x512xf32> to vector<2x128xf32>
    %cst_172 = arith.constant 5.000000e-01 : f32
    %542 = vector.broadcast %cst_172 : f32 to vector<2x128xf32>
    %543 = arith.mulf %542, %541 : vector<2x128xf32>
    %544 = math.tanh %543 : vector<2x128xf32>
    %cst_173 = arith.constant 5.000000e-01 : f32
    %545 = vector.broadcast %cst_173 : f32 to vector<2x128xf32>
    %546 = arith.mulf %545, %544 : vector<2x128xf32>
    %cst_174 = arith.constant 5.000000e-01 : f32
    %547 = vector.broadcast %cst_174 : f32 to vector<2x128xf32>
    %548 = arith.addf %546, %547 : vector<2x128xf32>
    %549 = vector.extract_strided_slice %540 {offsets = [0, 128], sizes = [2, 128], strides = [1, 1]} : vector<2x512xf32> to vector<2x128xf32>
    %cst_175 = arith.constant 5.000000e-01 : f32
    %550 = vector.broadcast %cst_175 : f32 to vector<2x128xf32>
    %551 = arith.mulf %550, %549 : vector<2x128xf32>
    %552 = math.tanh %551 : vector<2x128xf32>
    %cst_176 = arith.constant 5.000000e-01 : f32
    %553 = vector.broadcast %cst_176 : f32 to vector<2x128xf32>
    %554 = arith.mulf %553, %552 : vector<2x128xf32>
    %cst_177 = arith.constant 5.000000e-01 : f32
    %555 = vector.broadcast %cst_177 : f32 to vector<2x128xf32>
    %556 = arith.addf %554, %555 : vector<2x128xf32>
    %557 = vector.extract_strided_slice %540 {offsets = [0, 256], sizes = [2, 128], strides = [1, 1]} : vector<2x512xf32> to vector<2x128xf32>
    %558 = math.tanh %557 : vector<2x128xf32>
    %559 = vector.extract_strided_slice %540 {offsets = [0, 384], sizes = [2, 128], strides = [1, 1]} : vector<2x512xf32> to vector<2x128xf32>
    %cst_178 = arith.constant 5.000000e-01 : f32
    %560 = vector.broadcast %cst_178 : f32 to vector<2x128xf32>
    %561 = arith.mulf %560, %559 : vector<2x128xf32>
    %562 = math.tanh %561 : vector<2x128xf32>
    %cst_179 = arith.constant 5.000000e-01 : f32
    %563 = vector.broadcast %cst_179 : f32 to vector<2x128xf32>
    %564 = arith.mulf %563, %562 : vector<2x128xf32>
    %cst_180 = arith.constant 5.000000e-01 : f32
    %565 = vector.broadcast %cst_180 : f32 to vector<2x128xf32>
    %566 = arith.addf %564, %565 : vector<2x128xf32>
    %567 = arith.mulf %556, %498 : vector<2x128xf32>
    %568 = arith.mulf %548, %558 : vector<2x128xf32>
    %569 = arith.addf %567, %568 : vector<2x128xf32>
    %570 = math.tanh %569 : vector<2x128xf32>
    %571 = arith.mulf %566, %570 : vector<2x128xf32>
    %c8_i32 = arith.constant 8 : i32
    %c0_181 = arith.constant 0 : index
    %c0_182 = arith.constant 0 : index
    %572 = vector.load %arg4[%c0_181, %c0_182] : memref<128x128xf32, #tpu.memory_space<vmem>>, vector<128x128xf32>
    %cst_183 = arith.constant dense<0.000000e+00> : vector<2x128xf32>
    %573 = tpu.matmul %571, %572, %cst_183 {dimension_numbers = #tpu.dot_dimension_numbers<[1], [0], [0], [1], [0, 0, 1, 1], [], []>} : vector<2x128xf32>, vector<128x128xf32>, vector<2x128xf32> -> vector<2x128xf32>
    %c0_184 = arith.constant 0 : index
    %c0_185 = arith.constant 0 : index
    %574 = vector.load %arg5[%c0_184, %c0_185] : memref<1x128xf32, #tpu.memory_space<vmem>>, vector<1x128xf32>
    %575 = vector.broadcast %574 : vector<1x128xf32> to vector<2x128xf32>
    %576 = arith.addf %573, %575 : vector<2x128xf32>
    %577 = math.tanh %576 : vector<2x128xf32>
    %c0_186 = arith.constant 0 : index
    %c0_187 = arith.constant 0 : index
    %578 = vector.load %arg6[%c0_186, %c0_187] : memref<2x128xf32, #tpu.memory_space<vmem>>, vector<2x128xf32>
    tpu.vector_store %arg6[%c0_186, %c0_187], %577 {strides = array<i32>} : memref<2x128xf32, #tpu.memory_space<vmem>>, vector<2x128xf32>,
    return
  }
}

</mosaic_0001>

<bundles_post_ra>
// kernel: lstm_encoder.1
= control target key start
LH: loop header
LB: loop body
LE: loop exit
PB: predicated region body
PF: predicated region fallthrough
CT: control target
= control target key end

     0   :  { %s9682_s0 = inlined_call_operand.vmem [shape: f32[8,2,512], index: 0, kind: input, shape index: {}]   ;;  %s9683_s1 = inlined_call_operand.vmem [shape: f32[128,512], index: 1, kind: input, shape index: {}]   ;;  %s9684_s2 = inlined_call_operand.vmem [shape: f32[256,512], index: 2, kind: input, shape index: {}]   ;;  %s9685_s3 = inlined_call_operand.vmem [shape: f32[1,512], index: 3, kind: input, shape index: {}]   ;;  %s9686_s4 = inlined_call_operand.vmem [shape: f32[128,128], index: 4, kind: input, shape index: {}]   ;;  %s9687_s5 = inlined_call_operand.vmem [shape: f32[1,128], index: 5, kind: input, shape index: {}]   ;;  %s9688_s6 = inlined_call_operand.hbm [shape: f32[2,128], index: 6, kind: output, shape index: {}]  }
   0x1   :  { %v4028_v0 = vld [vmem:[%s9683_s1 + $0x1e8] sm:$0xff]  ;;  %v4033_v1 = vld [vmem:[%s9683_s1 + $0x1f8] sm:$0xff]  ;;  %v4038_v2 = vld [vmem:[%s9683_s1 + $0x1e0] sm:$0xff] }
   0x2   :  { %218 = vmatprep.subr.mxu0 %v4028_v0  ;;  %289 = vmatprep.subr.mxu1 %v4033_v1  ;;  %v4045_v3 = vld [vmem:[%s9683_s1 + $0x1f0] sm:$0xff]  ;;  %v4050_v4 = vld [vmem:[%s9683_s1 + $0x1c8] sm:$0xff]  ;;  %v4055_v5 = vld [vmem:[%s9683_s1 + $0x1d8] sm:$0xff] }
   0x3   :  { %219 = vmatpush1.msra.mxu0 %v4038_v2  ;;  %290 = vmatpush1.msra.mxu1 %v4045_v3  ;;  %v4062_v6 = vld [vmem:[%s9683_s1 + $0x1c0] sm:$0xff]  ;;  %v4067_v7 = vld [vmem:[%s9683_s1 + $0x1d0] sm:$0xff]  ;;  %v4072_v8 = vld [vmem:[%s9683_s1 + $0x1a8] sm:$0xff] }
   0x4   :  { %220 = vmatprep.subr.mxu0 %v4050_v4  ;;  %291 = vmatprep.subr.mxu1 %v4055_v5  ;;  %v4079_v9 = vld [vmem:[%s9683_s1 + $0x1b8] sm:$0xff]  ;;  %v4084_v10 = vld [vmem:[%s9683_s1 + $0x1a0] sm:$0xff]  ;;  %v4089_v11 = vld [vmem:[%s9683_s1 + $0x1b0] sm:$0xff] }
   0x5   :  { %221 = vmatpush1.msra.mxu0 %v4062_v6  ;;  %292 = vmatpush1.msra.mxu1 %v4067_v7  ;;  %v4096_v12 = vld [vmem:[%s9683_s1 + $0x188] sm:$0xff]  ;;  %v4101_v13 = vld [vmem:[%s9683_s1 + $0x198] sm:$0xff]  ;;  %v4108_v14 = vld [vmem:[%s9683_s1 + $0x180] sm:$0xff] }
   0x6   :  { %222 = vmatprep.subr.mxu0 %v4072_v8  ;;  %293 = vmatprep.subr.mxu1 %v4079_v9  ;;  %v4113_v15 = vld [vmem:[%s9683_s1 + $0x190] sm:$0xff]  ;;  %v4120_v16 = vld [vmem:[%s9683_s1 + $0x168] sm:$0xff]  ;;  %v4125_v17 = vld [vmem:[%s9683_s1 + $0x178] sm:$0xff] }
   0x7   :  { %223 = vmatpush1.msra.mxu0 %v4084_v10  ;;  %294 = vmatpush1.msra.mxu1 %v4089_v11  ;;  %v4132_v18 = vld [vmem:[%s9683_s1 + $0x160] sm:$0xff]  ;;  %v4137_v19 = vld [vmem:[%s9683_s1 + $0x170] sm:$0xff]  ;;  %v4144_v20 = vld [vmem:[%s9683_s1 + $0x148] sm:$0xff] }
   0x8   :  { %224 = vmatprep.subr.mxu0 %v4096_v12  ;;  %295 = vmatprep.subr.mxu1 %v4101_v13  ;;  %v4149_v21 = vld [vmem:[%s9683_s1 + $0x158] sm:$0xff]  ;;  %v4156_v22 = vld [vmem:[%s9683_s1 + $0x140] sm:$0xff]  ;;  %v4161_v23 = vld [vmem:[%s9683_s1 + $0x150] sm:$0xff] }
   0x9   :  { %225 = vmatpush1.msra.mxu0 %v4108_v14  ;;  %296 = vmatpush1.msra.mxu1 %v4113_v15  ;;  %v4168_v24 = vld [vmem:[%s9683_s1 + $0x128] sm:$0xff]  ;;  %v4173_v25 = vld [vmem:[%s9683_s1 + $0x138] sm:$0xff]  ;;  %v4180_v26 = vld [vmem:[%s9683_s1 + $0x120] sm:$0xff] }
   0xa   :  { %226 = vmatprep.subr.mxu0 %v4120_v16  ;;  %297 = vmatprep.subr.mxu1 %v4125_v17  ;;  %v4185_v27 = vld [vmem:[%s9683_s1 + $0x130] sm:$0xff]  ;;  %v4192_v28 = vld [vmem:[%s9683_s1 + $0x108] sm:$0xff]  ;;  %v4197_v29 = vld [vmem:[%s9683_s1 + $0x118] sm:$0xff] }
   0xb   :  { %227 = vmatpush1.msra.mxu0 %v4132_v18  ;;  %298 = vmatpush1.msra.mxu1 %v4137_v19  ;;  %v4204_v30 = vld [vmem:[%s9683_s1 + $0x100] sm:$0xff]  ;;  %v4209_v31 = vld [vmem:[%s9683_s1 + $0x110] sm:$0xff]  ;;  %v4216_v32 = vld [vmem:[%s9683_s1 + $0xe8] sm:$0xff] }
   0xc   :  { %228 = vmatprep.subr.mxu0 %v4144_v20  ;;  %299 = vmatprep.subr.mxu1 %v4149_v21  ;;  %v4221_v33 = vld [vmem:[%s9683_s1 + $0xf8] sm:$0xff]  ;;  %v4228_v34 = vld [vmem:[%s9683_s1 + $0xe0] sm:$0xff]  ;;  %v4233_v35 = vld [vmem:[%s9683_s1 + $0xf0] sm:$0xff] }
   0xd   :  { %229 = vmatpush1.msra.mxu0 %v4156_v22  ;;  %300 = vmatpush1.msra.mxu1 %v4161_v23  ;;  %v4240_v36 = vld [vmem:[%s9683_s1 + $0xc8] sm:$0xff]  ;;  %v4245_v37 = vld [vmem:[%s9683_s1 + $0xd8] sm:$0xff]  ;;  %v4252_v38 = vld [vmem:[%s9683_s1 + $0xc0] sm:$0xff] }
   0xe   :  { %230 = vmatprep.subr.mxu0 %v4168_v24  ;;  %301 = vmatprep.subr.mxu1 %v4173_v25  ;;  %v4257_v39 = vld [vmem:[%s9683_s1 + $0xd0] sm:$0xff]  ;;  %v4264_v40 = vld [vmem:[%s9683_s1 + $0xa8] sm:$0xff]  ;;  %v4269_v41 = vld [vmem:[%s9683_s1 + $0xb8] sm:$0xff] }
   0xf   :  { %231 = vmatpush1.msra.mxu0 %v4180_v26  ;;  %302 = vmatpush1.msra.mxu1 %v4185_v27  ;;  %v4276_v42 = vld [vmem:[%s9683_s1 + $0xa0] sm:$0xff]  ;;  %v4281_v43 = vld [vmem:[%s9683_s1 + $0xb0] sm:$0xff]  ;;  %v4288_v44 = vld [vmem:[%s9683_s1 + $0x88] sm:$0xff] }
  0x10   :  { %232 = vmatprep.subr.mxu0 %v4192_v28  ;;  %303 = vmatprep.subr.mxu1 %v4197_v29  ;;  %v4293_v45 = vld [vmem:[%s9683_s1 + $0x98] sm:$0xff]  ;;  %v4300_v46 = vld [vmem:[%s9683_s1 + $0x80] sm:$0xff]  ;;  %v4305_v47 = vld [vmem:[%s9683_s1 + $0x90] sm:$0xff] }
  0x11   :  { %233 = vmatpush1.msra.mxu0 %v4204_v30  ;;  %304 = vmatpush1.msra.mxu1 %v4209_v31  ;;  %10303 = vst [vmem:[#allocation5_spill] sm:$0xff] %v4305_v47  ;;  %v4312_v48 = vld [vmem:[%s9683_s1 + $0x68] sm:$0xff]  ;;  %v4317_v49 = vld [vmem:[%s9683_s1 + $0x78] sm:$0xff]  ;;  %v4324_v50 = vld [vmem:[%s9683_s1 + $0x60] sm:$0xff] }
  0x12   :  { %234 = vmatprep.subr.mxu0 %v4216_v32  ;;  %305 = vmatprep.subr.mxu1 %v4221_v33  ;;  %10304 = vst [vmem:[#allocation6_spill] sm:$0xff] %v4312_v48  ;;  %10305 = vst [vmem:[#allocation7_spill] sm:$0xff] %v4317_v49  ;;  %v4329_v51 = vld [vmem:[%s9683_s1 + $0x70] sm:$0xff]  ;;  %v4336_v52 = vld [vmem:[%s9683_s1 + $0x48] sm:$0xff] }
  0x13   :  { %235 = vmatpush1.msra.mxu0 %v4228_v34  ;;  %306 = vmatpush1.msra.mxu1 %v4233_v35  ;;  %10306 = vst [vmem:[#allocation8_spill] sm:$0xff] %v4324_v50  ;;  %10307 = vst [vmem:[#allocation9_spill] sm:$0xff] %v4329_v51  ;;  %v4341_v53 = vld [vmem:[%s9683_s1 + $0x58] sm:$0xff]  ;;  %v4348_v54 = vld [vmem:[%s9683_s1 + $0x40] sm:$0xff] }
  0x14   :  { %236 = vmatprep.subr.mxu0 %v4240_v36  ;;  %307 = vmatprep.subr.mxu1 %v4245_v37  ;;  %10308 = vst [vmem:[#allocation10_spill] sm:$0xff] %v4336_v52  ;;  %10309 = vst [vmem:[#allocation11_spill] sm:$0xff] %v4341_v53  ;;  %v4353_v55 = vld [vmem:[%s9683_s1 + $0x50] sm:$0xff]  ;;  %v4360_v56 = vld [vmem:[%s9683_s1 + $0x28] sm:$0xff] }
  0x15   :  { %237 = vmatpush1.msra.mxu0 %v4252_v38  ;;  %308 = vmatpush1.msra.mxu1 %v4257_v39  ;;  %10310 = vst [vmem:[#allocation12_spill] sm:$0xff] %v4348_v54  ;;  %10311 = vst [vmem:[#allocation13_spill] sm:$0xff] %v4353_v55  ;;  %v4365_v57 = vld [vmem:[%s9683_s1 + $0x38] sm:$0xff]  ;;  %v4372_v58 = vld [vmem:[%s9683_s1 + $0x20] sm:$0xff] }
  0x16   :  { %238 = vmatprep.subr.mxu0 %v4264_v40  ;;  %309 = vmatprep.subr.mxu1 %v4269_v41  ;;  %10312 = vst [vmem:[#allocation14_spill] sm:$0xff] %v4360_v56  ;;  %10313 = vst [vmem:[#allocation15_spill] sm:$0xff] %v4365_v57  ;;  %v4377_v59 = vld [vmem:[%s9683_s1 + $0x30] sm:$0xff]  ;;  %v4384_v60 = vld [vmem:[%s9683_s1 + $0x8] sm:$0xff] }
  0x17   :  { %239 = vmatpush1.msra.mxu0 %v4276_v42  ;;  %310 = vmatpush1.msra.mxu1 %v4281_v43  ;;  %10314 = vst [vmem:[#allocation16_spill] sm:$0xff] %v4372_v58  ;;  %10315 = vst [vmem:[#allocation17_spill] sm:$0xff] %v4377_v59  ;;  %v4389_v61 = vld [vmem:[%s9683_s1 + $0x18] sm:$0xff]  ;;  %v4396_v62 = vld [vmem:[%s9683_s1] sm:$0xff] }
  0x18   :  { %240 = vmatprep.subr.mxu0 %v4288_v44  ;;  %311 = vmatprep.subr.mxu1 %v4293_v45  ;;  %10316 = vst [vmem:[#allocation18_spill] sm:$0xff] %v4384_v60  ;;  %10317 = vst [vmem:[#allocation19_spill] sm:$0xff] %v4389_v61 }
  0x19   :  { %241 = vmatpush1.msra.mxu0 %v4300_v46  ;;  %312 = vmatpush1.msra.mxu1 %v4305_v47  ;;  %10318 = vst [vmem:[#allocation20_spill] sm:$0xff] %v4396_v62 }
  0x1a   :  { %242 = vmatprep.subr.mxu0 %v4312_v48  ;;  %313 = vmatprep.subr.mxu1 %v4317_v49 }
  0x1b   :  { %243 = vmatpush1.msra.mxu0 %v4324_v50  ;;  %314 = vmatpush1.msra.mxu1 %v4329_v51 }
  0x1c   :  { %244 = vmatprep.subr.mxu0 %v4336_v52  ;;  %315 = vmatprep.subr.mxu1 %v4341_v53 }
  0x1d   :  { %245 = vmatpush1.msra.mxu0 %v4348_v54  ;;  %316 = vmatpush1.msra.mxu1 %v4353_v55 }
  0x1e   :  { %246 = vmatprep.subr.mxu0 %v4360_v56  ;;  %317 = vmatprep.subr.mxu1 %v4365_v57 }
  0x1f   :  { %11 = vsyncpa [#allocation3], 0  ;;  %247 = vmatpush1.msra.mxu0 %v4372_v58  ;;  %318 = vmatpush1.msra.mxu1 %v4377_v59  ;;  %v4403_v63 = vld [vmem:[%s9683_s1 + $0x10] sm:$0xff]  ;;  %v9697_v57 = vmov 0.0   ;;  %v4412_v58 = vld [vmem:[%s9684_s2 + $0x1e8] sm:$0xff]  ;;  %v369_v55 = vlaneseq  ;;  %vm3988_vm0 = vmmov 0  }
  0x20   :  { %10319 = vst [vmem:[#allocation21_spill] sm:$0xff] %v4403_v63  ;;  %248 = vmatprep.subr.mxu0 %v4384_v60  ;;  %319 = vmatprep.subr.mxu1 %v4389_v61  ;;  %10320 = vst [vmem:[#allocation22_spill] sm:$0xff] %v4412_v58  ;;  %v4417_v59 = vld [vmem:[%s9684_s2 + $0x1f8] sm:$0xff]  ;;  %v4429_v61 = vld [vmem:[%s9684_s2 + $0x1f0] sm:$0xff]  ;;  %s3989_s9 = smov [#allocation2]  }
  0x21   :  { %249 = vmatpush1.msra.mxu0 %v4396_v62  ;;  %282 = vmatprep.mubr.f32.mxu0 %v9697_v57  ;;  %10321 = vst [vmem:[#allocation23_spill] sm:$0xff] %v4417_v59  ;;  %v4424_v62 = vld [vmem:[%s9684_s2 + $0x1e0] sm:$0xff]  ;;  %10323 = vst [vmem:[#allocation25_spill] sm:$0xff] %v4429_v61  ;;  %v4441_v60 = vld [vmem:[%s9684_s2 + $0x1d8] sm:$0xff]  ;;  %v5185_v53 = vshrl.u32 %v369_v55, 7 }
  0x22   :  { %320 = vmatpush1.msra.mxu1 %v4403_v63  ;;  %353 = vmatprep.mubr.f32.mxu1 %v9697_v57  ;;  %10322 = vst [vmem:[#allocation24_spill] sm:$0xff] %v4424_v62  ;;  %v4436_v63 = vld [vmem:[%s9684_s2 + $0x1c8] sm:$0xff]  ;;  %10325 = vst [vmem:[#allocation27_spill] sm:$0xff] %v4441_v60  ;;  %v4448_v56 = vld [vmem:[%s9684_s2 + $0x1c0] sm:$0xff] }
  0x23   :  { %283 = vmatmul.mubr.f32.vlgmr.msra.gmra.mxu0 %v9697_v57  ;;  %354 = vmatmul.mubr.f32.vlgmr.msra.gmra.mxu1 %v9697_v57  ;;  %10324 = vst [vmem:[#allocation26_spill] sm:$0xff] %v4436_v63  ;;  %10326 = vst [vmem:[#allocation28_spill] sm:$0xff] %v4448_v56  ;;  %v4453_v57 = vld [vmem:[%s9684_s2 + $0x1d0] sm:$0xff] }
  0x24   :  { %429 = vmatprep.subr.mxu0 %v4412_v58  ;;  %500 = vmatprep.subr.mxu1 %v4417_v59  ;;  %10327 = vst [vmem:[#allocation29_spill] sm:$0xff] %v4453_v57  ;;  %v4460_v58 = vld [vmem:[%s9684_s2 + $0x1a8] sm:$0xff]  ;;  %v4465_v59 = vld [vmem:[%s9684_s2 + $0x1b8] sm:$0xff]  ;;  %10449 = vst [vmem:[#allocation150_spill] sm:$0xff] %v5185_v53 }
  0x25   :  { %430 = vmatpush1.msra.mxu0 %v4424_v62  ;;  %501 = vmatpush1.msra.mxu1 %v4429_v61  ;;  %10328 = vst [vmem:[#allocation30_spill] sm:$0xff] %v4460_v58  ;;  %10329 = vst [vmem:[#allocation31_spill] sm:$0xff] %v4465_v59  ;;  %v4472_v62 = vld [vmem:[%s9684_s2 + $0x1a0] sm:$0xff]  ;;  %v4477_v61 = vld [vmem:[%s9684_s2 + $0x1b0] sm:$0xff] }
  0x26   :  { %431 = vmatprep.subr.mxu0 %v4436_v63  ;;  %502 = vmatprep.subr.mxu1 %v4441_v60  ;;  %10330 = vst [vmem:[#allocation32_spill] sm:$0xff] %v4472_v62  ;;  %10331 = vst [vmem:[#allocation33_spill] sm:$0xff] %v4477_v61  ;;  %v4484_v63 = vld [vmem:[%s9684_s2 + $0x188] sm:$0xff]  ;;  %v4489_v60 = vld [vmem:[%s9684_s2 + $0x198] sm:$0xff] }
  0x27   :  { %432 = vmatpush1.msra.mxu0 %v4448_v56  ;;  %503 = vmatpush1.msra.mxu1 %v4453_v57  ;;  %10332 = vst [vmem:[#allocation34_spill] sm:$0xff] %v4484_v63  ;;  %10333 = vst [vmem:[#allocation35_spill] sm:$0xff] %v4489_v60  ;;  %v4496_v56 = vld [vmem:[%s9684_s2 + $0x180] sm:$0xff]  ;;  %v4501_v57 = vld [vmem:[%s9684_s2 + $0x190] sm:$0xff] }
  0x28   :  { %433 = vmatprep.subr.mxu0 %v4460_v58  ;;  %504 = vmatprep.subr.mxu1 %v4465_v59  ;;  %10334 = vst [vmem:[#allocation36_spill] sm:$0xff] %v4496_v56  ;;  %10335 = vst [vmem:[#allocation37_spill] sm:$0xff] %v4501_v57  ;;  %v4508_v58 = vld [vmem:[%s9684_s2 + $0x168] sm:$0xff]  ;;  %v4513_v59 = vld [vmem:[%s9684_s2 + $0x178] sm:$0xff] }
  0x29   :  { %434 = vmatpush1.msra.mxu0 %v4472_v62  ;;  %505 = vmatpush1.msra.mxu1 %v4477_v61  ;;  %10336 = vst [vmem:[#allocation38_spill] sm:$0xff] %v4508_v58  ;;  %10337 = vst [vmem:[#allocation39_spill] sm:$0xff] %v4513_v59  ;;  %v4520_v62 = vld [vmem:[%s9684_s2 + $0x160] sm:$0xff]  ;;  %v4525_v61 = vld [vmem:[%s9684_s2 + $0x170] sm:$0xff] }
  0x2a   :  { %435 = vmatprep.subr.mxu0 %v4484_v63  ;;  %506 = vmatprep.subr.mxu1 %v4489_v60  ;;  %10338 = vst [vmem:[#allocation40_spill] sm:$0xff] %v4520_v62  ;;  %10339 = vst [vmem:[#allocation41_spill] sm:$0xff] %v4525_v61  ;;  %v4532_v63 = vld [vmem:[%s9684_s2 + $0x148] sm:$0xff]  ;;  %v4537_v60 = vld [vmem:[%s9684_s2 + $0x158] sm:$0xff] }
  0x2b   :  { %436 = vmatpush1.msra.mxu0 %v4496_v56  ;;  %507 = vmatpush1.msra.mxu1 %v4501_v57  ;;  %10340 = vst [vmem:[#allocation42_spill] sm:$0xff] %v4532_v63  ;;  %10341 = vst [vmem:[#allocation43_spill] sm:$0xff] %v4537_v60  ;;  %v4544_v56 = vld [vmem:[%s9684_s2 + $0x140] sm:$0xff]  ;;  %v4549_v57 = vld [vmem:[%s9684_s2 + $0x150] sm:$0xff] }
  0x2c   :  { %437 = vmatprep.subr.mxu0 %v4508_v58  ;;  %508 = vmatprep.subr.mxu1 %v4513_v59  ;;  %10342 = vst [vmem:[#allocation44_spill] sm:$0xff] %v4544_v56  ;;  %10343 = vst [vmem:[#allocation45_spill] sm:$0xff] %v4549_v57  ;;  %v10344_v59 = vmov 0.0   ;;  %v4562_v58 = vld [vmem:[%s9684_s2 + $0x128] sm:$0xff] }
  0x2d   :  { %438 = vmatpush1.msra.mxu0 %v4520_v62  ;;  %509 = vmatpush1.msra.mxu1 %v4525_v61  ;;  %10345 = vst [vmem:[#allocation46_spill] sm:$0xff] %v4562_v58  ;;  %v4567_v61 = vld [vmem:[%s9684_s2 + $0x138] sm:$0xff]  ;;  %v5026_v62 = vld [vmem:[%s9684_s2 + $0x2c0] sm:$0xff] }
  0x2e   :  { %439 = vmatprep.subr.mxu0 %v4532_v63  ;;  %510 = vmatprep.subr.mxu1 %v4537_v60  ;;  %10346 = vst [vmem:[#allocation47_spill] sm:$0xff] %v4567_v61  ;;  %v4992_v60 = vld [vmem:[%s9684_s2 + $0x2e8] sm:$0xff]  ;;  %v5009_v63 = vld [vmem:[%s9684_s2 + $0x2f0] sm:$0xff]  ;;  %10423 = vst [vmem:[#allocation124_spill] sm:$0xff] %v5026_v62 }
  0x2f   :  { %440 = vmatpush1.msra.mxu0 %v4544_v56  ;;  %511 = vmatpush1.msra.mxu1 %v4549_v57  ;;  %v4574_v57 = vld [vmem:[%s9684_s2 + $0x120] sm:$0xff]  ;;  %v4579_v56 = vld [vmem:[%s9684_s2 + $0x130] sm:$0xff]  ;;  %10417 = vst [vmem:[#allocation118_spill] sm:$0xff] %v4992_v60  ;;  %10420 = vst [vmem:[#allocation121_spill] sm:$0xff] %v5009_v63 }
  0x30   :  { %493 = vmatprep.mubr.f32.mxu0 %v10344_v59  ;;  %564 = vmatprep.mubr.f32.mxu1 %v10344_v59  ;;  %10347 = vst [vmem:[#allocation48_spill] sm:$0xff] %v4574_v57  ;;  %10348 = vst [vmem:[#allocation49_spill] sm:$0xff] %v4579_v56  ;;  %v5043_v59 = vld [vmem:[%s9684_s2 + $0x2b8] sm:$0xff] }
  0x31   :  { %441 = vmatprep.subr.mxu0 %v4562_v58  ;;  %512 = vmatprep.subr.mxu1 %v4567_v61  ;;  %v4586_v58 = vld [vmem:[%s9684_s2 + $0x108] sm:$0xff]  ;;  %v4591_v61 = vld [vmem:[%s9684_s2 + $0x118] sm:$0xff]  ;;  %10426 = vst [vmem:[#allocation127_spill] sm:$0xff] %v5043_v59 }
  0x32   :  { %442 = vmatpush1.msra.mxu0 %v4574_v57  ;;  %513 = vmatpush1.msra.mxu1 %v4579_v56  ;;  %10349 = vst [vmem:[#allocation50_spill] sm:$0xff] %v4586_v58  ;;  %10350 = vst [vmem:[#allocation51_spill] sm:$0xff] %v4591_v61  ;;  %v4598_v57 = vld [vmem:[%s9684_s2 + $0x100] sm:$0xff]  ;;  %v4603_v56 = vld [vmem:[%s9684_s2 + $0x110] sm:$0xff] }
  0x33   :  { %443 = vmatprep.subr.mxu0 %v4586_v58  ;;  %514 = vmatprep.subr.mxu1 %v4591_v61  ;;  %10351 = vst [vmem:[#allocation52_spill] sm:$0xff] %v4598_v57  ;;  %10352 = vst [vmem:[#allocation53_spill] sm:$0xff] %v4603_v56  ;;  %v4610_v58 = vld [vmem:[%s9684_s2 + $0xe8] sm:$0xff]  ;;  %v4615_v61 = vld [vmem:[%s9684_s2 + $0xf8] sm:$0xff] }
  0x34   :  { %444 = vmatpush1.msra.mxu0 %v4598_v57  ;;  %515 = vmatpush1.msra.mxu1 %v4603_v56  ;;  %10353 = vst [vmem:[#allocation54_spill] sm:$0xff] %v4610_v58  ;;  %10354 = vst [vmem:[#allocation55_spill] sm:$0xff] %v4615_v61  ;;  %v4622_v57 = vld [vmem:[%s9684_s2 + $0xe0] sm:$0xff]  ;;  %v4627_v56 = vld [vmem:[%s9684_s2 + $0xf0] sm:$0xff] }
  0x35   :  { %445 = vmatprep.subr.mxu0 %v4610_v58  ;;  %516 = vmatprep.subr.mxu1 %v4615_v61  ;;  %10355 = vst [vmem:[#allocation56_spill] sm:$0xff] %v4622_v57  ;;  %10356 = vst [vmem:[#allocation57_spill] sm:$0xff] %v4627_v56  ;;  %v4634_v58 = vld [vmem:[%s9684_s2 + $0xc8] sm:$0xff]  ;;  %v4639_v61 = vld [vmem:[%s9684_s2 + $0xd8] sm:$0xff] }
  0x36   :  { %446 = vmatpush1.msra.mxu0 %v4622_v57  ;;  %517 = vmatpush1.msra.mxu1 %v4627_v56  ;;  %10357 = vst [vmem:[#allocation58_spill] sm:$0xff] %v4634_v58  ;;  %10358 = vst [vmem:[#allocation59_spill] sm:$0xff] %v4639_v61  ;;  %v4646_v57 = vld [vmem:[%s9684_s2 + $0xc0] sm:$0xff]  ;;  %v4651_v56 = vld [vmem:[%s9684_s2 + $0xd0] sm:$0xff] }
  0x37   :  { %447 = vmatprep.subr.mxu0 %v4634_v58  ;;  %518 = vmatprep.subr.mxu1 %v4639_v61  ;;  %10359 = vst [vmem:[#allocation60_spill] sm:$0xff] %v4646_v57  ;;  %10360 = vst [vmem:[#allocation61_spill] sm:$0xff] %v4651_v56  ;;  %v4658_v58 = vld [vmem:[%s9684_s2 + $0xa8] sm:$0xff]  ;;  %v4663_v61 = vld [vmem:[%s9684_s2 + $0xb8] sm:$0xff] }
  0x38   :  { %448 = vmatpush1.msra.mxu0 %v4646_v57  ;;  %519 = vmatpush1.msra.mxu1 %v4651_v56  ;;  %10361 = vst [vmem:[#allocation62_spill] sm:$0xff] %v4658_v58  ;;  %10362 = vst [vmem:[#allocation63_spill] sm:$0xff] %v4663_v61  ;;  %v4670_v57 = vld [vmem:[%s9684_s2 + $0xa0] sm:$0xff]  ;;  %v4675_v56 = vld [vmem:[%s9684_s2 + $0xb0] sm:$0xff] }
  0x39   :  { %449 = vmatprep.subr.mxu0 %v4658_v58  ;;  %520 = vmatprep.subr.mxu1 %v4663_v61  ;;  %10363 = vst [vmem:[#allocation64_spill] sm:$0xff] %v4670_v57  ;;  %10364 = vst [vmem:[#allocation65_spill] sm:$0xff] %v4675_v56  ;;  %v4682_v58 = vld [vmem:[%s9684_s2 + $0x88] sm:$0xff]  ;;  %v4687_v61 = vld [vmem:[%s9684_s2 + $0x98] sm:$0xff] }
  0x3a   :  { %450 = vmatpush1.msra.mxu0 %v4670_v57  ;;  %521 = vmatpush1.msra.mxu1 %v4675_v56  ;;  %10365 = vst [vmem:[#allocation66_spill] sm:$0xff] %v4682_v58  ;;  %10366 = vst [vmem:[#allocation67_spill] sm:$0xff] %v4687_v61  ;;  %v4694_v57 = vld [vmem:[%s9684_s2 + $0x80] sm:$0xff]  ;;  %v4699_v56 = vld [vmem:[%s9684_s2 + $0x90] sm:$0xff] }
  0x3b   :  { %451 = vmatprep.subr.mxu0 %v4682_v58  ;;  %522 = vmatprep.subr.mxu1 %v4687_v61  ;;  %10367 = vst [vmem:[#allocation68_spill] sm:$0xff] %v4694_v57  ;;  %10368 = vst [vmem:[#allocation69_spill] sm:$0xff] %v4699_v56  ;;  %v4706_v58 = vld [vmem:[%s9684_s2 + $0x68] sm:$0xff]  ;;  %v4711_v61 = vld [vmem:[%s9684_s2 + $0x78] sm:$0xff] }
  0x3c   :  { %452 = vmatpush1.msra.mxu0 %v4694_v57  ;;  %523 = vmatpush1.msra.mxu1 %v4699_v56  ;;  %10369 = vst [vmem:[#allocation70_spill] sm:$0xff] %v4706_v58  ;;  %10370 = vst [vmem:[#allocation71_spill] sm:$0xff] %v4711_v61  ;;  %v4718_v57 = vld [vmem:[%s9684_s2 + $0x60] sm:$0xff]  ;;  %v4723_v56 = vld [vmem:[%s9684_s2 + $0x70] sm:$0xff] }
  0x3d   :  { %453 = vmatprep.subr.mxu0 %v4706_v58  ;;  %524 = vmatprep.subr.mxu1 %v4711_v61  ;;  %10371 = vst [vmem:[#allocation72_spill] sm:$0xff] %v4718_v57  ;;  %10372 = vst [vmem:[#allocation73_spill] sm:$0xff] %v4723_v56  ;;  %v4730_v58 = vld [vmem:[%s9684_s2 + $0x48] sm:$0xff]  ;;  %v4735_v61 = vld [vmem:[%s9684_s2 + $0x58] sm:$0xff] }
  0x3e   :  { %454 = vmatpush1.msra.mxu0 %v4718_v57  ;;  %525 = vmatpush1.msra.mxu1 %v4723_v56  ;;  %10373 = vst [vmem:[#allocation74_spill] sm:$0xff] %v4730_v58  ;;  %10374 = vst [vmem:[#allocation75_spill] sm:$0xff] %v4735_v61  ;;  %v4742_v57 = vld [vmem:[%s9684_s2 + $0x40] sm:$0xff]  ;;  %v4747_v56 = vld [vmem:[%s9684_s2 + $0x50] sm:$0xff] }
  0x3f   :  { %455 = vmatprep.subr.mxu0 %v4730_v58  ;;  %526 = vmatprep.subr.mxu1 %v4735_v61  ;;  %10375 = vst [vmem:[#allocation76_spill] sm:$0xff] %v4742_v57  ;;  %10376 = vst [vmem:[#allocation77_spill] sm:$0xff] %v4747_v56  ;;  %v4754_v58 = vld [vmem:[%s9684_s2 + $0x28] sm:$0xff]  ;;  %v4759_v61 = vld [vmem:[%s9684_s2 + $0x38] sm:$0xff] }
  0x40   :  { %456 = vmatpush1.msra.mxu0 %v4742_v57  ;;  %527 = vmatpush1.msra.mxu1 %v4747_v56  ;;  %10377 = vst [vmem:[#allocation78_spill] sm:$0xff] %v4754_v58  ;;  %10378 = vst [vmem:[#allocation79_spill] sm:$0xff] %v4759_v61  ;;  %v4766_v57 = vld [vmem:[%s9684_s2 + $0x20] sm:$0xff]  ;;  %v4771_v56 = vld [vmem:[%s9684_s2 + $0x30] sm:$0xff] }
  0x41   :  { %457 = vmatprep.subr.mxu0 %v4754_v58  ;;  %528 = vmatprep.subr.mxu1 %v4759_v61  ;;  %10379 = vst [vmem:[#allocation80_spill] sm:$0xff] %v4766_v57  ;;  %10380 = vst [vmem:[#allocation81_spill] sm:$0xff] %v4771_v56  ;;  %v4778_v58 = vld [vmem:[%s9684_s2 + $0x8] sm:$0xff]  ;;  %v4783_v61 = vld [vmem:[%s9684_s2 + $0x18] sm:$0xff] }
  0x42   :  { %458 = vmatpush1.msra.mxu0 %v4766_v57  ;;  %529 = vmatpush1.msra.mxu1 %v4771_v56  ;;  %10381 = vst [vmem:[#allocation82_spill] sm:$0xff] %v4778_v58  ;;  %10382 = vst [vmem:[#allocation83_spill] sm:$0xff] %v4783_v61  ;;  %v4790_v57 = vld [vmem:[%s9684_s2] sm:$0xff]  ;;  %v4795_v56 = vld [vmem:[%s9684_s2 + $0x10] sm:$0xff] }
  0x43   :  { %459 = vmatprep.subr.mxu0 %v4778_v58  ;;  %530 = vmatprep.subr.mxu1 %v4783_v61  ;;  %10383 = vst [vmem:[#allocation84_spill] sm:$0xff] %v4790_v57  ;;  %10384 = vst [vmem:[#allocation85_spill] sm:$0xff] %v4795_v56  ;;  %v4802_v58 = vld [vmem:[%s9684_s2 + $0x3e8] sm:$0xff]  ;;  %v4807_v61 = vld [vmem:[%s9684_s2 + $0x3f8] sm:$0xff] }
  0x44   :  { %460 = vmatpush1.msra.mxu0 %v4790_v57  ;;  %531 = vmatpush1.msra.mxu1 %v4795_v56  ;;  %10385 = vst [vmem:[#allocation86_spill] sm:$0xff] %v4802_v58  ;;  %10386 = vst [vmem:[#allocation87_spill] sm:$0xff] %v4807_v61  ;;  %v4814_v57 = vld [vmem:[%s9684_s2 + $0x3e0] sm:$0xff]  ;;  %v4819_v56 = vld [vmem:[%s9684_s2 + $0x3f0] sm:$0xff] }
  0x45   :  { %461 = vmatprep.subr.mxu0 %v4802_v58  ;;  %532 = vmatprep.subr.mxu1 %v4807_v61  ;;  %10387 = vst [vmem:[#allocation88_spill] sm:$0xff] %v4814_v57  ;;  %10388 = vst [vmem:[#allocation89_spill] sm:$0xff] %v4819_v56  ;;  %v4826_v58 = vld [vmem:[%s9684_s2 + $0x3c8] sm:$0xff]  ;;  %v4831_v61 = vld [vmem:[%s9684_s2 + $0x3d8] sm:$0xff] }
  0x46   :  { %462 = vmatpush2.msra.mxu0 %v4814_v57  ;;  %533 = vmatpush2.msra.mxu1 %v4819_v56  ;;  %10389 = vst [vmem:[#allocation90_spill] sm:$0xff] %v4826_v58  ;;  %10390 = vst [vmem:[#allocation91_spill] sm:$0xff] %v4831_v61  ;;  %v4838_v57 = vld [vmem:[%s9684_s2 + $0x3c0] sm:$0xff]  ;;  %v4843_v56 = vld [vmem:[%s9684_s2 + $0x3d0] sm:$0xff] }
  0x47   :  { %463 = vmatprep.subr.mxu0 %v4826_v58  ;;  %534 = vmatprep.subr.mxu1 %v4831_v61  ;;  %10391 = vst [vmem:[#allocation92_spill] sm:$0xff] %v4838_v57  ;;  %10392 = vst [vmem:[#allocation93_spill] sm:$0xff] %v4843_v56  ;;  %v4850_v58 = vld [vmem:[%s9684_s2 + $0x3a8] sm:$0xff]  ;;  %v4855_v61 = vld [vmem:[%s9684_s2 + $0x3b8] sm:$0xff] }
  0x48   :  { %464 = vmatpush2.msra.mxu0 %v4838_v57  ;;  %535 = vmatpush2.msra.mxu1 %v4843_v56  ;;  %10393 = vst [vmem:[#allocation94_spill] sm:$0xff] %v4850_v58  ;;  %10394 = vst [vmem:[#allocation95_spill] sm:$0xff] %v4855_v61  ;;  %v4862_v57 = vld [vmem:[%s9684_s2 + $0x3a0] sm:$0xff]  ;;  %v4867_v56 = vld [vmem:[%s9684_s2 + $0x3b0] sm:$0xff] }
  0x49   :  { %465 = vmatprep.subr.mxu0 %v4850_v58  ;;  %536 = vmatprep.subr.mxu1 %v4855_v61  ;;  %10395 = vst [vmem:[#allocation96_spill] sm:$0xff] %v4862_v57  ;;  %10396 = vst [vmem:[#allocation97_spill] sm:$0xff] %v4867_v56  ;;  %v4874_v58 = vld [vmem:[%s9684_s2 + $0x388] sm:$0xff]  ;;  %v4879_v61 = vld [vmem:[%s9684_s2 + $0x398] sm:$0xff] }
  0x4a   :  { %466 = vmatpush2.msra.mxu0 %v4862_v57  ;;  %537 = vmatpush2.msra.mxu1 %v4867_v56  ;;  %10397 = vst [vmem:[#allocation98_spill] sm:$0xff] %v4874_v58  ;;  %10398 = vst [vmem:[#allocation99_spill] sm:$0xff] %v4879_v61  ;;  %v4886_v57 = vld [vmem:[%s9684_s2 + $0x380] sm:$0xff]  ;;  %v4891_v56 = vld [vmem:[%s9684_s2 + $0x390] sm:$0xff] }
  0x4b   :  { %467 = vmatprep.subr.mxu0 %v4874_v58  ;;  %538 = vmatprep.subr.mxu1 %v4879_v61  ;;  %10399 = vst [vmem:[#allocation100_spill] sm:$0xff] %v4886_v57  ;;  %10400 = vst [vmem:[#allocation101_spill] sm:$0xff] %v4891_v56  ;;  %v4898_v58 = vld [vmem:[%s9684_s2 + $0x368] sm:$0xff]  ;;  %v4903_v61 = vld [vmem:[%s9684_s2 + $0x378] sm:$0xff] }
  0x4c   :  { %468 = vmatpush2.msra.mxu0 %v4886_v57  ;;  %539 = vmatpush2.msra.mxu1 %v4891_v56  ;;  %10401 = vst [vmem:[#allocation102_spill] sm:$0xff] %v4898_v58  ;;  %10402 = vst [vmem:[#allocation103_spill] sm:$0xff] %v4903_v61  ;;  %v4910_v57 = vld [vmem:[%s9684_s2 + $0x360] sm:$0xff]  ;;  %v4915_v56 = vld [vmem:[%s9684_s2 + $0x370] sm:$0xff] }
  0x4d   :  { %469 = vmatprep.subr.mxu0 %v4898_v58  ;;  %540 = vmatprep.subr.mxu1 %v4903_v61  ;;  %10403 = vst [vmem:[#allocation104_spill] sm:$0xff] %v4910_v57  ;;  %10404 = vst [vmem:[#allocation105_spill] sm:$0xff] %v4915_v56  ;;  %v4922_v58 = vld [vmem:[%s9684_s2 + $0x348] sm:$0xff]  ;;  %v4927_v61 = vld [vmem:[%s9684_s2 + $0x358] sm:$0xff] }
  0x4e   :  { %470 = vmatpush2.msra.mxu0 %v4910_v57  ;;  %541 = vmatpush2.msra.mxu1 %v4915_v56  ;;  %10405 = vst [vmem:[#allocation106_spill] sm:$0xff] %v4922_v58  ;;  %10406 = vst [vmem:[#allocation107_spill] sm:$0xff] %v4927_v61  ;;  %v4934_v57 = vld [vmem:[%s9684_s2 + $0x340] sm:$0xff]  ;;  %v4939_v56 = vld [vmem:[%s9684_s2 + $0x350] sm:$0xff] }
  0x4f   :  { %471 = vmatprep.subr.mxu0 %v4922_v58  ;;  %542 = vmatprep.subr.mxu1 %v4927_v61  ;;  %10407 = vst [vmem:[#allocation108_spill] sm:$0xff] %v4934_v57  ;;  %10408 = vst [vmem:[#allocation109_spill] sm:$0xff] %v4939_v56  ;;  %v4946_v58 = vld [vmem:[%s9684_s2 + $0x328] sm:$0xff]  ;;  %v4951_v61 = vld [vmem:[%s9684_s2 + $0x338] sm:$0xff] }
  0x50   :  { %472 = vmatpush2.msra.mxu0 %v4934_v57  ;;  %543 = vmatpush2.msra.mxu1 %v4939_v56  ;;  %10409 = vst [vmem:[#allocation110_spill] sm:$0xff] %v4946_v58  ;;  %10410 = vst [vmem:[#allocation111_spill] sm:$0xff] %v4951_v61  ;;  %v4958_v57 = vld [vmem:[%s9684_s2 + $0x320] sm:$0xff]  ;;  %v4963_v56 = vld [vmem:[%s9684_s2 + $0x330] sm:$0xff] }
  0x51   :  { %473 = vmatprep.subr.mxu0 %v4946_v58  ;;  %544 = vmatprep.subr.mxu1 %v4951_v61  ;;  %10411 = vst [vmem:[#allocation112_spill] sm:$0xff] %v4958_v57  ;;  %10412 = vst [vmem:[#allocation113_spill] sm:$0xff] %v4963_v56  ;;  %v4970_v58 = vld [vmem:[%s9684_s2 + $0x308] sm:$0xff]  ;;  %v4975_v61 = vld [vmem:[%s9684_s2 + $0x318] sm:$0xff] }
  0x52   :  { %474 = vmatpush2.msra.mxu0 %v4958_v57  ;;  %545 = vmatpush2.msra.mxu1 %v4963_v56  ;;  %10413 = vst [vmem:[#allocation114_spill] sm:$0xff] %v4970_v58  ;;  %10414 = vst [vmem:[#allocation115_spill] sm:$0xff] %v4975_v61  ;;  %v4982_v57 = vld [vmem:[%s9684_s2 + $0x300] sm:$0xff]  ;;  %v4987_v56 = vld [vmem:[%s9684_s2 + $0x310] sm:$0xff] }
  0x53   :  { %475 = vmatprep.subr.mxu0 %v4970_v58  ;;  %546 = vmatprep.subr.mxu1 %v4975_v61  ;;  %10415 = vst [vmem:[#allocation116_spill] sm:$0xff] %v4982_v57  ;;  %10416 = vst [vmem:[#allocation117_spill] sm:$0xff] %v4987_v56  ;;  %v4999_v61 = vld [vmem:[%s9684_s2 + $0x2f8] sm:$0xff]  ;;  %v5004_v58 = vld [vmem:[%s9684_s2 + $0x2e0] sm:$0xff] }
  0x54   :  { %476 = vmatpush2.msra.mxu0 %v4982_v57  ;;  %547 = vmatpush2.msra.mxu1 %v4987_v56  ;;  %10418 = vst [vmem:[#allocation119_spill] sm:$0xff] %v4999_v61  ;;  %10419 = vst [vmem:[#allocation120_spill] sm:$0xff] %v5004_v58  ;;  %v5016_v56 = vld [vmem:[%s9684_s2 + $0x2c8] sm:$0xff]  ;;  %v5021_v57 = vld [vmem:[%s9684_s2 + $0x2d8] sm:$0xff] }
  0x55   :  { %477 = vmatprep.subr.mxu0 %v4992_v60  ;;  %548 = vmatprep.subr.mxu1 %v4999_v61  ;;  %10421 = vst [vmem:[#allocation122_spill] sm:$0xff] %v5016_v56  ;;  %10422 = vst [vmem:[#allocation123_spill] sm:$0xff] %v5021_v57  ;;  %v5033_v61 = vld [vmem:[%s9684_s2 + $0x2d0] sm:$0xff]  ;;  %v5038_v60 = vld [vmem:[%s9684_s2 + $0x2a8] sm:$0xff] }
  0x56   :  { %478 = vmatpush2.msra.mxu0 %v5004_v58  ;;  %549 = vmatpush2.msra.mxu1 %v5009_v63  ;;  %10424 = vst [vmem:[#allocation125_spill] sm:$0xff] %v5033_v61  ;;  %10425 = vst [vmem:[#allocation126_spill] sm:$0xff] %v5038_v60  ;;  %v5050_v63 = vld [vmem:[%s9684_s2 + $0x2a0] sm:$0xff]  ;;  %v5055_v58 = vld [vmem:[%s9684_s2 + $0x2b0] sm:$0xff] }
  0x57   :  { %479 = vmatprep.subr.mxu0 %v5016_v56  ;;  %550 = vmatprep.subr.mxu1 %v5021_v57  ;;  %10427 = vst [vmem:[#allocation128_spill] sm:$0xff] %v5050_v63  ;;  %10428 = vst [vmem:[#allocation129_spill] sm:$0xff] %v5055_v58  ;;  %v5062_v56 = vld [vmem:[%s9684_s2 + $0x288] sm:$0xff]  ;;  %v5067_v57 = vld [vmem:[%s9684_s2 + $0x298] sm:$0xff] }
  0x58   :  { %480 = vmatpush2.msra.mxu0 %v5026_v62  ;;  %551 = vmatpush2.msra.mxu1 %v5033_v61  ;;  %10429 = vst [vmem:[#allocation130_spill] sm:$0xff] %v5062_v56  ;;  %10430 = vst [vmem:[#allocation131_spill] sm:$0xff] %v5067_v57  ;;  %v5074_v62 = vld [vmem:[%s9684_s2 + $0x280] sm:$0xff]  ;;  %v5079_v61 = vld [vmem:[%s9684_s2 + $0x290] sm:$0xff] }
  0x59   :  { %481 = vmatprep.subr.mxu0 %v5038_v60  ;;  %552 = vmatprep.subr.mxu1 %v5043_v59  ;;  %10431 = vst [vmem:[#allocation132_spill] sm:$0xff] %v5074_v62  ;;  %10432 = vst [vmem:[#allocation133_spill] sm:$0xff] %v5079_v61  ;;  %v5086_v60 = vld [vmem:[%s9684_s2 + $0x268] sm:$0xff]  ;;  %v5091_v59 = vld [vmem:[%s9684_s2 + $0x278] sm:$0xff] }
  0x5a   :  { %482 = vmatpush2.msra.mxu0 %v5050_v63  ;;  %553 = vmatpush2.msra.mxu1 %v5055_v58  ;;  %10433 = vst [vmem:[#allocation134_spill] sm:$0xff] %v5086_v60  ;;  %10434 = vst [vmem:[#allocation135_spill] sm:$0xff] %v5091_v59  ;;  %v5098_v63 = vld [vmem:[%s9684_s2 + $0x260] sm:$0xff]  ;;  %v5103_v58 = vld [vmem:[%s9684_s2 + $0x270] sm:$0xff] }
  0x5b   :  { %483 = vmatprep.subr.mxu0 %v5062_v56  ;;  %554 = vmatprep.subr.mxu1 %v5067_v57  ;;  %10435 = vst [vmem:[#allocation136_spill] sm:$0xff] %v5098_v63  ;;  %10436 = vst [vmem:[#allocation137_spill] sm:$0xff] %v5103_v58  ;;  %v5110_v56 = vld [vmem:[%s9684_s2 + $0x248] sm:$0xff]  ;;  %v5115_v57 = vld [vmem:[%s9684_s2 + $0x258] sm:$0xff] }
  0x5c   :  { %484 = vmatpush2.msra.mxu0 %v5074_v62  ;;  %555 = vmatpush2.msra.mxu1 %v5079_v61  ;;  %10437 = vst [vmem:[#allocation138_spill] sm:$0xff] %v5110_v56  ;;  %10438 = vst [vmem:[#allocation139_spill] sm:$0xff] %v5115_v57  ;;  %v5122_v62 = vld [vmem:[%s9684_s2 + $0x240] sm:$0xff]  ;;  %v5127_v61 = vld [vmem:[%s9684_s2 + $0x250] sm:$0xff] }
  0x5d   :  { %485 = vmatprep.subr.mxu0 %v5086_v60  ;;  %556 = vmatprep.subr.mxu1 %v5091_v59  ;;  %10439 = vst [vmem:[#allocation140_spill] sm:$0xff] %v5122_v62  ;;  %10440 = vst [vmem:[#allocation141_spill] sm:$0xff] %v5127_v61  ;;  %v5134_v60 = vld [vmem:[%s9684_s2 + $0x228] sm:$0xff]  ;;  %v5139_v59 = vld [vmem:[%s9684_s2 + $0x238] sm:$0xff] }
  0x5e   :  { %486 = vmatpush2.msra.mxu0 %v5098_v63  ;;  %557 = vmatpush2.msra.mxu1 %v5103_v58  ;;  %10441 = vst [vmem:[#allocation142_spill] sm:$0xff] %v5134_v60  ;;  %10442 = vst [vmem:[#allocation143_spill] sm:$0xff] %v5139_v59  ;;  %v5146_v63 = vld [vmem:[%s9684_s2 + $0x220] sm:$0xff]  ;;  %v5151_v58 = vld [vmem:[%s9684_s2 + $0x230] sm:$0xff] }
  0x5f   :  { %487 = vmatprep.subr.mxu0 %v5110_v56  ;;  %558 = vmatprep.subr.mxu1 %v5115_v57  ;;  %10443 = vst [vmem:[#allocation144_spill] sm:$0xff] %v5146_v63  ;;  %10444 = vst [vmem:[#allocation145_spill] sm:$0xff] %v5151_v58  ;;  %v5158_v56 = vld [vmem:[%s9684_s2 + $0x208] sm:$0xff]  ;;  %v5163_v57 = vld [vmem:[%s9684_s2 + $0x218] sm:$0xff] }
  0x60   :  { %488 = vmatpush2.msra.mxu0 %v5122_v62  ;;  %559 = vmatpush2.msra.mxu1 %v5127_v61  ;;  %10445 = vst [vmem:[#allocation146_spill] sm:$0xff] %v5158_v56  ;;  %10446 = vst [vmem:[#allocation147_spill] sm:$0xff] %v5163_v57  ;;  %v5170_v62 = vld [vmem:[%s9684_s2 + $0x200] sm:$0xff]  ;;  %v5175_v61 = vld [vmem:[%s9684_s2 + $0x210] sm:$0xff] }
  0x61   :  { %489 = vmatprep.subr.mxu0 %v5134_v60  ;;  %560 = vmatprep.subr.mxu1 %v5139_v59  ;;  %10447 = vst [vmem:[#allocation148_spill] sm:$0xff] %v5170_v62  ;;  %10448 = vst [vmem:[#allocation149_spill] sm:$0xff] %v5175_v61  ;;  %v3987_v59 = vmov 1983009808  }
  0x62   :  { %490 = vmatpush2.msra.mxu0 %v5146_v63  ;;  %561 = vmatpush2.msra.mxu1 %v5151_v58  ;;  %v367_v60 = vunpack.c.l.s4 %v3987_v59 }
  0x63   :  { %491 = vmatprep.subr.mxu0 %v5158_v56  ;;  %562 = vmatprep.subr.mxu1 %v5163_v57 }
  0x64   :  { %492 = vmatpush2.msra.mxu0 %v5170_v62  ;;  %563 = vmatpush2.msra.mxu1 %v5175_v61  ;;  %v368_v54 = vunpack.c.0.s8 %v367_v60 }
  0x65   :  { %591 = vmatprep.subr.mxu0 %v4028_v0  ;;  %662 = vmatprep.subr.mxu1 %v4033_v1  ;;  %v217_v1 = vld [vmem:[%s9682_s0] sm:$0xff] }
  0x66   :  { %v5188_v56 = vsub.s32 %v368_v54, %v5185_v53 }
  0x68   :  { %10450 = vst [vmem:[#allocation151_spill] sm:$0xff] %v5188_v56 }
  0xe3   :  { %v284_v63 = vpop.f32.mrf.mxu0  ;;  %v355_v58 = vpop.f32.mrf.mxu1 }
  0xe5   :  { %v286_v57 = vpop.f32.mrf.mxu0  ;;  %v357_v52 = vpop.f32.mrf.mxu1 }
  0xe6   :  { %v364_v62 = vcombine.low %v284_v63, %v286_v57  ;;  %v365_v51 = vcombine.low %v355_v58, %v357_v52 }
  0xe8   :  { %v372_v61 = vrot.slane %v364_v62, %v5188_v56  ;;  %v379_v0 = vrot.slane %v365_v51, %v5188_v56 }
  0xea   :  { %v380_v59 = vcombine.low %v372_v61, %v379_v0 }
  0xec   :  { %v382_v55 = vadd.f32 %v380_v59, %v217_v1 }
  0xee   :  { %v383_v60 = vmul.f32 0.5, %v382_v55  ;;  %v388_v50 = vrot.slane %v382_v55, 2  ;;  %v394_v54 = vrot.slane %v382_v55, 4  ;;  %v397_v53 = vrot.slane %v382_v55, 6 }
  0xf0   :  { %3226 = vtanh.f32 %v383_v60  ;;  %v390_v49 = vmul.f32 0.5, %v388_v50  ;;  %v399_v57 = vmul.f32 0.5, %v397_v53  ;;  %v10498_v53 = vld [vmem:[#allocation51_spill] sm:$0xff]  ;;  %v10500_v60 = vld [vmem:[#allocation53_spill] sm:$0xff] }
  0xf2   :  { %3228 = vtanh.f32 %v390_v49 }
  0xf3   :  { %3230 = vtanh.f32 %v394_v54  ;;  %v10501_v54 = vld [vmem:[#allocation54_spill] sm:$0xff] }
  0xf4   :  { %3232 = vtanh.f32 %v399_v57  ;;  %v10502_v57 = vld [vmem:[#allocation55_spill] sm:$0xff] }
  0xfd   :  { %v3227_v52 = vpop.eup %3226 }
  0xfe   :  { %v385_v58 = vmul.f32 0.5, %v3227_v52  ;;  %v10503_v52 = vld [vmem:[#allocation56_spill] sm:$0xff] }
  0xff   :  { %v3229_v62 = vpop.eup %3228 }
 0x100   :  { %v386_v63 = vadd.f32 0.5, %v385_v58  ;;  %v392_v51 = vmul.f32 0.5, %v3229_v62  ;;  %v3231_v48 = vpop.eup %3230  ;;  %v10504_v58 = vld [vmem:[#allocation57_spill] sm:$0xff]  ;;  %v10505_v62 = vld [vmem:[#allocation58_spill] sm:$0xff] }
 0x101   :  { %v3233_v50 = vpop.eup %3232 }
 0x102   :  { %v393_v56 = vadd.f32 0.5, %v392_v51  ;;  %v404_v61 = vmul.f32 %v3231_v48, %v386_v63  ;;  %v401_v49 = vmul.f32 0.5, %v3233_v50  ;;  %v10497_v48 = vld [vmem:[#allocation50_spill] sm:$0xff]  ;;  %v10506_v63 = vld [vmem:[#allocation59_spill] sm:$0xff]  ;;  %v10507_v51 = vld [vmem:[#allocation60_spill] sm:$0xff] }
 0x103   :  { %v10509_v50 = vld [vmem:[#allocation62_spill] sm:$0xff] }
 0x104   :  { %v403_v47 = vmul.f32 0.0, %v393_v56  ;;  %v402_v1 = vadd.f32 0.5, %v401_v49  ;;  %v10499_v56 = vld [vmem:[#allocation52_spill] sm:$0xff]  ;;  %v10510_v49 = vld [vmem:[#allocation63_spill] sm:$0xff] }
 0x106   :  { %v5195_v0 = vadd.f32 %v404_v61, %v403_v47  ;;  %v10496_v47 = vld [vmem:[#allocation49_spill] sm:$0xff] }
 0x107   :  { %v10508_v61 = vld [vmem:[#allocation61_spill] sm:$0xff] }
 0x108   :  { %3234 = vtanh.f32 %v5195_v0 }
 0x115   :  { %v3235_v59 = vpop.eup %3234 }
 0x116   :  { %v5198_v55 = vmul.f32 %v3235_v59, %v402_v1  ;;  %v10511_v1 = vld [vmem:[#allocation64_spill] sm:$0xff]  ;;  %v10512_v59 = vld [vmem:[#allocation65_spill] sm:$0xff] }
 0x118   :  { %494 = vmatmul.mubr.f32.vlgmr.msra.gmra.mxu0 %v5198_v55  ;;  %565 = vmatmul.mubr.f32.vlgmr.msra.gmra.mxu1 %v5198_v55 }
 0x119   :  { %592 = vmatpush1.msra.mxu0 %v4038_v2  ;;  %663 = vmatpush1.msra.mxu1 %v4045_v3  ;;  %v10451_v2 = vld [vmem:[#allocation5_spill] sm:$0xff]  ;;  %v10452_v3 = vld [vmem:[#allocation6_spill] sm:$0xff] }
 0x11a   :  { %593 = vmatprep.subr.mxu0 %v4050_v4  ;;  %664 = vmatprep.subr.mxu1 %v4055_v5  ;;  %v10453_v4 = vld [vmem:[#allocation7_spill] sm:$0xff]  ;;  %v10454_v5 = vld [vmem:[#allocation8_spill] sm:$0xff] }
 0x11b   :  { %594 = vmatpush1.msra.mxu0 %v4062_v6  ;;  %665 = vmatpush1.msra.mxu1 %v4067_v7  ;;  %v10455_v6 = vld [vmem:[#allocation9_spill] sm:$0xff]  ;;  %v10456_v7 = vld [vmem:[#allocation10_spill] sm:$0xff] }
 0x11c   :  { %595 = vmatprep.subr.mxu0 %v4072_v8  ;;  %666 = vmatprep.subr.mxu1 %v4079_v9  ;;  %v10457_v8 = vld [vmem:[#allocation11_spill] sm:$0xff]  ;;  %v10458_v9 = vld [vmem:[#allocation12_spill] sm:$0xff] }
 0x11d   :  { %596 = vmatpush1.msra.mxu0 %v4084_v10  ;;  %667 = vmatpush1.msra.mxu1 %v4089_v11  ;;  %v10459_v10 = vld [vmem:[#allocation13_spill] sm:$0xff]  ;;  %v10460_v11 = vld [vmem:[#allocation14_spill] sm:$0xff] }
 0x11e   :  { %597 = vmatprep.subr.mxu0 %v4096_v12  ;;  %668 = vmatprep.subr.mxu1 %v4101_v13  ;;  %v10461_v12 = vld [vmem:[#allocation15_spill] sm:$0xff]  ;;  %v10462_v13 = vld [vmem:[#allocation16_spill] sm:$0xff] }
 0x11f   :  { %598 = vmatpush1.msra.mxu0 %v4108_v14  ;;  %669 = vmatpush1.msra.mxu1 %v4113_v15  ;;  %v10463_v14 = vld [vmem:[#allocation17_spill] sm:$0xff]  ;;  %v10464_v15 = vld [vmem:[#allocation18_spill] sm:$0xff] }
 0x120   :  { %599 = vmatprep.subr.mxu0 %v4120_v16  ;;  %670 = vmatprep.subr.mxu1 %v4125_v17  ;;  %v10465_v16 = vld [vmem:[#allocation19_spill] sm:$0xff]  ;;  %v10466_v17 = vld [vmem:[#allocation20_spill] sm:$0xff] }
 0x121   :  { %600 = vmatpush1.msra.mxu0 %v4132_v18  ;;  %671 = vmatpush1.msra.mxu1 %v4137_v19  ;;  %v10467_v18 = vmov 0.0   ;;  %v10468_v19 = vld [vmem:[#allocation21_spill] sm:$0xff] }
 0x122   :  { %601 = vmatprep.subr.mxu0 %v4144_v20  ;;  %672 = vmatprep.subr.mxu1 %v4149_v21  ;;  %v10469_v20 = vld [vmem:[#allocation22_spill] sm:$0xff]  ;;  %v10470_v21 = vld [vmem:[#allocation23_spill] sm:$0xff] }
 0x123   :  { %602 = vmatpush1.msra.mxu0 %v4156_v22  ;;  %673 = vmatpush1.msra.mxu1 %v4161_v23  ;;  %v10471_v22 = vld [vmem:[#allocation24_spill] sm:$0xff]  ;;  %v10472_v23 = vld [vmem:[#allocation25_spill] sm:$0xff] }
 0x124   :  { %603 = vmatprep.subr.mxu0 %v4168_v24  ;;  %674 = vmatprep.subr.mxu1 %v4173_v25  ;;  %v10473_v24 = vld [vmem:[#allocation26_spill] sm:$0xff]  ;;  %v10474_v25 = vld [vmem:[#allocation27_spill] sm:$0xff] }
 0x125   :  { %604 = vmatpush1.msra.mxu0 %v4180_v26  ;;  %675 = vmatpush1.msra.mxu1 %v4185_v27  ;;  %v10475_v26 = vld [vmem:[#allocation28_spill] sm:$0xff]  ;;  %v10476_v27 = vld [vmem:[#allocation29_spill] sm:$0xff] }
 0x126   :  { %605 = vmatprep.subr.mxu0 %v4192_v28  ;;  %676 = vmatprep.subr.mxu1 %v4197_v29  ;;  %v10477_v28 = vld [vmem:[#allocation30_spill] sm:$0xff]  ;;  %v10478_v29 = vld [vmem:[#allocation31_spill] sm:$0xff] }
 0x127   :  { %606 = vmatpush1.msra.mxu0 %v4204_v30  ;;  %677 = vmatpush1.msra.mxu1 %v4209_v31  ;;  %v10479_v30 = vld [vmem:[#allocation32_spill] sm:$0xff]  ;;  %v10480_v31 = vld [vmem:[#allocation33_spill] sm:$0xff] }
 0x128   :  { %607 = vmatprep.subr.mxu0 %v4216_v32  ;;  %678 = vmatprep.subr.mxu1 %v4221_v33  ;;  %v10481_v32 = vld [vmem:[#allocation34_spill] sm:$0xff]  ;;  %v10482_v33 = vld [vmem:[#allocation35_spill] sm:$0xff] }
 0x129   :  { %608 = vmatpush1.msra.mxu0 %v4228_v34  ;;  %679 = vmatpush1.msra.mxu1 %v4233_v35  ;;  %v10483_v34 = vld [vmem:[#allocation36_spill] sm:$0xff]  ;;  %v10484_v35 = vld [vmem:[#allocation37_spill] sm:$0xff] }
 0x12a   :  { %609 = vmatprep.subr.mxu0 %v4240_v36  ;;  %680 = vmatprep.subr.mxu1 %v4245_v37  ;;  %v10485_v36 = vld [vmem:[#allocation38_spill] sm:$0xff]  ;;  %v10486_v37 = vld [vmem:[#allocation39_spill] sm:$0xff] }
 0x12b   :  { %610 = vmatpush1.msra.mxu0 %v4252_v38  ;;  %681 = vmatpush1.msra.mxu1 %v4257_v39  ;;  %v10487_v38 = vld [vmem:[#allocation40_spill] sm:$0xff]  ;;  %v10488_v39 = vld [vmem:[#allocation41_spill] sm:$0xff] }
 0x12c   :  { %611 = vmatprep.subr.mxu0 %v4264_v40  ;;  %682 = vmatprep.subr.mxu1 %v4269_v41  ;;  %v10489_v40 = vld [vmem:[#allocation42_spill] sm:$0xff]  ;;  %v10490_v41 = vld [vmem:[#allocation43_spill] sm:$0xff] }
 0x12d   :  { %612 = vmatpush1.msra.mxu0 %v4276_v42  ;;  %683 = vmatpush1.msra.mxu1 %v4281_v43  ;;  %v10491_v42 = vld [vmem:[#allocation44_spill] sm:$0xff]  ;;  %v10492_v43 = vld [vmem:[#allocation45_spill] sm:$0xff] }
 0x12e   :  { %613 = vmatprep.subr.mxu0 %v4288_v44  ;;  %684 = vmatprep.subr.mxu1 %v4293_v45  ;;  %v10493_v44 = vld [vmem:[#allocation46_spill] sm:$0xff]  ;;  %v10494_v45 = vld [vmem:[#allocation47_spill] sm:$0xff] }
 0x12f   :  { %614 = vmatpush1.msra.mxu0 %v4300_v46  ;;  %685 = vmatpush1.msra.mxu1 %v10451_v2  ;;  %v10495_v46 = vld [vmem:[#allocation48_spill] sm:$0xff]  ;;  %v10514_v2 = vld [vmem:[#allocation67_spill] sm:$0xff] }
 0x130   :  { %615 = vmatprep.subr.mxu0 %v10452_v3  ;;  %686 = vmatprep.subr.mxu1 %v10453_v4  ;;  %v10515_v3 = vld [vmem:[#allocation68_spill] sm:$0xff]  ;;  %v10516_v4 = vld [vmem:[#allocation69_spill] sm:$0xff] }
 0x131   :  { %616 = vmatpush1.msra.mxu0 %v10454_v5  ;;  %687 = vmatpush1.msra.mxu1 %v10455_v6  ;;  %v10517_v5 = vld [vmem:[#allocation70_spill] sm:$0xff]  ;;  %v10518_v6 = vld [vmem:[#allocation71_spill] sm:$0xff] }
 0x132   :  { %617 = vmatprep.subr.mxu0 %v10456_v7  ;;  %688 = vmatprep.subr.mxu1 %v10457_v8  ;;  %v10519_v7 = vld [vmem:[#allocation72_spill] sm:$0xff]  ;;  %v10520_v8 = vld [vmem:[#allocation73_spill] sm:$0xff] }
 0x133   :  { %618 = vmatpush1.msra.mxu0 %v10458_v9  ;;  %689 = vmatpush1.msra.mxu1 %v10459_v10  ;;  %v10521_v9 = vld [vmem:[#allocation74_spill] sm:$0xff]  ;;  %v10522_v10 = vld [vmem:[#allocation75_spill] sm:$0xff] }
 0x134   :  { %619 = vmatprep.subr.mxu0 %v10460_v11  ;;  %690 = vmatprep.subr.mxu1 %v10461_v12  ;;  %v10523_v11 = vld [vmem:[#allocation76_spill] sm:$0xff]  ;;  %v10524_v12 = vld [vmem:[#allocation77_spill] sm:$0xff] }
 0x135   :  { %620 = vmatpush1.msra.mxu0 %v10462_v13  ;;  %691 = vmatpush1.msra.mxu1 %v10463_v14  ;;  %v10525_v13 = vld [vmem:[#allocation78_spill] sm:$0xff]  ;;  %v10526_v14 = vld [vmem:[#allocation79_spill] sm:$0xff] }
 0x136   :  { %621 = vmatprep.subr.mxu0 %v10464_v15  ;;  %692 = vmatprep.subr.mxu1 %v10465_v16  ;;  %v10527_v15 = vld [vmem:[#allocation80_spill] sm:$0xff]  ;;  %v10528_v16 = vld [vmem:[#allocation81_spill] sm:$0xff] }
 0x137   :  { %622 = vmatpush1.msra.mxu0 %v10466_v17  ;;  %655 = vmatprep.mubr.f32.mxu0 %v10467_v18  ;;  %v10529_v17 = vld [vmem:[#allocation82_spill] sm:$0xff] }
 0x138   :  { %693 = vmatpush1.msra.mxu1 %v10468_v19  ;;  %726 = vmatprep.mubr.f32.mxu1 %v10467_v18  ;;  %v10530_v19 = vld [vmem:[#allocation83_spill] sm:$0xff] }
 0x139   :  { %656 = vmatmul.mubr.f32.vlgmr.msra.gmra.mxu0 %v5198_v55  ;;  %727 = vmatmul.mubr.f32.vlgmr.msra.gmra.mxu1 %v5198_v55  ;;  %v10513_v55 = vld [vmem:[#allocation66_spill] sm:$0xff] }
 0x13a   :  { %781 = vmatprep.subr.mxu0 %v10469_v20  ;;  %852 = vmatprep.subr.mxu1 %v10470_v21  ;;  %v10531_v20 = vld [vmem:[#allocation84_spill] sm:$0xff]  ;;  %v10532_v21 = vld [vmem:[#allocation85_spill] sm:$0xff] }
 0x13b   :  { %782 = vmatpush1.msra.mxu0 %v10471_v22  ;;  %853 = vmatpush1.msra.mxu1 %v10472_v23  ;;  %v10533_v22 = vld [vmem:[#allocation86_spill] sm:$0xff]  ;;  %v10534_v23 = vld [vmem:[#allocation87_spill] sm:$0xff] }
 0x13c   :  { %783 = vmatprep.subr.mxu0 %v10473_v24  ;;  %854 = vmatprep.subr.mxu1 %v10474_v25  ;;  %v10535_v24 = vld [vmem:[#allocation88_spill] sm:$0xff]  ;;  %v10536_v25 = vld [vmem:[#allocation89_spill] sm:$0xff] }
 0x13d   :  { %784 = vmatpush1.msra.mxu0 %v10475_v26  ;;  %855 = vmatpush1.msra.mxu1 %v10476_v27  ;;  %v10537_v26 = vld [vmem:[#allocation90_spill] sm:$0xff]  ;;  %v10538_v27 = vld [vmem:[#allocation91_spill] sm:$0xff] }
 0x13e   :  { %785 = vmatprep.subr.mxu0 %v10477_v28  ;;  %856 = vmatprep.subr.mxu1 %v10478_v29  ;;  %v10539_v28 = vld [vmem:[#allocation92_spill] sm:$0xff]  ;;  %v10540_v29 = vld [vmem:[#allocation93_spill] sm:$0xff] }
 0x13f   :  { %786 = vmatpush1.msra.mxu0 %v10479_v30  ;;  %857 = vmatpush1.msra.mxu1 %v10480_v31  ;;  %v10541_v30 = vld [vmem:[#allocation94_spill] sm:$0xff]  ;;  %v10542_v31 = vld [vmem:[#allocation95_spill] sm:$0xff] }
 0x140   :  { %787 = vmatprep.subr.mxu0 %v10481_v32  ;;  %858 = vmatprep.subr.mxu1 %v10482_v33  ;;  %v10543_v32 = vld [vmem:[#allocation96_spill] sm:$0xff]  ;;  %v10544_v33 = vld [vmem:[#allocation97_spill] sm:$0xff] }
 0x141   :  { %788 = vmatpush1.msra.mxu0 %v10483_v34  ;;  %859 = vmatpush1.msra.mxu1 %v10484_v35  ;;  %v10545_v34 = vld [vmem:[#allocation98_spill] sm:$0xff]  ;;  %v10546_v35 = vld [vmem:[#allocation99_spill] sm:$0xff] }
 0x142   :  { %789 = vmatprep.subr.mxu0 %v10485_v36  ;;  %860 = vmatprep.subr.mxu1 %v10486_v37  ;;  %v10547_v36 = vld [vmem:[#allocation100_spill] sm:$0xff]  ;;  %v10548_v37 = vld [vmem:[#allocation101_spill] sm:$0xff] }
 0x143   :  { %790 = vmatpush1.msra.mxu0 %v10487_v38  ;;  %861 = vmatpush1.msra.mxu1 %v10488_v39  ;;  %v10549_v38 = vld [vmem:[#allocation102_spill] sm:$0xff]  ;;  %v10550_v39 = vld [vmem:[#allocation103_spill] sm:$0xff] }
 0x144   :  { %791 = vmatprep.subr.mxu0 %v10489_v40  ;;  %862 = vmatprep.subr.mxu1 %v10490_v41  ;;  %v10551_v40 = vld [vmem:[#allocation104_spill] sm:$0xff]  ;;  %v10552_v41 = vld [vmem:[#allocation105_spill] sm:$0xff] }
 0x145   :  { %792 = vmatpush1.msra.mxu0 %v10491_v42  ;;  %863 = vmatpush1.msra.mxu1 %v10492_v43  ;;  %v10553_v42 = vld [vmem:[#allocation106_spill] sm:$0xff]  ;;  %v10554_v43 = vld [vmem:[#allocation107_spill] sm:$0xff] }
 0x146   :  { %793 = vmatprep.subr.mxu0 %v10493_v44  ;;  %864 = vmatprep.subr.mxu1 %v10494_v45  ;;  %v10555_v44 = vld [vmem:[#allocation108_spill] sm:$0xff]  ;;  %v10556_v45 = vld [vmem:[#allocation109_spill] sm:$0xff] }
 0x147   :  { %794 = vmatpush1.msra.mxu0 %v10495_v46  ;;  %865 = vmatpush1.msra.mxu1 %v10496_v47  ;;  %v10557_v46 = vld [vmem:[#allocation110_spill] sm:$0xff]  ;;  %v10558_v47 = vld [vmem:[#allocation111_spill] sm:$0xff] }
 0x148   :  { %795 = vmatprep.subr.mxu0 %v10497_v48  ;;  %866 = vmatprep.subr.mxu1 %v10498_v53  ;;  %v10559_v48 = vld [vmem:[#allocation112_spill] sm:$0xff]  ;;  %v10560_v53 = vld [vmem:[#allocation113_spill] sm:$0xff] }
 0x149   :  { %796 = vmatpush1.msra.mxu0 %v10499_v56  ;;  %867 = vmatpush1.msra.mxu1 %v10500_v60  ;;  %v10561_v56 = vld [vmem:[#allocation114_spill] sm:$0xff]  ;;  %v10562_v60 = vld [vmem:[#allocation115_spill] sm:$0xff] }
 0x14a   :  { %797 = vmatprep.subr.mxu0 %v10501_v54  ;;  %868 = vmatprep.subr.mxu1 %v10502_v57  ;;  %v10563_v54 = vld [vmem:[#allocation116_spill] sm:$0xff]  ;;  %v10564_v57 = vld [vmem:[#allocation117_spill] sm:$0xff] }
 0x14b   :  { %798 = vmatpush1.msra.mxu0 %v10503_v52  ;;  %869 = vmatpush1.msra.mxu1 %v10504_v58  ;;  %v10565_v52 = vld [vmem:[#allocation118_spill] sm:$0xff]  ;;  %v10566_v58 = vld [vmem:[#allocation119_spill] sm:$0xff] }
 0x14c   :  { %799 = vmatprep.subr.mxu0 %v10505_v62  ;;  %870 = vmatprep.subr.mxu1 %v10506_v63  ;;  %v10567_v62 = vld [vmem:[#allocation120_spill] sm:$0xff]  ;;  %v10568_v63 = vld [vmem:[#allocation121_spill] sm:$0xff] }
 0x14d   :  { %800 = vmatpush1.msra.mxu0 %v10507_v51  ;;  %871 = vmatpush1.msra.mxu1 %v10508_v61  ;;  %v10569_v51 = vld [vmem:[#allocation122_spill] sm:$0xff]  ;;  %v10570_v61 = vld [vmem:[#allocation123_spill] sm:$0xff] }
 0x14e   :  { %801 = vmatprep.subr.mxu0 %v10509_v50  ;;  %872 = vmatprep.subr.mxu1 %v10510_v49  ;;  %v10571_v50 = vld [vmem:[#allocation124_spill] sm:$0xff]  ;;  %v10572_v49 = vld [vmem:[#allocation125_spill] sm:$0xff] }
 0x14f   :  { %802 = vmatpush1.msra.mxu0 %v10511_v1  ;;  %873 = vmatpush1.msra.mxu1 %v10512_v59  ;;  %v10573_v1 = vld [vmem:[#allocation126_spill] sm:$0xff]  ;;  %v10574_v59 = vld [vmem:[#allocation127_spill] sm:$0xff] }
 0x150   :  { %803 = vmatprep.subr.mxu0 %v10513_v55  ;;  %874 = vmatprep.subr.mxu1 %v10514_v2  ;;  %v10575_v55 = vld [vmem:[#allocation128_spill] sm:$0xff]  ;;  %v10576_v2 = vld [vmem:[#allocation129_spill] sm:$0xff] }
 0x151   :  { %804 = vmatpush1.msra.mxu0 %v10515_v3  ;;  %875 = vmatpush1.msra.mxu1 %v10516_v4  ;;  %v10577_v3 = vld [vmem:[#allocation130_spill] sm:$0xff]  ;;  %v10578_v4 = vld [vmem:[#allocation131_spill] sm:$0xff] }
 0x152   :  { %805 = vmatprep.subr.mxu0 %v10517_v5  ;;  %876 = vmatprep.subr.mxu1 %v10518_v6  ;;  %v10579_v5 = vld [vmem:[#allocation132_spill] sm:$0xff]  ;;  %v10580_v6 = vld [vmem:[#allocation133_spill] sm:$0xff] }
 0x153   :  { %806 = vmatpush1.msra.mxu0 %v10519_v7  ;;  %877 = vmatpush1.msra.mxu1 %v10520_v8  ;;  %v10581_v7 = vld [vmem:[#allocation134_spill] sm:$0xff]  ;;  %v10582_v8 = vld [vmem:[#allocation135_spill] sm:$0xff] }
 0x154   :  { %807 = vmatprep.subr.mxu0 %v10521_v9  ;;  %878 = vmatprep.subr.mxu1 %v10522_v10  ;;  %v10583_v9 = vld [vmem:[#allocation136_spill] sm:$0xff]  ;;  %v10584_v10 = vld [vmem:[#allocation137_spill] sm:$0xff] }
 0x155   :  { %808 = vmatpush1.msra.mxu0 %v10523_v11  ;;  %879 = vmatpush1.msra.mxu1 %v10524_v12  ;;  %v10585_v11 = vld [vmem:[#allocation138_spill] sm:$0xff]  ;;  %v10586_v12 = vld [vmem:[#allocation139_spill] sm:$0xff] }
 0x156   :  { %809 = vmatprep.subr.mxu0 %v10525_v13  ;;  %880 = vmatprep.subr.mxu1 %v10526_v14  ;;  %v10587_v13 = vld [vmem:[#allocation140_spill] sm:$0xff]  ;;  %v10588_v14 = vld [vmem:[#allocation141_spill] sm:$0xff] }
 0x157   :  { %810 = vmatpush1.msra.mxu0 %v10527_v15  ;;  %881 = vmatpush1.msra.mxu1 %v10528_v16  ;;  %v10589_v15 = vld [vmem:[#allocation142_spill] sm:$0xff]  ;;  %v10590_v16 = vld [vmem:[#allocation143_spill] sm:$0xff] }
 0x158   :  { %811 = vmatprep.subr.mxu0 %v10529_v17  ;;  %882 = vmatprep.subr.mxu1 %v10530_v19  ;;  %v10591_v17 = vld [vmem:[#allocation144_spill] sm:$0xff]  ;;  %v10592_v19 = vld [vmem:[#allocation145_spill] sm:$0xff] }
 0x159   :  { %812 = vmatpush1.msra.mxu0 %v10531_v20  ;;  %883 = vmatpush1.msra.mxu1 %v10532_v21  ;;  %v10593_v20 = vld [vmem:[#allocation146_spill] sm:$0xff]  ;;  %v10594_v21 = vld [vmem:[#allocation147_spill] sm:$0xff] }
 0x15a   :  { %813 = vmatprep.subr.mxu0 %v10533_v22  ;;  %884 = vmatprep.subr.mxu1 %v10534_v23  ;;  %v10595_v22 = vld [vmem:[#allocation148_spill] sm:$0xff]  ;;  %v10596_v23 = vld [vmem:[#allocation149_spill] sm:$0xff] }
 0x15b   :  { %814 = vmatpush2.msra.mxu0 %v10535_v24  ;;  %885 = vmatpush2.msra.mxu1 %v10536_v25  ;;  %v5399_v24 = vld [vmem:[%s9683_s1 + $0x1e8] sm:$0xff]  ;;  %v5405_v25 = vld [vmem:[%s9683_s1 + $0x1f8] sm:$0xff] }
 0x15c   :  { %815 = vmatprep.subr.mxu0 %v10537_v26  ;;  %886 = vmatprep.subr.mxu1 %v10538_v27  ;;  %v10597_v26 = vld [vmem:[#allocation150_spill] sm:$0xff] }
 0x15d   :  { %816 = vmatpush2.msra.mxu0 %v10539_v28  ;;  %887 = vmatpush2.msra.mxu1 %v10540_v29  ;;  %v411_v27 = vsub.s32 0, %v10597_v26  ;;  %v216_v28 = vld [vmem:[%s9685_s3] sm:$0xf]  ;;  %v415_v29 = vsub.s32 1, %v10597_v26 }
 0x15e   :  { %817 = vmatprep.subr.mxu0 %v10541_v30  ;;  %888 = vmatprep.subr.mxu1 %v10542_v31  ;;  %v419_v31 = vsub.s32 2, %v10597_v26 }
 0x15f   :  { %818 = vmatpush2.msra.mxu0 %v10543_v32  ;;  %889 = vmatpush2.msra.mxu1 %v10544_v33  ;;  %v5413_v30 = vrot.slane %v216_v28, %v411_v27  ;;  %v5416_v32 = vrot.slane %v216_v28, %v415_v29 }
 0x160   :  { %819 = vmatprep.subr.mxu0 %v10545_v34  ;;  %890 = vmatprep.subr.mxu1 %v10546_v35 }
 0x161   :  { %820 = vmatpush2.msra.mxu0 %v10547_v36  ;;  %891 = vmatpush2.msra.mxu1 %v10548_v37  ;;  %10598 = vst [vmem:[#allocation5_spill] sm:$0xff] %v5413_v30  ;;  %v5419_v37 = vrot.slane %v216_v28, %v419_v31 }
 0x162   :  { %821 = vmatprep.subr.mxu0 %v10549_v38  ;;  %892 = vmatprep.subr.mxu1 %v10550_v39 }
 0x163   :  { %822 = vmatpush2.msra.mxu0 %v10551_v40  ;;  %893 = vmatpush2.msra.mxu1 %v10552_v41  ;;  %10599 = vst [vmem:[#allocation6_spill] sm:$0xff] %v5419_v37  ;;  %v423_v41 = vsub.s32 3, %v10597_v26 }
 0x164   :  { %823 = vmatprep.subr.mxu0 %v10553_v42  ;;  %894 = vmatprep.subr.mxu1 %v10554_v43 }
 0x165   :  { %824 = vmatpush2.msra.mxu0 %v10555_v44  ;;  %895 = vmatpush2.msra.mxu1 %v10556_v45  ;;  %v5424_v43 = vrot.slane %v216_v28, %v423_v41  ;;  %v5470_v41 = vld [vmem:[%s9683_s1 + $0x1c0] sm:$0xff] }
 0x166   :  { %825 = vmatprep.subr.mxu0 %v10557_v46  ;;  %896 = vmatprep.subr.mxu1 %v10558_v47 }
 0x167   :  { %826 = vmatpush2.msra.mxu0 %v10559_v48  ;;  %897 = vmatpush2.msra.mxu1 %v10560_v53  ;;  %10600 = vst [vmem:[#allocation7_spill] sm:$0xff] %v5424_v43 }
 0x168   :  { %827 = vmatprep.subr.mxu0 %v10561_v56  ;;  %898 = vmatprep.subr.mxu1 %v10562_v60 }
 0x169   :  { %828 = vmatpush2.msra.mxu0 %v10563_v54  ;;  %899 = vmatpush2.msra.mxu1 %v10564_v57 }
 0x16a   :  { %829 = vmatprep.subr.mxu0 %v10565_v52  ;;  %900 = vmatprep.subr.mxu1 %v10566_v58 }
 0x16b   :  { %830 = vmatpush2.msra.mxu0 %v10567_v62  ;;  %901 = vmatpush2.msra.mxu1 %v10568_v63 }
 0x16c   :  { %831 = vmatprep.subr.mxu0 %v10569_v51  ;;  %902 = vmatprep.subr.mxu1 %v10570_v61 }
 0x16d   :  { %832 = vmatpush2.msra.mxu0 %v10571_v50  ;;  %903 = vmatpush2.msra.mxu1 %v10572_v49 }
 0x16e   :  { %833 = vmatprep.subr.mxu0 %v10573_v1  ;;  %904 = vmatprep.subr.mxu1 %v10574_v59 }
 0x16f   :  { %834 = vmatpush2.msra.mxu0 %v10575_v55  ;;  %905 = vmatpush2.msra.mxu1 %v10576_v2  ;;  %v10601_v2 = vld [vmem:[#allocation151_spill] sm:$0xff] }
 0x170   :  { %835 = vmatprep.subr.mxu0 %v10577_v3  ;;  %906 = vmatprep.subr.mxu1 %v10578_v4 }
 0x171   :  { %836 = vmatpush2.msra.mxu0 %v10579_v5  ;;  %907 = vmatpush2.msra.mxu1 %v10580_v6  ;;  %v3162_v5 = vld [vmem:[%s9682_s0 + $0x8] sm:$0xff] }
 0x172   :  { %837 = vmatprep.subr.mxu0 %v10581_v7  ;;  %908 = vmatprep.subr.mxu1 %v10582_v8 }
 0x173   :  { %838 = vmatpush2.msra.mxu0 %v10583_v9  ;;  %909 = vmatpush2.msra.mxu1 %v10584_v10 }
 0x174   :  { %839 = vmatprep.subr.mxu0 %v10585_v11  ;;  %910 = vmatprep.subr.mxu1 %v10586_v12 }
 0x175   :  { %840 = vmatpush2.msra.mxu0 %v10587_v13  ;;  %911 = vmatpush2.msra.mxu1 %v10588_v14 }
 0x176   :  { %841 = vmatprep.subr.mxu0 %v10589_v15  ;;  %912 = vmatprep.subr.mxu1 %v10590_v16 }
 0x177   :  { %842 = vmatpush2.msra.mxu0 %v10591_v17  ;;  %913 = vmatpush2.msra.mxu1 %v10592_v19 }
 0x178   :  { %843 = vmatprep.subr.mxu0 %v10593_v20  ;;  %914 = vmatprep.subr.mxu1 %v10594_v21 }
 0x179   :  { %844 = vmatpush2.msra.mxu0 %v10595_v22  ;;  %915 = vmatpush2.msra.mxu1 %v10596_v23 }
 0x17a   :  { %943 = vmatprep.subr.mxu0 %v5399_v24  ;;  %1014 = vmatprep.subr.mxu1 %v5405_v25 }
 0x1d8   :  { %v495_v33 = vpop.f32.mrf.mxu0  ;;  %v566_v39 = vpop.f32.mrf.mxu1 }
 0x1d9   :  { %v496_v34 = vadd.f32 %v495_v33, %v5413_v30  ;;  %v567_v42 = vadd.f32 %v566_v39, %v5419_v37  ;;  %v5458_v39 = vld [vmem:[%s9683_s1 + $0x1c8] sm:$0xff] }
 0x1da   :  { %v497_v35 = vpop.f32.mrf.mxu0  ;;  %v568_v44 = vpop.f32.mrf.mxu1 }
 0x1db   :  { %v571_v36 = vmul.f32 0.5, %v496_v34  ;;  %v498_v38 = vadd.f32 %v497_v35, %v5416_v32  ;;  %v569_v45 = vadd.f32 %v568_v44, %v5424_v43  ;;  %v5482_v44 = vld [vmem:[%s9683_s1 + $0x1a8] sm:$0xff] }
 0x1dd   :  { %3236 = vtanh.f32 %v571_v36  ;;  %v575_v40 = vmul.f32 0.5, %v498_v38  ;;  %v580_v46 = vmul.f32 0.5, %v569_v45  ;;  %v5446_v38 = vld [vmem:[%s9683_s1 + $0x1e0] sm:$0xff]  ;;  %v5488_v45 = vld [vmem:[%s9683_s1 + $0x1b8] sm:$0xff] }
 0x1df   :  { %3238 = vtanh.f32 %v575_v40  ;;  %v5464_v40 = vld [vmem:[%s9683_s1 + $0x1d8] sm:$0xff] }
 0x1e0   :  { %3240 = vtanh.f32 %v567_v42  ;;  %v5476_v42 = vld [vmem:[%s9683_s1 + $0x1d0] sm:$0xff] }
 0x1e1   :  { %3242 = vtanh.f32 %v580_v46  ;;  %v5494_v46 = vld [vmem:[%s9683_s1 + $0x1a0] sm:$0xff] }
 0x1ea   :  { %v3237_v47 = vpop.eup %3236 }
 0x1eb   :  { %v573_v48 = vmul.f32 0.5, %v3237_v47  ;;  %v5500_v47 = vld [vmem:[%s9683_s1 + $0x1b0] sm:$0xff] }
 0x1ec   :  { %v3239_v53 = vpop.eup %3238 }
 0x1ed   :  { %v574_v56 = vadd.f32 0.5, %v573_v48  ;;  %v577_v60 = vmul.f32 0.5, %v3239_v53  ;;  %v3241_v57 = vpop.eup %3240  ;;  %v5506_v48 = vld [vmem:[%s9683_s1 + $0x188] sm:$0xff]  ;;  %v5512_v53 = vld [vmem:[%s9683_s1 + $0x198] sm:$0xff] }
 0x1ee   :  { %v3243_v61 = vpop.eup %3242 }
 0x1ef   :  { %v578_v54 = vadd.f32 0.5, %v577_v60  ;;  %v585_v58 = vmul.f32 %v3241_v57, %v574_v56  ;;  %v582_v55 = vmul.f32 0.5, %v3243_v61  ;;  %v5518_v56 = vld [vmem:[%s9683_s1 + $0x180] sm:$0xff]  ;;  %v5524_v60 = vld [vmem:[%s9683_s1 + $0x190] sm:$0xff]  ;;  %v5536_v57 = vld [vmem:[%s9683_s1 + $0x178] sm:$0xff] }
 0x1f0   :  { %v5566_v61 = vld [vmem:[%s9683_s1 + $0x140] sm:$0xff] }
 0x1f1   :  { %v584_v52 = vmul.f32 0.0, %v578_v54  ;;  %v583_v7 = vadd.f32 0.5, %v582_v55  ;;  %v5530_v54 = vld [vmem:[%s9683_s1 + $0x168] sm:$0xff]  ;;  %v5596_v55 = vld [vmem:[%s9683_s1 + $0x130] sm:$0xff] }
 0x1f3   :  { %v5427_v62 = vadd.f32 %v585_v58, %v584_v52  ;;  %v5542_v52 = vld [vmem:[%s9683_s1 + $0x160] sm:$0xff]  ;;  %v5548_v58 = vld [vmem:[%s9683_s1 + $0x170] sm:$0xff] }
 0x1f5   :  { %3244 = vtanh.f32 %v5427_v62 }
 0x1f9   :  { %v657_v63 = vpop.f32.mrf.mxu0  ;;  %v728_v51 = vpop.f32.mrf.mxu1 }
 0x1fb   :  { %v659_v50 = vpop.f32.mrf.mxu0  ;;  %v730_v49 = vpop.f32.mrf.mxu1 }
 0x1fc   :  { %v737_v1 = vcombine.low %v657_v63, %v659_v50  ;;  %v738_v59 = vcombine.low %v728_v51, %v730_v49  ;;  %v5554_v63 = vld [vmem:[%s9683_s1 + $0x148] sm:$0xff]  ;;  %v5560_v51 = vld [vmem:[%s9683_s1 + $0x158] sm:$0xff]  ;;  %v5572_v50 = vld [vmem:[%s9683_s1 + $0x150] sm:$0xff] }
 0x1fd   :  { %v5578_v49 = vld [vmem:[%s9683_s1 + $0x128] sm:$0xff] }
 0x1fe   :  { %v745_v3 = vrot.slane %v737_v1, %v10601_v2  ;;  %v752_v4 = vrot.slane %v738_v59, %v10601_v2  ;;  %v5584_v1 = vld [vmem:[%s9683_s1 + $0x138] sm:$0xff]  ;;  %v5590_v59 = vld [vmem:[%s9683_s1 + $0x120] sm:$0xff] }
 0x200   :  { %v753_v6 = vcombine.low %v745_v3, %v752_v4  ;;  %v5602_v3 = vld [vmem:[%s9683_s1 + $0x108] sm:$0xff]  ;;  %v5608_v4 = vld [vmem:[%s9683_s1 + $0x118] sm:$0xff] }
 0x202   :  { %v3245_v8 = vpop.eup %3244  ;;  %v755_v9 = vadd.f32 %v3162_v5, %v753_v6  ;;  %v5614_v5 = vld [vmem:[%s9683_s1 + $0x100] sm:$0xff]  ;;  %v5620_v6 = vld [vmem:[%s9683_s1 + $0x110] sm:$0xff] }
 0x203   :  { %v588_v10 = vmul.f32 %v3245_v8, %v583_v7  ;;  %v5626_v7 = vld [vmem:[%s9683_s1 + $0xe8] sm:$0xff]  ;;  %v5632_v8 = vld [vmem:[%s9683_s1 + $0xf8] sm:$0xff] }
 0x204   :  { %v756_v11 = vmul.f32 0.5, %v755_v9  ;;  %v761_v12 = vrot.slane %v755_v9, 2  ;;  %v767_v14 = vrot.slane %v755_v9, 4  ;;  %v770_v15 = vrot.slane %v755_v9, 6  ;;  %v5638_v9 = vld [vmem:[%s9683_s1 + $0xe0] sm:$0xff] }
 0x205   :  { %845 = vmatprep.mubr.f32.mxu0 %v588_v10  ;;  %916 = vmatprep.mubr.f32.mxu1 %v588_v10  ;;  %v5644_v10 = vld [vmem:[%s9683_s1 + $0xf0] sm:$0xff] }
 0x206   :  { %3246 = vtanh.f32 %v756_v11  ;;  %v763_v13 = vmul.f32 0.5, %v761_v12  ;;  %v772_v16 = vmul.f32 0.5, %v770_v15  ;;  %v5650_v11 = vld [vmem:[%s9683_s1 + $0xc8] sm:$0xff]  ;;  %v5656_v12 = vld [vmem:[%s9683_s1 + $0xd8] sm:$0xff] }
 0x207   :  { %v5674_v15 = vld [vmem:[%s9683_s1 + $0xa8] sm:$0xff] }
 0x208   :  { %3248 = vtanh.f32 %v763_v13  ;;  %v5662_v13 = vld [vmem:[%s9683_s1 + $0xc0] sm:$0xff] }
 0x209   :  { %3250 = vtanh.f32 %v767_v14  ;;  %v5668_v14 = vld [vmem:[%s9683_s1 + $0xd0] sm:$0xff] }
 0x20a   :  { %3252 = vtanh.f32 %v772_v16  ;;  %v5680_v16 = vld [vmem:[%s9683_s1 + $0xb8] sm:$0xff] }
 0x213   :  { %v3247_v17 = vpop.eup %3246 }
 0x214   :  { %v758_v19 = vmul.f32 0.5, %v3247_v17  ;;  %v5686_v17 = vld [vmem:[%s9683_s1 + $0xa0] sm:$0xff] }
 0x215   :  { %v3249_v20 = vpop.eup %3248 }
 0x216   :  { %v759_v21 = vadd.f32 0.5, %v758_v19  ;;  %v765_v22 = vmul.f32 0.5, %v3249_v20  ;;  %v3251_v26 = vpop.eup %3250  ;;  %v5692_v19 = vld [vmem:[%s9683_s1 + $0xb0] sm:$0xff]  ;;  %v5698_v20 = vld [vmem:[%s9683_s1 + $0x88] sm:$0xff] }
 0x217   :  { %v3253_v31 = vpop.eup %3252  ;;  %10602 = vst [vmem:[#allocation8_spill] sm:$0xff] %v5698_v20 }
 0x218   :  { %v766_v23 = vadd.f32 0.5, %v765_v22  ;;  %v777_v28 = vmul.f32 %v3251_v26, %v759_v21  ;;  %v774_v33 = vmul.f32 0.5, %v3253_v31  ;;  %v5704_v21 = vld [vmem:[%s9683_s1 + $0x98] sm:$0xff]  ;;  %v5710_v22 = vld [vmem:[%s9683_s1 + $0x80] sm:$0xff]  ;;  %v5722_v26 = vld [vmem:[%s9683_s1 + $0x68] sm:$0xff] }
 0x219   :  { %10603 = vst [vmem:[#allocation9_spill] sm:$0xff] %v5704_v21  ;;  %10604 = vst [vmem:[#allocation10_spill] sm:$0xff] %v5710_v22  ;;  %v5740_v31 = vld [vmem:[%s9683_s1 + $0x70] sm:$0xff] }
 0x21a   :  { %v776_v27 = vmul.f32 %v766_v23, %v5195_v0  ;;  %v775_v34 = vadd.f32 0.5, %v774_v33  ;;  %v5452_v0 = vld [vmem:[%s9683_s1 + $0x1f0] sm:$0xff]  ;;  %10606 = vst [vmem:[#allocation12_spill] sm:$0xff] %v5722_v26  ;;  %10609 = vst [vmem:[#allocation15_spill] sm:$0xff] %v5740_v31  ;;  %v5746_v33 = vld [vmem:[%s9683_s1 + $0x48] sm:$0xff] }
 0x21b   :  { %v5716_v23 = vld [vmem:[%s9683_s1 + $0x90] sm:$0xff]  ;;  %10610 = vst [vmem:[#allocation16_spill] sm:$0xff] %v5746_v33 }
 0x21c   :  { %v5436_v29 = vadd.f32 %v777_v28, %v776_v27  ;;  %10605 = vst [vmem:[#allocation11_spill] sm:$0xff] %v5716_v23  ;;  %v5728_v27 = vld [vmem:[%s9683_s1 + $0x78] sm:$0xff]  ;;  %v5734_v28 = vld [vmem:[%s9683_s1 + $0x60] sm:$0xff] }
 0x21d   :  { %10607 = vst [vmem:[#allocation13_spill] sm:$0xff] %v5728_v27  ;;  %10608 = vst [vmem:[#allocation14_spill] sm:$0xff] %v5734_v28 }
 0x21e   :  { %3254 = vtanh.f32 %v5436_v29 }
 0x22b   :  { %v3255_v35 = vpop.eup %3254 }
 0x22c   :  { %v5439_v36 = vmul.f32 %v3255_v35, %v775_v34  ;;  %v5752_v34 = vld [vmem:[%s9683_s1 + $0x58] sm:$0xff]  ;;  %v5758_v35 = vld [vmem:[%s9683_s1 + $0x40] sm:$0xff] }
 0x22d   :  { %10611 = vst [vmem:[#allocation17_spill] sm:$0xff] %v5752_v34  ;;  %10612 = vst [vmem:[#allocation18_spill] sm:$0xff] %v5758_v35 }
 0x22e   :  { %846 = vmatmul.mubr.f32.vlgmr.msra.gmra.mxu0 %v5439_v36  ;;  %917 = vmatmul.mubr.f32.vlgmr.msra.gmra.mxu1 %v5439_v36 }
 0x22f   :  { %944 = vmatpush1.msra.mxu0 %v5446_v38  ;;  %1015 = vmatpush1.msra.mxu1 %v5452_v0 }
 0x230   :  { %945 = vmatprep.subr.mxu0 %v5458_v39  ;;  %1016 = vmatprep.subr.mxu1 %v5464_v40 }
 0x231   :  { %946 = vmatpush1.msra.mxu0 %v5470_v41  ;;  %1017 = vmatpush1.msra.mxu1 %v5476_v42 }
 0x232   :  { %947 = vmatprep.subr.mxu0 %v5482_v44  ;;  %1018 = vmatprep.subr.mxu1 %v5488_v45 }
 0x233   :  { %948 = vmatpush1.msra.mxu0 %v5494_v46  ;;  %1019 = vmatpush1.msra.mxu1 %v5500_v47 }
 0x234   :  { %949 = vmatprep.subr.mxu0 %v5506_v48  ;;  %1020 = vmatprep.subr.mxu1 %v5512_v53 }
 0x235   :  { %950 = vmatpush1.msra.mxu0 %v5518_v56  ;;  %1021 = vmatpush1.msra.mxu1 %v5524_v60 }
 0x236   :  { %951 = vmatprep.subr.mxu0 %v5530_v54  ;;  %1022 = vmatprep.subr.mxu1 %v5536_v57 }
 0x237   :  { %952 = vmatpush1.msra.mxu0 %v5542_v52  ;;  %1023 = vmatpush1.msra.mxu1 %v5548_v58 }
 0x238   :  { %953 = vmatprep.subr.mxu0 %v5554_v63  ;;  %1024 = vmatprep.subr.mxu1 %v5560_v51 }
 0x239   :  { %954 = vmatpush1.msra.mxu0 %v5566_v61  ;;  %1025 = vmatpush1.msra.mxu1 %v5572_v50 }
 0x23a   :  { %955 = vmatprep.subr.mxu0 %v5578_v49  ;;  %1026 = vmatprep.subr.mxu1 %v5584_v1 }
 0x23b   :  { %956 = vmatpush1.msra.mxu0 %v5590_v59  ;;  %1027 = vmatpush1.msra.mxu1 %v5596_v55 }
 0x23c   :  { %957 = vmatprep.subr.mxu0 %v5602_v3  ;;  %1028 = vmatprep.subr.mxu1 %v5608_v4 }
 0x23d   :  { %958 = vmatpush1.msra.mxu0 %v5614_v5  ;;  %1029 = vmatpush1.msra.mxu1 %v5620_v6 }
 0x23e   :  { %959 = vmatprep.subr.mxu0 %v5626_v7  ;;  %1030 = vmatprep.subr.mxu1 %v5632_v8 }
 0x23f   :  { %960 = vmatpush1.msra.mxu0 %v5638_v9  ;;  %1031 = vmatpush1.msra.mxu1 %v5644_v10 }
 0x240   :  { %961 = vmatprep.subr.mxu0 %v5650_v11  ;;  %1032 = vmatprep.subr.mxu1 %v5656_v12 }
 0x241   :  { %962 = vmatpush1.msra.mxu0 %v5662_v13  ;;  %1033 = vmatpush1.msra.mxu1 %v5668_v14 }
 0x242   :  { %963 = vmatprep.subr.mxu0 %v5674_v15  ;;  %1034 = vmatprep.subr.mxu1 %v5680_v16 }
 0x243   :  { %964 = vmatpush1.msra.mxu0 %v5686_v17  ;;  %1035 = vmatpush1.msra.mxu1 %v5692_v19 }
 0x244   :  { %965 = vmatprep.subr.mxu0 %v5698_v20  ;;  %1036 = vmatprep.subr.mxu1 %v5704_v21 }
 0x245   :  { %966 = vmatpush1.msra.mxu0 %v5710_v22  ;;  %1037 = vmatpush1.msra.mxu1 %v5716_v23 }
 0x246   :  { %967 = vmatprep.subr.mxu0 %v5722_v26  ;;  %1038 = vmatprep.subr.mxu1 %v5728_v27 }
 0x247   :  { %968 = vmatpush1.msra.mxu0 %v5734_v28  ;;  %1039 = vmatpush1.msra.mxu1 %v5740_v31  ;;  %v5764_v31 = vld [vmem:[%s9683_s1 + $0x50] sm:$0xff] }
 0x248   :  { %969 = vmatprep.subr.mxu0 %v5746_v33  ;;  %1040 = vmatprep.subr.mxu1 %v5752_v34  ;;  %10613 = vst [vmem:[#allocation19_spill] sm:$0xff] %v5764_v31  ;;  %v5770_v33 = vld [vmem:[%s9683_s1 + $0x28] sm:$0xff]  ;;  %v5776_v34 = vld [vmem:[%s9683_s1 + $0x38] sm:$0xff] }
 0x249   :  { %970 = vmatpush1.msra.mxu0 %v5758_v35  ;;  %1041 = vmatpush1.msra.mxu1 %v5764_v31  ;;  %10614 = vst [vmem:[#allocation20_spill] sm:$0xff] %v5770_v33  ;;  %10615 = vst [vmem:[#allocation21_spill] sm:$0xff] %v5776_v34  ;;  %v5782_v35 = vld [vmem:[%s9683_s1 + $0x20] sm:$0xff]  ;;  %v5788_v31 = vld [vmem:[%s9683_s1 + $0x30] sm:$0xff] }
 0x24a   :  { %971 = vmatprep.subr.mxu0 %v5770_v33  ;;  %1042 = vmatprep.subr.mxu1 %v5776_v34  ;;  %10616 = vst [vmem:[#allocation22_spill] sm:$0xff] %v5782_v35  ;;  %10617 = vst [vmem:[#allocation23_spill] sm:$0xff] %v5788_v31  ;;  %v5794_v33 = vld [vmem:[%s9683_s1 + $0x8] sm:$0xff]  ;;  %v5800_v34 = vld [vmem:[%s9683_s1 + $0x18] sm:$0xff] }
 0x24b   :  { %972 = vmatpush1.msra.mxu0 %v5782_v35  ;;  %1043 = vmatpush1.msra.mxu1 %v5788_v31  ;;  %10618 = vst [vmem:[#allocation24_spill] sm:$0xff] %v5794_v33  ;;  %10619 = vst [vmem:[#allocation25_spill] sm:$0xff] %v5800_v34  ;;  %v5806_v35 = vld [vmem:[%s9683_s1] sm:$0xff] }
 0x24c   :  { %973 = vmatprep.subr.mxu0 %v5794_v33  ;;  %1044 = vmatprep.subr.mxu1 %v5800_v34  ;;  %10620 = vst [vmem:[#allocation26_spill] sm:$0xff] %v5806_v35  ;;  %v5813_v33 = vld [vmem:[%s9683_s1 + $0x10] sm:$0xff]  ;;  %v5822_v34 = vld [vmem:[%s9684_s2 + $0x1e8] sm:$0xff] }
 0x24d   :  { %974 = vmatpush1.msra.mxu0 %v5806_v35  ;;  %1007 = vmatprep.mubr.f32.mxu0 %v10467_v18  ;;  %10621 = vst [vmem:[#allocation27_spill] sm:$0xff] %v5813_v33  ;;  %10622 = vst [vmem:[#allocation28_spill] sm:$0xff] %v5822_v34  ;;  %v5828_v35 = vld [vmem:[%s9684_s2 + $0x1f8] sm:$0xff] }
 0x24e   :  { %1045 = vmatpush1.msra.mxu1 %v5813_v33  ;;  %1078 = vmatprep.mubr.f32.mxu1 %v10467_v18  ;;  %10623 = vst [vmem:[#allocation29_spill] sm:$0xff] %v5828_v35  ;;  %v5834_v33 = vld [vmem:[%s9684_s2 + $0x1e0] sm:$0xff] }
 0x24f   :  { %1008 = vmatmul.mubr.f32.vlgmr.msra.gmra.mxu0 %v5439_v36  ;;  %1079 = vmatmul.mubr.f32.vlgmr.msra.gmra.mxu1 %v5439_v36  ;;  %10624 = vst [vmem:[#allocation30_spill] sm:$0xff] %v5834_v33  ;;  %v5840_v36 = vld [vmem:[%s9684_s2 + $0x1f0] sm:$0xff] }
 0x250   :  { %1133 = vmatprep.subr.mxu0 %v5822_v34  ;;  %1204 = vmatprep.subr.mxu1 %v5828_v35  ;;  %10625 = vst [vmem:[#allocation31_spill] sm:$0xff] %v5840_v36  ;;  %v5846_v34 = vld [vmem:[%s9684_s2 + $0x1c8] sm:$0xff]  ;;  %v5852_v35 = vld [vmem:[%s9684_s2 + $0x1d8] sm:$0xff] }
 0x251   :  { %1134 = vmatpush1.msra.mxu0 %v5834_v33  ;;  %1205 = vmatpush1.msra.mxu1 %v5840_v36  ;;  %10626 = vst [vmem:[#allocation32_spill] sm:$0xff] %v5846_v34  ;;  %10627 = vst [vmem:[#allocation33_spill] sm:$0xff] %v5852_v35  ;;  %v5858_v33 = vld [vmem:[%s9684_s2 + $0x1c0] sm:$0xff]  ;;  %v5864_v36 = vld [vmem:[%s9684_s2 + $0x1d0] sm:$0xff] }
 0x252   :  { %1135 = vmatprep.subr.mxu0 %v5846_v34  ;;  %1206 = vmatprep.subr.mxu1 %v5852_v35  ;;  %10628 = vst [vmem:[#allocation34_spill] sm:$0xff] %v5858_v33  ;;  %10629 = vst [vmem:[#allocation35_spill] sm:$0xff] %v5864_v36  ;;  %v5870_v34 = vld [vmem:[%s9684_s2 + $0x1a8] sm:$0xff]  ;;  %v5876_v35 = vld [vmem:[%s9684_s2 + $0x1b8] sm:$0xff] }
 0x253   :  { %1136 = vmatpush1.msra.mxu0 %v5858_v33  ;;  %1207 = vmatpush1.msra.mxu1 %v5864_v36  ;;  %10630 = vst [vmem:[#allocation36_spill] sm:$0xff] %v5870_v34  ;;  %10631 = vst [vmem:[#allocation37_spill] sm:$0xff] %v5876_v35  ;;  %v5882_v33 = vld [vmem:[%s9684_s2 + $0x1a0] sm:$0xff]  ;;  %v5888_v36 = vld [vmem:[%s9684_s2 + $0x1b0] sm:$0xff] }
 0x254   :  { %1137 = vmatprep.subr.mxu0 %v5870_v34  ;;  %1208 = vmatprep.subr.mxu1 %v5876_v35  ;;  %10632 = vst [vmem:[#allocation38_spill] sm:$0xff] %v5882_v33  ;;  %10633 = vst [vmem:[#allocation39_spill] sm:$0xff] %v5888_v36  ;;  %v5894_v34 = vld [vmem:[%s9684_s2 + $0x188] sm:$0xff]  ;;  %v5900_v35 = vld [vmem:[%s9684_s2 + $0x198] sm:$0xff] }
 0x255   :  { %1138 = vmatpush1.msra.mxu0 %v5882_v33  ;;  %1209 = vmatpush1.msra.mxu1 %v5888_v36  ;;  %10634 = vst [vmem:[#allocation40_spill] sm:$0xff] %v5894_v34  ;;  %10635 = vst [vmem:[#allocation41_spill] sm:$0xff] %v5900_v35  ;;  %v5906_v33 = vld [vmem:[%s9684_s2 + $0x180] sm:$0xff]  ;;  %v5912_v36 = vld [vmem:[%s9684_s2 + $0x190] sm:$0xff] }
 0x256   :  { %1139 = vmatprep.subr.mxu0 %v5894_v34  ;;  %1210 = vmatprep.subr.mxu1 %v5900_v35  ;;  %10636 = vst [vmem:[#allocation42_spill] sm:$0xff] %v5906_v33  ;;  %10637 = vst [vmem:[#allocation43_spill] sm:$0xff] %v5912_v36  ;;  %v5918_v34 = vld [vmem:[%s9684_s2 + $0x168] sm:$0xff]  ;;  %v5924_v35 = vld [vmem:[%s9684_s2 + $0x178] sm:$0xff] }
 0x257   :  { %1140 = vmatpush1.msra.mxu0 %v5906_v33  ;;  %1211 = vmatpush1.msra.mxu1 %v5912_v36  ;;  %10638 = vst [vmem:[#allocation44_spill] sm:$0xff] %v5918_v34  ;;  %10639 = vst [vmem:[#allocation45_spill] sm:$0xff] %v5924_v35  ;;  %v5930_v33 = vld [vmem:[%s9684_s2 + $0x160] sm:$0xff]  ;;  %v5936_v36 = vld [vmem:[%s9684_s2 + $0x170] sm:$0xff] }
 0x258   :  { %1141 = vmatprep.subr.mxu0 %v5918_v34  ;;  %1212 = vmatprep.subr.mxu1 %v5924_v35  ;;  %10640 = vst [vmem:[#allocation46_spill] sm:$0xff] %v5930_v33  ;;  %10641 = vst [vmem:[#allocation47_spill] sm:$0xff] %v5936_v36  ;;  %v5942_v34 = vld [vmem:[%s9684_s2 + $0x148] sm:$0xff]  ;;  %v5948_v35 = vld [vmem:[%s9684_s2 + $0x158] sm:$0xff] }
 0x259   :  { %1142 = vmatpush1.msra.mxu0 %v5930_v33  ;;  %1213 = vmatpush1.msra.mxu1 %v5936_v36  ;;  %10642 = vst [vmem:[#allocation48_spill] sm:$0xff] %v5942_v34  ;;  %10643 = vst [vmem:[#allocation49_spill] sm:$0xff] %v5948_v35  ;;  %v5954_v33 = vld [vmem:[%s9684_s2 + $0x140] sm:$0xff]  ;;  %v5960_v36 = vld [vmem:[%s9684_s2 + $0x150] sm:$0xff] }
 0x25a   :  { %1143 = vmatprep.subr.mxu0 %v5942_v34  ;;  %1214 = vmatprep.subr.mxu1 %v5948_v35  ;;  %10644 = vst [vmem:[#allocation50_spill] sm:$0xff] %v5954_v33  ;;  %10645 = vst [vmem:[#allocation51_spill] sm:$0xff] %v5960_v36  ;;  %v5966_v34 = vld [vmem:[%s9684_s2 + $0x128] sm:$0xff]  ;;  %v5972_v35 = vld [vmem:[%s9684_s2 + $0x138] sm:$0xff] }
 0x25b   :  { %1144 = vmatpush1.msra.mxu0 %v5954_v33  ;;  %1215 = vmatpush1.msra.mxu1 %v5960_v36  ;;  %10646 = vst [vmem:[#allocation52_spill] sm:$0xff] %v5966_v34  ;;  %10647 = vst [vmem:[#allocation53_spill] sm:$0xff] %v5972_v35  ;;  %v5978_v33 = vld [vmem:[%s9684_s2 + $0x120] sm:$0xff]  ;;  %v5984_v36 = vld [vmem:[%s9684_s2 + $0x130] sm:$0xff] }
 0x25c   :  { %1145 = vmatprep.subr.mxu0 %v5966_v34  ;;  %1216 = vmatprep.subr.mxu1 %v5972_v35  ;;  %10648 = vst [vmem:[#allocation54_spill] sm:$0xff] %v5978_v33  ;;  %10649 = vst [vmem:[#allocation55_spill] sm:$0xff] %v5984_v36  ;;  %v5990_v34 = vld [vmem:[%s9684_s2 + $0x108] sm:$0xff]  ;;  %v5996_v35 = vld [vmem:[%s9684_s2 + $0x118] sm:$0xff] }
 0x25d   :  { %1146 = vmatpush1.msra.mxu0 %v5978_v33  ;;  %1217 = vmatpush1.msra.mxu1 %v5984_v36  ;;  %10650 = vst [vmem:[#allocation56_spill] sm:$0xff] %v5990_v34  ;;  %10651 = vst [vmem:[#allocation57_spill] sm:$0xff] %v5996_v35  ;;  %v6002_v33 = vld [vmem:[%s9684_s2 + $0x100] sm:$0xff]  ;;  %v6008_v36 = vld [vmem:[%s9684_s2 + $0x110] sm:$0xff] }
 0x25e   :  { %1147 = vmatprep.subr.mxu0 %v5990_v34  ;;  %1218 = vmatprep.subr.mxu1 %v5996_v35  ;;  %10652 = vst [vmem:[#allocation58_spill] sm:$0xff] %v6002_v33  ;;  %10653 = vst [vmem:[#allocation59_spill] sm:$0xff] %v6008_v36  ;;  %v6014_v34 = vld [vmem:[%s9684_s2 + $0xe8] sm:$0xff]  ;;  %v6020_v35 = vld [vmem:[%s9684_s2 + $0xf8] sm:$0xff] }
 0x25f   :  { %1148 = vmatpush1.msra.mxu0 %v6002_v33  ;;  %1219 = vmatpush1.msra.mxu1 %v6008_v36  ;;  %10654 = vst [vmem:[#allocation60_spill] sm:$0xff] %v6014_v34  ;;  %10655 = vst [vmem:[#allocation61_spill] sm:$0xff] %v6020_v35  ;;  %v6026_v33 = vld [vmem:[%s9684_s2 + $0xe0] sm:$0xff]  ;;  %v6032_v36 = vld [vmem:[%s9684_s2 + $0xf0] sm:$0xff] }
 0x260   :  { %1149 = vmatprep.subr.mxu0 %v6014_v34  ;;  %1220 = vmatprep.subr.mxu1 %v6020_v35  ;;  %10656 = vst [vmem:[#allocation62_spill] sm:$0xff] %v6026_v33  ;;  %10657 = vst [vmem:[#allocation63_spill] sm:$0xff] %v6032_v36  ;;  %v6038_v34 = vld [vmem:[%s9684_s2 + $0xc8] sm:$0xff]  ;;  %v6044_v35 = vld [vmem:[%s9684_s2 + $0xd8] sm:$0xff] }
 0x261   :  { %1150 = vmatpush1.msra.mxu0 %v6026_v33  ;;  %1221 = vmatpush1.msra.mxu1 %v6032_v36  ;;  %10658 = vst [vmem:[#allocation64_spill] sm:$0xff] %v6038_v34  ;;  %10659 = vst [vmem:[#allocation65_spill] sm:$0xff] %v6044_v35  ;;  %v6050_v33 = vld [vmem:[%s9684_s2 + $0xc0] sm:$0xff]  ;;  %v6056_v36 = vld [vmem:[%s9684_s2 + $0xd0] sm:$0xff] }
 0x262   :  { %1151 = vmatprep.subr.mxu0 %v6038_v34  ;;  %1222 = vmatprep.subr.mxu1 %v6044_v35  ;;  %10660 = vst [vmem:[#allocation66_spill] sm:$0xff] %v6050_v33  ;;  %10661 = vst [vmem:[#allocation67_spill] sm:$0xff] %v6056_v36  ;;  %v6062_v34 = vld [vmem:[%s9684_s2 + $0xa8] sm:$0xff]  ;;  %v6068_v35 = vld [vmem:[%s9684_s2 + $0xb8] sm:$0xff] }
 0x263   :  { %1152 = vmatpush1.msra.mxu0 %v6050_v33  ;;  %1223 = vmatpush1.msra.mxu1 %v6056_v36  ;;  %10662 = vst [vmem:[#allocation68_spill] sm:$0xff] %v6062_v34  ;;  %10663 = vst [vmem:[#allocation69_spill] sm:$0xff] %v6068_v35  ;;  %v6074_v33 = vld [vmem:[%s9684_s2 + $0xa0] sm:$0xff]  ;;  %v6080_v36 = vld [vmem:[%s9684_s2 + $0xb0] sm:$0xff] }
 0x264   :  { %1153 = vmatprep.subr.mxu0 %v6062_v34  ;;  %1224 = vmatprep.subr.mxu1 %v6068_v35  ;;  %10664 = vst [vmem:[#allocation70_spill] sm:$0xff] %v6074_v33  ;;  %10665 = vst [vmem:[#allocation71_spill] sm:$0xff] %v6080_v36  ;;  %v6086_v34 = vld [vmem:[%s9684_s2 + $0x88] sm:$0xff]  ;;  %v6092_v35 = vld [vmem:[%s9684_s2 + $0x98] sm:$0xff] }
 0x265   :  { %1154 = vmatpush1.msra.mxu0 %v6074_v33  ;;  %1225 = vmatpush1.msra.mxu1 %v6080_v36  ;;  %10666 = vst [vmem:[#allocation72_spill] sm:$0xff] %v6086_v34  ;;  %10667 = vst [vmem:[#allocation73_spill] sm:$0xff] %v6092_v35  ;;  %v6098_v33 = vld [vmem:[%s9684_s2 + $0x80] sm:$0xff]  ;;  %v6104_v36 = vld [vmem:[%s9684_s2 + $0x90] sm:$0xff] }
 0x266   :  { %1155 = vmatprep.subr.mxu0 %v6086_v34  ;;  %1226 = vmatprep.subr.mxu1 %v6092_v35  ;;  %10668 = vst [vmem:[#allocation74_spill] sm:$0xff] %v6098_v33  ;;  %10669 = vst [vmem:[#allocation75_spill] sm:$0xff] %v6104_v36  ;;  %v6110_v34 = vld [vmem:[%s9684_s2 + $0x68] sm:$0xff]  ;;  %v6116_v35 = vld [vmem:[%s9684_s2 + $0x78] sm:$0xff] }
 0x267   :  { %1156 = vmatpush1.msra.mxu0 %v6098_v33  ;;  %1227 = vmatpush1.msra.mxu1 %v6104_v36  ;;  %10670 = vst [vmem:[#allocation76_spill] sm:$0xff] %v6110_v34  ;;  %10671 = vst [vmem:[#allocation77_spill] sm:$0xff] %v6116_v35  ;;  %v6122_v33 = vld [vmem:[%s9684_s2 + $0x60] sm:$0xff]  ;;  %v6128_v36 = vld [vmem:[%s9684_s2 + $0x70] sm:$0xff] }
 0x268   :  { %1157 = vmatprep.subr.mxu0 %v6110_v34  ;;  %1228 = vmatprep.subr.mxu1 %v6116_v35  ;;  %10672 = vst [vmem:[#allocation78_spill] sm:$0xff] %v6122_v33  ;;  %10673 = vst [vmem:[#allocation79_spill] sm:$0xff] %v6128_v36  ;;  %v6134_v34 = vld [vmem:[%s9684_s2 + $0x48] sm:$0xff]  ;;  %v6140_v35 = vld [vmem:[%s9684_s2 + $0x58] sm:$0xff] }
 0x269   :  { %1158 = vmatpush1.msra.mxu0 %v6122_v33  ;;  %1229 = vmatpush1.msra.mxu1 %v6128_v36  ;;  %10674 = vst [vmem:[#allocation80_spill] sm:$0xff] %v6134_v34  ;;  %10675 = vst [vmem:[#allocation81_spill] sm:$0xff] %v6140_v35  ;;  %v6146_v33 = vld [vmem:[%s9684_s2 + $0x40] sm:$0xff]  ;;  %v6152_v36 = vld [vmem:[%s9684_s2 + $0x50] sm:$0xff] }
 0x26a   :  { %1159 = vmatprep.subr.mxu0 %v6134_v34  ;;  %1230 = vmatprep.subr.mxu1 %v6140_v35  ;;  %10676 = vst [vmem:[#allocation82_spill] sm:$0xff] %v6146_v33  ;;  %10677 = vst [vmem:[#allocation83_spill] sm:$0xff] %v6152_v36  ;;  %v6158_v34 = vld [vmem:[%s9684_s2 + $0x28] sm:$0xff]  ;;  %v6164_v35 = vld [vmem:[%s9684_s2 + $0x38] sm:$0xff] }
 0x26b   :  { %1160 = vmatpush1.msra.mxu0 %v6146_v33  ;;  %1231 = vmatpush1.msra.mxu1 %v6152_v36  ;;  %10678 = vst [vmem:[#allocation84_spill] sm:$0xff] %v6158_v34  ;;  %10679 = vst [vmem:[#allocation85_spill] sm:$0xff] %v6164_v35  ;;  %v6170_v33 = vld [vmem:[%s9684_s2 + $0x20] sm:$0xff]  ;;  %v6176_v36 = vld [vmem:[%s9684_s2 + $0x30] sm:$0xff] }
 0x26c   :  { %1161 = vmatprep.subr.mxu0 %v6158_v34  ;;  %1232 = vmatprep.subr.mxu1 %v6164_v35  ;;  %10680 = vst [vmem:[#allocation86_spill] sm:$0xff] %v6170_v33  ;;  %10681 = vst [vmem:[#allocation87_spill] sm:$0xff] %v6176_v36  ;;  %v6182_v34 = vld [vmem:[%s9684_s2 + $0x8] sm:$0xff]  ;;  %v6188_v35 = vld [vmem:[%s9684_s2 + $0x18] sm:$0xff] }
 0x26d   :  { %1162 = vmatpush1.msra.mxu0 %v6170_v33  ;;  %1233 = vmatpush1.msra.mxu1 %v6176_v36  ;;  %10682 = vst [vmem:[#allocation88_spill] sm:$0xff] %v6182_v34  ;;  %10683 = vst [vmem:[#allocation89_spill] sm:$0xff] %v6188_v35  ;;  %v6194_v33 = vld [vmem:[%s9684_s2] sm:$0xff]  ;;  %v6200_v36 = vld [vmem:[%s9684_s2 + $0x10] sm:$0xff] }
 0x26e   :  { %1163 = vmatprep.subr.mxu0 %v6182_v34  ;;  %1234 = vmatprep.subr.mxu1 %v6188_v35  ;;  %10684 = vst [vmem:[#allocation90_spill] sm:$0xff] %v6194_v33  ;;  %10685 = vst [vmem:[#allocation91_spill] sm:$0xff] %v6200_v36  ;;  %v6206_v34 = vld [vmem:[%s9684_s2 + $0x3e8] sm:$0xff]  ;;  %v6212_v35 = vld [vmem:[%s9684_s2 + $0x3f8] sm:$0xff] }
 0x26f   :  { %1164 = vmatpush1.msra.mxu0 %v6194_v33  ;;  %1235 = vmatpush1.msra.mxu1 %v6200_v36  ;;  %10686 = vst [vmem:[#allocation92_spill] sm:$0xff] %v6206_v34  ;;  %10687 = vst [vmem:[#allocation93_spill] sm:$0xff] %v6212_v35  ;;  %v6218_v33 = vld [vmem:[%s9684_s2 + $0x3e0] sm:$0xff]  ;;  %v6224_v36 = vld [vmem:[%s9684_s2 + $0x3f0] sm:$0xff] }
 0x270   :  { %1165 = vmatprep.subr.mxu0 %v6206_v34  ;;  %1236 = vmatprep.subr.mxu1 %v6212_v35  ;;  %10688 = vst [vmem:[#allocation94_spill] sm:$0xff] %v6218_v33  ;;  %10689 = vst [vmem:[#allocation95_spill] sm:$0xff] %v6224_v36  ;;  %v6230_v34 = vld [vmem:[%s9684_s2 + $0x3c8] sm:$0xff]  ;;  %v6236_v35 = vld [vmem:[%s9684_s2 + $0x3d8] sm:$0xff] }
 0x271   :  { %1166 = vmatpush2.msra.mxu0 %v6218_v33  ;;  %1237 = vmatpush2.msra.mxu1 %v6224_v36  ;;  %10690 = vst [vmem:[#allocation96_spill] sm:$0xff] %v6230_v34  ;;  %10691 = vst [vmem:[#allocation97_spill] sm:$0xff] %v6236_v35  ;;  %v6242_v33 = vld [vmem:[%s9684_s2 + $0x3c0] sm:$0xff]  ;;  %v6248_v36 = vld [vmem:[%s9684_s2 + $0x3d0] sm:$0xff] }
 0x272   :  { %1167 = vmatprep.subr.mxu0 %v6230_v34  ;;  %1238 = vmatprep.subr.mxu1 %v6236_v35  ;;  %10692 = vst [vmem:[#allocation98_spill] sm:$0xff] %v6242_v33  ;;  %10693 = vst [vmem:[#allocation99_spill] sm:$0xff] %v6248_v36  ;;  %v6254_v34 = vld [vmem:[%s9684_s2 + $0x3a8] sm:$0xff]  ;;  %v6260_v35 = vld [vmem:[%s9684_s2 + $0x3b8] sm:$0xff] }
 0x273   :  { %1168 = vmatpush2.msra.mxu0 %v6242_v33  ;;  %1239 = vmatpush2.msra.mxu1 %v6248_v36  ;;  %10694 = vst [vmem:[#allocation100_spill] sm:$0xff] %v6254_v34  ;;  %10695 = vst [vmem:[#allocation101_spill] sm:$0xff] %v6260_v35  ;;  %v6266_v33 = vld [vmem:[%s9684_s2 + $0x3a0] sm:$0xff]  ;;  %v6272_v36 = vld [vmem:[%s9684_s2 + $0x3b0] sm:$0xff] }
 0x274   :  { %1169 = vmatprep.subr.mxu0 %v6254_v34  ;;  %1240 = vmatprep.subr.mxu1 %v6260_v35  ;;  %10696 = vst [vmem:[#allocation102_spill] sm:$0xff] %v6266_v33  ;;  %10697 = vst [vmem:[#allocation103_spill] sm:$0xff] %v6272_v36  ;;  %v6278_v34 = vld [vmem:[%s9684_s2 + $0x388] sm:$0xff]  ;;  %v6284_v35 = vld [vmem:[%s9684_s2 + $0x398] sm:$0xff] }
 0x275   :  { %1170 = vmatpush2.msra.mxu0 %v6266_v33  ;;  %1241 = vmatpush2.msra.mxu1 %v6272_v36  ;;  %10698 = vst [vmem:[#allocation104_spill] sm:$0xff] %v6278_v34  ;;  %10699 = vst [vmem:[#allocation105_spill] sm:$0xff] %v6284_v35  ;;  %v6290_v33 = vld [vmem:[%s9684_s2 + $0x380] sm:$0xff]  ;;  %v6296_v36 = vld [vmem:[%s9684_s2 + $0x390] sm:$0xff] }
 0x276   :  { %1171 = vmatprep.subr.mxu0 %v6278_v34  ;;  %1242 = vmatprep.subr.mxu1 %v6284_v35  ;;  %10700 = vst [vmem:[#allocation106_spill] sm:$0xff] %v6290_v33  ;;  %10701 = vst [vmem:[#allocation107_spill] sm:$0xff] %v6296_v36  ;;  %v6302_v34 = vld [vmem:[%s9684_s2 + $0x368] sm:$0xff]  ;;  %v6308_v35 = vld [vmem:[%s9684_s2 + $0x378] sm:$0xff] }
 0x277   :  { %1172 = vmatpush2.msra.mxu0 %v6290_v33  ;;  %1243 = vmatpush2.msra.mxu1 %v6296_v36  ;;  %10702 = vst [vmem:[#allocation108_spill] sm:$0xff] %v6302_v34  ;;  %10703 = vst [vmem:[#allocation109_spill] sm:$0xff] %v6308_v35  ;;  %v6314_v33 = vld [vmem:[%s9684_s2 + $0x360] sm:$0xff]  ;;  %v6320_v36 = vld [vmem:[%s9684_s2 + $0x370] sm:$0xff] }
 0x278   :  { %1173 = vmatprep.subr.mxu0 %v6302_v34  ;;  %1244 = vmatprep.subr.mxu1 %v6308_v35  ;;  %10704 = vst [vmem:[#allocation110_spill] sm:$0xff] %v6314_v33  ;;  %10705 = vst [vmem:[#allocation111_spill] sm:$0xff] %v6320_v36  ;;  %v6326_v34 = vld [vmem:[%s9684_s2 + $0x348] sm:$0xff]  ;;  %v6332_v35 = vld [vmem:[%s9684_s2 + $0x358] sm:$0xff] }
 0x279   :  { %1174 = vmatpush2.msra.mxu0 %v6314_v33  ;;  %1245 = vmatpush2.msra.mxu1 %v6320_v36  ;;  %10706 = vst [vmem:[#allocation112_spill] sm:$0xff] %v6326_v34  ;;  %10707 = vst [vmem:[#allocation113_spill] sm:$0xff] %v6332_v35  ;;  %v6338_v33 = vld [vmem:[%s9684_s2 + $0x340] sm:$0xff]  ;;  %v6344_v36 = vld [vmem:[%s9684_s2 + $0x350] sm:$0xff] }
 0x27a   :  { %1175 = vmatprep.subr.mxu0 %v6326_v34  ;;  %1246 = vmatprep.subr.mxu1 %v6332_v35  ;;  %10708 = vst [vmem:[#allocation114_spill] sm:$0xff] %v6338_v33  ;;  %10709 = vst [vmem:[#allocation115_spill] sm:$0xff] %v6344_v36  ;;  %v6350_v34 = vld [vmem:[%s9684_s2 + $0x328] sm:$0xff]  ;;  %v6356_v35 = vld [vmem:[%s9684_s2 + $0x338] sm:$0xff] }
 0x27b   :  { %1176 = vmatpush2.msra.mxu0 %v6338_v33  ;;  %1247 = vmatpush2.msra.mxu1 %v6344_v36  ;;  %10710 = vst [vmem:[#allocation116_spill] sm:$0xff] %v6350_v34  ;;  %10711 = vst [vmem:[#allocation117_spill] sm:$0xff] %v6356_v35  ;;  %v6362_v33 = vld [vmem:[%s9684_s2 + $0x320] sm:$0xff]  ;;  %v6368_v36 = vld [vmem:[%s9684_s2 + $0x330] sm:$0xff] }
 0x27c   :  { %1177 = vmatprep.subr.mxu0 %v6350_v34  ;;  %1248 = vmatprep.subr.mxu1 %v6356_v35  ;;  %10712 = vst [vmem:[#allocation118_spill] sm:$0xff] %v6362_v33  ;;  %10713 = vst [vmem:[#allocation119_spill] sm:$0xff] %v6368_v36  ;;  %v6374_v34 = vld [vmem:[%s9684_s2 + $0x308] sm:$0xff]  ;;  %v6380_v35 = vld [vmem:[%s9684_s2 + $0x318] sm:$0xff] }
 0x27d   :  { %1178 = vmatpush2.msra.mxu0 %v6362_v33  ;;  %1249 = vmatpush2.msra.mxu1 %v6368_v36  ;;  %10714 = vst [vmem:[#allocation120_spill] sm:$0xff] %v6374_v34  ;;  %10715 = vst [vmem:[#allocation121_spill] sm:$0xff] %v6380_v35  ;;  %v6386_v33 = vld [vmem:[%s9684_s2 + $0x300] sm:$0xff]  ;;  %v6392_v36 = vld [vmem:[%s9684_s2 + $0x310] sm:$0xff] }
 0x27e   :  { %1179 = vmatprep.subr.mxu0 %v6374_v34  ;;  %1250 = vmatprep.subr.mxu1 %v6380_v35  ;;  %10716 = vst [vmem:[#allocation122_spill] sm:$0xff] %v6386_v33  ;;  %10717 = vst [vmem:[#allocation123_spill] sm:$0xff] %v6392_v36  ;;  %v6398_v34 = vld [vmem:[%s9684_s2 + $0x2e8] sm:$0xff]  ;;  %v6404_v35 = vld [vmem:[%s9684_s2 + $0x2f8] sm:$0xff] }
 0x27f   :  { %1180 = vmatpush2.msra.mxu0 %v6386_v33  ;;  %1251 = vmatpush2.msra.mxu1 %v6392_v36  ;;  %10718 = vst [vmem:[#allocation124_spill] sm:$0xff] %v6398_v34  ;;  %10719 = vst [vmem:[#allocation125_spill] sm:$0xff] %v6404_v35  ;;  %v6410_v33 = vld [vmem:[%s9684_s2 + $0x2e0] sm:$0xff]  ;;  %v6416_v36 = vld [vmem:[%s9684_s2 + $0x2f0] sm:$0xff] }
 0x280   :  { %1181 = vmatprep.subr.mxu0 %v6398_v34  ;;  %1252 = vmatprep.subr.mxu1 %v6404_v35  ;;  %10720 = vst [vmem:[#allocation126_spill] sm:$0xff] %v6410_v33  ;;  %10721 = vst [vmem:[#allocation127_spill] sm:$0xff] %v6416_v36  ;;  %v6422_v34 = vld [vmem:[%s9684_s2 + $0x2c8] sm:$0xff]  ;;  %v6428_v35 = vld [vmem:[%s9684_s2 + $0x2d8] sm:$0xff] }
 0x281   :  { %1182 = vmatpush2.msra.mxu0 %v6410_v33  ;;  %1253 = vmatpush2.msra.mxu1 %v6416_v36  ;;  %10722 = vst [vmem:[#allocation128_spill] sm:$0xff] %v6422_v34  ;;  %10723 = vst [vmem:[#allocation129_spill] sm:$0xff] %v6428_v35  ;;  %v6434_v33 = vld [vmem:[%s9684_s2 + $0x2c0] sm:$0xff]  ;;  %v6440_v36 = vld [vmem:[%s9684_s2 + $0x2d0] sm:$0xff] }
 0x282   :  { %1183 = vmatprep.subr.mxu0 %v6422_v34  ;;  %1254 = vmatprep.subr.mxu1 %v6428_v35  ;;  %10724 = vst [vmem:[#allocation130_spill] sm:$0xff] %v6434_v33  ;;  %10725 = vst [vmem:[#allocation131_spill] sm:$0xff] %v6440_v36  ;;  %v6446_v34 = vld [vmem:[%s9684_s2 + $0x2a8] sm:$0xff]  ;;  %v6452_v35 = vld [vmem:[%s9684_s2 + $0x2b8] sm:$0xff] }
 0x283   :  { %1184 = vmatpush2.msra.mxu0 %v6434_v33  ;;  %1255 = vmatpush2.msra.mxu1 %v6440_v36  ;;  %10726 = vst [vmem:[#allocation132_spill] sm:$0xff] %v6446_v34  ;;  %10727 = vst [vmem:[#allocation133_spill] sm:$0xff] %v6452_v35  ;;  %v6458_v33 = vld [vmem:[%s9684_s2 + $0x2a0] sm:$0xff]  ;;  %v6464_v36 = vld [vmem:[%s9684_s2 + $0x2b0] sm:$0xff] }
 0x284   :  { %1185 = vmatprep.subr.mxu0 %v6446_v34  ;;  %1256 = vmatprep.subr.mxu1 %v6452_v35  ;;  %10728 = vst [vmem:[#allocation134_spill] sm:$0xff] %v6458_v33  ;;  %10729 = vst [vmem:[#allocation135_spill] sm:$0xff] %v6464_v36  ;;  %v6470_v34 = vld [vmem:[%s9684_s2 + $0x288] sm:$0xff]  ;;  %v6476_v35 = vld [vmem:[%s9684_s2 + $0x298] sm:$0xff] }
 0x285   :  { %1186 = vmatpush2.msra.mxu0 %v6458_v33  ;;  %1257 = vmatpush2.msra.mxu1 %v6464_v36  ;;  %10730 = vst [vmem:[#allocation136_spill] sm:$0xff] %v6470_v34  ;;  %10731 = vst [vmem:[#allocation137_spill] sm:$0xff] %v6476_v35  ;;  %v6482_v33 = vld [vmem:[%s9684_s2 + $0x280] sm:$0xff]  ;;  %v6488_v36 = vld [vmem:[%s9684_s2 + $0x290] sm:$0xff] }
 0x286   :  { %1187 = vmatprep.subr.mxu0 %v6470_v34  ;;  %1258 = vmatprep.subr.mxu1 %v6476_v35  ;;  %10732 = vst [vmem:[#allocation138_spill] sm:$0xff] %v6482_v33  ;;  %10733 = vst [vmem:[#allocation139_spill] sm:$0xff] %v6488_v36  ;;  %v6494_v34 = vld [vmem:[%s9684_s2 + $0x268] sm:$0xff]  ;;  %v6500_v35 = vld [vmem:[%s9684_s2 + $0x278] sm:$0xff] }
 0x287   :  { %1188 = vmatpush2.msra.mxu0 %v6482_v33  ;;  %1259 = vmatpush2.msra.mxu1 %v6488_v36  ;;  %10734 = vst [vmem:[#allocation140_spill] sm:$0xff] %v6494_v34  ;;  %10735 = vst [vmem:[#allocation141_spill] sm:$0xff] %v6500_v35  ;;  %v6506_v33 = vld [vmem:[%s9684_s2 + $0x260] sm:$0xff]  ;;  %v6512_v36 = vld [vmem:[%s9684_s2 + $0x270] sm:$0xff] }
 0x288   :  { %1189 = vmatprep.subr.mxu0 %v6494_v34  ;;  %1260 = vmatprep.subr.mxu1 %v6500_v35  ;;  %10736 = vst [vmem:[#allocation142_spill] sm:$0xff] %v6506_v33  ;;  %10737 = vst [vmem:[#allocation143_spill] sm:$0xff] %v6512_v36  ;;  %v6518_v34 = vld [vmem:[%s9684_s2 + $0x248] sm:$0xff]  ;;  %v6524_v35 = vld [vmem:[%s9684_s2 + $0x258] sm:$0xff] }
 0x289   :  { %1190 = vmatpush2.msra.mxu0 %v6506_v33  ;;  %1261 = vmatpush2.msra.mxu1 %v6512_v36  ;;  %10738 = vst [vmem:[#allocation144_spill] sm:$0xff] %v6518_v34  ;;  %10739 = vst [vmem:[#allocation145_spill] sm:$0xff] %v6524_v35  ;;  %v6530_v33 = vld [vmem:[%s9684_s2 + $0x240] sm:$0xff]  ;;  %v6536_v36 = vld [vmem:[%s9684_s2 + $0x250] sm:$0xff] }
 0x28a   :  { %1191 = vmatprep.subr.mxu0 %v6518_v34  ;;  %1262 = vmatprep.subr.mxu1 %v6524_v35  ;;  %10740 = vst [vmem:[#allocation146_spill] sm:$0xff] %v6530_v33  ;;  %10741 = vst [vmem:[#allocation147_spill] sm:$0xff] %v6536_v36  ;;  %v6542_v34 = vld [vmem:[%s9684_s2 + $0x228] sm:$0xff]  ;;  %v6548_v35 = vld [vmem:[%s9684_s2 + $0x238] sm:$0xff] }
 0x28b   :  { %1192 = vmatpush2.msra.mxu0 %v6530_v33  ;;  %1263 = vmatpush2.msra.mxu1 %v6536_v36  ;;  %10742 = vst [vmem:[#allocation148_spill] sm:$0xff] %v6542_v34  ;;  %10743 = vst [vmem:[#allocation149_spill] sm:$0xff] %v6548_v35  ;;  %v6554_v33 = vld [vmem:[%s9684_s2 + $0x220] sm:$0xff]  ;;  %v6560_v36 = vld [vmem:[%s9684_s2 + $0x230] sm:$0xff] }
 0x28c   :  { %1193 = vmatprep.subr.mxu0 %v6542_v34  ;;  %1264 = vmatprep.subr.mxu1 %v6548_v35  ;;  %10744 = vst [vmem:[#allocation150_spill] sm:$0xff] %v6554_v33  ;;  %10745 = vst [vmem:[#allocation152_spill] sm:$0xff] %v6560_v36  ;;  %v6566_v34 = vld [vmem:[%s9684_s2 + $0x208] sm:$0xff]  ;;  %v6572_v35 = vld [vmem:[%s9684_s2 + $0x218] sm:$0xff] }
 0x28d   :  { %1194 = vmatpush2.msra.mxu0 %v6554_v33  ;;  %1265 = vmatpush2.msra.mxu1 %v6560_v36  ;;  %10746 = vst [vmem:[#allocation153_spill] sm:$0xff] %v6566_v34  ;;  %10747 = vst [vmem:[#allocation154_spill] sm:$0xff] %v6572_v35  ;;  %v6578_v33 = vld [vmem:[%s9684_s2 + $0x200] sm:$0xff]  ;;  %v6584_v36 = vld [vmem:[%s9684_s2 + $0x210] sm:$0xff] }
 0x28e   :  { %1195 = vmatprep.subr.mxu0 %v6566_v34  ;;  %1266 = vmatprep.subr.mxu1 %v6572_v35  ;;  %10748 = vst [vmem:[#allocation155_spill] sm:$0xff] %v6578_v33  ;;  %10749 = vst [vmem:[#allocation156_spill] sm:$0xff] %v6584_v36 }
 0x28f   :  { %1196 = vmatpush2.msra.mxu0 %v6578_v33  ;;  %1267 = vmatpush2.msra.mxu1 %v6584_v36 }
 0x290   :  { %1295 = vmatprep.subr.mxu0 %v5399_v24  ;;  %1366 = vmatprep.subr.mxu1 %v5405_v25 }
 0x2ee   :  { %v847_v34 = vpop.f32.mrf.mxu0  ;;  %v918_v27 = vpop.f32.mrf.mxu1 }
 0x2ef   :  { %v848_v35 = vadd.f32 %v847_v34, %v5413_v30  ;;  %v919_v26 = vadd.f32 %v918_v27, %v5419_v37 }
 0x2f0   :  { %v849_v18 = vpop.f32.mrf.mxu0  ;;  %v920_v23 = vpop.f32.mrf.mxu1 }
 0x2f1   :  { %v923_v31 = vmul.f32 0.5, %v848_v35  ;;  %v850_v28 = vadd.f32 %v849_v18, %v5416_v32  ;;  %v921_v36 = vadd.f32 %v920_v23, %v5424_v43 }
 0x2f3   :  { %3256 = vtanh.f32 %v923_v31  ;;  %v927_v33 = vmul.f32 0.5, %v850_v28  ;;  %v932_v24 = vmul.f32 0.5, %v921_v36 }
 0x2f5   :  { %3258 = vtanh.f32 %v927_v33 }
 0x2f6   :  { %3260 = vtanh.f32 %v919_v26 }
 0x2f7   :  { %3262 = vtanh.f32 %v932_v24 }
 0x300   :  { %v3257_v22 = vpop.eup %3256 }
 0x301   :  { %v925_v25 = vmul.f32 0.5, %v3257_v22 }
 0x302   :  { %v3259_v21 = vpop.eup %3258 }
 0x303   :  { %v926_v20 = vadd.f32 0.5, %v925_v25  ;;  %v929_v34 = vmul.f32 0.5, %v3259_v21  ;;  %v3261_v30 = vpop.eup %3260 }
 0x304   :  { %v3263_v33 = vpop.eup %3262 }
 0x305   :  { %v930_v35 = vadd.f32 0.5, %v929_v34  ;;  %v937_v31 = vmul.f32 %v3261_v30, %v926_v20  ;;  %v934_v37 = vmul.f32 0.5, %v3263_v33  ;;  %v3163_v30 = vld [vmem:[%s9682_s0 + $0x10] sm:$0xff] }
 0x307   :  { %v936_v18 = vmul.f32 %v930_v35, %v5427_v62  ;;  %v935_v20 = vadd.f32 0.5, %v934_v37 }
 0x309   :  { %v6594_v28 = vadd.f32 %v937_v31, %v936_v18 }
 0x30b   :  { %3264 = vtanh.f32 %v6594_v28 }
 0x30f   :  { %v1009_v27 = vpop.f32.mrf.mxu0  ;;  %v1080_v26 = vpop.f32.mrf.mxu1 }
 0x311   :  { %v1011_v23 = vpop.f32.mrf.mxu0  ;;  %v1082_v36 = vpop.f32.mrf.mxu1 }
 0x312   :  { %v1089_v43 = vcombine.low %v1009_v27, %v1011_v23  ;;  %v1090_v22 = vcombine.low %v1080_v26, %v1082_v36 }
 0x314   :  { %v1097_v21 = vrot.slane %v1089_v43, %v10601_v2  ;;  %v1104_v24 = vrot.slane %v1090_v22, %v10601_v2 }
 0x316   :  { %v1105_v62 = vcombine.low %v1097_v21, %v1104_v24 }
 0x318   :  { %v3265_v25 = vpop.eup %3264  ;;  %v1107_v34 = vadd.f32 %v3163_v30, %v1105_v62 }
 0x319   :  { %v940_v35 = vmul.f32 %v3265_v25, %v935_v20 }
 0x31a   :  { %v1108_v18 = vmul.f32 0.5, %v1107_v34  ;;  %v1113_v31 = vrot.slane %v1107_v34, 2  ;;  %v1119_v26 = vrot.slane %v1107_v34, 4  ;;  %v1122_v43 = vrot.slane %v1107_v34, 6 }
 0x31b   :  { %1197 = vmatprep.mubr.f32.mxu0 %v940_v35  ;;  %1268 = vmatprep.mubr.f32.mxu1 %v940_v35 }
 0x31c   :  { %3266 = vtanh.f32 %v1108_v18  ;;  %v1115_v27 = vmul.f32 0.5, %v1113_v31  ;;  %v1124_v33 = vmul.f32 0.5, %v1122_v43  ;;  %v10796_v43 = vld [vmem:[#allocation53_spill] sm:$0xff] }
 0x31e   :  { %3268 = vtanh.f32 %v1115_v27  ;;  %v10794_v27 = vld [vmem:[#allocation51_spill] sm:$0xff] }
 0x31f   :  { %3270 = vtanh.f32 %v1119_v26  ;;  %v10795_v26 = vld [vmem:[#allocation52_spill] sm:$0xff] }
 0x320   :  { %3272 = vtanh.f32 %v1124_v33  ;;  %v10797_v33 = vld [vmem:[#allocation54_spill] sm:$0xff] }
 0x329   :  { %v3267_v23 = vpop.eup %3266 }
 0x32a   :  { %v1110_v36 = vmul.f32 0.5, %v3267_v23  ;;  %v10798_v23 = vld [vmem:[#allocation55_spill] sm:$0xff] }
 0x32b   :  { %v3269_v22 = vpop.eup %3268 }
 0x32c   :  { %v1111_v2 = vadd.f32 0.5, %v1110_v36  ;;  %v1117_v21 = vmul.f32 0.5, %v3269_v22  ;;  %v3271_v24 = vpop.eup %3270  ;;  %v10799_v36 = vld [vmem:[#allocation56_spill] sm:$0xff]  ;;  %v10800_v22 = vld [vmem:[#allocation57_spill] sm:$0xff] }
 0x32d   :  { %v3273_v25 = vpop.eup %3272 }
 0x32e   :  { %v1118_v37 = vadd.f32 0.5, %v1117_v21  ;;  %v1129_v62 = vmul.f32 %v3271_v24, %v1111_v2  ;;  %v1126_v35 = vmul.f32 0.5, %v3273_v25  ;;  %v10750_v2 = vld [vmem:[#allocation8_spill] sm:$0xff]  ;;  %v10801_v21 = vld [vmem:[#allocation58_spill] sm:$0xff]  ;;  %v10806_v25 = vld [vmem:[#allocation63_spill] sm:$0xff] }
 0x32f   :  { %v10803_v24 = vld [vmem:[#allocation60_spill] sm:$0xff] }
 0x330   :  { %v1128_v30 = vmul.f32 %v1118_v37, %v5436_v29  ;;  %v1127_v18 = vadd.f32 0.5, %v1126_v35  ;;  %v10751_v29 = vld [vmem:[#allocation9_spill] sm:$0xff]  ;;  %v10802_v37 = vld [vmem:[#allocation59_spill] sm:$0xff]  ;;  %v10807_v35 = vld [vmem:[#allocation64_spill] sm:$0xff] }
 0x332   :  { %v6603_v20 = vadd.f32 %v1129_v62, %v1128_v30  ;;  %v10804_v30 = vld [vmem:[#allocation61_spill] sm:$0xff]  ;;  %v10805_v62 = vld [vmem:[#allocation62_spill] sm:$0xff] }
 0x334   :  { %3274 = vtanh.f32 %v6603_v20 }
 0x341   :  { %v3275_v34 = vpop.eup %3274 }
 0x342   :  { %v6606_v31 = vmul.f32 %v3275_v34, %v1127_v18  ;;  %v10808_v18 = vld [vmem:[#allocation65_spill] sm:$0xff]  ;;  %v10809_v34 = vld [vmem:[#allocation66_spill] sm:$0xff] }
 0x344   :  { %1198 = vmatmul.mubr.f32.vlgmr.msra.gmra.mxu0 %v6606_v31  ;;  %1269 = vmatmul.mubr.f32.vlgmr.msra.gmra.mxu1 %v6606_v31 }
 0x345   :  { %1296 = vmatpush1.msra.mxu0 %v5446_v38  ;;  %1367 = vmatpush1.msra.mxu1 %v5452_v0  ;;  %v10752_v38 = vld [vmem:[#allocation10_spill] sm:$0xff]  ;;  %v10753_v0 = vld [vmem:[#allocation11_spill] sm:$0xff] }
 0x346   :  { %1297 = vmatprep.subr.mxu0 %v5458_v39  ;;  %1368 = vmatprep.subr.mxu1 %v5464_v40  ;;  %v10754_v39 = vld [vmem:[#allocation12_spill] sm:$0xff]  ;;  %v10755_v40 = vld [vmem:[#allocation13_spill] sm:$0xff] }
 0x347   :  { %1298 = vmatpush1.msra.mxu0 %v5470_v41  ;;  %1369 = vmatpush1.msra.mxu1 %v5476_v42  ;;  %v10756_v41 = vld [vmem:[#allocation14_spill] sm:$0xff]  ;;  %v10757_v42 = vld [vmem:[#allocation15_spill] sm:$0xff] }
 0x348   :  { %1299 = vmatprep.subr.mxu0 %v5482_v44  ;;  %1370 = vmatprep.subr.mxu1 %v5488_v45  ;;  %v10758_v44 = vld [vmem:[#allocation16_spill] sm:$0xff]  ;;  %v10759_v45 = vld [vmem:[#allocation17_spill] sm:$0xff] }
 0x349   :  { %1300 = vmatpush1.msra.mxu0 %v5494_v46  ;;  %1371 = vmatpush1.msra.mxu1 %v5500_v47  ;;  %v10760_v46 = vld [vmem:[#allocation18_spill] sm:$0xff]  ;;  %v10761_v47 = vld [vmem:[#allocation19_spill] sm:$0xff] }
 0x34a   :  { %1301 = vmatprep.subr.mxu0 %v5506_v48  ;;  %1372 = vmatprep.subr.mxu1 %v5512_v53  ;;  %v10762_v48 = vld [vmem:[#allocation20_spill] sm:$0xff]  ;;  %v10763_v53 = vld [vmem:[#allocation21_spill] sm:$0xff] }
 0x34b   :  { %1302 = vmatpush1.msra.mxu0 %v5518_v56  ;;  %1373 = vmatpush1.msra.mxu1 %v5524_v60  ;;  %v10764_v56 = vld [vmem:[#allocation22_spill] sm:$0xff]  ;;  %v10765_v60 = vld [vmem:[#allocation23_spill] sm:$0xff] }
 0x34c   :  { %1303 = vmatprep.subr.mxu0 %v5530_v54  ;;  %1374 = vmatprep.subr.mxu1 %v5536_v57  ;;  %v10766_v54 = vld [vmem:[#allocation24_spill] sm:$0xff]  ;;  %v10767_v57 = vld [vmem:[#allocation25_spill] sm:$0xff] }
 0x34d   :  { %1304 = vmatpush1.msra.mxu0 %v5542_v52  ;;  %1375 = vmatpush1.msra.mxu1 %v5548_v58  ;;  %v10768_v52 = vld [vmem:[#allocation26_spill] sm:$0xff]  ;;  %v10769_v58 = vmov 0.0  }
 0x34e   :  { %1305 = vmatprep.subr.mxu0 %v5554_v63  ;;  %1376 = vmatprep.subr.mxu1 %v5560_v51  ;;  %v10770_v63 = vld [vmem:[#allocation27_spill] sm:$0xff]  ;;  %v10771_v51 = vld [vmem:[#allocation28_spill] sm:$0xff] }
 0x34f   :  { %1306 = vmatpush1.msra.mxu0 %v5566_v61  ;;  %1377 = vmatpush1.msra.mxu1 %v5572_v50  ;;  %v10772_v61 = vld [vmem:[#allocation29_spill] sm:$0xff]  ;;  %v10773_v50 = vld [vmem:[#allocation30_spill] sm:$0xff] }
 0x350   :  { %1307 = vmatprep.subr.mxu0 %v5578_v49  ;;  %1378 = vmatprep.subr.mxu1 %v5584_v1  ;;  %v10774_v49 = vld [vmem:[#allocation31_spill] sm:$0xff]  ;;  %v10775_v1 = vld [vmem:[#allocation32_spill] sm:$0xff] }
 0x351   :  { %1308 = vmatpush1.msra.mxu0 %v5590_v59  ;;  %1379 = vmatpush1.msra.mxu1 %v5596_v55  ;;  %v10776_v59 = vld [vmem:[#allocation33_spill] sm:$0xff]  ;;  %v10777_v55 = vld [vmem:[#allocation34_spill] sm:$0xff] }
 0x352   :  { %1309 = vmatprep.subr.mxu0 %v5602_v3  ;;  %1380 = vmatprep.subr.mxu1 %v5608_v4  ;;  %v10778_v3 = vld [vmem:[#allocation35_spill] sm:$0xff]  ;;  %v10779_v4 = vld [vmem:[#allocation36_spill] sm:$0xff] }
 0x353   :  { %1310 = vmatpush1.msra.mxu0 %v5614_v5  ;;  %1381 = vmatpush1.msra.mxu1 %v5620_v6  ;;  %v10780_v5 = vld [vmem:[#allocation37_spill] sm:$0xff]  ;;  %v10781_v6 = vld [vmem:[#allocation38_spill] sm:$0xff] }
 0x354   :  { %1311 = vmatprep.subr.mxu0 %v5626_v7  ;;  %1382 = vmatprep.subr.mxu1 %v5632_v8  ;;  %v10782_v7 = vld [vmem:[#allocation39_spill] sm:$0xff]  ;;  %v10783_v8 = vld [vmem:[#allocation40_spill] sm:$0xff] }
 0x355   :  { %1312 = vmatpush1.msra.mxu0 %v5638_v9  ;;  %1383 = vmatpush1.msra.mxu1 %v5644_v10  ;;  %v10784_v9 = vld [vmem:[#allocation41_spill] sm:$0xff]  ;;  %v10785_v10 = vld [vmem:[#allocation42_spill] sm:$0xff] }
 0x356   :  { %1313 = vmatprep.subr.mxu0 %v5650_v11  ;;  %1384 = vmatprep.subr.mxu1 %v5656_v12  ;;  %v10786_v11 = vld [vmem:[#allocation43_spill] sm:$0xff]  ;;  %v10787_v12 = vld [vmem:[#allocation44_spill] sm:$0xff] }
 0x357   :  { %1314 = vmatpush1.msra.mxu0 %v5662_v13  ;;  %1385 = vmatpush1.msra.mxu1 %v5668_v14  ;;  %v10788_v13 = vld [vmem:[#allocation45_spill] sm:$0xff]  ;;  %v10789_v14 = vld [vmem:[#allocation46_spill] sm:$0xff] }
 0x358   :  { %1315 = vmatprep.subr.mxu0 %v5674_v15  ;;  %1386 = vmatprep.subr.mxu1 %v5680_v16  ;;  %v10790_v15 = vld [vmem:[#allocation47_spill] sm:$0xff]  ;;  %v10791_v16 = vld [vmem:[#allocation48_spill] sm:$0xff] }
 0x359   :  { %1316 = vmatpush1.msra.mxu0 %v5686_v17  ;;  %1387 = vmatpush1.msra.mxu1 %v5692_v19  ;;  %v10792_v17 = vld [vmem:[#allocation49_spill] sm:$0xff]  ;;  %v10793_v19 = vld [vmem:[#allocation50_spill] sm:$0xff] }
 0x35a   :  { %1317 = vmatprep.subr.mxu0 %v10750_v2  ;;  %1388 = vmatprep.subr.mxu1 %v10751_v29  ;;  %v10811_v2 = vld [vmem:[#allocation68_spill] sm:$0xff]  ;;  %v10812_v29 = vld [vmem:[#allocation69_spill] sm:$0xff] }
 0x35b   :  { %1318 = vmatpush1.msra.mxu0 %v10752_v38  ;;  %1389 = vmatpush1.msra.mxu1 %v10753_v0  ;;  %v10813_v38 = vld [vmem:[#allocation70_spill] sm:$0xff]  ;;  %v10814_v0 = vld [vmem:[#allocation71_spill] sm:$0xff] }
 0x35c   :  { %1319 = vmatprep.subr.mxu0 %v10754_v39  ;;  %1390 = vmatprep.subr.mxu1 %v10755_v40  ;;  %v10815_v39 = vld [vmem:[#allocation72_spill] sm:$0xff]  ;;  %v10816_v40 = vld [vmem:[#allocation73_spill] sm:$0xff] }
 0x35d   :  { %1320 = vmatpush1.msra.mxu0 %v10756_v41  ;;  %1391 = vmatpush1.msra.mxu1 %v10757_v42  ;;  %v10817_v41 = vld [vmem:[#allocation74_spill] sm:$0xff]  ;;  %v10818_v42 = vld [vmem:[#allocation75_spill] sm:$0xff] }
 0x35e   :  { %1321 = vmatprep.subr.mxu0 %v10758_v44  ;;  %1392 = vmatprep.subr.mxu1 %v10759_v45  ;;  %v10819_v44 = vld [vmem:[#allocation76_spill] sm:$0xff]  ;;  %v10820_v45 = vld [vmem:[#allocation77_spill] sm:$0xff] }
 0x35f   :  { %1322 = vmatpush1.msra.mxu0 %v10760_v46  ;;  %1393 = vmatpush1.msra.mxu1 %v10761_v47  ;;  %v10821_v46 = vld [vmem:[#allocation78_spill] sm:$0xff]  ;;  %v10822_v47 = vld [vmem:[#allocation79_spill] sm:$0xff] }
 0x360   :  { %1323 = vmatprep.subr.mxu0 %v10762_v48  ;;  %1394 = vmatprep.subr.mxu1 %v10763_v53  ;;  %v10823_v48 = vld [vmem:[#allocation80_spill] sm:$0xff]  ;;  %v10824_v53 = vld [vmem:[#allocation81_spill] sm:$0xff] }
 0x361   :  { %1324 = vmatpush1.msra.mxu0 %v10764_v56  ;;  %1395 = vmatpush1.msra.mxu1 %v10765_v60  ;;  %v10825_v56 = vld [vmem:[#allocation82_spill] sm:$0xff]  ;;  %v10826_v60 = vld [vmem:[#allocation83_spill] sm:$0xff] }
 0x362   :  { %1325 = vmatprep.subr.mxu0 %v10766_v54  ;;  %1396 = vmatprep.subr.mxu1 %v10767_v57  ;;  %v10827_v54 = vld [vmem:[#allocation84_spill] sm:$0xff]  ;;  %v10828_v57 = vld [vmem:[#allocation85_spill] sm:$0xff] }
 0x363   :  { %1326 = vmatpush1.msra.mxu0 %v10768_v52  ;;  %1359 = vmatprep.mubr.f32.mxu0 %v10769_v58  ;;  %v10829_v52 = vld [vmem:[#allocation86_spill] sm:$0xff] }
 0x364   :  { %1397 = vmatpush1.msra.mxu1 %v10770_v63  ;;  %1430 = vmatprep.mubr.f32.mxu1 %v10769_v58  ;;  %v10830_v63 = vld [vmem:[#allocation87_spill] sm:$0xff] }
 0x365   :  { %1360 = vmatmul.mubr.f32.vlgmr.msra.gmra.mxu0 %v6606_v31  ;;  %1431 = vmatmul.mubr.f32.vlgmr.msra.gmra.mxu1 %v6606_v31  ;;  %v10810_v31 = vld [vmem:[#allocation67_spill] sm:$0xff] }
 0x366   :  { %1485 = vmatprep.subr.mxu0 %v10771_v51  ;;  %1556 = vmatprep.subr.mxu1 %v10772_v61  ;;  %v10831_v51 = vld [vmem:[#allocation88_spill] sm:$0xff]  ;;  %v10832_v61 = vld [vmem:[#allocation89_spill] sm:$0xff] }
 0x367   :  { %1486 = vmatpush1.msra.mxu0 %v10773_v50  ;;  %1557 = vmatpush1.msra.mxu1 %v10774_v49  ;;  %v10833_v50 = vld [vmem:[#allocation90_spill] sm:$0xff]  ;;  %v10834_v49 = vld [vmem:[#allocation91_spill] sm:$0xff] }
 0x368   :  { %1487 = vmatprep.subr.mxu0 %v10775_v1  ;;  %1558 = vmatprep.subr.mxu1 %v10776_v59  ;;  %v10835_v1 = vld [vmem:[#allocation92_spill] sm:$0xff]  ;;  %v10836_v59 = vld [vmem:[#allocation93_spill] sm:$0xff] }
 0x369   :  { %1488 = vmatpush1.msra.mxu0 %v10777_v55  ;;  %1559 = vmatpush1.msra.mxu1 %v10778_v3  ;;  %v10837_v55 = vld [vmem:[#allocation94_spill] sm:$0xff]  ;;  %v10838_v3 = vld [vmem:[#allocation95_spill] sm:$0xff] }
 0x36a   :  { %1489 = vmatprep.subr.mxu0 %v10779_v4  ;;  %1560 = vmatprep.subr.mxu1 %v10780_v5  ;;  %v10839_v4 = vld [vmem:[#allocation96_spill] sm:$0xff]  ;;  %v10840_v5 = vld [vmem:[#allocation97_spill] sm:$0xff] }
 0x36b   :  { %1490 = vmatpush1.msra.mxu0 %v10781_v6  ;;  %1561 = vmatpush1.msra.mxu1 %v10782_v7  ;;  %v10841_v6 = vld [vmem:[#allocation98_spill] sm:$0xff]  ;;  %v10842_v7 = vld [vmem:[#allocation99_spill] sm:$0xff] }
 0x36c   :  { %1491 = vmatprep.subr.mxu0 %v10783_v8  ;;  %1562 = vmatprep.subr.mxu1 %v10784_v9  ;;  %v10843_v8 = vld [vmem:[#allocation100_spill] sm:$0xff]  ;;  %v10844_v9 = vld [vmem:[#allocation101_spill] sm:$0xff] }
 0x36d   :  { %1492 = vmatpush1.msra.mxu0 %v10785_v10  ;;  %1563 = vmatpush1.msra.mxu1 %v10786_v11  ;;  %v10845_v10 = vld [vmem:[#allocation102_spill] sm:$0xff]  ;;  %v10846_v11 = vld [vmem:[#allocation103_spill] sm:$0xff] }
 0x36e   :  { %1493 = vmatprep.subr.mxu0 %v10787_v12  ;;  %1564 = vmatprep.subr.mxu1 %v10788_v13  ;;  %v10847_v12 = vld [vmem:[#allocation104_spill] sm:$0xff]  ;;  %v10848_v13 = vld [vmem:[#allocation105_spill] sm:$0xff] }
 0x36f   :  { %1494 = vmatpush1.msra.mxu0 %v10789_v14  ;;  %1565 = vmatpush1.msra.mxu1 %v10790_v15  ;;  %v10849_v14 = vld [vmem:[#allocation106_spill] sm:$0xff]  ;;  %v10850_v15 = vld [vmem:[#allocation107_spill] sm:$0xff] }
 0x370   :  { %1495 = vmatprep.subr.mxu0 %v10791_v16  ;;  %1566 = vmatprep.subr.mxu1 %v10792_v17  ;;  %v10851_v16 = vld [vmem:[#allocation108_spill] sm:$0xff]  ;;  %v10852_v17 = vld [vmem:[#allocation109_spill] sm:$0xff] }
 0x371   :  { %1496 = vmatpush1.msra.mxu0 %v10793_v19  ;;  %1567 = vmatpush1.msra.mxu1 %v10794_v27  ;;  %v10853_v19 = vld [vmem:[#allocation110_spill] sm:$0xff]  ;;  %v10854_v27 = vld [vmem:[#allocation111_spill] sm:$0xff] }
 0x372   :  { %1497 = vmatprep.subr.mxu0 %v10795_v26  ;;  %1568 = vmatprep.subr.mxu1 %v10796_v43  ;;  %v10855_v26 = vld [vmem:[#allocation112_spill] sm:$0xff]  ;;  %v10856_v43 = vld [vmem:[#allocation113_spill] sm:$0xff] }
 0x373   :  { %1498 = vmatpush1.msra.mxu0 %v10797_v33  ;;  %1569 = vmatpush1.msra.mxu1 %v10798_v23  ;;  %v10857_v33 = vld [vmem:[#allocation114_spill] sm:$0xff]  ;;  %v10858_v23 = vld [vmem:[#allocation115_spill] sm:$0xff] }
 0x374   :  { %1499 = vmatprep.subr.mxu0 %v10799_v36  ;;  %1570 = vmatprep.subr.mxu1 %v10800_v22  ;;  %v10859_v36 = vld [vmem:[#allocation116_spill] sm:$0xff]  ;;  %v10860_v22 = vld [vmem:[#allocation117_spill] sm:$0xff] }
 0x375   :  { %1500 = vmatpush1.msra.mxu0 %v10801_v21  ;;  %1571 = vmatpush1.msra.mxu1 %v10802_v37  ;;  %v10861_v21 = vld [vmem:[#allocation118_spill] sm:$0xff]  ;;  %v10862_v37 = vld [vmem:[#allocation119_spill] sm:$0xff] }
 0x376   :  { %1501 = vmatprep.subr.mxu0 %v10803_v24  ;;  %1572 = vmatprep.subr.mxu1 %v10804_v30  ;;  %v10863_v24 = vld [vmem:[#allocation120_spill] sm:$0xff]  ;;  %v10864_v30 = vld [vmem:[#allocation121_spill] sm:$0xff] }
 0x377   :  { %1502 = vmatpush1.msra.mxu0 %v10805_v62  ;;  %1573 = vmatpush1.msra.mxu1 %v10806_v25  ;;  %v10865_v62 = vld [vmem:[#allocation122_spill] sm:$0xff]  ;;  %v10866_v25 = vld [vmem:[#allocation123_spill] sm:$0xff] }
 0x378   :  { %1503 = vmatprep.subr.mxu0 %v10807_v35  ;;  %1574 = vmatprep.subr.mxu1 %v10808_v18  ;;  %v10867_v35 = vld [vmem:[#allocation124_spill] sm:$0xff]  ;;  %v10868_v18 = vld [vmem:[#allocation125_spill] sm:$0xff] }
 0x379   :  { %1504 = vmatpush1.msra.mxu0 %v10809_v34  ;;  %1575 = vmatpush1.msra.mxu1 %v10810_v31  ;;  %v10869_v34 = vld [vmem:[#allocation126_spill] sm:$0xff]  ;;  %v10870_v31 = vld [vmem:[#allocation127_spill] sm:$0xff] }
 0x37a   :  { %1505 = vmatprep.subr.mxu0 %v10811_v2  ;;  %1576 = vmatprep.subr.mxu1 %v10812_v29  ;;  %v10871_v2 = vld [vmem:[#allocation128_spill] sm:$0xff]  ;;  %v10872_v29 = vld [vmem:[#allocation129_spill] sm:$0xff] }
 0x37b   :  { %1506 = vmatpush1.msra.mxu0 %v10813_v38  ;;  %1577 = vmatpush1.msra.mxu1 %v10814_v0  ;;  %v10873_v38 = vld [vmem:[#allocation130_spill] sm:$0xff]  ;;  %v10874_v0 = vld [vmem:[#allocation131_spill] sm:$0xff] }
 0x37c   :  { %1507 = vmatprep.subr.mxu0 %v10815_v39  ;;  %1578 = vmatprep.subr.mxu1 %v10816_v40  ;;  %v10875_v39 = vld [vmem:[#allocation132_spill] sm:$0xff]  ;;  %v10876_v40 = vld [vmem:[#allocation133_spill] sm:$0xff] }
 0x37d   :  { %1508 = vmatpush1.msra.mxu0 %v10817_v41  ;;  %1579 = vmatpush1.msra.mxu1 %v10818_v42  ;;  %v10877_v41 = vld [vmem:[#allocation134_spill] sm:$0xff]  ;;  %v10878_v42 = vld [vmem:[#allocation135_spill] sm:$0xff] }
 0x37e   :  { %1509 = vmatprep.subr.mxu0 %v10819_v44  ;;  %1580 = vmatprep.subr.mxu1 %v10820_v45  ;;  %v10879_v44 = vld [vmem:[#allocation136_spill] sm:$0xff]  ;;  %v10880_v45 = vld [vmem:[#allocation137_spill] sm:$0xff] }
 0x37f   :  { %1510 = vmatpush1.msra.mxu0 %v10821_v46  ;;  %1581 = vmatpush1.msra.mxu1 %v10822_v47  ;;  %v10881_v46 = vld [vmem:[#allocation138_spill] sm:$0xff]  ;;  %v10882_v47 = vld [vmem:[#allocation139_spill] sm:$0xff] }
 0x380   :  { %1511 = vmatprep.subr.mxu0 %v10823_v48  ;;  %1582 = vmatprep.subr.mxu1 %v10824_v53  ;;  %v10883_v48 = vld [vmem:[#allocation140_spill] sm:$0xff]  ;;  %v10884_v53 = vld [vmem:[#allocation141_spill] sm:$0xff] }
 0x381   :  { %1512 = vmatpush1.msra.mxu0 %v10825_v56  ;;  %1583 = vmatpush1.msra.mxu1 %v10826_v60  ;;  %v10885_v56 = vld [vmem:[#allocation142_spill] sm:$0xff]  ;;  %v10886_v60 = vld [vmem:[#allocation143_spill] sm:$0xff] }
 0x382   :  { %1513 = vmatprep.subr.mxu0 %v10827_v54  ;;  %1584 = vmatprep.subr.mxu1 %v10828_v57  ;;  %v10887_v54 = vld [vmem:[#allocation144_spill] sm:$0xff]  ;;  %v10888_v57 = vld [vmem:[#allocation145_spill] sm:$0xff] }
 0x383   :  { %1514 = vmatpush1.msra.mxu0 %v10829_v52  ;;  %1585 = vmatpush1.msra.mxu1 %v10830_v63  ;;  %v10889_v52 = vld [vmem:[#allocation146_spill] sm:$0xff]  ;;  %v10890_v63 = vld [vmem:[#allocation147_spill] sm:$0xff] }
 0x384   :  { %1515 = vmatprep.subr.mxu0 %v10831_v51  ;;  %1586 = vmatprep.subr.mxu1 %v10832_v61  ;;  %v10891_v51 = vld [vmem:[#allocation148_spill] sm:$0xff]  ;;  %v10892_v61 = vld [vmem:[#allocation149_spill] sm:$0xff] }
 0x385   :  { %1516 = vmatpush1.msra.mxu0 %v10833_v50  ;;  %1587 = vmatpush1.msra.mxu1 %v10834_v49  ;;  %v10893_v50 = vld [vmem:[#allocation150_spill] sm:$0xff]  ;;  %v10894_v49 = vld [vmem:[#allocation152_spill] sm:$0xff] }
 0x386   :  { %1517 = vmatprep.subr.mxu0 %v10835_v1  ;;  %1588 = vmatprep.subr.mxu1 %v10836_v59  ;;  %v10895_v1 = vld [vmem:[#allocation153_spill] sm:$0xff]  ;;  %v10896_v59 = vld [vmem:[#allocation154_spill] sm:$0xff] }
 0x387   :  { %1518 = vmatpush2.msra.mxu0 %v10837_v55  ;;  %1589 = vmatpush2.msra.mxu1 %v10838_v3  ;;  %v10897_v55 = vld [vmem:[#allocation155_spill] sm:$0xff]  ;;  %v10898_v3 = vld [vmem:[#allocation156_spill] sm:$0xff] }
 0x388   :  { %1519 = vmatprep.subr.mxu0 %v10839_v4  ;;  %1590 = vmatprep.subr.mxu1 %v10840_v5  ;;  %v6807_v4 = vld [vmem:[%s9683_s1 + $0x1e8] sm:$0xff]  ;;  %v6813_v5 = vld [vmem:[%s9683_s1 + $0x1f8] sm:$0xff] }
 0x389   :  { %1520 = vmatpush2.msra.mxu0 %v10841_v6  ;;  %1591 = vmatpush2.msra.mxu1 %v10842_v7  ;;  %v10899_v7 = vld [vmem:[#allocation5_spill] sm:$0xff] }
 0x38a   :  { %1521 = vmatprep.subr.mxu0 %v10843_v8  ;;  %1592 = vmatprep.subr.mxu1 %v10844_v9 }
 0x38b   :  { %1522 = vmatpush2.msra.mxu0 %v10845_v10  ;;  %1593 = vmatpush2.msra.mxu1 %v10846_v11 }
 0x38c   :  { %1523 = vmatprep.subr.mxu0 %v10847_v12  ;;  %1594 = vmatprep.subr.mxu1 %v10848_v13 }
 0x38d   :  { %1524 = vmatpush2.msra.mxu0 %v10849_v14  ;;  %1595 = vmatpush2.msra.mxu1 %v10850_v15  ;;  %v10900_v14 = vld [vmem:[#allocation6_spill] sm:$0xff] }
 0x38e   :  { %1525 = vmatprep.subr.mxu0 %v10851_v16  ;;  %1596 = vmatprep.subr.mxu1 %v10852_v17  ;;  %v10901_v17 = vld [vmem:[#allocation7_spill] sm:$0xff] }
 0x38f   :  { %1526 = vmatpush2.msra.mxu0 %v10853_v19  ;;  %1597 = vmatpush2.msra.mxu1 %v10854_v27 }
 0x390   :  { %1527 = vmatprep.subr.mxu0 %v10855_v26  ;;  %1598 = vmatprep.subr.mxu1 %v10856_v43 }
 0x391   :  { %1528 = vmatpush2.msra.mxu0 %v10857_v33  ;;  %1599 = vmatpush2.msra.mxu1 %v10858_v23 }
 0x392   :  { %1529 = vmatprep.subr.mxu0 %v10859_v36  ;;  %1600 = vmatprep.subr.mxu1 %v10860_v22 }
 0x393   :  { %1530 = vmatpush2.msra.mxu0 %v10861_v21  ;;  %1601 = vmatpush2.msra.mxu1 %v10862_v37 }
 0x394   :  { %1531 = vmatprep.subr.mxu0 %v10863_v24  ;;  %1602 = vmatprep.subr.mxu1 %v10864_v30 }
 0x395   :  { %1532 = vmatpush2.msra.mxu0 %v10865_v62  ;;  %1603 = vmatpush2.msra.mxu1 %v10866_v25 }
 0x396   :  { %1533 = vmatprep.subr.mxu0 %v10867_v35  ;;  %1604 = vmatprep.subr.mxu1 %v10868_v18 }
 0x397   :  { %1534 = vmatpush2.msra.mxu0 %v10869_v34  ;;  %1605 = vmatpush2.msra.mxu1 %v10870_v31 }
 0x398   :  { %1535 = vmatprep.subr.mxu0 %v10871_v2  ;;  %1606 = vmatprep.subr.mxu1 %v10872_v29 }
 0x399   :  { %1536 = vmatpush2.msra.mxu0 %v10873_v38  ;;  %1607 = vmatpush2.msra.mxu1 %v10874_v0  ;;  %v10902_v38 = vld [vmem:[#allocation151_spill] sm:$0xff] }
 0x39a   :  { %1537 = vmatprep.subr.mxu0 %v10875_v39  ;;  %1608 = vmatprep.subr.mxu1 %v10876_v40 }
 0x39b   :  { %1538 = vmatpush2.msra.mxu0 %v10877_v41  ;;  %1609 = vmatpush2.msra.mxu1 %v10878_v42 }
 0x39c   :  { %1539 = vmatprep.subr.mxu0 %v10879_v44  ;;  %1610 = vmatprep.subr.mxu1 %v10880_v45 }
 0x39d   :  { %1540 = vmatpush2.msra.mxu0 %v10881_v46  ;;  %1611 = vmatpush2.msra.mxu1 %v10882_v47 }
 0x39e   :  { %1541 = vmatprep.subr.mxu0 %v10883_v48  ;;  %1612 = vmatprep.subr.mxu1 %v10884_v53 }
 0x39f   :  { %1542 = vmatpush2.msra.mxu0 %v10885_v56  ;;  %1613 = vmatpush2.msra.mxu1 %v10886_v60 }
 0x3a0   :  { %1543 = vmatprep.subr.mxu0 %v10887_v54  ;;  %1614 = vmatprep.subr.mxu1 %v10888_v57 }
 0x3a1   :  { %1544 = vmatpush2.msra.mxu0 %v10889_v52  ;;  %1615 = vmatpush2.msra.mxu1 %v10890_v63 }
 0x3a2   :  { %1545 = vmatprep.subr.mxu0 %v10891_v51  ;;  %1616 = vmatprep.subr.mxu1 %v10892_v61 }
 0x3a3   :  { %1546 = vmatpush2.msra.mxu0 %v10893_v50  ;;  %1617 = vmatpush2.msra.mxu1 %v10894_v49 }
 0x3a4   :  { %1547 = vmatprep.subr.mxu0 %v10895_v1  ;;  %1618 = vmatprep.subr.mxu1 %v10896_v59 }
 0x3a5   :  { %1548 = vmatpush2.msra.mxu0 %v10897_v55  ;;  %1619 = vmatpush2.msra.mxu1 %v10898_v3 }
 0x3a6   :  { %1647 = vmatprep.subr.mxu0 %v6807_v4  ;;  %1718 = vmatprep.subr.mxu1 %v6813_v5 }
 0x404   :  { %v1199_v6 = vpop.f32.mrf.mxu0  ;;  %v1270_v12 = vpop.f32.mrf.mxu1 }
 0x405   :  { %v1200_v8 = vadd.f32 %v1199_v6, %v10899_v7  ;;  %v1271_v15 = vadd.f32 %v1270_v12, %v10900_v14  ;;  %v6858_v12 = vld [vmem:[%s9683_s1 + $0x1d8] sm:$0xff] }
 0x406   :  { %v1201_v9 = vpop.f32.mrf.mxu0  ;;  %v1272_v16 = vpop.f32.mrf.mxu1 }
 0x407   :  { %v1275_v10 = vmul.f32 0.5, %v1200_v8  ;;  %v1202_v11 = vadd.f32 %v1201_v9, %v5416_v32  ;;  %v1273_v19 = vadd.f32 %v1272_v16, %v10901_v17  ;;  %v6876_v16 = vld [vmem:[%s9683_s1 + $0x1a8] sm:$0xff] }
 0x409   :  { %3276 = vtanh.f32 %v1275_v10  ;;  %v1279_v13 = vmul.f32 0.5, %v1202_v11  ;;  %v1284_v27 = vmul.f32 0.5, %v1273_v19  ;;  %v6840_v10 = vld [vmem:[%s9683_s1 + $0x1e0] sm:$0xff]  ;;  %v6852_v11 = vld [vmem:[%s9683_s1 + $0x1c8] sm:$0xff]  ;;  %v6882_v19 = vld [vmem:[%s9683_s1 + $0x1b8] sm:$0xff] }
 0x40b   :  { %3278 = vtanh.f32 %v1279_v13  ;;  %v6864_v13 = vld [vmem:[%s9683_s1 + $0x1c0] sm:$0xff] }
 0x40c   :  { %3280 = vtanh.f32 %v1271_v15  ;;  %v6870_v15 = vld [vmem:[%s9683_s1 + $0x1d0] sm:$0xff] }
 0x40d   :  { %3282 = vtanh.f32 %v1284_v27  ;;  %v6888_v27 = vld [vmem:[%s9683_s1 + $0x1a0] sm:$0xff] }
 0x416   :  { %v3277_v26 = vpop.eup %3276 }
 0x417   :  { %v1277_v43 = vmul.f32 0.5, %v3277_v26  ;;  %v6894_v26 = vld [vmem:[%s9683_s1 + $0x1b0] sm:$0xff] }
 0x418   :  { %v3279_v33 = vpop.eup %3278 }
 0x419   :  { %v1278_v23 = vadd.f32 0.5, %v1277_v43  ;;  %v1281_v36 = vmul.f32 0.5, %v3279_v33  ;;  %v3281_v21 = vpop.eup %3280  ;;  %v6900_v43 = vld [vmem:[%s9683_s1 + $0x188] sm:$0xff]  ;;  %v6906_v33 = vld [vmem:[%s9683_s1 + $0x198] sm:$0xff] }
 0x41a   :  { %v3283_v35 = vpop.eup %3282 }
 0x41b   :  { %v1282_v22 = vadd.f32 0.5, %v1281_v36  ;;  %v1289_v24 = vmul.f32 %v3281_v21, %v1278_v23  ;;  %v1286_v29 = vmul.f32 0.5, %v3283_v35  ;;  %v6912_v23 = vld [vmem:[%s9683_s1 + $0x180] sm:$0xff]  ;;  %v6918_v36 = vld [vmem:[%s9683_s1 + $0x190] sm:$0xff]  ;;  %v6930_v21 = vld [vmem:[%s9683_s1 + $0x178] sm:$0xff] }
 0x41c   :  { %v6960_v35 = vld [vmem:[%s9683_s1 + $0x140] sm:$0xff] }
 0x41d   :  { %v1288_v37 = vmul.f32 %v1282_v22, %v6594_v28  ;;  %v3164_v28 = vld [vmem:[%s9682_s0 + $0x18] sm:$0xff]  ;;  %v1287_v41 = vadd.f32 0.5, %v1286_v29  ;;  %v6924_v22 = vld [vmem:[%s9683_s1 + $0x168] sm:$0xff]  ;;  %v6990_v29 = vld [vmem:[%s9683_s1 + $0x130] sm:$0xff] }
 0x41f   :  { %v6821_v30 = vadd.f32 %v1289_v24, %v1288_v37  ;;  %v6936_v37 = vld [vmem:[%s9683_s1 + $0x160] sm:$0xff]  ;;  %v6942_v24 = vld [vmem:[%s9683_s1 + $0x170] sm:$0xff] }
 0x421   :  { %3284 = vtanh.f32 %v6821_v30 }
 0x425   :  { %v1361_v62 = vpop.f32.mrf.mxu0  ;;  %v1432_v25 = vpop.f32.mrf.mxu1 }
 0x427   :  { %v1363_v18 = vpop.f32.mrf.mxu0  ;;  %v1434_v34 = vpop.f32.mrf.mxu1 }
 0x428   :  { %v1441_v31 = vcombine.low %v1361_v62, %v1363_v18  ;;  %v1442_v2 = vcombine.low %v1432_v25, %v1434_v34  ;;  %v6948_v62 = vld [vmem:[%s9683_s1 + $0x148] sm:$0xff]  ;;  %v6954_v25 = vld [vmem:[%s9683_s1 + $0x158] sm:$0xff]  ;;  %v6966_v18 = vld [vmem:[%s9683_s1 + $0x150] sm:$0xff] }
 0x429   :  { %v6972_v34 = vld [vmem:[%s9683_s1 + $0x128] sm:$0xff] }
 0x42a   :  { %v1449_v0 = vrot.slane %v1441_v31, %v10902_v38  ;;  %v1456_v39 = vrot.slane %v1442_v2, %v10902_v38  ;;  %v6978_v31 = vld [vmem:[%s9683_s1 + $0x138] sm:$0xff]  ;;  %v6984_v2 = vld [vmem:[%s9683_s1 + $0x120] sm:$0xff] }
 0x42c   :  { %v1457_v40 = vcombine.low %v1449_v0, %v1456_v39  ;;  %v6996_v0 = vld [vmem:[%s9683_s1 + $0x108] sm:$0xff]  ;;  %v7002_v39 = vld [vmem:[%s9683_s1 + $0x118] sm:$0xff] }
 0x42e   :  { %v3285_v42 = vpop.eup %3284  ;;  %v1459_v44 = vadd.f32 %v3164_v28, %v1457_v40  ;;  %v7008_v28 = vld [vmem:[%s9683_s1 + $0x100] sm:$0xff]  ;;  %v7014_v40 = vld [vmem:[%s9683_s1 + $0x110] sm:$0xff] }
 0x42f   :  { %v1292_v45 = vmul.f32 %v3285_v42, %v1287_v41  ;;  %v7020_v41 = vld [vmem:[%s9683_s1 + $0xe8] sm:$0xff]  ;;  %v7026_v42 = vld [vmem:[%s9683_s1 + $0xf8] sm:$0xff] }
 0x430   :  { %v1460_v46 = vmul.f32 0.5, %v1459_v44  ;;  %v1465_v47 = vrot.slane %v1459_v44, 2  ;;  %v1471_v53 = vrot.slane %v1459_v44, 4  ;;  %v1474_v56 = vrot.slane %v1459_v44, 6  ;;  %v7032_v44 = vld [vmem:[%s9683_s1 + $0xe0] sm:$0xff] }
 0x431   :  { %1549 = vmatprep.mubr.f32.mxu0 %v1292_v45  ;;  %1620 = vmatprep.mubr.f32.mxu1 %v1292_v45  ;;  %v7038_v45 = vld [vmem:[%s9683_s1 + $0xf0] sm:$0xff] }
 0x432   :  { %3286 = vtanh.f32 %v1460_v46  ;;  %v1467_v48 = vmul.f32 0.5, %v1465_v47  ;;  %v1476_v60 = vmul.f32 0.5, %v1474_v56  ;;  %v7044_v46 = vld [vmem:[%s9683_s1 + $0xc8] sm:$0xff]  ;;  %v7050_v47 = vld [vmem:[%s9683_s1 + $0xd8] sm:$0xff] }
 0x433   :  { %v7068_v56 = vld [vmem:[%s9683_s1 + $0xa8] sm:$0xff] }
 0x434   :  { %3288 = vtanh.f32 %v1467_v48  ;;  %v7056_v48 = vld [vmem:[%s9683_s1 + $0xc0] sm:$0xff] }
 0x435   :  { %3290 = vtanh.f32 %v1471_v53  ;;  %v7062_v53 = vld [vmem:[%s9683_s1 + $0xd0] sm:$0xff] }
 0x436   :  { %3292 = vtanh.f32 %v1476_v60  ;;  %v7074_v60 = vld [vmem:[%s9683_s1 + $0xb8] sm:$0xff] }
 0x43f   :  { %v3287_v54 = vpop.eup %3286 }
 0x440   :  { %v1462_v57 = vmul.f32 0.5, %v3287_v54  ;;  %v7080_v54 = vld [vmem:[%s9683_s1 + $0xa0] sm:$0xff] }
 0x441   :  { %v3289_v52 = vpop.eup %3288 }
 0x442   :  { %v1463_v63 = vadd.f32 0.5, %v1462_v57  ;;  %v1469_v51 = vmul.f32 0.5, %v3289_v52  ;;  %v3291_v50 = vpop.eup %3290  ;;  %v7086_v57 = vld [vmem:[%s9683_s1 + $0xb0] sm:$0xff]  ;;  %v7092_v52 = vld [vmem:[%s9683_s1 + $0x88] sm:$0xff] }
 0x443   :  { %v3293_v55 = vpop.eup %3292  ;;  %10903 = vst [vmem:[#allocation8_spill] sm:$0xff] %v7092_v52 }
 0x444   :  { %v1470_v61 = vadd.f32 0.5, %v1469_v51  ;;  %v1481_v1 = vmul.f32 %v3291_v50, %v1463_v63  ;;  %v1478_v3 = vmul.f32 0.5, %v3293_v55  ;;  %v7098_v63 = vld [vmem:[%s9683_s1 + $0x98] sm:$0xff]  ;;  %v7104_v51 = vld [vmem:[%s9683_s1 + $0x80] sm:$0xff]  ;;  %v7116_v50 = vld [vmem:[%s9683_s1 + $0x68] sm:$0xff] }
 0x445   :  { %10904 = vst [vmem:[#allocation9_spill] sm:$0xff] %v7098_v63  ;;  %10905 = vst [vmem:[#allocation10_spill] sm:$0xff] %v7104_v51  ;;  %v7134_v55 = vld [vmem:[%s9683_s1 + $0x70] sm:$0xff] }
 0x446   :  { %v1480_v49 = vmul.f32 %v1470_v61, %v6603_v20  ;;  %v1479_v6 = vadd.f32 0.5, %v1478_v3  ;;  %v6846_v20 = vld [vmem:[%s9683_s1 + $0x1f0] sm:$0xff]  ;;  %10907 = vst [vmem:[#allocation12_spill] sm:$0xff] %v7116_v50  ;;  %10910 = vst [vmem:[#allocation15_spill] sm:$0xff] %v7134_v55  ;;  %v7140_v3 = vld [vmem:[%s9683_s1 + $0x48] sm:$0xff] }
 0x447   :  { %v7110_v61 = vld [vmem:[%s9683_s1 + $0x90] sm:$0xff]  ;;  %10911 = vst [vmem:[#allocation16_spill] sm:$0xff] %v7140_v3 }
 0x448   :  { %v6830_v59 = vadd.f32 %v1481_v1, %v1480_v49  ;;  %10906 = vst [vmem:[#allocation11_spill] sm:$0xff] %v7110_v61  ;;  %v7122_v49 = vld [vmem:[%s9683_s1 + $0x78] sm:$0xff]  ;;  %v7128_v1 = vld [vmem:[%s9683_s1 + $0x60] sm:$0xff] }
 0x449   :  { %10908 = vst [vmem:[#allocation13_spill] sm:$0xff] %v7122_v49  ;;  %10909 = vst [vmem:[#allocation14_spill] sm:$0xff] %v7128_v1 }
 0x44a   :  { %3294 = vtanh.f32 %v6830_v59 }
 0x457   :  { %v3295_v8 = vpop.eup %3294 }
 0x458   :  { %v6833_v9 = vmul.f32 %v3295_v8, %v1479_v6  ;;  %v7146_v6 = vld [vmem:[%s9683_s1 + $0x58] sm:$0xff]  ;;  %v7152_v8 = vld [vmem:[%s9683_s1 + $0x40] sm:$0xff] }
 0x459   :  { %10912 = vst [vmem:[#allocation17_spill] sm:$0xff] %v7146_v6  ;;  %10913 = vst [vmem:[#allocation18_spill] sm:$0xff] %v7152_v8 }
 0x45a   :  { %1550 = vmatmul.mubr.f32.vlgmr.msra.gmra.mxu0 %v6833_v9  ;;  %1621 = vmatmul.mubr.f32.vlgmr.msra.gmra.mxu1 %v6833_v9 }
 0x45b   :  { %1648 = vmatpush1.msra.mxu0 %v6840_v10  ;;  %1719 = vmatpush1.msra.mxu1 %v6846_v20 }
 0x45c   :  { %1649 = vmatprep.subr.mxu0 %v6852_v11  ;;  %1720 = vmatprep.subr.mxu1 %v6858_v12 }
 0x45d   :  { %1650 = vmatpush1.msra.mxu0 %v6864_v13  ;;  %1721 = vmatpush1.msra.mxu1 %v6870_v15 }
 0x45e   :  { %1651 = vmatprep.subr.mxu0 %v6876_v16  ;;  %1722 = vmatprep.subr.mxu1 %v6882_v19 }
 0x45f   :  { %1652 = vmatpush1.msra.mxu0 %v6888_v27  ;;  %1723 = vmatpush1.msra.mxu1 %v6894_v26 }
 0x460   :  { %1653 = vmatprep.subr.mxu0 %v6900_v43  ;;  %1724 = vmatprep.subr.mxu1 %v6906_v33 }
 0x461   :  { %1654 = vmatpush1.msra.mxu0 %v6912_v23  ;;  %1725 = vmatpush1.msra.mxu1 %v6918_v36 }
 0x462   :  { %1655 = vmatprep.subr.mxu0 %v6924_v22  ;;  %1726 = vmatprep.subr.mxu1 %v6930_v21 }
 0x463   :  { %1656 = vmatpush1.msra.mxu0 %v6936_v37  ;;  %1727 = vmatpush1.msra.mxu1 %v6942_v24 }
 0x464   :  { %1657 = vmatprep.subr.mxu0 %v6948_v62  ;;  %1728 = vmatprep.subr.mxu1 %v6954_v25 }
 0x465   :  { %1658 = vmatpush1.msra.mxu0 %v6960_v35  ;;  %1729 = vmatpush1.msra.mxu1 %v6966_v18 }
 0x466   :  { %1659 = vmatprep.subr.mxu0 %v6972_v34  ;;  %1730 = vmatprep.subr.mxu1 %v6978_v31 }
 0x467   :  { %1660 = vmatpush1.msra.mxu0 %v6984_v2  ;;  %1731 = vmatpush1.msra.mxu1 %v6990_v29 }
 0x468   :  { %1661 = vmatprep.subr.mxu0 %v6996_v0  ;;  %1732 = vmatprep.subr.mxu1 %v7002_v39 }
 0x469   :  { %1662 = vmatpush1.msra.mxu0 %v7008_v28  ;;  %1733 = vmatpush1.msra.mxu1 %v7014_v40 }
 0x46a   :  { %1663 = vmatprep.subr.mxu0 %v7020_v41  ;;  %1734 = vmatprep.subr.mxu1 %v7026_v42 }
 0x46b   :  { %1664 = vmatpush1.msra.mxu0 %v7032_v44  ;;  %1735 = vmatpush1.msra.mxu1 %v7038_v45 }
 0x46c   :  { %1665 = vmatprep.subr.mxu0 %v7044_v46  ;;  %1736 = vmatprep.subr.mxu1 %v7050_v47 }
 0x46d   :  { %1666 = vmatpush1.msra.mxu0 %v7056_v48  ;;  %1737 = vmatpush1.msra.mxu1 %v7062_v53 }
 0x46e   :  { %1667 = vmatprep.subr.mxu0 %v7068_v56  ;;  %1738 = vmatprep.subr.mxu1 %v7074_v60 }
 0x46f   :  { %1668 = vmatpush1.msra.mxu0 %v7080_v54  ;;  %1739 = vmatpush1.msra.mxu1 %v7086_v57 }
 0x470   :  { %1669 = vmatprep.subr.mxu0 %v7092_v52  ;;  %1740 = vmatprep.subr.mxu1 %v7098_v63 }
 0x471   :  { %1670 = vmatpush1.msra.mxu0 %v7104_v51  ;;  %1741 = vmatpush1.msra.mxu1 %v7110_v61 }
 0x472   :  { %1671 = vmatprep.subr.mxu0 %v7116_v50  ;;  %1742 = vmatprep.subr.mxu1 %v7122_v49 }
 0x473   :  { %1672 = vmatpush1.msra.mxu0 %v7128_v1  ;;  %1743 = vmatpush1.msra.mxu1 %v7134_v55  ;;  %v7158_v55 = vld [vmem:[%s9683_s1 + $0x50] sm:$0xff] }
 0x474   :  { %1673 = vmatprep.subr.mxu0 %v7140_v3  ;;  %1744 = vmatprep.subr.mxu1 %v7146_v6  ;;  %10914 = vst [vmem:[#allocation19_spill] sm:$0xff] %v7158_v55  ;;  %v7164_v3 = vld [vmem:[%s9683_s1 + $0x28] sm:$0xff]  ;;  %v7170_v6 = vld [vmem:[%s9683_s1 + $0x38] sm:$0xff] }
 0x475   :  { %1674 = vmatpush1.msra.mxu0 %v7152_v8  ;;  %1745 = vmatpush1.msra.mxu1 %v7158_v55  ;;  %10915 = vst [vmem:[#allocation20_spill] sm:$0xff] %v7164_v3  ;;  %10916 = vst [vmem:[#allocation21_spill] sm:$0xff] %v7170_v6  ;;  %v7176_v8 = vld [vmem:[%s9683_s1 + $0x20] sm:$0xff]  ;;  %v7182_v55 = vld [vmem:[%s9683_s1 + $0x30] sm:$0xff] }
 0x476   :  { %1675 = vmatprep.subr.mxu0 %v7164_v3  ;;  %1746 = vmatprep.subr.mxu1 %v7170_v6  ;;  %10917 = vst [vmem:[#allocation22_spill] sm:$0xff] %v7176_v8  ;;  %10918 = vst [vmem:[#allocation23_spill] sm:$0xff] %v7182_v55  ;;  %v7188_v3 = vld [vmem:[%s9683_s1 + $0x8] sm:$0xff]  ;;  %v7194_v6 = vld [vmem:[%s9683_s1 + $0x18] sm:$0xff] }
 0x477   :  { %1676 = vmatpush1.msra.mxu0 %v7176_v8  ;;  %1747 = vmatpush1.msra.mxu1 %v7182_v55  ;;  %10919 = vst [vmem:[#allocation24_spill] sm:$0xff] %v7188_v3  ;;  %10920 = vst [vmem:[#allocation25_spill] sm:$0xff] %v7194_v6  ;;  %v7200_v8 = vld [vmem:[%s9683_s1] sm:$0xff] }
 0x478   :  { %1677 = vmatprep.subr.mxu0 %v7188_v3  ;;  %1748 = vmatprep.subr.mxu1 %v7194_v6  ;;  %10921 = vst [vmem:[#allocation26_spill] sm:$0xff] %v7200_v8  ;;  %v7207_v3 = vld [vmem:[%s9683_s1 + $0x10] sm:$0xff]  ;;  %v7216_v6 = vld [vmem:[%s9684_s2 + $0x1e8] sm:$0xff] }
 0x479   :  { %1678 = vmatpush1.msra.mxu0 %v7200_v8  ;;  %1711 = vmatprep.mubr.f32.mxu0 %v10769_v58  ;;  %10922 = vst [vmem:[#allocation27_spill] sm:$0xff] %v7207_v3  ;;  %10923 = vst [vmem:[#allocation28_spill] sm:$0xff] %v7216_v6  ;;  %v7222_v8 = vld [vmem:[%s9684_s2 + $0x1f8] sm:$0xff] }
 0x47a   :  { %1749 = vmatpush1.msra.mxu1 %v7207_v3  ;;  %1782 = vmatprep.mubr.f32.mxu1 %v10769_v58  ;;  %10924 = vst [vmem:[#allocation29_spill] sm:$0xff] %v7222_v8  ;;  %v7228_v3 = vld [vmem:[%s9684_s2 + $0x1e0] sm:$0xff] }
 0x47b   :  { %1712 = vmatmul.mubr.f32.vlgmr.msra.gmra.mxu0 %v6833_v9  ;;  %1783 = vmatmul.mubr.f32.vlgmr.msra.gmra.mxu1 %v6833_v9  ;;  %10925 = vst [vmem:[#allocation30_spill] sm:$0xff] %v7228_v3  ;;  %v7234_v9 = vld [vmem:[%s9684_s2 + $0x1f0] sm:$0xff] }
 0x47c   :  { %1837 = vmatprep.subr.mxu0 %v7216_v6  ;;  %1908 = vmatprep.subr.mxu1 %v7222_v8  ;;  %10926 = vst [vmem:[#allocation31_spill] sm:$0xff] %v7234_v9  ;;  %v7240_v6 = vld [vmem:[%s9684_s2 + $0x1c8] sm:$0xff]  ;;  %v7246_v8 = vld [vmem:[%s9684_s2 + $0x1d8] sm:$0xff] }
 0x47d   :  { %1838 = vmatpush1.msra.mxu0 %v7228_v3  ;;  %1909 = vmatpush1.msra.mxu1 %v7234_v9  ;;  %10927 = vst [vmem:[#allocation32_spill] sm:$0xff] %v7240_v6  ;;  %10928 = vst [vmem:[#allocation33_spill] sm:$0xff] %v7246_v8  ;;  %v7252_v3 = vld [vmem:[%s9684_s2 + $0x1c0] sm:$0xff]  ;;  %v7258_v9 = vld [vmem:[%s9684_s2 + $0x1d0] sm:$0xff] }
 0x47e   :  { %1839 = vmatprep.subr.mxu0 %v7240_v6  ;;  %1910 = vmatprep.subr.mxu1 %v7246_v8  ;;  %10929 = vst [vmem:[#allocation34_spill] sm:$0xff] %v7252_v3  ;;  %10930 = vst [vmem:[#allocation35_spill] sm:$0xff] %v7258_v9  ;;  %v7264_v6 = vld [vmem:[%s9684_s2 + $0x1a8] sm:$0xff]  ;;  %v7270_v8 = vld [vmem:[%s9684_s2 + $0x1b8] sm:$0xff] }
 0x47f   :  { %1840 = vmatpush1.msra.mxu0 %v7252_v3  ;;  %1911 = vmatpush1.msra.mxu1 %v7258_v9  ;;  %10931 = vst [vmem:[#allocation36_spill] sm:$0xff] %v7264_v6  ;;  %10932 = vst [vmem:[#allocation37_spill] sm:$0xff] %v7270_v8  ;;  %v7276_v3 = vld [vmem:[%s9684_s2 + $0x1a0] sm:$0xff]  ;;  %v7282_v9 = vld [vmem:[%s9684_s2 + $0x1b0] sm:$0xff] }
 0x480   :  { %1841 = vmatprep.subr.mxu0 %v7264_v6  ;;  %1912 = vmatprep.subr.mxu1 %v7270_v8  ;;  %10933 = vst [vmem:[#allocation38_spill] sm:$0xff] %v7276_v3  ;;  %10934 = vst [vmem:[#allocation39_spill] sm:$0xff] %v7282_v9  ;;  %v7288_v6 = vld [vmem:[%s9684_s2 + $0x188] sm:$0xff]  ;;  %v7294_v8 = vld [vmem:[%s9684_s2 + $0x198] sm:$0xff] }
 0x481   :  { %1842 = vmatpush1.msra.mxu0 %v7276_v3  ;;  %1913 = vmatpush1.msra.mxu1 %v7282_v9  ;;  %10935 = vst [vmem:[#allocation40_spill] sm:$0xff] %v7288_v6  ;;  %10936 = vst [vmem:[#allocation41_spill] sm:$0xff] %v7294_v8  ;;  %v7300_v3 = vld [vmem:[%s9684_s2 + $0x180] sm:$0xff]  ;;  %v7306_v9 = vld [vmem:[%s9684_s2 + $0x190] sm:$0xff] }
 0x482   :  { %1843 = vmatprep.subr.mxu0 %v7288_v6  ;;  %1914 = vmatprep.subr.mxu1 %v7294_v8  ;;  %10937 = vst [vmem:[#allocation42_spill] sm:$0xff] %v7300_v3  ;;  %10938 = vst [vmem:[#allocation43_spill] sm:$0xff] %v7306_v9  ;;  %v7312_v6 = vld [vmem:[%s9684_s2 + $0x168] sm:$0xff]  ;;  %v7318_v8 = vld [vmem:[%s9684_s2 + $0x178] sm:$0xff] }
 0x483   :  { %1844 = vmatpush1.msra.mxu0 %v7300_v3  ;;  %1915 = vmatpush1.msra.mxu1 %v7306_v9  ;;  %10939 = vst [vmem:[#allocation44_spill] sm:$0xff] %v7312_v6  ;;  %10940 = vst [vmem:[#allocation45_spill] sm:$0xff] %v7318_v8  ;;  %v7324_v3 = vld [vmem:[%s9684_s2 + $0x160] sm:$0xff]  ;;  %v7330_v9 = vld [vmem:[%s9684_s2 + $0x170] sm:$0xff] }
 0x484   :  { %1845 = vmatprep.subr.mxu0 %v7312_v6  ;;  %1916 = vmatprep.subr.mxu1 %v7318_v8  ;;  %10941 = vst [vmem:[#allocation46_spill] sm:$0xff] %v7324_v3  ;;  %10942 = vst [vmem:[#allocation47_spill] sm:$0xff] %v7330_v9  ;;  %v7336_v6 = vld [vmem:[%s9684_s2 + $0x148] sm:$0xff]  ;;  %v7342_v8 = vld [vmem:[%s9684_s2 + $0x158] sm:$0xff] }
 0x485   :  { %1846 = vmatpush1.msra.mxu0 %v7324_v3  ;;  %1917 = vmatpush1.msra.mxu1 %v7330_v9  ;;  %10943 = vst [vmem:[#allocation48_spill] sm:$0xff] %v7336_v6  ;;  %10944 = vst [vmem:[#allocation49_spill] sm:$0xff] %v7342_v8  ;;  %v7348_v3 = vld [vmem:[%s9684_s2 + $0x140] sm:$0xff]  ;;  %v7354_v9 = vld [vmem:[%s9684_s2 + $0x150] sm:$0xff] }
 0x486   :  { %1847 = vmatprep.subr.mxu0 %v7336_v6  ;;  %1918 = vmatprep.subr.mxu1 %v7342_v8  ;;  %10945 = vst [vmem:[#allocation50_spill] sm:$0xff] %v7348_v3  ;;  %10946 = vst [vmem:[#allocation51_spill] sm:$0xff] %v7354_v9  ;;  %v7360_v6 = vld [vmem:[%s9684_s2 + $0x128] sm:$0xff]  ;;  %v7366_v8 = vld [vmem:[%s9684_s2 + $0x138] sm:$0xff] }
 0x487   :  { %1848 = vmatpush1.msra.mxu0 %v7348_v3  ;;  %1919 = vmatpush1.msra.mxu1 %v7354_v9  ;;  %10947 = vst [vmem:[#allocation52_spill] sm:$0xff] %v7360_v6  ;;  %10948 = vst [vmem:[#allocation53_spill] sm:$0xff] %v7366_v8  ;;  %v7372_v3 = vld [vmem:[%s9684_s2 + $0x120] sm:$0xff]  ;;  %v7378_v9 = vld [vmem:[%s9684_s2 + $0x130] sm:$0xff] }
 0x488   :  { %1849 = vmatprep.subr.mxu0 %v7360_v6  ;;  %1920 = vmatprep.subr.mxu1 %v7366_v8  ;;  %10949 = vst [vmem:[#allocation54_spill] sm:$0xff] %v7372_v3  ;;  %10950 = vst [vmem:[#allocation55_spill] sm:$0xff] %v7378_v9  ;;  %v7384_v6 = vld [vmem:[%s9684_s2 + $0x108] sm:$0xff]  ;;  %v7390_v8 = vld [vmem:[%s9684_s2 + $0x118] sm:$0xff] }
 0x489   :  { %1850 = vmatpush1.msra.mxu0 %v7372_v3  ;;  %1921 = vmatpush1.msra.mxu1 %v7378_v9  ;;  %10951 = vst [vmem:[#allocation56_spill] sm:$0xff] %v7384_v6  ;;  %10952 = vst [vmem:[#allocation57_spill] sm:$0xff] %v7390_v8  ;;  %v7396_v3 = vld [vmem:[%s9684_s2 + $0x100] sm:$0xff]  ;;  %v7402_v9 = vld [vmem:[%s9684_s2 + $0x110] sm:$0xff] }
 0x48a   :  { %1851 = vmatprep.subr.mxu0 %v7384_v6  ;;  %1922 = vmatprep.subr.mxu1 %v7390_v8  ;;  %10953 = vst [vmem:[#allocation58_spill] sm:$0xff] %v7396_v3  ;;  %10954 = vst [vmem:[#allocation59_spill] sm:$0xff] %v7402_v9  ;;  %v7408_v6 = vld [vmem:[%s9684_s2 + $0xe8] sm:$0xff]  ;;  %v7414_v8 = vld [vmem:[%s9684_s2 + $0xf8] sm:$0xff] }
 0x48b   :  { %1852 = vmatpush1.msra.mxu0 %v7396_v3  ;;  %1923 = vmatpush1.msra.mxu1 %v7402_v9  ;;  %10955 = vst [vmem:[#allocation60_spill] sm:$0xff] %v7408_v6  ;;  %10956 = vst [vmem:[#allocation61_spill] sm:$0xff] %v7414_v8  ;;  %v7420_v3 = vld [vmem:[%s9684_s2 + $0xe0] sm:$0xff]  ;;  %v7426_v9 = vld [vmem:[%s9684_s2 + $0xf0] sm:$0xff] }
 0x48c   :  { %1853 = vmatprep.subr.mxu0 %v7408_v6  ;;  %1924 = vmatprep.subr.mxu1 %v7414_v8  ;;  %10957 = vst [vmem:[#allocation62_spill] sm:$0xff] %v7420_v3  ;;  %10958 = vst [vmem:[#allocation63_spill] sm:$0xff] %v7426_v9  ;;  %v7432_v6 = vld [vmem:[%s9684_s2 + $0xc8] sm:$0xff]  ;;  %v7438_v8 = vld [vmem:[%s9684_s2 + $0xd8] sm:$0xff] }
 0x48d   :  { %1854 = vmatpush1.msra.mxu0 %v7420_v3  ;;  %1925 = vmatpush1.msra.mxu1 %v7426_v9  ;;  %10959 = vst [vmem:[#allocation64_spill] sm:$0xff] %v7432_v6  ;;  %10960 = vst [vmem:[#allocation65_spill] sm:$0xff] %v7438_v8  ;;  %v7444_v3 = vld [vmem:[%s9684_s2 + $0xc0] sm:$0xff]  ;;  %v7450_v9 = vld [vmem:[%s9684_s2 + $0xd0] sm:$0xff] }
 0x48e   :  { %1855 = vmatprep.subr.mxu0 %v7432_v6  ;;  %1926 = vmatprep.subr.mxu1 %v7438_v8  ;;  %10961 = vst [vmem:[#allocation66_spill] sm:$0xff] %v7444_v3  ;;  %10962 = vst [vmem:[#allocation67_spill] sm:$0xff] %v7450_v9  ;;  %v7456_v6 = vld [vmem:[%s9684_s2 + $0xa8] sm:$0xff]  ;;  %v7462_v8 = vld [vmem:[%s9684_s2 + $0xb8] sm:$0xff] }
 0x48f   :  { %1856 = vmatpush1.msra.mxu0 %v7444_v3  ;;  %1927 = vmatpush1.msra.mxu1 %v7450_v9  ;;  %10963 = vst [vmem:[#allocation68_spill] sm:$0xff] %v7456_v6  ;;  %10964 = vst [vmem:[#allocation69_spill] sm:$0xff] %v7462_v8  ;;  %v7468_v3 = vld [vmem:[%s9684_s2 + $0xa0] sm:$0xff]  ;;  %v7474_v9 = vld [vmem:[%s9684_s2 + $0xb0] sm:$0xff] }
 0x490   :  { %1857 = vmatprep.subr.mxu0 %v7456_v6  ;;  %1928 = vmatprep.subr.mxu1 %v7462_v8  ;;  %10965 = vst [vmem:[#allocation70_spill] sm:$0xff] %v7468_v3  ;;  %10966 = vst [vmem:[#allocation71_spill] sm:$0xff] %v7474_v9  ;;  %v7480_v6 = vld [vmem:[%s9684_s2 + $0x88] sm:$0xff]  ;;  %v7486_v8 = vld [vmem:[%s9684_s2 + $0x98] sm:$0xff] }
 0x491   :  { %1858 = vmatpush1.msra.mxu0 %v7468_v3  ;;  %1929 = vmatpush1.msra.mxu1 %v7474_v9  ;;  %10967 = vst [vmem:[#allocation72_spill] sm:$0xff] %v7480_v6  ;;  %10968 = vst [vmem:[#allocation73_spill] sm:$0xff] %v7486_v8  ;;  %v7492_v3 = vld [vmem:[%s9684_s2 + $0x80] sm:$0xff]  ;;  %v7498_v9 = vld [vmem:[%s9684_s2 + $0x90] sm:$0xff] }
 0x492   :  { %1859 = vmatprep.subr.mxu0 %v7480_v6  ;;  %1930 = vmatprep.subr.mxu1 %v7486_v8  ;;  %10969 = vst [vmem:[#allocation74_spill] sm:$0xff] %v7492_v3  ;;  %10970 = vst [vmem:[#allocation75_spill] sm:$0xff] %v7498_v9  ;;  %v7504_v6 = vld [vmem:[%s9684_s2 + $0x68] sm:$0xff]  ;;  %v7510_v8 = vld [vmem:[%s9684_s2 + $0x78] sm:$0xff] }
 0x493   :  { %1860 = vmatpush1.msra.mxu0 %v7492_v3  ;;  %1931 = vmatpush1.msra.mxu1 %v7498_v9  ;;  %10971 = vst [vmem:[#allocation76_spill] sm:$0xff] %v7504_v6  ;;  %10972 = vst [vmem:[#allocation77_spill] sm:$0xff] %v7510_v8  ;;  %v7516_v3 = vld [vmem:[%s9684_s2 + $0x60] sm:$0xff]  ;;  %v7522_v9 = vld [vmem:[%s9684_s2 + $0x70] sm:$0xff] }
 0x494   :  { %1861 = vmatprep.subr.mxu0 %v7504_v6  ;;  %1932 = vmatprep.subr.mxu1 %v7510_v8  ;;  %10973 = vst [vmem:[#allocation78_spill] sm:$0xff] %v7516_v3  ;;  %10974 = vst [vmem:[#allocation79_spill] sm:$0xff] %v7522_v9  ;;  %v7528_v6 = vld [vmem:[%s9684_s2 + $0x48] sm:$0xff]  ;;  %v7534_v8 = vld [vmem:[%s9684_s2 + $0x58] sm:$0xff] }
 0x495   :  { %1862 = vmatpush1.msra.mxu0 %v7516_v3  ;;  %1933 = vmatpush1.msra.mxu1 %v7522_v9  ;;  %10975 = vst [vmem:[#allocation80_spill] sm:$0xff] %v7528_v6  ;;  %10976 = vst [vmem:[#allocation81_spill] sm:$0xff] %v7534_v8  ;;  %v7540_v3 = vld [vmem:[%s9684_s2 + $0x40] sm:$0xff]  ;;  %v7546_v9 = vld [vmem:[%s9684_s2 + $0x50] sm:$0xff] }
 0x496   :  { %1863 = vmatprep.subr.mxu0 %v7528_v6  ;;  %1934 = vmatprep.subr.mxu1 %v7534_v8  ;;  %10977 = vst [vmem:[#allocation82_spill] sm:$0xff] %v7540_v3  ;;  %10978 = vst [vmem:[#allocation83_spill] sm:$0xff] %v7546_v9  ;;  %v7552_v6 = vld [vmem:[%s9684_s2 + $0x28] sm:$0xff]  ;;  %v7558_v8 = vld [vmem:[%s9684_s2 + $0x38] sm:$0xff] }
 0x497   :  { %1864 = vmatpush1.msra.mxu0 %v7540_v3  ;;  %1935 = vmatpush1.msra.mxu1 %v7546_v9  ;;  %10979 = vst [vmem:[#allocation84_spill] sm:$0xff] %v7552_v6  ;;  %10980 = vst [vmem:[#allocation85_spill] sm:$0xff] %v7558_v8  ;;  %v7564_v3 = vld [vmem:[%s9684_s2 + $0x20] sm:$0xff]  ;;  %v7570_v9 = vld [vmem:[%s9684_s2 + $0x30] sm:$0xff] }
 0x498   :  { %1865 = vmatprep.subr.mxu0 %v7552_v6  ;;  %1936 = vmatprep.subr.mxu1 %v7558_v8  ;;  %10981 = vst [vmem:[#allocation86_spill] sm:$0xff] %v7564_v3  ;;  %10982 = vst [vmem:[#allocation87_spill] sm:$0xff] %v7570_v9  ;;  %v7576_v6 = vld [vmem:[%s9684_s2 + $0x8] sm:$0xff]  ;;  %v7582_v8 = vld [vmem:[%s9684_s2 + $0x18] sm:$0xff] }
 0x499   :  { %1866 = vmatpush1.msra.mxu0 %v7564_v3  ;;  %1937 = vmatpush1.msra.mxu1 %v7570_v9  ;;  %10983 = vst [vmem:[#allocation88_spill] sm:$0xff] %v7576_v6  ;;  %10984 = vst [vmem:[#allocation89_spill] sm:$0xff] %v7582_v8  ;;  %v7588_v3 = vld [vmem:[%s9684_s2] sm:$0xff]  ;;  %v7594_v9 = vld [vmem:[%s9684_s2 + $0x10] sm:$0xff] }
 0x49a   :  { %1867 = vmatprep.subr.mxu0 %v7576_v6  ;;  %1938 = vmatprep.subr.mxu1 %v7582_v8  ;;  %10985 = vst [vmem:[#allocation90_spill] sm:$0xff] %v7588_v3  ;;  %10986 = vst [vmem:[#allocation91_spill] sm:$0xff] %v7594_v9  ;;  %v7600_v6 = vld [vmem:[%s9684_s2 + $0x3e8] sm:$0xff]  ;;  %v7606_v8 = vld [vmem:[%s9684_s2 + $0x3f8] sm:$0xff] }
 0x49b   :  { %1868 = vmatpush1.msra.mxu0 %v7588_v3  ;;  %1939 = vmatpush1.msra.mxu1 %v7594_v9  ;;  %10987 = vst [vmem:[#allocation92_spill] sm:$0xff] %v7600_v6  ;;  %10988 = vst [vmem:[#allocation93_spill] sm:$0xff] %v7606_v8  ;;  %v7612_v3 = vld [vmem:[%s9684_s2 + $0x3e0] sm:$0xff]  ;;  %v7618_v9 = vld [vmem:[%s9684_s2 + $0x3f0] sm:$0xff] }
 0x49c   :  { %1869 = vmatprep.subr.mxu0 %v7600_v6  ;;  %1940 = vmatprep.subr.mxu1 %v7606_v8  ;;  %10989 = vst [vmem:[#allocation94_spill] sm:$0xff] %v7612_v3  ;;  %10990 = vst [vmem:[#allocation95_spill] sm:$0xff] %v7618_v9  ;;  %v7624_v6 = vld [vmem:[%s9684_s2 + $0x3c8] sm:$0xff]  ;;  %v7630_v8 = vld [vmem:[%s9684_s2 + $0x3d8] sm:$0xff] }
 0x49d   :  { %1870 = vmatpush2.msra.mxu0 %v7612_v3  ;;  %1941 = vmatpush2.msra.mxu1 %v7618_v9  ;;  %10991 = vst [vmem:[#allocation96_spill] sm:$0xff] %v7624_v6  ;;  %10992 = vst [vmem:[#allocation97_spill] sm:$0xff] %v7630_v8  ;;  %v7636_v3 = vld [vmem:[%s9684_s2 + $0x3c0] sm:$0xff]  ;;  %v7642_v9 = vld [vmem:[%s9684_s2 + $0x3d0] sm:$0xff] }
 0x49e   :  { %1871 = vmatprep.subr.mxu0 %v7624_v6  ;;  %1942 = vmatprep.subr.mxu1 %v7630_v8  ;;  %10993 = vst [vmem:[#allocation98_spill] sm:$0xff] %v7636_v3  ;;  %10994 = vst [vmem:[#allocation99_spill] sm:$0xff] %v7642_v9  ;;  %v7648_v6 = vld [vmem:[%s9684_s2 + $0x3a8] sm:$0xff]  ;;  %v7654_v8 = vld [vmem:[%s9684_s2 + $0x3b8] sm:$0xff] }
 0x49f   :  { %1872 = vmatpush2.msra.mxu0 %v7636_v3  ;;  %1943 = vmatpush2.msra.mxu1 %v7642_v9  ;;  %10995 = vst [vmem:[#allocation100_spill] sm:$0xff] %v7648_v6  ;;  %10996 = vst [vmem:[#allocation101_spill] sm:$0xff] %v7654_v8  ;;  %v7660_v3 = vld [vmem:[%s9684_s2 + $0x3a0] sm:$0xff]  ;;  %v7666_v9 = vld [vmem:[%s9684_s2 + $0x3b0] sm:$0xff] }
 0x4a0   :  { %1873 = vmatprep.subr.mxu0 %v7648_v6  ;;  %1944 = vmatprep.subr.mxu1 %v7654_v8  ;;  %10997 = vst [vmem:[#allocation102_spill] sm:$0xff] %v7660_v3  ;;  %10998 = vst [vmem:[#allocation103_spill] sm:$0xff] %v7666_v9  ;;  %v7672_v6 = vld [vmem:[%s9684_s2 + $0x388] sm:$0xff]  ;;  %v7678_v8 = vld [vmem:[%s9684_s2 + $0x398] sm:$0xff] }
 0x4a1   :  { %1874 = vmatpush2.msra.mxu0 %v7660_v3  ;;  %1945 = vmatpush2.msra.mxu1 %v7666_v9  ;;  %10999 = vst [vmem:[#allocation104_spill] sm:$0xff] %v7672_v6  ;;  %11000 = vst [vmem:[#allocation105_spill] sm:$0xff] %v7678_v8  ;;  %v7684_v3 = vld [vmem:[%s9684_s2 + $0x380] sm:$0xff]  ;;  %v7690_v9 = vld [vmem:[%s9684_s2 + $0x390] sm:$0xff] }
 0x4a2   :  { %1875 = vmatprep.subr.mxu0 %v7672_v6  ;;  %1946 = vmatprep.subr.mxu1 %v7678_v8  ;;  %11001 = vst [vmem:[#allocation106_spill] sm:$0xff] %v7684_v3  ;;  %11002 = vst [vmem:[#allocation107_spill] sm:$0xff] %v7690_v9  ;;  %v7696_v6 = vld [vmem:[%s9684_s2 + $0x368] sm:$0xff]  ;;  %v7702_v8 = vld [vmem:[%s9684_s2 + $0x378] sm:$0xff] }
 0x4a3   :  { %1876 = vmatpush2.msra.mxu0 %v7684_v3  ;;  %1947 = vmatpush2.msra.mxu1 %v7690_v9  ;;  %11003 = vst [vmem:[#allocation108_spill] sm:$0xff] %v7696_v6  ;;  %11004 = vst [vmem:[#allocation109_spill] sm:$0xff] %v7702_v8  ;;  %v7708_v3 = vld [vmem:[%s9684_s2 + $0x360] sm:$0xff]  ;;  %v7714_v9 = vld [vmem:[%s9684_s2 + $0x370] sm:$0xff] }
 0x4a4   :  { %1877 = vmatprep.subr.mxu0 %v7696_v6  ;;  %1948 = vmatprep.subr.mxu1 %v7702_v8  ;;  %11005 = vst [vmem:[#allocation110_spill] sm:$0xff] %v7708_v3  ;;  %11006 = vst [vmem:[#allocation111_spill] sm:$0xff] %v7714_v9  ;;  %v7720_v6 = vld [vmem:[%s9684_s2 + $0x348] sm:$0xff]  ;;  %v7726_v8 = vld [vmem:[%s9684_s2 + $0x358] sm:$0xff] }
 0x4a5   :  { %1878 = vmatpush2.msra.mxu0 %v7708_v3  ;;  %1949 = vmatpush2.msra.mxu1 %v7714_v9  ;;  %11007 = vst [vmem:[#allocation112_spill] sm:$0xff] %v7720_v6  ;;  %11008 = vst [vmem:[#allocation113_spill] sm:$0xff] %v7726_v8  ;;  %v7732_v3 = vld [vmem:[%s9684_s2 + $0x340] sm:$0xff]  ;;  %v7738_v9 = vld [vmem:[%s9684_s2 + $0x350] sm:$0xff] }
 0x4a6   :  { %1879 = vmatprep.subr.mxu0 %v7720_v6  ;;  %1950 = vmatprep.subr.mxu1 %v7726_v8  ;;  %11009 = vst [vmem:[#allocation114_spill] sm:$0xff] %v7732_v3  ;;  %11010 = vst [vmem:[#allocation115_spill] sm:$0xff] %v7738_v9  ;;  %v7744_v6 = vld [vmem:[%s9684_s2 + $0x328] sm:$0xff]  ;;  %v7750_v8 = vld [vmem:[%s9684_s2 + $0x338] sm:$0xff] }
 0x4a7   :  { %1880 = vmatpush2.msra.mxu0 %v7732_v3  ;;  %1951 = vmatpush2.msra.mxu1 %v7738_v9  ;;  %11011 = vst [vmem:[#allocation116_spill] sm:$0xff] %v7744_v6  ;;  %11012 = vst [vmem:[#allocation117_spill] sm:$0xff] %v7750_v8  ;;  %v7756_v3 = vld [vmem:[%s9684_s2 + $0x320] sm:$0xff]  ;;  %v7762_v9 = vld [vmem:[%s9684_s2 + $0x330] sm:$0xff] }
 0x4a8   :  { %1881 = vmatprep.subr.mxu0 %v7744_v6  ;;  %1952 = vmatprep.subr.mxu1 %v7750_v8  ;;  %11013 = vst [vmem:[#allocation118_spill] sm:$0xff] %v7756_v3  ;;  %11014 = vst [vmem:[#allocation119_spill] sm:$0xff] %v7762_v9  ;;  %v7768_v6 = vld [vmem:[%s9684_s2 + $0x308] sm:$0xff]  ;;  %v7774_v8 = vld [vmem:[%s9684_s2 + $0x318] sm:$0xff] }
 0x4a9   :  { %1882 = vmatpush2.msra.mxu0 %v7756_v3  ;;  %1953 = vmatpush2.msra.mxu1 %v7762_v9  ;;  %11015 = vst [vmem:[#allocation120_spill] sm:$0xff] %v7768_v6  ;;  %11016 = vst [vmem:[#allocation121_spill] sm:$0xff] %v7774_v8  ;;  %v7780_v3 = vld [vmem:[%s9684_s2 + $0x300] sm:$0xff]  ;;  %v7786_v9 = vld [vmem:[%s9684_s2 + $0x310] sm:$0xff] }
 0x4aa   :  { %1883 = vmatprep.subr.mxu0 %v7768_v6  ;;  %1954 = vmatprep.subr.mxu1 %v7774_v8  ;;  %11017 = vst [vmem:[#allocation122_spill] sm:$0xff] %v7780_v3  ;;  %11018 = vst [vmem:[#allocation123_spill] sm:$0xff] %v7786_v9  ;;  %v7792_v6 = vld [vmem:[%s9684_s2 + $0x2e8] sm:$0xff]  ;;  %v7798_v8 = vld [vmem:[%s9684_s2 + $0x2f8] sm:$0xff] }
 0x4ab   :  { %1884 = vmatpush2.msra.mxu0 %v7780_v3  ;;  %1955 = vmatpush2.msra.mxu1 %v7786_v9  ;;  %11019 = vst [vmem:[#allocation124_spill] sm:$0xff] %v7792_v6  ;;  %11020 = vst [vmem:[#allocation125_spill] sm:$0xff] %v7798_v8  ;;  %v7804_v3 = vld [vmem:[%s9684_s2 + $0x2e0] sm:$0xff]  ;;  %v7810_v9 = vld [vmem:[%s9684_s2 + $0x2f0] sm:$0xff] }
 0x4ac   :  { %1885 = vmatprep.subr.mxu0 %v7792_v6  ;;  %1956 = vmatprep.subr.mxu1 %v7798_v8  ;;  %11021 = vst [vmem:[#allocation126_spill] sm:$0xff] %v7804_v3  ;;  %11022 = vst [vmem:[#allocation127_spill] sm:$0xff] %v7810_v9  ;;  %v7816_v6 = vld [vmem:[%s9684_s2 + $0x2c8] sm:$0xff]  ;;  %v7822_v8 = vld [vmem:[%s9684_s2 + $0x2d8] sm:$0xff] }
 0x4ad   :  { %1886 = vmatpush2.msra.mxu0 %v7804_v3  ;;  %1957 = vmatpush2.msra.mxu1 %v7810_v9  ;;  %11023 = vst [vmem:[#allocation128_spill] sm:$0xff] %v7816_v6  ;;  %11024 = vst [vmem:[#allocation129_spill] sm:$0xff] %v7822_v8  ;;  %v7828_v3 = vld [vmem:[%s9684_s2 + $0x2c0] sm:$0xff]  ;;  %v7834_v9 = vld [vmem:[%s9684_s2 + $0x2d0] sm:$0xff] }
 0x4ae   :  { %1887 = vmatprep.subr.mxu0 %v7816_v6  ;;  %1958 = vmatprep.subr.mxu1 %v7822_v8  ;;  %11025 = vst [vmem:[#allocation130_spill] sm:$0xff] %v7828_v3  ;;  %11026 = vst [vmem:[#allocation131_spill] sm:$0xff] %v7834_v9  ;;  %v7840_v6 = vld [vmem:[%s9684_s2 + $0x2a8] sm:$0xff]  ;;  %v7846_v8 = vld [vmem:[%s9684_s2 + $0x2b8] sm:$0xff] }
 0x4af   :  { %1888 = vmatpush2.msra.mxu0 %v7828_v3  ;;  %1959 = vmatpush2.msra.mxu1 %v7834_v9  ;;  %11027 = vst [vmem:[#allocation132_spill] sm:$0xff] %v7840_v6  ;;  %11028 = vst [vmem:[#allocation133_spill] sm:$0xff] %v7846_v8  ;;  %v7852_v3 = vld [vmem:[%s9684_s2 + $0x2a0] sm:$0xff]  ;;  %v7858_v9 = vld [vmem:[%s9684_s2 + $0x2b0] sm:$0xff] }
 0x4b0   :  { %1889 = vmatprep.subr.mxu0 %v7840_v6  ;;  %1960 = vmatprep.subr.mxu1 %v7846_v8  ;;  %11029 = vst [vmem:[#allocation134_spill] sm:$0xff] %v7852_v3  ;;  %11030 = vst [vmem:[#allocation135_spill] sm:$0xff] %v7858_v9  ;;  %v7864_v6 = vld [vmem:[%s9684_s2 + $0x288] sm:$0xff]  ;;  %v7870_v8 = vld [vmem:[%s9684_s2 + $0x298] sm:$0xff] }
 0x4b1   :  { %1890 = vmatpush2.msra.mxu0 %v7852_v3  ;;  %1961 = vmatpush2.msra.mxu1 %v7858_v9  ;;  %11031 = vst [vmem:[#allocation136_spill] sm:$0xff] %v7864_v6  ;;  %11032 = vst [vmem:[#allocation137_spill] sm:$0xff] %v7870_v8  ;;  %v7876_v3 = vld [vmem:[%s9684_s2 + $0x280] sm:$0xff]  ;;  %v7882_v9 = vld [vmem:[%s9684_s2 + $0x290] sm:$0xff] }
 0x4b2   :  { %1891 = vmatprep.subr.mxu0 %v7864_v6  ;;  %1962 = vmatprep.subr.mxu1 %v7870_v8  ;;  %11033 = vst [vmem:[#allocation138_spill] sm:$0xff] %v7876_v3  ;;  %11034 = vst [vmem:[#allocation139_spill] sm:$0xff] %v7882_v9  ;;  %v7888_v6 = vld [vmem:[%s9684_s2 + $0x268] sm:$0xff]  ;;  %v7894_v8 = vld [vmem:[%s9684_s2 + $0x278] sm:$0xff] }
 0x4b3   :  { %1892 = vmatpush2.msra.mxu0 %v7876_v3  ;;  %1963 = vmatpush2.msra.mxu1 %v7882_v9  ;;  %11035 = vst [vmem:[#allocation140_spill] sm:$0xff] %v7888_v6  ;;  %11036 = vst [vmem:[#allocation141_spill] sm:$0xff] %v7894_v8  ;;  %v7900_v3 = vld [vmem:[%s9684_s2 + $0x260] sm:$0xff]  ;;  %v7906_v9 = vld [vmem:[%s9684_s2 + $0x270] sm:$0xff] }
 0x4b4   :  { %1893 = vmatprep.subr.mxu0 %v7888_v6  ;;  %1964 = vmatprep.subr.mxu1 %v7894_v8  ;;  %11037 = vst [vmem:[#allocation142_spill] sm:$0xff] %v7900_v3  ;;  %11038 = vst [vmem:[#allocation143_spill] sm:$0xff] %v7906_v9  ;;  %v7912_v6 = vld [vmem:[%s9684_s2 + $0x248] sm:$0xff]  ;;  %v7918_v8 = vld [vmem:[%s9684_s2 + $0x258] sm:$0xff] }
 0x4b5   :  { %1894 = vmatpush2.msra.mxu0 %v7900_v3  ;;  %1965 = vmatpush2.msra.mxu1 %v7906_v9  ;;  %11039 = vst [vmem:[#allocation144_spill] sm:$0xff] %v7912_v6  ;;  %11040 = vst [vmem:[#allocation145_spill] sm:$0xff] %v7918_v8  ;;  %v7924_v3 = vld [vmem:[%s9684_s2 + $0x240] sm:$0xff]  ;;  %v7930_v9 = vld [vmem:[%s9684_s2 + $0x250] sm:$0xff] }
 0x4b6   :  { %1895 = vmatprep.subr.mxu0 %v7912_v6  ;;  %1966 = vmatprep.subr.mxu1 %v7918_v8  ;;  %11041 = vst [vmem:[#allocation146_spill] sm:$0xff] %v7924_v3  ;;  %11042 = vst [vmem:[#allocation147_spill] sm:$0xff] %v7930_v9  ;;  %v7936_v6 = vld [vmem:[%s9684_s2 + $0x228] sm:$0xff]  ;;  %v7942_v8 = vld [vmem:[%s9684_s2 + $0x238] sm:$0xff] }
 0x4b7   :  { %1896 = vmatpush2.msra.mxu0 %v7924_v3  ;;  %1967 = vmatpush2.msra.mxu1 %v7930_v9  ;;  %11043 = vst [vmem:[#allocation148_spill] sm:$0xff] %v7936_v6  ;;  %11044 = vst [vmem:[#allocation149_spill] sm:$0xff] %v7942_v8  ;;  %v7948_v3 = vld [vmem:[%s9684_s2 + $0x220] sm:$0xff]  ;;  %v7954_v9 = vld [vmem:[%s9684_s2 + $0x230] sm:$0xff] }
 0x4b8   :  { %1897 = vmatprep.subr.mxu0 %v7936_v6  ;;  %1968 = vmatprep.subr.mxu1 %v7942_v8  ;;  %11045 = vst [vmem:[#allocation150_spill] sm:$0xff] %v7948_v3  ;;  %11046 = vst [vmem:[#allocation152_spill] sm:$0xff] %v7954_v9  ;;  %v7960_v6 = vld [vmem:[%s9684_s2 + $0x208] sm:$0xff]  ;;  %v7966_v8 = vld [vmem:[%s9684_s2 + $0x218] sm:$0xff] }
 0x4b9   :  { %1898 = vmatpush2.msra.mxu0 %v7948_v3  ;;  %1969 = vmatpush2.msra.mxu1 %v7954_v9  ;;  %11047 = vst [vmem:[#allocation153_spill] sm:$0xff] %v7960_v6  ;;  %11048 = vst [vmem:[#allocation154_spill] sm:$0xff] %v7966_v8  ;;  %v7972_v3 = vld [vmem:[%s9684_s2 + $0x200] sm:$0xff]  ;;  %v7978_v9 = vld [vmem:[%s9684_s2 + $0x210] sm:$0xff] }
 0x4ba   :  { %1899 = vmatprep.subr.mxu0 %v7960_v6  ;;  %1970 = vmatprep.subr.mxu1 %v7966_v8  ;;  %11049 = vst [vmem:[#allocation155_spill] sm:$0xff] %v7972_v3  ;;  %11050 = vst [vmem:[#allocation156_spill] sm:$0xff] %v7978_v9 }
 0x4bb   :  { %1900 = vmatpush2.msra.mxu0 %v7972_v3  ;;  %1971 = vmatpush2.msra.mxu1 %v7978_v9 }
 0x4bc   :  { %1999 = vmatprep.subr.mxu0 %v6807_v4  ;;  %2070 = vmatprep.subr.mxu1 %v6813_v5 }
 0x51a   :  { %v1551_v6 = vpop.f32.mrf.mxu0  ;;  %v1622_v49 = vpop.f32.mrf.mxu1 }
 0x51b   :  { %v1552_v8 = vadd.f32 %v1551_v6, %v10899_v7  ;;  %v1623_v50 = vadd.f32 %v1622_v49, %v10900_v14 }
 0x51c   :  { %v1553_v58 = vpop.f32.mrf.mxu0  ;;  %v1624_v61 = vpop.f32.mrf.mxu1 }
 0x51d   :  { %v1627_v55 = vmul.f32 0.5, %v1552_v8  ;;  %v1554_v1 = vadd.f32 %v1553_v58, %v5416_v32  ;;  %v1625_v9 = vadd.f32 %v1624_v61, %v10901_v17 }
 0x51f   :  { %3296 = vtanh.f32 %v1627_v55  ;;  %v1631_v3 = vmul.f32 0.5, %v1554_v1  ;;  %v1636_v4 = vmul.f32 0.5, %v1625_v9 }
 0x521   :  { %3298 = vtanh.f32 %v1631_v3 }
 0x522   :  { %3300 = vtanh.f32 %v1623_v50 }
 0x523   :  { %3302 = vtanh.f32 %v1636_v4 }
 0x52c   :  { %v3297_v51 = vpop.eup %3296 }
 0x52d   :  { %v1629_v5 = vmul.f32 0.5, %v3297_v51 }
 0x52e   :  { %v3299_v63 = vpop.eup %3298 }
 0x52f   :  { %v1630_v52 = vadd.f32 0.5, %v1629_v5  ;;  %v1633_v6 = vmul.f32 0.5, %v3299_v63  ;;  %v3301_v7 = vpop.eup %3300 }
 0x530   :  { %v3303_v3 = vpop.eup %3302 }
 0x531   :  { %v1634_v8 = vadd.f32 0.5, %v1633_v6  ;;  %v1641_v55 = vmul.f32 %v3301_v7, %v1630_v52  ;;  %v1638_v14 = vmul.f32 0.5, %v3303_v3  ;;  %v3165_v7 = vld [vmem:[%s9682_s0 + $0x20] sm:$0xff] }
 0x533   :  { %v1640_v58 = vmul.f32 %v1634_v8, %v6821_v30  ;;  %v1639_v52 = vadd.f32 0.5, %v1638_v14 }
 0x535   :  { %v7988_v1 = vadd.f32 %v1641_v55, %v1640_v58 }
 0x537   :  { %3304 = vtanh.f32 %v7988_v1 }
 0x53b   :  { %v1713_v49 = vpop.f32.mrf.mxu0  ;;  %v1784_v50 = vpop.f32.mrf.mxu1 }
 0x53d   :  { %v1715_v61 = vpop.f32.mrf.mxu0  ;;  %v1786_v9 = vpop.f32.mrf.mxu1 }
 0x53e   :  { %v1793_v17 = vcombine.low %v1713_v49, %v1715_v61  ;;  %v1794_v51 = vcombine.low %v1784_v50, %v1786_v9 }
 0x540   :  { %v1801_v63 = vrot.slane %v1793_v17, %v10902_v38  ;;  %v1808_v4 = vrot.slane %v1794_v51, %v10902_v38 }
 0x542   :  { %v1809_v30 = vcombine.low %v1801_v63, %v1808_v4 }
 0x544   :  { %v3305_v5 = vpop.eup %3304  ;;  %v1811_v6 = vadd.f32 %v3165_v7, %v1809_v30 }
 0x545   :  { %v1644_v8 = vmul.f32 %v3305_v5, %v1639_v52 }
 0x546   :  { %v1812_v58 = vmul.f32 0.5, %v1811_v6  ;;  %v1817_v55 = vrot.slane %v1811_v6, 2  ;;  %v1823_v50 = vrot.slane %v1811_v6, 4  ;;  %v1826_v17 = vrot.slane %v1811_v6, 6 }
 0x547   :  { %1901 = vmatprep.mubr.f32.mxu0 %v1644_v8  ;;  %1972 = vmatprep.mubr.f32.mxu1 %v1644_v8 }
 0x548   :  { %3306 = vtanh.f32 %v1812_v58  ;;  %v1819_v49 = vmul.f32 0.5, %v1817_v55  ;;  %v1828_v3 = vmul.f32 0.5, %v1826_v17  ;;  %v11097_v17 = vld [vmem:[#allocation53_spill] sm:$0xff] }
 0x54a   :  { %3308 = vtanh.f32 %v1819_v49  ;;  %v11095_v49 = vld [vmem:[#allocation51_spill] sm:$0xff] }
 0x54b   :  { %3310 = vtanh.f32 %v1823_v50  ;;  %v11096_v50 = vld [vmem:[#allocation52_spill] sm:$0xff] }
 0x54c   :  { %3312 = vtanh.f32 %v1828_v3  ;;  %v11098_v3 = vld [vmem:[#allocation54_spill] sm:$0xff] }
 0x555   :  { %v3307_v61 = vpop.eup %3306 }
 0x556   :  { %v1814_v9 = vmul.f32 0.5, %v3307_v61  ;;  %v11099_v61 = vld [vmem:[#allocation55_spill] sm:$0xff] }
 0x557   :  { %v3309_v51 = vpop.eup %3308 }
 0x558   :  { %v1815_v38 = vadd.f32 0.5, %v1814_v9  ;;  %v1821_v63 = vmul.f32 0.5, %v3309_v51  ;;  %v3311_v4 = vpop.eup %3310  ;;  %v11100_v9 = vld [vmem:[#allocation56_spill] sm:$0xff]  ;;  %v11101_v51 = vld [vmem:[#allocation57_spill] sm:$0xff] }
 0x559   :  { %v3313_v5 = vpop.eup %3312 }
 0x55a   :  { %v1822_v14 = vadd.f32 0.5, %v1821_v63  ;;  %v1833_v30 = vmul.f32 %v3311_v4, %v1815_v38  ;;  %v1830_v8 = vmul.f32 0.5, %v3313_v5  ;;  %v11051_v38 = vld [vmem:[#allocation8_spill] sm:$0xff]  ;;  %v11102_v63 = vld [vmem:[#allocation58_spill] sm:$0xff]  ;;  %v11107_v5 = vld [vmem:[#allocation63_spill] sm:$0xff] }
 0x55b   :  { %v11104_v4 = vld [vmem:[#allocation60_spill] sm:$0xff] }
 0x55c   :  { %v1832_v7 = vmul.f32 %v1822_v14, %v6830_v59  ;;  %v1831_v58 = vadd.f32 0.5, %v1830_v8  ;;  %v11052_v59 = vld [vmem:[#allocation9_spill] sm:$0xff]  ;;  %v11103_v14 = vld [vmem:[#allocation59_spill] sm:$0xff]  ;;  %v11108_v8 = vld [vmem:[#allocation64_spill] sm:$0xff] }
 0x55e   :  { %v7997_v52 = vadd.f32 %v1833_v30, %v1832_v7  ;;  %v11105_v7 = vld [vmem:[#allocation61_spill] sm:$0xff]  ;;  %v11106_v30 = vld [vmem:[#allocation62_spill] sm:$0xff] }
 0x560   :  { %3314 = vtanh.f32 %v7997_v52 }
 0x56d   :  { %v3315_v6 = vpop.eup %3314 }
 0x56e   :  { %v8000_v55 = vmul.f32 %v3315_v6, %v1831_v58  ;;  %v11109_v58 = vld [vmem:[#allocation65_spill] sm:$0xff]  ;;  %v11110_v6 = vld [vmem:[#allocation66_spill] sm:$0xff] }
 0x570   :  { %1902 = vmatmul.mubr.f32.vlgmr.msra.gmra.mxu0 %v8000_v55  ;;  %1973 = vmatmul.mubr.f32.vlgmr.msra.gmra.mxu1 %v8000_v55 }
 0x571   :  { %2000 = vmatpush1.msra.mxu0 %v6840_v10  ;;  %2071 = vmatpush1.msra.mxu1 %v6846_v20  ;;  %v11053_v10 = vld [vmem:[#allocation10_spill] sm:$0xff]  ;;  %v11054_v20 = vld [vmem:[#allocation11_spill] sm:$0xff] }
 0x572   :  { %2001 = vmatprep.subr.mxu0 %v6852_v11  ;;  %2072 = vmatprep.subr.mxu1 %v6858_v12  ;;  %v11055_v11 = vld [vmem:[#allocation12_spill] sm:$0xff]  ;;  %v11056_v12 = vld [vmem:[#allocation13_spill] sm:$0xff] }
 0x573   :  { %2002 = vmatpush1.msra.mxu0 %v6864_v13  ;;  %2073 = vmatpush1.msra.mxu1 %v6870_v15  ;;  %v11057_v13 = vld [vmem:[#allocation14_spill] sm:$0xff]  ;;  %v11058_v15 = vld [vmem:[#allocation15_spill] sm:$0xff] }
 0x574   :  { %2003 = vmatprep.subr.mxu0 %v6876_v16  ;;  %2074 = vmatprep.subr.mxu1 %v6882_v19  ;;  %v11059_v16 = vld [vmem:[#allocation16_spill] sm:$0xff]  ;;  %v11060_v19 = vld [vmem:[#allocation17_spill] sm:$0xff] }
 0x575   :  { %2004 = vmatpush1.msra.mxu0 %v6888_v27  ;;  %2075 = vmatpush1.msra.mxu1 %v6894_v26  ;;  %v11061_v27 = vld [vmem:[#allocation18_spill] sm:$0xff]  ;;  %v11062_v26 = vld [vmem:[#allocation19_spill] sm:$0xff] }
 0x576   :  { %2005 = vmatprep.subr.mxu0 %v6900_v43  ;;  %2076 = vmatprep.subr.mxu1 %v6906_v33  ;;  %v11063_v43 = vld [vmem:[#allocation20_spill] sm:$0xff]  ;;  %v11064_v33 = vld [vmem:[#allocation21_spill] sm:$0xff] }
 0x577   :  { %2006 = vmatpush1.msra.mxu0 %v6912_v23  ;;  %2077 = vmatpush1.msra.mxu1 %v6918_v36  ;;  %v11065_v23 = vld [vmem:[#allocation22_spill] sm:$0xff]  ;;  %v11066_v36 = vld [vmem:[#allocation23_spill] sm:$0xff] }
 0x578   :  { %2007 = vmatprep.subr.mxu0 %v6924_v22  ;;  %2078 = vmatprep.subr.mxu1 %v6930_v21  ;;  %v11067_v22 = vld [vmem:[#allocation24_spill] sm:$0xff]  ;;  %v11068_v21 = vld [vmem:[#allocation25_spill] sm:$0xff] }
 0x579   :  { %2008 = vmatpush1.msra.mxu0 %v6936_v37  ;;  %2079 = vmatpush1.msra.mxu1 %v6942_v24  ;;  %v11069_v37 = vld [vmem:[#allocation26_spill] sm:$0xff]  ;;  %v11070_v24 = vmov 0.0  }
 0x57a   :  { %2009 = vmatprep.subr.mxu0 %v6948_v62  ;;  %2080 = vmatprep.subr.mxu1 %v6954_v25  ;;  %v11071_v62 = vld [vmem:[#allocation27_spill] sm:$0xff]  ;;  %v11072_v25 = vld [vmem:[#allocation28_spill] sm:$0xff] }
 0x57b   :  { %2010 = vmatpush1.msra.mxu0 %v6960_v35  ;;  %2081 = vmatpush1.msra.mxu1 %v6966_v18  ;;  %v11073_v35 = vld [vmem:[#allocation29_spill] sm:$0xff]  ;;  %v11074_v18 = vld [vmem:[#allocation30_spill] sm:$0xff] }
 0x57c   :  { %2011 = vmatprep.subr.mxu0 %v6972_v34  ;;  %2082 = vmatprep.subr.mxu1 %v6978_v31  ;;  %v11075_v34 = vld [vmem:[#allocation31_spill] sm:$0xff]  ;;  %v11076_v31 = vld [vmem:[#allocation32_spill] sm:$0xff] }
 0x57d   :  { %2012 = vmatpush1.msra.mxu0 %v6984_v2  ;;  %2083 = vmatpush1.msra.mxu1 %v6990_v29  ;;  %v11077_v2 = vld [vmem:[#allocation33_spill] sm:$0xff]  ;;  %v11078_v29 = vld [vmem:[#allocation34_spill] sm:$0xff] }
 0x57e   :  { %2013 = vmatprep.subr.mxu0 %v6996_v0  ;;  %2084 = vmatprep.subr.mxu1 %v7002_v39  ;;  %v11079_v0 = vld [vmem:[#allocation35_spill] sm:$0xff]  ;;  %v11080_v39 = vld [vmem:[#allocation36_spill] sm:$0xff] }
 0x57f   :  { %2014 = vmatpush1.msra.mxu0 %v7008_v28  ;;  %2085 = vmatpush1.msra.mxu1 %v7014_v40  ;;  %v11081_v28 = vld [vmem:[#allocation37_spill] sm:$0xff]  ;;  %v11082_v40 = vld [vmem:[#allocation38_spill] sm:$0xff] }
 0x580   :  { %2015 = vmatprep.subr.mxu0 %v7020_v41  ;;  %2086 = vmatprep.subr.mxu1 %v7026_v42  ;;  %v11083_v41 = vld [vmem:[#allocation39_spill] sm:$0xff]  ;;  %v11084_v42 = vld [vmem:[#allocation40_spill] sm:$0xff] }
 0x581   :  { %2016 = vmatpush1.msra.mxu0 %v7032_v44  ;;  %2087 = vmatpush1.msra.mxu1 %v7038_v45  ;;  %v11085_v44 = vld [vmem:[#allocation41_spill] sm:$0xff]  ;;  %v11086_v45 = vld [vmem:[#allocation42_spill] sm:$0xff] }
 0x582   :  { %2017 = vmatprep.subr.mxu0 %v7044_v46  ;;  %2088 = vmatprep.subr.mxu1 %v7050_v47  ;;  %v11087_v46 = vld [vmem:[#allocation43_spill] sm:$0xff]  ;;  %v11088_v47 = vld [vmem:[#allocation44_spill] sm:$0xff] }
 0x583   :  { %2018 = vmatpush1.msra.mxu0 %v7056_v48  ;;  %2089 = vmatpush1.msra.mxu1 %v7062_v53  ;;  %v11089_v48 = vld [vmem:[#allocation45_spill] sm:$0xff]  ;;  %v11090_v53 = vld [vmem:[#allocation46_spill] sm:$0xff] }
 0x584   :  { %2019 = vmatprep.subr.mxu0 %v7068_v56  ;;  %2090 = vmatprep.subr.mxu1 %v7074_v60  ;;  %v11091_v56 = vld [vmem:[#allocation47_spill] sm:$0xff]  ;;  %v11092_v60 = vld [vmem:[#allocation48_spill] sm:$0xff] }
 0x585   :  { %2020 = vmatpush1.msra.mxu0 %v7080_v54  ;;  %2091 = vmatpush1.msra.mxu1 %v7086_v57  ;;  %v11093_v54 = vld [vmem:[#allocation49_spill] sm:$0xff]  ;;  %v11094_v57 = vld [vmem:[#allocation50_spill] sm:$0xff] }
 0x586   :  { %2021 = vmatprep.subr.mxu0 %v11051_v38  ;;  %2092 = vmatprep.subr.mxu1 %v11052_v59  ;;  %v11112_v38 = vld [vmem:[#allocation68_spill] sm:$0xff]  ;;  %v11113_v59 = vld [vmem:[#allocation69_spill] sm:$0xff] }
 0x587   :  { %2022 = vmatpush1.msra.mxu0 %v11053_v10  ;;  %2093 = vmatpush1.msra.mxu1 %v11054_v20  ;;  %v11114_v10 = vld [vmem:[#allocation70_spill] sm:$0xff]  ;;  %v11115_v20 = vld [vmem:[#allocation71_spill] sm:$0xff] }
 0x588   :  { %2023 = vmatprep.subr.mxu0 %v11055_v11  ;;  %2094 = vmatprep.subr.mxu1 %v11056_v12  ;;  %v11116_v11 = vld [vmem:[#allocation72_spill] sm:$0xff]  ;;  %v11117_v12 = vld [vmem:[#allocation73_spill] sm:$0xff] }
 0x589   :  { %2024 = vmatpush1.msra.mxu0 %v11057_v13  ;;  %2095 = vmatpush1.msra.mxu1 %v11058_v15  ;;  %v11118_v13 = vld [vmem:[#allocation74_spill] sm:$0xff]  ;;  %v11119_v15 = vld [vmem:[#allocation75_spill] sm:$0xff] }
 0x58a   :  { %2025 = vmatprep.subr.mxu0 %v11059_v16  ;;  %2096 = vmatprep.subr.mxu1 %v11060_v19  ;;  %v11120_v16 = vld [vmem:[#allocation76_spill] sm:$0xff]  ;;  %v11121_v19 = vld [vmem:[#allocation77_spill] sm:$0xff] }
 0x58b   :  { %2026 = vmatpush1.msra.mxu0 %v11061_v27  ;;  %2097 = vmatpush1.msra.mxu1 %v11062_v26  ;;  %v11122_v27 = vld [vmem:[#allocation78_spill] sm:$0xff]  ;;  %v11123_v26 = vld [vmem:[#allocation79_spill] sm:$0xff] }
 0x58c   :  { %2027 = vmatprep.subr.mxu0 %v11063_v43  ;;  %2098 = vmatprep.subr.mxu1 %v11064_v33  ;;  %v11124_v43 = vld [vmem:[#allocation80_spill] sm:$0xff]  ;;  %v11125_v33 = vld [vmem:[#allocation81_spill] sm:$0xff] }
 0x58d   :  { %2028 = vmatpush1.msra.mxu0 %v11065_v23  ;;  %2099 = vmatpush1.msra.mxu1 %v11066_v36  ;;  %v11126_v23 = vld [vmem:[#allocation82_spill] sm:$0xff]  ;;  %v11127_v36 = vld [vmem:[#allocation83_spill] sm:$0xff] }
 0x58e   :  { %2029 = vmatprep.subr.mxu0 %v11067_v22  ;;  %2100 = vmatprep.subr.mxu1 %v11068_v21  ;;  %v11128_v22 = vld [vmem:[#allocation84_spill] sm:$0xff]  ;;  %v11129_v21 = vld [vmem:[#allocation85_spill] sm:$0xff] }
 0x58f   :  { %2030 = vmatpush1.msra.mxu0 %v11069_v37  ;;  %2063 = vmatprep.mubr.f32.mxu0 %v11070_v24  ;;  %v11130_v37 = vld [vmem:[#allocation86_spill] sm:$0xff] }
 0x590   :  { %2101 = vmatpush1.msra.mxu1 %v11071_v62  ;;  %2134 = vmatprep.mubr.f32.mxu1 %v11070_v24  ;;  %v11131_v62 = vld [vmem:[#allocation87_spill] sm:$0xff] }
 0x591   :  { %2064 = vmatmul.mubr.f32.vlgmr.msra.gmra.mxu0 %v8000_v55  ;;  %2135 = vmatmul.mubr.f32.vlgmr.msra.gmra.mxu1 %v8000_v55  ;;  %v11111_v55 = vld [vmem:[#allocation67_spill] sm:$0xff] }
 0x592   :  { %2189 = vmatprep.subr.mxu0 %v11072_v25  ;;  %2260 = vmatprep.subr.mxu1 %v11073_v35  ;;  %v11132_v25 = vld [vmem:[#allocation88_spill] sm:$0xff]  ;;  %v11133_v35 = vld [vmem:[#allocation89_spill] sm:$0xff] }
 0x593   :  { %2190 = vmatpush1.msra.mxu0 %v11074_v18  ;;  %2261 = vmatpush1.msra.mxu1 %v11075_v34  ;;  %v11134_v18 = vld [vmem:[#allocation90_spill] sm:$0xff]  ;;  %v11135_v34 = vld [vmem:[#allocation91_spill] sm:$0xff] }
 0x594   :  { %2191 = vmatprep.subr.mxu0 %v11076_v31  ;;  %2262 = vmatprep.subr.mxu1 %v11077_v2  ;;  %v11136_v31 = vld [vmem:[#allocation92_spill] sm:$0xff]  ;;  %v11137_v2 = vld [vmem:[#allocation93_spill] sm:$0xff] }
 0x595   :  { %2192 = vmatpush1.msra.mxu0 %v11078_v29  ;;  %2263 = vmatpush1.msra.mxu1 %v11079_v0  ;;  %v11138_v29 = vld [vmem:[#allocation94_spill] sm:$0xff]  ;;  %v11139_v0 = vld [vmem:[#allocation95_spill] sm:$0xff] }
 0x596   :  { %2193 = vmatprep.subr.mxu0 %v11080_v39  ;;  %2264 = vmatprep.subr.mxu1 %v11081_v28  ;;  %v11140_v39 = vld [vmem:[#allocation96_spill] sm:$0xff]  ;;  %v11141_v28 = vld [vmem:[#allocation97_spill] sm:$0xff] }
 0x597   :  { %2194 = vmatpush1.msra.mxu0 %v11082_v40  ;;  %2265 = vmatpush1.msra.mxu1 %v11083_v41  ;;  %v11142_v40 = vld [vmem:[#allocation98_spill] sm:$0xff]  ;;  %v11143_v41 = vld [vmem:[#allocation99_spill] sm:$0xff] }
 0x598   :  { %2195 = vmatprep.subr.mxu0 %v11084_v42  ;;  %2266 = vmatprep.subr.mxu1 %v11085_v44  ;;  %v11144_v42 = vld [vmem:[#allocation100_spill] sm:$0xff]  ;;  %v11145_v44 = vld [vmem:[#allocation101_spill] sm:$0xff] }
 0x599   :  { %2196 = vmatpush1.msra.mxu0 %v11086_v45  ;;  %2267 = vmatpush1.msra.mxu1 %v11087_v46  ;;  %v11146_v45 = vld [vmem:[#allocation102_spill] sm:$0xff]  ;;  %v11147_v46 = vld [vmem:[#allocation103_spill] sm:$0xff] }
 0x59a   :  { %2197 = vmatprep.subr.mxu0 %v11088_v47  ;;  %2268 = vmatprep.subr.mxu1 %v11089_v48  ;;  %v11148_v47 = vld [vmem:[#allocation104_spill] sm:$0xff]  ;;  %v11149_v48 = vld [vmem:[#allocation105_spill] sm:$0xff] }
 0x59b   :  { %2198 = vmatpush1.msra.mxu0 %v11090_v53  ;;  %2269 = vmatpush1.msra.mxu1 %v11091_v56  ;;  %v11150_v53 = vld [vmem:[#allocation106_spill] sm:$0xff]  ;;  %v11151_v56 = vld [vmem:[#allocation107_spill] sm:$0xff] }
 0x59c   :  { %2199 = vmatprep.subr.mxu0 %v11092_v60  ;;  %2270 = vmatprep.subr.mxu1 %v11093_v54  ;;  %v11152_v60 = vld [vmem:[#allocation108_spill] sm:$0xff]  ;;  %v11153_v54 = vld [vmem:[#allocation109_spill] sm:$0xff] }
 0x59d   :  { %2200 = vmatpush1.msra.mxu0 %v11094_v57  ;;  %2271 = vmatpush1.msra.mxu1 %v11095_v49  ;;  %v11154_v57 = vld [vmem:[#allocation110_spill] sm:$0xff]  ;;  %v11155_v49 = vld [vmem:[#allocation111_spill] sm:$0xff] }
 0x59e   :  { %2201 = vmatprep.subr.mxu0 %v11096_v50  ;;  %2272 = vmatprep.subr.mxu1 %v11097_v17  ;;  %v11156_v50 = vld [vmem:[#allocation112_spill] sm:$0xff]  ;;  %v11157_v17 = vld [vmem:[#allocation113_spill] sm:$0xff] }
 0x59f   :  { %2202 = vmatpush1.msra.mxu0 %v11098_v3  ;;  %2273 = vmatpush1.msra.mxu1 %v11099_v61  ;;  %v11158_v3 = vld [vmem:[#allocation114_spill] sm:$0xff]  ;;  %v11159_v61 = vld [vmem:[#allocation115_spill] sm:$0xff] }
 0x5a0   :  { %2203 = vmatprep.subr.mxu0 %v11100_v9  ;;  %2274 = vmatprep.subr.mxu1 %v11101_v51  ;;  %v11160_v9 = vld [vmem:[#allocation116_spill] sm:$0xff]  ;;  %v11161_v51 = vld [vmem:[#allocation117_spill] sm:$0xff] }
 0x5a1   :  { %2204 = vmatpush1.msra.mxu0 %v11102_v63  ;;  %2275 = vmatpush1.msra.mxu1 %v11103_v14  ;;  %v11162_v63 = vld [vmem:[#allocation118_spill] sm:$0xff]  ;;  %v11163_v14 = vld [vmem:[#allocation119_spill] sm:$0xff] }
 0x5a2   :  { %2205 = vmatprep.subr.mxu0 %v11104_v4  ;;  %2276 = vmatprep.subr.mxu1 %v11105_v7  ;;  %v11164_v4 = vld [vmem:[#allocation120_spill] sm:$0xff]  ;;  %v11165_v7 = vld [vmem:[#allocation121_spill] sm:$0xff] }
 0x5a3   :  { %2206 = vmatpush1.msra.mxu0 %v11106_v30  ;;  %2277 = vmatpush1.msra.mxu1 %v11107_v5  ;;  %v11166_v30 = vld [vmem:[#allocation122_spill] sm:$0xff]  ;;  %v11167_v5 = vld [vmem:[#allocation123_spill] sm:$0xff] }
 0x5a4   :  { %2207 = vmatprep.subr.mxu0 %v11108_v8  ;;  %2278 = vmatprep.subr.mxu1 %v11109_v58  ;;  %v11168_v8 = vld [vmem:[#allocation124_spill] sm:$0xff]  ;;  %v11169_v58 = vld [vmem:[#allocation125_spill] sm:$0xff] }
 0x5a5   :  { %2208 = vmatpush1.msra.mxu0 %v11110_v6  ;;  %2279 = vmatpush1.msra.mxu1 %v11111_v55  ;;  %v11170_v6 = vld [vmem:[#allocation126_spill] sm:$0xff]  ;;  %v11171_v55 = vld [vmem:[#allocation127_spill] sm:$0xff] }
 0x5a6   :  { %2209 = vmatprep.subr.mxu0 %v11112_v38  ;;  %2280 = vmatprep.subr.mxu1 %v11113_v59  ;;  %v11172_v38 = vld [vmem:[#allocation128_spill] sm:$0xff]  ;;  %v11173_v59 = vld [vmem:[#allocation129_spill] sm:$0xff] }
 0x5a7   :  { %2210 = vmatpush1.msra.mxu0 %v11114_v10  ;;  %2281 = vmatpush1.msra.mxu1 %v11115_v20  ;;  %v11174_v10 = vld [vmem:[#allocation130_spill] sm:$0xff]  ;;  %v11175_v20 = vld [vmem:[#allocation131_spill] sm:$0xff] }
 0x5a8   :  { %2211 = vmatprep.subr.mxu0 %v11116_v11  ;;  %2282 = vmatprep.subr.mxu1 %v11117_v12  ;;  %v11176_v11 = vld [vmem:[#allocation132_spill] sm:$0xff]  ;;  %v11177_v12 = vld [vmem:[#allocation133_spill] sm:$0xff] }
 0x5a9   :  { %2212 = vmatpush1.msra.mxu0 %v11118_v13  ;;  %2283 = vmatpush1.msra.mxu1 %v11119_v15  ;;  %v11178_v13 = vld [vmem:[#allocation134_spill] sm:$0xff]  ;;  %v11179_v15 = vld [vmem:[#allocation135_spill] sm:$0xff] }
 0x5aa   :  { %2213 = vmatprep.subr.mxu0 %v11120_v16  ;;  %2284 = vmatprep.subr.mxu1 %v11121_v19  ;;  %v11180_v16 = vld [vmem:[#allocation136_spill] sm:$0xff]  ;;  %v11181_v19 = vld [vmem:[#allocation137_spill] sm:$0xff] }
 0x5ab   :  { %2214 = vmatpush1.msra.mxu0 %v11122_v27  ;;  %2285 = vmatpush1.msra.mxu1 %v11123_v26  ;;  %v11182_v27 = vld [vmem:[#allocation138_spill] sm:$0xff]  ;;  %v11183_v26 = vld [vmem:[#allocation139_spill] sm:$0xff] }
 0x5ac   :  { %2215 = vmatprep.subr.mxu0 %v11124_v43  ;;  %2286 = vmatprep.subr.mxu1 %v11125_v33  ;;  %v11184_v43 = vld [vmem:[#allocation140_spill] sm:$0xff]  ;;  %v11185_v33 = vld [vmem:[#allocation141_spill] sm:$0xff] }
 0x5ad   :  { %2216 = vmatpush1.msra.mxu0 %v11126_v23  ;;  %2287 = vmatpush1.msra.mxu1 %v11127_v36  ;;  %v11186_v23 = vld [vmem:[#allocation142_spill] sm:$0xff]  ;;  %v11187_v36 = vld [vmem:[#allocation143_spill] sm:$0xff] }
 0x5ae   :  { %2217 = vmatprep.subr.mxu0 %v11128_v22  ;;  %2288 = vmatprep.subr.mxu1 %v11129_v21  ;;  %v11188_v22 = vld [vmem:[#allocation144_spill] sm:$0xff]  ;;  %v11189_v21 = vld [vmem:[#allocation145_spill] sm:$0xff] }
 0x5af   :  { %2218 = vmatpush1.msra.mxu0 %v11130_v37  ;;  %2289 = vmatpush1.msra.mxu1 %v11131_v62  ;;  %v11190_v37 = vld [vmem:[#allocation146_spill] sm:$0xff]  ;;  %v11191_v62 = vld [vmem:[#allocation147_spill] sm:$0xff] }
 0x5b0   :  { %2219 = vmatprep.subr.mxu0 %v11132_v25  ;;  %2290 = vmatprep.subr.mxu1 %v11133_v35  ;;  %v11192_v25 = vld [vmem:[#allocation148_spill] sm:$0xff]  ;;  %v11193_v35 = vld [vmem:[#allocation149_spill] sm:$0xff] }
 0x5b1   :  { %2220 = vmatpush1.msra.mxu0 %v11134_v18  ;;  %2291 = vmatpush1.msra.mxu1 %v11135_v34  ;;  %v11194_v18 = vld [vmem:[#allocation150_spill] sm:$0xff]  ;;  %v11195_v34 = vld [vmem:[#allocation152_spill] sm:$0xff] }
 0x5b2   :  { %2221 = vmatprep.subr.mxu0 %v11136_v31  ;;  %2292 = vmatprep.subr.mxu1 %v11137_v2  ;;  %v11196_v31 = vld [vmem:[#allocation153_spill] sm:$0xff]  ;;  %v11197_v2 = vld [vmem:[#allocation154_spill] sm:$0xff] }
 0x5b3   :  { %2222 = vmatpush2.msra.mxu0 %v11138_v29  ;;  %2293 = vmatpush2.msra.mxu1 %v11139_v0  ;;  %v11198_v29 = vld [vmem:[#allocation155_spill] sm:$0xff]  ;;  %v11199_v0 = vld [vmem:[#allocation156_spill] sm:$0xff] }
 0x5b4   :  { %2223 = vmatprep.subr.mxu0 %v11140_v39  ;;  %2294 = vmatprep.subr.mxu1 %v11141_v28  ;;  %v8201_v39 = vld [vmem:[%s9683_s1 + $0x1e8] sm:$0xff]  ;;  %v8207_v28 = vld [vmem:[%s9683_s1 + $0x1f8] sm:$0xff] }
 0x5b5   :  { %2224 = vmatpush2.msra.mxu0 %v11142_v40  ;;  %2295 = vmatpush2.msra.mxu1 %v11143_v41  ;;  %v11200_v41 = vld [vmem:[#allocation5_spill] sm:$0xff] }
 0x5b6   :  { %2225 = vmatprep.subr.mxu0 %v11144_v42  ;;  %2296 = vmatprep.subr.mxu1 %v11145_v44 }
 0x5b7   :  { %2226 = vmatpush2.msra.mxu0 %v11146_v45  ;;  %2297 = vmatpush2.msra.mxu1 %v11147_v46 }
 0x5b8   :  { %2227 = vmatprep.subr.mxu0 %v11148_v47  ;;  %2298 = vmatprep.subr.mxu1 %v11149_v48 }
 0x5b9   :  { %2228 = vmatpush2.msra.mxu0 %v11150_v53  ;;  %2299 = vmatpush2.msra.mxu1 %v11151_v56  ;;  %v11201_v53 = vld [vmem:[#allocation6_spill] sm:$0xff] }
 0x5ba   :  { %2229 = vmatprep.subr.mxu0 %v11152_v60  ;;  %2300 = vmatprep.subr.mxu1 %v11153_v54  ;;  %v11202_v54 = vld [vmem:[#allocation7_spill] sm:$0xff] }
 0x5bb   :  { %2230 = vmatpush2.msra.mxu0 %v11154_v57  ;;  %2301 = vmatpush2.msra.mxu1 %v11155_v49 }
 0x5bc   :  { %2231 = vmatprep.subr.mxu0 %v11156_v50  ;;  %2302 = vmatprep.subr.mxu1 %v11157_v17 }
 0x5bd   :  { %2232 = vmatpush2.msra.mxu0 %v11158_v3  ;;  %2303 = vmatpush2.msra.mxu1 %v11159_v61 }
 0x5be   :  { %2233 = vmatprep.subr.mxu0 %v11160_v9  ;;  %2304 = vmatprep.subr.mxu1 %v11161_v51 }
 0x5bf   :  { %2234 = vmatpush2.msra.mxu0 %v11162_v63  ;;  %2305 = vmatpush2.msra.mxu1 %v11163_v14 }
 0x5c0   :  { %2235 = vmatprep.subr.mxu0 %v11164_v4  ;;  %2306 = vmatprep.subr.mxu1 %v11165_v7 }
 0x5c1   :  { %2236 = vmatpush2.msra.mxu0 %v11166_v30  ;;  %2307 = vmatpush2.msra.mxu1 %v11167_v5 }
 0x5c2   :  { %2237 = vmatprep.subr.mxu0 %v11168_v8  ;;  %2308 = vmatprep.subr.mxu1 %v11169_v58 }
 0x5c3   :  { %2238 = vmatpush2.msra.mxu0 %v11170_v6  ;;  %2309 = vmatpush2.msra.mxu1 %v11171_v55 }
 0x5c4   :  { %2239 = vmatprep.subr.mxu0 %v11172_v38  ;;  %2310 = vmatprep.subr.mxu1 %v11173_v59 }
 0x5c5   :  { %2240 = vmatpush2.msra.mxu0 %v11174_v10  ;;  %2311 = vmatpush2.msra.mxu1 %v11175_v20  ;;  %v11203_v10 = vld [vmem:[#allocation151_spill] sm:$0xff] }
 0x5c6   :  { %2241 = vmatprep.subr.mxu0 %v11176_v11  ;;  %2312 = vmatprep.subr.mxu1 %v11177_v12 }
 0x5c7   :  { %2242 = vmatpush2.msra.mxu0 %v11178_v13  ;;  %2313 = vmatpush2.msra.mxu1 %v11179_v15 }
 0x5c8   :  { %2243 = vmatprep.subr.mxu0 %v11180_v16  ;;  %2314 = vmatprep.subr.mxu1 %v11181_v19 }
 0x5c9   :  { %2244 = vmatpush2.msra.mxu0 %v11182_v27  ;;  %2315 = vmatpush2.msra.mxu1 %v11183_v26 }
 0x5ca   :  { %2245 = vmatprep.subr.mxu0 %v11184_v43  ;;  %2316 = vmatprep.subr.mxu1 %v11185_v33 }
 0x5cb   :  { %2246 = vmatpush2.msra.mxu0 %v11186_v23  ;;  %2317 = vmatpush2.msra.mxu1 %v11187_v36 }
 0x5cc   :  { %2247 = vmatprep.subr.mxu0 %v11188_v22  ;;  %2318 = vmatprep.subr.mxu1 %v11189_v21 }
 0x5cd   :  { %2248 = vmatpush2.msra.mxu0 %v11190_v37  ;;  %2319 = vmatpush2.msra.mxu1 %v11191_v62 }
 0x5ce   :  { %2249 = vmatprep.subr.mxu0 %v11192_v25  ;;  %2320 = vmatprep.subr.mxu1 %v11193_v35 }
 0x5cf   :  { %2250 = vmatpush2.msra.mxu0 %v11194_v18  ;;  %2321 = vmatpush2.msra.mxu1 %v11195_v34 }
 0x5d0   :  { %2251 = vmatprep.subr.mxu0 %v11196_v31  ;;  %2322 = vmatprep.subr.mxu1 %v11197_v2 }
 0x5d1   :  { %2252 = vmatpush2.msra.mxu0 %v11198_v29  ;;  %2323 = vmatpush2.msra.mxu1 %v11199_v0 }
 0x5d2   :  { %2351 = vmatprep.subr.mxu0 %v8201_v39  ;;  %2422 = vmatprep.subr.mxu1 %v8207_v28 }
 0x630   :  { %v1903_v40 = vpop.f32.mrf.mxu0  ;;  %v1974_v47 = vpop.f32.mrf.mxu1 }
 0x631   :  { %v1904_v42 = vadd.f32 %v1903_v40, %v11200_v41  ;;  %v1975_v56 = vadd.f32 %v1974_v47, %v11201_v53  ;;  %v8252_v47 = vld [vmem:[%s9683_s1 + $0x1d8] sm:$0xff] }
 0x632   :  { %v1905_v44 = vpop.f32.mrf.mxu0  ;;  %v1976_v60 = vpop.f32.mrf.mxu1 }
 0x633   :  { %v1979_v45 = vmul.f32 0.5, %v1904_v42  ;;  %v1906_v46 = vadd.f32 %v1905_v44, %v5416_v32  ;;  %v1977_v57 = vadd.f32 %v1976_v60, %v11202_v54  ;;  %v8270_v60 = vld [vmem:[%s9683_s1 + $0x1a8] sm:$0xff] }
 0x635   :  { %3316 = vtanh.f32 %v1979_v45  ;;  %v1983_v48 = vmul.f32 0.5, %v1906_v46  ;;  %v1988_v49 = vmul.f32 0.5, %v1977_v57  ;;  %v8234_v45 = vld [vmem:[%s9683_s1 + $0x1e0] sm:$0xff]  ;;  %v8246_v46 = vld [vmem:[%s9683_s1 + $0x1c8] sm:$0xff]  ;;  %v8276_v57 = vld [vmem:[%s9683_s1 + $0x1b8] sm:$0xff] }
 0x637   :  { %3318 = vtanh.f32 %v1983_v48  ;;  %v8258_v48 = vld [vmem:[%s9683_s1 + $0x1c0] sm:$0xff] }
 0x638   :  { %3320 = vtanh.f32 %v1975_v56  ;;  %v8264_v56 = vld [vmem:[%s9683_s1 + $0x1d0] sm:$0xff] }
 0x639   :  { %3322 = vtanh.f32 %v1988_v49  ;;  %v8282_v49 = vld [vmem:[%s9683_s1 + $0x1a0] sm:$0xff] }
 0x642   :  { %v3317_v50 = vpop.eup %3316 }
 0x643   :  { %v1981_v17 = vmul.f32 0.5, %v3317_v50  ;;  %v8288_v50 = vld [vmem:[%s9683_s1 + $0x1b0] sm:$0xff] }
 0x644   :  { %v3319_v3 = vpop.eup %3318 }
 0x645   :  { %v1982_v61 = vadd.f32 0.5, %v1981_v17  ;;  %v1985_v9 = vmul.f32 0.5, %v3319_v3  ;;  %v3321_v63 = vpop.eup %3320  ;;  %v8294_v17 = vld [vmem:[%s9683_s1 + $0x188] sm:$0xff]  ;;  %v8300_v3 = vld [vmem:[%s9683_s1 + $0x198] sm:$0xff] }
 0x646   :  { %v3323_v8 = vpop.eup %3322 }
 0x647   :  { %v1986_v51 = vadd.f32 0.5, %v1985_v9  ;;  %v1993_v4 = vmul.f32 %v3321_v63, %v1982_v61  ;;  %v1990_v59 = vmul.f32 0.5, %v3323_v8  ;;  %v8306_v61 = vld [vmem:[%s9683_s1 + $0x180] sm:$0xff]  ;;  %v8312_v9 = vld [vmem:[%s9683_s1 + $0x190] sm:$0xff]  ;;  %v8324_v63 = vld [vmem:[%s9683_s1 + $0x178] sm:$0xff] }
 0x648   :  { %v8354_v8 = vld [vmem:[%s9683_s1 + $0x140] sm:$0xff] }
 0x649   :  { %v1992_v14 = vmul.f32 %v1986_v51, %v7988_v1  ;;  %v3166_v1 = vld [vmem:[%s9682_s0 + $0x28] sm:$0xff]  ;;  %v1991_v13 = vadd.f32 0.5, %v1990_v59  ;;  %v8384_v59 = vld [vmem:[%s9683_s1 + $0x130] sm:$0xff] }
 0x64a   :  { %v8318_v51 = vld [vmem:[%s9683_s1 + $0x168] sm:$0xff] }
 0x64b   :  { %v8215_v7 = vadd.f32 %v1993_v4, %v1992_v14  ;;  %v8330_v14 = vld [vmem:[%s9683_s1 + $0x160] sm:$0xff]  ;;  %v8336_v4 = vld [vmem:[%s9683_s1 + $0x170] sm:$0xff] }
 0x64d   :  { %3324 = vtanh.f32 %v8215_v7 }
 0x651   :  { %v2065_v30 = vpop.f32.mrf.mxu0  ;;  %v2136_v5 = vpop.f32.mrf.mxu1 }
 0x653   :  { %v2067_v58 = vpop.f32.mrf.mxu0  ;;  %v2138_v6 = vpop.f32.mrf.mxu1 }
 0x654   :  { %v2145_v55 = vcombine.low %v2065_v30, %v2067_v58  ;;  %v2146_v38 = vcombine.low %v2136_v5, %v2138_v6  ;;  %v8342_v30 = vld [vmem:[%s9683_s1 + $0x148] sm:$0xff]  ;;  %v8348_v5 = vld [vmem:[%s9683_s1 + $0x158] sm:$0xff]  ;;  %v8360_v58 = vld [vmem:[%s9683_s1 + $0x150] sm:$0xff] }
 0x655   :  { %v8366_v6 = vld [vmem:[%s9683_s1 + $0x128] sm:$0xff] }
 0x656   :  { %v2153_v20 = vrot.slane %v2145_v55, %v11203_v10  ;;  %v2160_v11 = vrot.slane %v2146_v38, %v11203_v10  ;;  %v8372_v55 = vld [vmem:[%s9683_s1 + $0x138] sm:$0xff]  ;;  %v8378_v38 = vld [vmem:[%s9683_s1 + $0x120] sm:$0xff] }
 0x658   :  { %v2161_v12 = vcombine.low %v2153_v20, %v2160_v11  ;;  %v8390_v20 = vld [vmem:[%s9683_s1 + $0x108] sm:$0xff]  ;;  %v8396_v11 = vld [vmem:[%s9683_s1 + $0x118] sm:$0xff] }
 0x65a   :  { %v3325_v15 = vpop.eup %3324  ;;  %v2163_v16 = vadd.f32 %v3166_v1, %v2161_v12  ;;  %v8402_v1 = vld [vmem:[%s9683_s1 + $0x100] sm:$0xff]  ;;  %v8408_v12 = vld [vmem:[%s9683_s1 + $0x110] sm:$0xff] }
 0x65b   :  { %v1996_v19 = vmul.f32 %v3325_v15, %v1991_v13  ;;  %v8414_v13 = vld [vmem:[%s9683_s1 + $0xe8] sm:$0xff]  ;;  %v8420_v15 = vld [vmem:[%s9683_s1 + $0xf8] sm:$0xff] }
 0x65c   :  { %v2164_v27 = vmul.f32 0.5, %v2163_v16  ;;  %v2169_v26 = vrot.slane %v2163_v16, 2  ;;  %v2175_v33 = vrot.slane %v2163_v16, 4  ;;  %v2178_v23 = vrot.slane %v2163_v16, 6  ;;  %v8426_v16 = vld [vmem:[%s9683_s1 + $0xe0] sm:$0xff] }
 0x65d   :  { %2253 = vmatprep.mubr.f32.mxu0 %v1996_v19  ;;  %2324 = vmatprep.mubr.f32.mxu1 %v1996_v19  ;;  %v8432_v19 = vld [vmem:[%s9683_s1 + $0xf0] sm:$0xff] }
 0x65e   :  { %3326 = vtanh.f32 %v2164_v27  ;;  %v2171_v43 = vmul.f32 0.5, %v2169_v26  ;;  %v2180_v36 = vmul.f32 0.5, %v2178_v23  ;;  %v8438_v27 = vld [vmem:[%s9683_s1 + $0xc8] sm:$0xff]  ;;  %v8444_v26 = vld [vmem:[%s9683_s1 + $0xd8] sm:$0xff] }
 0x65f   :  { %v8462_v23 = vld [vmem:[%s9683_s1 + $0xa8] sm:$0xff] }
 0x660   :  { %3328 = vtanh.f32 %v2171_v43  ;;  %v8450_v43 = vld [vmem:[%s9683_s1 + $0xc0] sm:$0xff] }
 0x661   :  { %3330 = vtanh.f32 %v2175_v33  ;;  %v8456_v33 = vld [vmem:[%s9683_s1 + $0xd0] sm:$0xff] }
 0x662   :  { %3332 = vtanh.f32 %v2180_v36  ;;  %v8468_v36 = vld [vmem:[%s9683_s1 + $0xb8] sm:$0xff] }
 0x66b   :  { %v3327_v22 = vpop.eup %3326 }
 0x66c   :  { %v2166_v21 = vmul.f32 0.5, %v3327_v22  ;;  %v8474_v22 = vld [vmem:[%s9683_s1 + $0xa0] sm:$0xff] }
 0x66d   :  { %v3329_v37 = vpop.eup %3328 }
 0x66e   :  { %v2167_v62 = vadd.f32 0.5, %v2166_v21  ;;  %v2173_v25 = vmul.f32 0.5, %v3329_v37  ;;  %v3331_v18 = vpop.eup %3330  ;;  %v8480_v21 = vld [vmem:[%s9683_s1 + $0xb0] sm:$0xff]  ;;  %v8486_v37 = vld [vmem:[%s9683_s1 + $0x88] sm:$0xff] }
 0x66f   :  { %v3333_v29 = vpop.eup %3332  ;;  %11204 = vst [vmem:[#allocation8_spill] sm:$0xff] %v8486_v37 }
 0x670   :  { %v2174_v35 = vadd.f32 0.5, %v2173_v25  ;;  %v2185_v31 = vmul.f32 %v3331_v18, %v2167_v62  ;;  %v2182_v0 = vmul.f32 0.5, %v3333_v29  ;;  %v8492_v62 = vld [vmem:[%s9683_s1 + $0x98] sm:$0xff]  ;;  %v8498_v25 = vld [vmem:[%s9683_s1 + $0x80] sm:$0xff]  ;;  %v8510_v18 = vld [vmem:[%s9683_s1 + $0x68] sm:$0xff] }
 0x671   :  { %11205 = vst [vmem:[#allocation9_spill] sm:$0xff] %v8492_v62  ;;  %11206 = vst [vmem:[#allocation10_spill] sm:$0xff] %v8498_v25  ;;  %v8528_v29 = vld [vmem:[%s9683_s1 + $0x70] sm:$0xff] }
 0x672   :  { %v2184_v34 = vmul.f32 %v2174_v35, %v7997_v52  ;;  %v2183_v40 = vadd.f32 0.5, %v2182_v0  ;;  %v8240_v52 = vld [vmem:[%s9683_s1 + $0x1f0] sm:$0xff]  ;;  %11208 = vst [vmem:[#allocation12_spill] sm:$0xff] %v8510_v18  ;;  %11211 = vst [vmem:[#allocation15_spill] sm:$0xff] %v8528_v29  ;;  %v8534_v0 = vld [vmem:[%s9683_s1 + $0x48] sm:$0xff] }
 0x673   :  { %v8504_v35 = vld [vmem:[%s9683_s1 + $0x90] sm:$0xff]  ;;  %11212 = vst [vmem:[#allocation16_spill] sm:$0xff] %v8534_v0 }
 0x674   :  { %v8224_v2 = vadd.f32 %v2185_v31, %v2184_v34  ;;  %11207 = vst [vmem:[#allocation11_spill] sm:$0xff] %v8504_v35  ;;  %v8516_v34 = vld [vmem:[%s9683_s1 + $0x78] sm:$0xff]  ;;  %v8522_v31 = vld [vmem:[%s9683_s1 + $0x60] sm:$0xff] }
 0x675   :  { %11209 = vst [vmem:[#allocation13_spill] sm:$0xff] %v8516_v34  ;;  %11210 = vst [vmem:[#allocation14_spill] sm:$0xff] %v8522_v31 }
 0x676   :  { %3334 = vtanh.f32 %v8224_v2 }
 0x683   :  { %v3335_v42 = vpop.eup %3334 }
 0x684   :  { %v8227_v44 = vmul.f32 %v3335_v42, %v2183_v40  ;;  %v8540_v40 = vld [vmem:[%s9683_s1 + $0x58] sm:$0xff]  ;;  %v8546_v42 = vld [vmem:[%s9683_s1 + $0x40] sm:$0xff] }
 0x685   :  { %11213 = vst [vmem:[#allocation17_spill] sm:$0xff] %v8540_v40  ;;  %11214 = vst [vmem:[#allocation18_spill] sm:$0xff] %v8546_v42 }
 0x686   :  { %2254 = vmatmul.mubr.f32.vlgmr.msra.gmra.mxu0 %v8227_v44  ;;  %2325 = vmatmul.mubr.f32.vlgmr.msra.gmra.mxu1 %v8227_v44 }
 0x687   :  { %2352 = vmatpush1.msra.mxu0 %v8234_v45  ;;  %2423 = vmatpush1.msra.mxu1 %v8240_v52 }
 0x688   :  { %2353 = vmatprep.subr.mxu0 %v8246_v46  ;;  %2424 = vmatprep.subr.mxu1 %v8252_v47 }
 0x689   :  { %2354 = vmatpush1.msra.mxu0 %v8258_v48  ;;  %2425 = vmatpush1.msra.mxu1 %v8264_v56 }
 0x68a   :  { %2355 = vmatprep.subr.mxu0 %v8270_v60  ;;  %2426 = vmatprep.subr.mxu1 %v8276_v57 }
 0x68b   :  { %2356 = vmatpush1.msra.mxu0 %v8282_v49  ;;  %2427 = vmatpush1.msra.mxu1 %v8288_v50 }
 0x68c   :  { %2357 = vmatprep.subr.mxu0 %v8294_v17  ;;  %2428 = vmatprep.subr.mxu1 %v8300_v3 }
 0x68d   :  { %2358 = vmatpush1.msra.mxu0 %v8306_v61  ;;  %2429 = vmatpush1.msra.mxu1 %v8312_v9 }
 0x68e   :  { %2359 = vmatprep.subr.mxu0 %v8318_v51  ;;  %2430 = vmatprep.subr.mxu1 %v8324_v63 }
 0x68f   :  { %2360 = vmatpush1.msra.mxu0 %v8330_v14  ;;  %2431 = vmatpush1.msra.mxu1 %v8336_v4 }
 0x690   :  { %2361 = vmatprep.subr.mxu0 %v8342_v30  ;;  %2432 = vmatprep.subr.mxu1 %v8348_v5 }
 0x691   :  { %2362 = vmatpush1.msra.mxu0 %v8354_v8  ;;  %2433 = vmatpush1.msra.mxu1 %v8360_v58 }
 0x692   :  { %2363 = vmatprep.subr.mxu0 %v8366_v6  ;;  %2434 = vmatprep.subr.mxu1 %v8372_v55 }
 0x693   :  { %2364 = vmatpush1.msra.mxu0 %v8378_v38  ;;  %2435 = vmatpush1.msra.mxu1 %v8384_v59 }
 0x694   :  { %2365 = vmatprep.subr.mxu0 %v8390_v20  ;;  %2436 = vmatprep.subr.mxu1 %v8396_v11 }
 0x695   :  { %2366 = vmatpush1.msra.mxu0 %v8402_v1  ;;  %2437 = vmatpush1.msra.mxu1 %v8408_v12 }
 0x696   :  { %2367 = vmatprep.subr.mxu0 %v8414_v13  ;;  %2438 = vmatprep.subr.mxu1 %v8420_v15 }
 0x697   :  { %2368 = vmatpush1.msra.mxu0 %v8426_v16  ;;  %2439 = vmatpush1.msra.mxu1 %v8432_v19 }
 0x698   :  { %2369 = vmatprep.subr.mxu0 %v8438_v27  ;;  %2440 = vmatprep.subr.mxu1 %v8444_v26 }
 0x699   :  { %2370 = vmatpush1.msra.mxu0 %v8450_v43  ;;  %2441 = vmatpush1.msra.mxu1 %v8456_v33 }
 0x69a   :  { %2371 = vmatprep.subr.mxu0 %v8462_v23  ;;  %2442 = vmatprep.subr.mxu1 %v8468_v36 }
 0x69b   :  { %2372 = vmatpush1.msra.mxu0 %v8474_v22  ;;  %2443 = vmatpush1.msra.mxu1 %v8480_v21 }
 0x69c   :  { %2373 = vmatprep.subr.mxu0 %v8486_v37  ;;  %2444 = vmatprep.subr.mxu1 %v8492_v62 }
 0x69d   :  { %2374 = vmatpush1.msra.mxu0 %v8498_v25  ;;  %2445 = vmatpush1.msra.mxu1 %v8504_v35 }
 0x69e   :  { %2375 = vmatprep.subr.mxu0 %v8510_v18  ;;  %2446 = vmatprep.subr.mxu1 %v8516_v34 }
 0x69f   :  { %2376 = vmatpush1.msra.mxu0 %v8522_v31  ;;  %2447 = vmatpush1.msra.mxu1 %v8528_v29  ;;  %v8552_v29 = vld [vmem:[%s9683_s1 + $0x50] sm:$0xff] }
 0x6a0   :  { %2377 = vmatprep.subr.mxu0 %v8534_v0  ;;  %2448 = vmatprep.subr.mxu1 %v8540_v40  ;;  %11215 = vst [vmem:[#allocation19_spill] sm:$0xff] %v8552_v29  ;;  %v8558_v0 = vld [vmem:[%s9683_s1 + $0x28] sm:$0xff]  ;;  %v8564_v40 = vld [vmem:[%s9683_s1 + $0x38] sm:$0xff] }
 0x6a1   :  { %2378 = vmatpush1.msra.mxu0 %v8546_v42  ;;  %2449 = vmatpush1.msra.mxu1 %v8552_v29  ;;  %11216 = vst [vmem:[#allocation20_spill] sm:$0xff] %v8558_v0  ;;  %11217 = vst [vmem:[#allocation21_spill] sm:$0xff] %v8564_v40  ;;  %v8570_v42 = vld [vmem:[%s9683_s1 + $0x20] sm:$0xff]  ;;  %v8576_v29 = vld [vmem:[%s9683_s1 + $0x30] sm:$0xff] }
 0x6a2   :  { %2379 = vmatprep.subr.mxu0 %v8558_v0  ;;  %2450 = vmatprep.subr.mxu1 %v8564_v40  ;;  %11218 = vst [vmem:[#allocation22_spill] sm:$0xff] %v8570_v42  ;;  %11219 = vst [vmem:[#allocation23_spill] sm:$0xff] %v8576_v29  ;;  %v8582_v0 = vld [vmem:[%s9683_s1 + $0x8] sm:$0xff]  ;;  %v8588_v40 = vld [vmem:[%s9683_s1 + $0x18] sm:$0xff] }
 0x6a3   :  { %2380 = vmatpush1.msra.mxu0 %v8570_v42  ;;  %2451 = vmatpush1.msra.mxu1 %v8576_v29  ;;  %11220 = vst [vmem:[#allocation24_spill] sm:$0xff] %v8582_v0  ;;  %11221 = vst [vmem:[#allocation25_spill] sm:$0xff] %v8588_v40  ;;  %v8594_v42 = vld [vmem:[%s9683_s1] sm:$0xff] }
 0x6a4   :  { %2381 = vmatprep.subr.mxu0 %v8582_v0  ;;  %2452 = vmatprep.subr.mxu1 %v8588_v40  ;;  %11222 = vst [vmem:[#allocation26_spill] sm:$0xff] %v8594_v42  ;;  %v8601_v0 = vld [vmem:[%s9683_s1 + $0x10] sm:$0xff]  ;;  %v8610_v40 = vld [vmem:[%s9684_s2 + $0x1e8] sm:$0xff]  ;;  %s3154_s1 = sshll.u32 %s3989_s9, 4  ;;  %s3155_s1 = int_to_ptr.vmem [resolvable:$true] %s3154_s1 }
 0x6a5   :  { %2382 = vmatpush1.msra.mxu0 %v8594_v42  ;;  %2415 = vmatprep.mubr.f32.mxu0 %v11070_v24  ;;  %11223 = vst [vmem:[#allocation27_spill] sm:$0xff] %v8601_v0  ;;  %11224 = vst [vmem:[#allocation28_spill] sm:$0xff] %v8610_v40  ;;  %v8616_v42 = vld [vmem:[%s9684_s2 + $0x1f8] sm:$0xff]  ;;  %s3964_s10 = scalar_lea.vmem %s3155_s1, 32  ;;  %p3969_p1 = scmp.lt.s32.totalorder %s3155_s1, %s3155_s1 }
 0x6a6   :  { %2453 = vmatpush1.msra.mxu1 %v8601_v0  ;;  %2486 = vmatprep.mubr.f32.mxu1 %v11070_v24  ;;  %11225 = vst [vmem:[#allocation29_spill] sm:$0xff] %v8616_v42  ;;  %v8622_v0 = vld [vmem:[%s9684_s2 + $0x1e0] sm:$0xff]  ;;  %p3965_p0 = scmp.ne.s32.totalorder %s3155_s1, %s3964_s10  ;;  %p3970_p2 = scmp.lt.s32.totalorder %s3964_s10, %s3964_s10 }
 0x6a7   :  { %2416 = vmatmul.mubr.f32.vlgmr.msra.gmra.mxu0 %v8227_v44  ;;  %2487 = vmatmul.mubr.f32.vlgmr.msra.gmra.mxu1 %v8227_v44  ;;  %11226 = vst [vmem:[#allocation30_spill] sm:$0xff] %v8622_v0  ;;  %v8628_v44 = vld [vmem:[%s9684_s2 + $0x1f0] sm:$0xff] }
 0x6a8   :  { %2541 = vmatprep.subr.mxu0 %v8610_v40  ;;  %2612 = vmatprep.subr.mxu1 %v8616_v42  ;;  %11227 = vst [vmem:[#allocation31_spill] sm:$0xff] %v8628_v44  ;;  %v8634_v40 = vld [vmem:[%s9684_s2 + $0x1c8] sm:$0xff]  ;;  %v8640_v42 = vld [vmem:[%s9684_s2 + $0x1d8] sm:$0xff]  ;;  %p3971_p3 = por %p3970_p2, %p3969_p1 }
 0x6a9   :  { %2542 = vmatpush1.msra.mxu0 %v8622_v0  ;;  %2613 = vmatpush1.msra.mxu1 %v8628_v44  ;;  %11228 = vst [vmem:[#allocation32_spill] sm:$0xff] %v8634_v40  ;;  %11229 = vst [vmem:[#allocation33_spill] sm:$0xff] %v8640_v42  ;;  %v8646_v0 = vld [vmem:[%s9684_s2 + $0x1c0] sm:$0xff]  ;;  %v8652_v44 = vld [vmem:[%s9684_s2 + $0x1d0] sm:$0xff] }
 0x6aa   :  { %2543 = vmatprep.subr.mxu0 %v8634_v40  ;;  %2614 = vmatprep.subr.mxu1 %v8640_v42  ;;  %11230 = vst [vmem:[#allocation34_spill] sm:$0xff] %v8646_v0  ;;  %11231 = vst [vmem:[#allocation35_spill] sm:$0xff] %v8652_v44  ;;  %v8658_v40 = vld [vmem:[%s9684_s2 + $0x1a8] sm:$0xff]  ;;  %v8664_v42 = vld [vmem:[%s9684_s2 + $0x1b8] sm:$0xff]  ;;  %p3972_p4 = pnand %p3971_p3, %p3965_p0 }
 0x6ab   :  { %2544 = vmatpush1.msra.mxu0 %v8646_v0  ;;  %2615 = vmatpush1.msra.mxu1 %v8652_v44  ;;  %11232 = vst [vmem:[#allocation36_spill] sm:$0xff] %v8658_v40  ;;  %11233 = vst [vmem:[#allocation37_spill] sm:$0xff] %v8664_v42  ;;  %v8670_v0 = vld [vmem:[%s9684_s2 + $0x1a0] sm:$0xff]  ;;  %v8676_v44 = vld [vmem:[%s9684_s2 + $0x1b0] sm:$0xff] }
 0x6ac   :  { %2545 = vmatprep.subr.mxu0 %v8658_v40  ;;  %2616 = vmatprep.subr.mxu1 %v8664_v42  ;;  %11234 = vst [vmem:[#allocation38_spill] sm:$0xff] %v8670_v0  ;;  %11235 = vst [vmem:[#allocation39_spill] sm:$0xff] %v8676_v44  ;;  %v8682_v40 = vld [vmem:[%s9684_s2 + $0x188] sm:$0xff]  ;;  %v8688_v42 = vld [vmem:[%s9684_s2 + $0x198] sm:$0xff] }
 0x6ad   :  { %2546 = vmatpush1.msra.mxu0 %v8670_v0  ;;  %2617 = vmatpush1.msra.mxu1 %v8676_v44  ;;  %11236 = vst [vmem:[#allocation40_spill] sm:$0xff] %v8682_v40  ;;  %11237 = vst [vmem:[#allocation41_spill] sm:$0xff] %v8688_v42  ;;  %v8694_v0 = vld [vmem:[%s9684_s2 + $0x180] sm:$0xff]  ;;  %v8700_v44 = vld [vmem:[%s9684_s2 + $0x190] sm:$0xff] }
 0x6ae   :  { %2547 = vmatprep.subr.mxu0 %v8682_v40  ;;  %2618 = vmatprep.subr.mxu1 %v8688_v42  ;;  %11238 = vst [vmem:[#allocation42_spill] sm:$0xff] %v8694_v0  ;;  %11239 = vst [vmem:[#allocation43_spill] sm:$0xff] %v8700_v44  ;;  %v8706_v40 = vld [vmem:[%s9684_s2 + $0x168] sm:$0xff]  ;;  %v8712_v42 = vld [vmem:[%s9684_s2 + $0x178] sm:$0xff] }
 0x6af   :  { %2548 = vmatpush1.msra.mxu0 %v8694_v0  ;;  %2619 = vmatpush1.msra.mxu1 %v8700_v44  ;;  %11240 = vst [vmem:[#allocation44_spill] sm:$0xff] %v8706_v40  ;;  %11241 = vst [vmem:[#allocation45_spill] sm:$0xff] %v8712_v42  ;;  %v8718_v0 = vld [vmem:[%s9684_s2 + $0x160] sm:$0xff]  ;;  %v8724_v44 = vld [vmem:[%s9684_s2 + $0x170] sm:$0xff] }
 0x6b0   :  { %2549 = vmatprep.subr.mxu0 %v8706_v40  ;;  %2620 = vmatprep.subr.mxu1 %v8712_v42  ;;  %11242 = vst [vmem:[#allocation46_spill] sm:$0xff] %v8718_v0  ;;  %11243 = vst [vmem:[#allocation47_spill] sm:$0xff] %v8724_v44  ;;  %v8730_v40 = vld [vmem:[%s9684_s2 + $0x148] sm:$0xff]  ;;  %v8736_v42 = vld [vmem:[%s9684_s2 + $0x158] sm:$0xff] }
 0x6b1   :  { %2550 = vmatpush1.msra.mxu0 %v8718_v0  ;;  %2621 = vmatpush1.msra.mxu1 %v8724_v44  ;;  %11244 = vst [vmem:[#allocation48_spill] sm:$0xff] %v8730_v40  ;;  %11245 = vst [vmem:[#allocation49_spill] sm:$0xff] %v8736_v42  ;;  %v8742_v0 = vld [vmem:[%s9684_s2 + $0x140] sm:$0xff]  ;;  %v8748_v44 = vld [vmem:[%s9684_s2 + $0x150] sm:$0xff] }
 0x6b2   :  { %2551 = vmatprep.subr.mxu0 %v8730_v40  ;;  %2622 = vmatprep.subr.mxu1 %v8736_v42  ;;  %11246 = vst [vmem:[#allocation50_spill] sm:$0xff] %v8742_v0  ;;  %11247 = vst [vmem:[#allocation51_spill] sm:$0xff] %v8748_v44  ;;  %v8754_v40 = vld [vmem:[%s9684_s2 + $0x128] sm:$0xff]  ;;  %v8760_v42 = vld [vmem:[%s9684_s2 + $0x138] sm:$0xff] }
 0x6b3   :  { %2552 = vmatpush1.msra.mxu0 %v8742_v0  ;;  %2623 = vmatpush1.msra.mxu1 %v8748_v44  ;;  %11248 = vst [vmem:[#allocation52_spill] sm:$0xff] %v8754_v40  ;;  %11249 = vst [vmem:[#allocation53_spill] sm:$0xff] %v8760_v42  ;;  %v8766_v0 = vld [vmem:[%s9684_s2 + $0x120] sm:$0xff]  ;;  %v8772_v44 = vld [vmem:[%s9684_s2 + $0x130] sm:$0xff] }
 0x6b4   :  { %2553 = vmatprep.subr.mxu0 %v8754_v40  ;;  %2624 = vmatprep.subr.mxu1 %v8760_v42  ;;  %11250 = vst [vmem:[#allocation54_spill] sm:$0xff] %v8766_v0  ;;  %11251 = vst [vmem:[#allocation55_spill] sm:$0xff] %v8772_v44  ;;  %v8778_v40 = vld [vmem:[%s9684_s2 + $0x108] sm:$0xff]  ;;  %v8784_v42 = vld [vmem:[%s9684_s2 + $0x118] sm:$0xff] }
 0x6b5   :  { %2554 = vmatpush1.msra.mxu0 %v8766_v0  ;;  %2625 = vmatpush1.msra.mxu1 %v8772_v44  ;;  %11252 = vst [vmem:[#allocation56_spill] sm:$0xff] %v8778_v40  ;;  %11253 = vst [vmem:[#allocation57_spill] sm:$0xff] %v8784_v42  ;;  %v8790_v0 = vld [vmem:[%s9684_s2 + $0x100] sm:$0xff]  ;;  %v8796_v44 = vld [vmem:[%s9684_s2 + $0x110] sm:$0xff] }
 0x6b6   :  { %2555 = vmatprep.subr.mxu0 %v8778_v40  ;;  %2626 = vmatprep.subr.mxu1 %v8784_v42  ;;  %11254 = vst [vmem:[#allocation58_spill] sm:$0xff] %v8790_v0  ;;  %11255 = vst [vmem:[#allocation59_spill] sm:$0xff] %v8796_v44  ;;  %v8802_v40 = vld [vmem:[%s9684_s2 + $0xe8] sm:$0xff]  ;;  %v8808_v42 = vld [vmem:[%s9684_s2 + $0xf8] sm:$0xff] }
 0x6b7   :  { %2556 = vmatpush1.msra.mxu0 %v8790_v0  ;;  %2627 = vmatpush1.msra.mxu1 %v8796_v44  ;;  %11256 = vst [vmem:[#allocation60_spill] sm:$0xff] %v8802_v40  ;;  %11257 = vst [vmem:[#allocation61_spill] sm:$0xff] %v8808_v42  ;;  %v8814_v0 = vld [vmem:[%s9684_s2 + $0xe0] sm:$0xff]  ;;  %v8820_v44 = vld [vmem:[%s9684_s2 + $0xf0] sm:$0xff] }
 0x6b8   :  { %2557 = vmatprep.subr.mxu0 %v8802_v40  ;;  %2628 = vmatprep.subr.mxu1 %v8808_v42  ;;  %11258 = vst [vmem:[#allocation62_spill] sm:$0xff] %v8814_v0  ;;  %11259 = vst [vmem:[#allocation63_spill] sm:$0xff] %v8820_v44  ;;  %v8826_v40 = vld [vmem:[%s9684_s2 + $0xc8] sm:$0xff]  ;;  %v8832_v42 = vld [vmem:[%s9684_s2 + $0xd8] sm:$0xff] }
 0x6b9   :  { %2558 = vmatpush1.msra.mxu0 %v8814_v0  ;;  %2629 = vmatpush1.msra.mxu1 %v8820_v44  ;;  %11260 = vst [vmem:[#allocation64_spill] sm:$0xff] %v8826_v40  ;;  %11261 = vst [vmem:[#allocation65_spill] sm:$0xff] %v8832_v42  ;;  %v8838_v0 = vld [vmem:[%s9684_s2 + $0xc0] sm:$0xff]  ;;  %v8844_v44 = vld [vmem:[%s9684_s2 + $0xd0] sm:$0xff] }
 0x6ba   :  { %2559 = vmatprep.subr.mxu0 %v8826_v40  ;;  %2630 = vmatprep.subr.mxu1 %v8832_v42  ;;  %11262 = vst [vmem:[#allocation66_spill] sm:$0xff] %v8838_v0  ;;  %11263 = vst [vmem:[#allocation67_spill] sm:$0xff] %v8844_v44  ;;  %v8850_v40 = vld [vmem:[%s9684_s2 + $0xa8] sm:$0xff]  ;;  %v8856_v42 = vld [vmem:[%s9684_s2 + $0xb8] sm:$0xff] }
 0x6bb   :  { %2560 = vmatpush1.msra.mxu0 %v8838_v0  ;;  %2631 = vmatpush1.msra.mxu1 %v8844_v44  ;;  %11264 = vst [vmem:[#allocation68_spill] sm:$0xff] %v8850_v40  ;;  %11265 = vst [vmem:[#allocation69_spill] sm:$0xff] %v8856_v42  ;;  %v8862_v0 = vld [vmem:[%s9684_s2 + $0xa0] sm:$0xff]  ;;  %v8868_v44 = vld [vmem:[%s9684_s2 + $0xb0] sm:$0xff] }
 0x6bc   :  { %2561 = vmatprep.subr.mxu0 %v8850_v40  ;;  %2632 = vmatprep.subr.mxu1 %v8856_v42  ;;  %11266 = vst [vmem:[#allocation70_spill] sm:$0xff] %v8862_v0  ;;  %11267 = vst [vmem:[#allocation71_spill] sm:$0xff] %v8868_v44  ;;  %v8874_v40 = vld [vmem:[%s9684_s2 + $0x88] sm:$0xff]  ;;  %v8880_v42 = vld [vmem:[%s9684_s2 + $0x98] sm:$0xff] }
 0x6bd   :  { %2562 = vmatpush1.msra.mxu0 %v8862_v0  ;;  %2633 = vmatpush1.msra.mxu1 %v8868_v44  ;;  %11268 = vst [vmem:[#allocation72_spill] sm:$0xff] %v8874_v40  ;;  %11269 = vst [vmem:[#allocation73_spill] sm:$0xff] %v8880_v42  ;;  %v8886_v0 = vld [vmem:[%s9684_s2 + $0x80] sm:$0xff]  ;;  %v8892_v44 = vld [vmem:[%s9684_s2 + $0x90] sm:$0xff] }
 0x6be   :  { %2563 = vmatprep.subr.mxu0 %v8874_v40  ;;  %2634 = vmatprep.subr.mxu1 %v8880_v42  ;;  %11270 = vst [vmem:[#allocation74_spill] sm:$0xff] %v8886_v0  ;;  %11271 = vst [vmem:[#allocation75_spill] sm:$0xff] %v8892_v44  ;;  %v8898_v40 = vld [vmem:[%s9684_s2 + $0x68] sm:$0xff]  ;;  %v8904_v42 = vld [vmem:[%s9684_s2 + $0x78] sm:$0xff] }
 0x6bf   :  { %2564 = vmatpush1.msra.mxu0 %v8886_v0  ;;  %2635 = vmatpush1.msra.mxu1 %v8892_v44  ;;  %11272 = vst [vmem:[#allocation76_spill] sm:$0xff] %v8898_v40  ;;  %11273 = vst [vmem:[#allocation77_spill] sm:$0xff] %v8904_v42  ;;  %v8910_v0 = vld [vmem:[%s9684_s2 + $0x60] sm:$0xff]  ;;  %v8916_v44 = vld [vmem:[%s9684_s2 + $0x70] sm:$0xff] }
 0x6c0   :  { %2565 = vmatprep.subr.mxu0 %v8898_v40  ;;  %2636 = vmatprep.subr.mxu1 %v8904_v42  ;;  %11274 = vst [vmem:[#allocation78_spill] sm:$0xff] %v8910_v0  ;;  %11275 = vst [vmem:[#allocation79_spill] sm:$0xff] %v8916_v44  ;;  %v8922_v40 = vld [vmem:[%s9684_s2 + $0x48] sm:$0xff]  ;;  %v8928_v42 = vld [vmem:[%s9684_s2 + $0x58] sm:$0xff] }
 0x6c1   :  { %2566 = vmatpush1.msra.mxu0 %v8910_v0  ;;  %2637 = vmatpush1.msra.mxu1 %v8916_v44  ;;  %11276 = vst [vmem:[#allocation80_spill] sm:$0xff] %v8922_v40  ;;  %11277 = vst [vmem:[#allocation81_spill] sm:$0xff] %v8928_v42  ;;  %v8934_v0 = vld [vmem:[%s9684_s2 + $0x40] sm:$0xff]  ;;  %v8940_v44 = vld [vmem:[%s9684_s2 + $0x50] sm:$0xff] }
 0x6c2   :  { %2567 = vmatprep.subr.mxu0 %v8922_v40  ;;  %2638 = vmatprep.subr.mxu1 %v8928_v42  ;;  %11278 = vst [vmem:[#allocation82_spill] sm:$0xff] %v8934_v0  ;;  %11279 = vst [vmem:[#allocation83_spill] sm:$0xff] %v8940_v44  ;;  %v8946_v40 = vld [vmem:[%s9684_s2 + $0x28] sm:$0xff]  ;;  %v8952_v42 = vld [vmem:[%s9684_s2 + $0x38] sm:$0xff] }
 0x6c3   :  { %2568 = vmatpush1.msra.mxu0 %v8934_v0  ;;  %2639 = vmatpush1.msra.mxu1 %v8940_v44  ;;  %11280 = vst [vmem:[#allocation84_spill] sm:$0xff] %v8946_v40  ;;  %11281 = vst [vmem:[#allocation85_spill] sm:$0xff] %v8952_v42  ;;  %v8958_v0 = vld [vmem:[%s9684_s2 + $0x20] sm:$0xff]  ;;  %v8964_v44 = vld [vmem:[%s9684_s2 + $0x30] sm:$0xff] }
 0x6c4   :  { %2569 = vmatprep.subr.mxu0 %v8946_v40  ;;  %2640 = vmatprep.subr.mxu1 %v8952_v42  ;;  %11282 = vst [vmem:[#allocation86_spill] sm:$0xff] %v8958_v0  ;;  %11283 = vst [vmem:[#allocation87_spill] sm:$0xff] %v8964_v44  ;;  %v8970_v40 = vld [vmem:[%s9684_s2 + $0x8] sm:$0xff]  ;;  %v8976_v42 = vld [vmem:[%s9684_s2 + $0x18] sm:$0xff] }
 0x6c5   :  { %2570 = vmatpush1.msra.mxu0 %v8958_v0  ;;  %2641 = vmatpush1.msra.mxu1 %v8964_v44  ;;  %11284 = vst [vmem:[#allocation88_spill] sm:$0xff] %v8970_v40  ;;  %11285 = vst [vmem:[#allocation89_spill] sm:$0xff] %v8976_v42  ;;  %v8982_v0 = vld [vmem:[%s9684_s2] sm:$0xff]  ;;  %v8988_v44 = vld [vmem:[%s9684_s2 + $0x10] sm:$0xff] }
 0x6c6   :  { %2571 = vmatprep.subr.mxu0 %v8970_v40  ;;  %2642 = vmatprep.subr.mxu1 %v8976_v42  ;;  %11286 = vst [vmem:[#allocation90_spill] sm:$0xff] %v8982_v0  ;;  %11287 = vst [vmem:[#allocation91_spill] sm:$0xff] %v8988_v44  ;;  %v8994_v40 = vld [vmem:[%s9684_s2 + $0x3e8] sm:$0xff]  ;;  %v9000_v42 = vld [vmem:[%s9684_s2 + $0x3f8] sm:$0xff] }
 0x6c7   :  { %2572 = vmatpush1.msra.mxu0 %v8982_v0  ;;  %2643 = vmatpush1.msra.mxu1 %v8988_v44  ;;  %11288 = vst [vmem:[#allocation92_spill] sm:$0xff] %v8994_v40  ;;  %11289 = vst [vmem:[#allocation93_spill] sm:$0xff] %v9000_v42  ;;  %v9006_v0 = vld [vmem:[%s9684_s2 + $0x3e0] sm:$0xff]  ;;  %v9012_v44 = vld [vmem:[%s9684_s2 + $0x3f0] sm:$0xff] }
 0x6c8   :  { %2573 = vmatprep.subr.mxu0 %v8994_v40  ;;  %2644 = vmatprep.subr.mxu1 %v9000_v42  ;;  %11290 = vst [vmem:[#allocation94_spill] sm:$0xff] %v9006_v0  ;;  %11291 = vst [vmem:[#allocation95_spill] sm:$0xff] %v9012_v44  ;;  %v9018_v40 = vld [vmem:[%s9684_s2 + $0x3c8] sm:$0xff]  ;;  %v9024_v42 = vld [vmem:[%s9684_s2 + $0x3d8] sm:$0xff] }
 0x6c9   :  { %2574 = vmatpush2.msra.mxu0 %v9006_v0  ;;  %2645 = vmatpush2.msra.mxu1 %v9012_v44  ;;  %11292 = vst [vmem:[#allocation96_spill] sm:$0xff] %v9018_v40  ;;  %11293 = vst [vmem:[#allocation97_spill] sm:$0xff] %v9024_v42  ;;  %v9030_v0 = vld [vmem:[%s9684_s2 + $0x3c0] sm:$0xff]  ;;  %v9036_v44 = vld [vmem:[%s9684_s2 + $0x3d0] sm:$0xff] }
 0x6ca   :  { %2575 = vmatprep.subr.mxu0 %v9018_v40  ;;  %2646 = vmatprep.subr.mxu1 %v9024_v42  ;;  %11294 = vst [vmem:[#allocation98_spill] sm:$0xff] %v9030_v0  ;;  %11295 = vst [vmem:[#allocation99_spill] sm:$0xff] %v9036_v44  ;;  %v9042_v40 = vld [vmem:[%s9684_s2 + $0x3a8] sm:$0xff]  ;;  %v9048_v42 = vld [vmem:[%s9684_s2 + $0x3b8] sm:$0xff] }
 0x6cb   :  { %2576 = vmatpush2.msra.mxu0 %v9030_v0  ;;  %2647 = vmatpush2.msra.mxu1 %v9036_v44  ;;  %11296 = vst [vmem:[#allocation100_spill] sm:$0xff] %v9042_v40  ;;  %11297 = vst [vmem:[#allocation101_spill] sm:$0xff] %v9048_v42  ;;  %v9054_v0 = vld [vmem:[%s9684_s2 + $0x3a0] sm:$0xff]  ;;  %v9060_v44 = vld [vmem:[%s9684_s2 + $0x3b0] sm:$0xff] }
 0x6cc   :  { %2577 = vmatprep.subr.mxu0 %v9042_v40  ;;  %2648 = vmatprep.subr.mxu1 %v9048_v42  ;;  %11298 = vst [vmem:[#allocation102_spill] sm:$0xff] %v9054_v0  ;;  %11299 = vst [vmem:[#allocation103_spill] sm:$0xff] %v9060_v44  ;;  %v9066_v40 = vld [vmem:[%s9684_s2 + $0x388] sm:$0xff]  ;;  %v9072_v42 = vld [vmem:[%s9684_s2 + $0x398] sm:$0xff] }
 0x6cd   :  { %2578 = vmatpush2.msra.mxu0 %v9054_v0  ;;  %2649 = vmatpush2.msra.mxu1 %v9060_v44  ;;  %11300 = vst [vmem:[#allocation104_spill] sm:$0xff] %v9066_v40  ;;  %11301 = vst [vmem:[#allocation105_spill] sm:$0xff] %v9072_v42  ;;  %v9078_v0 = vld [vmem:[%s9684_s2 + $0x380] sm:$0xff]  ;;  %v9084_v44 = vld [vmem:[%s9684_s2 + $0x390] sm:$0xff] }
 0x6ce   :  { %2579 = vmatprep.subr.mxu0 %v9066_v40  ;;  %2650 = vmatprep.subr.mxu1 %v9072_v42  ;;  %11302 = vst [vmem:[#allocation106_spill] sm:$0xff] %v9078_v0  ;;  %11303 = vst [vmem:[#allocation107_spill] sm:$0xff] %v9084_v44  ;;  %v9090_v40 = vld [vmem:[%s9684_s2 + $0x368] sm:$0xff]  ;;  %v9096_v42 = vld [vmem:[%s9684_s2 + $0x378] sm:$0xff] }
 0x6cf   :  { %2580 = vmatpush2.msra.mxu0 %v9078_v0  ;;  %2651 = vmatpush2.msra.mxu1 %v9084_v44  ;;  %11304 = vst [vmem:[#allocation108_spill] sm:$0xff] %v9090_v40  ;;  %11305 = vst [vmem:[#allocation109_spill] sm:$0xff] %v9096_v42  ;;  %v9102_v0 = vld [vmem:[%s9684_s2 + $0x360] sm:$0xff]  ;;  %v9108_v44 = vld [vmem:[%s9684_s2 + $0x370] sm:$0xff] }
 0x6d0   :  { %2581 = vmatprep.subr.mxu0 %v9090_v40  ;;  %2652 = vmatprep.subr.mxu1 %v9096_v42  ;;  %11306 = vst [vmem:[#allocation110_spill] sm:$0xff] %v9102_v0  ;;  %11307 = vst [vmem:[#allocation111_spill] sm:$0xff] %v9108_v44  ;;  %v9114_v40 = vld [vmem:[%s9684_s2 + $0x348] sm:$0xff]  ;;  %v9120_v42 = vld [vmem:[%s9684_s2 + $0x358] sm:$0xff] }
 0x6d1   :  { %2582 = vmatpush2.msra.mxu0 %v9102_v0  ;;  %2653 = vmatpush2.msra.mxu1 %v9108_v44  ;;  %11308 = vst [vmem:[#allocation112_spill] sm:$0xff] %v9114_v40  ;;  %11309 = vst [vmem:[#allocation113_spill] sm:$0xff] %v9120_v42  ;;  %v9126_v0 = vld [vmem:[%s9684_s2 + $0x340] sm:$0xff]  ;;  %v9132_v44 = vld [vmem:[%s9684_s2 + $0x350] sm:$0xff] }
 0x6d2   :  { %2583 = vmatprep.subr.mxu0 %v9114_v40  ;;  %2654 = vmatprep.subr.mxu1 %v9120_v42  ;;  %11310 = vst [vmem:[#allocation114_spill] sm:$0xff] %v9126_v0  ;;  %11311 = vst [vmem:[#allocation115_spill] sm:$0xff] %v9132_v44  ;;  %v9138_v40 = vld [vmem:[%s9684_s2 + $0x328] sm:$0xff]  ;;  %v9144_v42 = vld [vmem:[%s9684_s2 + $0x338] sm:$0xff] }
 0x6d3   :  { %2584 = vmatpush2.msra.mxu0 %v9126_v0  ;;  %2655 = vmatpush2.msra.mxu1 %v9132_v44  ;;  %11312 = vst [vmem:[#allocation116_spill] sm:$0xff] %v9138_v40  ;;  %11313 = vst [vmem:[#allocation117_spill] sm:$0xff] %v9144_v42  ;;  %v9150_v0 = vld [vmem:[%s9684_s2 + $0x320] sm:$0xff]  ;;  %v9156_v44 = vld [vmem:[%s9684_s2 + $0x330] sm:$0xff] }
 0x6d4   :  { %2585 = vmatprep.subr.mxu0 %v9138_v40  ;;  %2656 = vmatprep.subr.mxu1 %v9144_v42  ;;  %11314 = vst [vmem:[#allocation118_spill] sm:$0xff] %v9150_v0  ;;  %11315 = vst [vmem:[#allocation119_spill] sm:$0xff] %v9156_v44  ;;  %v9162_v40 = vld [vmem:[%s9684_s2 + $0x308] sm:$0xff]  ;;  %v9168_v42 = vld [vmem:[%s9684_s2 + $0x318] sm:$0xff] }
 0x6d5   :  { %2586 = vmatpush2.msra.mxu0 %v9150_v0  ;;  %2657 = vmatpush2.msra.mxu1 %v9156_v44  ;;  %11316 = vst [vmem:[#allocation120_spill] sm:$0xff] %v9162_v40  ;;  %11317 = vst [vmem:[#allocation121_spill] sm:$0xff] %v9168_v42  ;;  %v9174_v0 = vld [vmem:[%s9684_s2 + $0x300] sm:$0xff]  ;;  %v9180_v44 = vld [vmem:[%s9684_s2 + $0x310] sm:$0xff] }
 0x6d6   :  { %2587 = vmatprep.subr.mxu0 %v9162_v40  ;;  %2658 = vmatprep.subr.mxu1 %v9168_v42  ;;  %11318 = vst [vmem:[#allocation122_spill] sm:$0xff] %v9174_v0  ;;  %11319 = vst [vmem:[#allocation123_spill] sm:$0xff] %v9180_v44  ;;  %v9186_v40 = vld [vmem:[%s9684_s2 + $0x2e8] sm:$0xff]  ;;  %v9192_v42 = vld [vmem:[%s9684_s2 + $0x2f8] sm:$0xff] }
 0x6d7   :  { %2588 = vmatpush2.msra.mxu0 %v9174_v0  ;;  %2659 = vmatpush2.msra.mxu1 %v9180_v44  ;;  %11320 = vst [vmem:[#allocation124_spill] sm:$0xff] %v9186_v40  ;;  %11321 = vst [vmem:[#allocation125_spill] sm:$0xff] %v9192_v42  ;;  %v9198_v0 = vld [vmem:[%s9684_s2 + $0x2e0] sm:$0xff]  ;;  %v9204_v44 = vld [vmem:[%s9684_s2 + $0x2f0] sm:$0xff] }
 0x6d8   :  { %2589 = vmatprep.subr.mxu0 %v9186_v40  ;;  %2660 = vmatprep.subr.mxu1 %v9192_v42  ;;  %11322 = vst [vmem:[#allocation126_spill] sm:$0xff] %v9198_v0  ;;  %11323 = vst [vmem:[#allocation127_spill] sm:$0xff] %v9204_v44  ;;  %v9210_v40 = vld [vmem:[%s9684_s2 + $0x2c8] sm:$0xff]  ;;  %v9216_v42 = vld [vmem:[%s9684_s2 + $0x2d8] sm:$0xff] }
 0x6d9   :  { %2590 = vmatpush2.msra.mxu0 %v9198_v0  ;;  %2661 = vmatpush2.msra.mxu1 %v9204_v44  ;;  %11324 = vst [vmem:[#allocation128_spill] sm:$0xff] %v9210_v40  ;;  %11325 = vst [vmem:[#allocation129_spill] sm:$0xff] %v9216_v42  ;;  %v9222_v0 = vld [vmem:[%s9684_s2 + $0x2c0] sm:$0xff]  ;;  %v9228_v44 = vld [vmem:[%s9684_s2 + $0x2d0] sm:$0xff] }
 0x6da   :  { %2591 = vmatprep.subr.mxu0 %v9210_v40  ;;  %2662 = vmatprep.subr.mxu1 %v9216_v42  ;;  %11326 = vst [vmem:[#allocation130_spill] sm:$0xff] %v9222_v0  ;;  %11327 = vst [vmem:[#allocation131_spill] sm:$0xff] %v9228_v44  ;;  %v9234_v40 = vld [vmem:[%s9684_s2 + $0x2a8] sm:$0xff]  ;;  %v9240_v42 = vld [vmem:[%s9684_s2 + $0x2b8] sm:$0xff] }
 0x6db   :  { %2592 = vmatpush2.msra.mxu0 %v9222_v0  ;;  %2663 = vmatpush2.msra.mxu1 %v9228_v44  ;;  %11328 = vst [vmem:[#allocation132_spill] sm:$0xff] %v9234_v40  ;;  %11329 = vst [vmem:[#allocation133_spill] sm:$0xff] %v9240_v42  ;;  %v9246_v0 = vld [vmem:[%s9684_s2 + $0x2a0] sm:$0xff]  ;;  %v9252_v44 = vld [vmem:[%s9684_s2 + $0x2b0] sm:$0xff] }
 0x6dc   :  { %2593 = vmatprep.subr.mxu0 %v9234_v40  ;;  %2664 = vmatprep.subr.mxu1 %v9240_v42  ;;  %11330 = vst [vmem:[#allocation134_spill] sm:$0xff] %v9246_v0  ;;  %11331 = vst [vmem:[#allocation135_spill] sm:$0xff] %v9252_v44  ;;  %v9258_v40 = vld [vmem:[%s9684_s2 + $0x288] sm:$0xff]  ;;  %v9264_v42 = vld [vmem:[%s9684_s2 + $0x298] sm:$0xff] }
 0x6dd   :  { %2594 = vmatpush2.msra.mxu0 %v9246_v0  ;;  %2665 = vmatpush2.msra.mxu1 %v9252_v44  ;;  %11332 = vst [vmem:[#allocation136_spill] sm:$0xff] %v9258_v40  ;;  %11333 = vst [vmem:[#allocation137_spill] sm:$0xff] %v9264_v42  ;;  %v9270_v0 = vld [vmem:[%s9684_s2 + $0x280] sm:$0xff]  ;;  %v9276_v44 = vld [vmem:[%s9684_s2 + $0x290] sm:$0xff] }
 0x6de   :  { %2595 = vmatprep.subr.mxu0 %v9258_v40  ;;  %2666 = vmatprep.subr.mxu1 %v9264_v42  ;;  %11334 = vst [vmem:[#allocation138_spill] sm:$0xff] %v9270_v0  ;;  %11335 = vst [vmem:[#allocation139_spill] sm:$0xff] %v9276_v44  ;;  %v9282_v40 = vld [vmem:[%s9684_s2 + $0x268] sm:$0xff]  ;;  %v9288_v42 = vld [vmem:[%s9684_s2 + $0x278] sm:$0xff] }
 0x6df   :  { %2596 = vmatpush2.msra.mxu0 %v9270_v0  ;;  %2667 = vmatpush2.msra.mxu1 %v9276_v44  ;;  %11336 = vst [vmem:[#allocation140_spill] sm:$0xff] %v9282_v40  ;;  %11337 = vst [vmem:[#allocation141_spill] sm:$0xff] %v9288_v42  ;;  %v9294_v0 = vld [vmem:[%s9684_s2 + $0x260] sm:$0xff]  ;;  %v9300_v44 = vld [vmem:[%s9684_s2 + $0x270] sm:$0xff] }
 0x6e0   :  { %2597 = vmatprep.subr.mxu0 %v9282_v40  ;;  %2668 = vmatprep.subr.mxu1 %v9288_v42  ;;  %11338 = vst [vmem:[#allocation142_spill] sm:$0xff] %v9294_v0  ;;  %11339 = vst [vmem:[#allocation143_spill] sm:$0xff] %v9300_v44  ;;  %v9306_v40 = vld [vmem:[%s9684_s2 + $0x248] sm:$0xff]  ;;  %v9312_v42 = vld [vmem:[%s9684_s2 + $0x258] sm:$0xff] }
 0x6e1   :  { %2598 = vmatpush2.msra.mxu0 %v9294_v0  ;;  %2669 = vmatpush2.msra.mxu1 %v9300_v44  ;;  %11340 = vst [vmem:[#allocation144_spill] sm:$0xff] %v9306_v40  ;;  %11341 = vst [vmem:[#allocation145_spill] sm:$0xff] %v9312_v42  ;;  %v9318_v0 = vld [vmem:[%s9684_s2 + $0x240] sm:$0xff]  ;;  %v9324_v44 = vld [vmem:[%s9684_s2 + $0x250] sm:$0xff] }
 0x6e2   :  { %2599 = vmatprep.subr.mxu0 %v9306_v40  ;;  %2670 = vmatprep.subr.mxu1 %v9312_v42  ;;  %11342 = vst [vmem:[#allocation146_spill] sm:$0xff] %v9318_v0  ;;  %11343 = vst [vmem:[#allocation147_spill] sm:$0xff] %v9324_v44  ;;  %v9330_v40 = vld [vmem:[%s9684_s2 + $0x228] sm:$0xff]  ;;  %v9336_v42 = vld [vmem:[%s9684_s2 + $0x238] sm:$0xff] }
 0x6e3   :  { %2600 = vmatpush2.msra.mxu0 %v9318_v0  ;;  %2671 = vmatpush2.msra.mxu1 %v9324_v44  ;;  %11344 = vst [vmem:[#allocation148_spill] sm:$0xff] %v9330_v40  ;;  %11345 = vst [vmem:[#allocation149_spill] sm:$0xff] %v9336_v42  ;;  %v9342_v0 = vld [vmem:[%s9684_s2 + $0x220] sm:$0xff]  ;;  %v9348_v44 = vld [vmem:[%s9684_s2 + $0x230] sm:$0xff] }
 0x6e4   :  { %2601 = vmatprep.subr.mxu0 %v9330_v40  ;;  %2672 = vmatprep.subr.mxu1 %v9336_v42  ;;  %11346 = vst [vmem:[#allocation150_spill] sm:$0xff] %v9342_v0  ;;  %11347 = vst [vmem:[#allocation152_spill] sm:$0xff] %v9348_v44  ;;  %v9354_v40 = vld [vmem:[%s9684_s2 + $0x208] sm:$0xff]  ;;  %v9360_v42 = vld [vmem:[%s9684_s2 + $0x218] sm:$0xff] }
 0x6e5   :  { %2602 = vmatpush2.msra.mxu0 %v9342_v0  ;;  %2673 = vmatpush2.msra.mxu1 %v9348_v44  ;;  %11348 = vst [vmem:[#allocation153_spill] sm:$0xff] %v9354_v40  ;;  %11349 = vst [vmem:[#allocation154_spill] sm:$0xff] %v9360_v42  ;;  %v9366_v0 = vld [vmem:[%s9684_s2 + $0x200] sm:$0xff]  ;;  %v9372_v44 = vld [vmem:[%s9684_s2 + $0x210] sm:$0xff] }
 0x6e6   :  { %2603 = vmatprep.subr.mxu0 %v9354_v40  ;;  %2674 = vmatprep.subr.mxu1 %v9360_v42  ;;  %11350 = vst [vmem:[#allocation155_spill] sm:$0xff] %v9366_v0  ;;  %11351 = vst [vmem:[#allocation156_spill] sm:$0xff] %v9372_v44 }
 0x6e7   :  { %2604 = vmatpush2.msra.mxu0 %v9366_v0  ;;  %2675 = vmatpush2.msra.mxu1 %v9372_v44 }
 0x6e8   :  { %2703 = vmatprep.subr.mxu0 %v8201_v39  ;;  %2774 = vmatprep.subr.mxu1 %v8207_v28 }
 0x746   :  { %v2255_v40 = vpop.f32.mrf.mxu0  ;;  %v2326_v34 = vpop.f32.mrf.mxu1 }
 0x747   :  { %v2256_v42 = vadd.f32 %v2255_v40, %v11200_v41  ;;  %v2327_v18 = vadd.f32 %v2326_v34, %v11201_v53 }
 0x748   :  { %v2257_v24 = vpop.f32.mrf.mxu0  ;;  %v2328_v35 = vpop.f32.mrf.mxu1 }
 0x749   :  { %v2331_v29 = vmul.f32 0.5, %v2256_v42  ;;  %v2258_v31 = vadd.f32 %v2257_v24, %v5416_v32  ;;  %v2329_v44 = vadd.f32 %v2328_v35, %v11202_v54 }
 0x74b   :  { %3336 = vtanh.f32 %v2331_v29  ;;  %v2335_v0 = vmul.f32 0.5, %v2258_v31  ;;  %v2340_v39 = vmul.f32 0.5, %v2329_v44 }
 0x74d   :  { %3338 = vtanh.f32 %v2335_v0 }
 0x74e   :  { %3340 = vtanh.f32 %v2327_v18 }
 0x74f   :  { %3342 = vtanh.f32 %v2340_v39 }
 0x758   :  { %v3337_v25 = vpop.eup %3336 }
 0x759   :  { %v2333_v28 = vmul.f32 0.5, %v3337_v25 }
 0x75a   :  { %v3339_v62 = vpop.eup %3338 }
 0x75b   :  { %v2334_v37 = vadd.f32 0.5, %v2333_v28  ;;  %v2337_v40 = vmul.f32 0.5, %v3339_v62  ;;  %v3341_v41 = vpop.eup %3340 }
 0x75c   :  { %v3343_v0 = vpop.eup %3342 }
 0x75d   :  { %v2338_v42 = vadd.f32 0.5, %v2337_v40  ;;  %v2345_v29 = vmul.f32 %v3341_v41, %v2334_v37  ;;  %v2342_v53 = vmul.f32 0.5, %v3343_v0  ;;  %v3167_v41 = vld [vmem:[%s9682_s0 + $0x30] sm:$0xff] }
 0x75f   :  { %v2344_v24 = vmul.f32 %v2338_v42, %v8215_v7  ;;  %v2343_v37 = vadd.f32 0.5, %v2342_v53 }
 0x761   :  { %v9382_v31 = vadd.f32 %v2345_v29, %v2344_v24 }
 0x763   :  { %3344 = vtanh.f32 %v9382_v31 }
 0x767   :  { %v2417_v34 = vpop.f32.mrf.mxu0  ;;  %v2488_v18 = vpop.f32.mrf.mxu1 }
 0x769   :  { %v2419_v35 = vpop.f32.mrf.mxu0  ;;  %v2490_v44 = vpop.f32.mrf.mxu1 }
 0x76a   :  { %v2497_v54 = vcombine.low %v2417_v34, %v2419_v35  ;;  %v2498_v25 = vcombine.low %v2488_v18, %v2490_v44 }
 0x76c   :  { %v2505_v62 = vrot.slane %v2497_v54, %v11203_v10  ;;  %v2512_v39 = vrot.slane %v2498_v25, %v11203_v10 }
 0x76e   :  { %v2513_v7 = vcombine.low %v2505_v62, %v2512_v39 }
 0x770   :  { %v3345_v28 = vpop.eup %3344  ;;  %v2515_v40 = vadd.f32 %v3167_v41, %v2513_v7 }
 0x771   :  { %v2348_v42 = vmul.f32 %v3345_v28, %v2343_v37 }
 0x772   :  { %v2516_v24 = vmul.f32 0.5, %v2515_v40  ;;  %v2521_v29 = vrot.slane %v2515_v40, 2  ;;  %v2527_v18 = vrot.slane %v2515_v40, 4  ;;  %v2530_v54 = vrot.slane %v2515_v40, 6 }
 0x773   :  { %2605 = vmatprep.mubr.f32.mxu0 %v2348_v42  ;;  %2676 = vmatprep.mubr.f32.mxu1 %v2348_v42 }
 0x774   :  { %3346 = vtanh.f32 %v2516_v24  ;;  %v2523_v34 = vmul.f32 0.5, %v2521_v29  ;;  %v2532_v0 = vmul.f32 0.5, %v2530_v54  ;;  %v11398_v54 = vld [vmem:[#allocation53_spill] sm:$0xff] }
 0x776   :  { %3348 = vtanh.f32 %v2523_v34  ;;  %v11396_v34 = vld [vmem:[#allocation51_spill] sm:$0xff] }
 0x777   :  { %3350 = vtanh.f32 %v2527_v18  ;;  %v11397_v18 = vld [vmem:[#allocation52_spill] sm:$0xff] }
 0x778   :  { %3352 = vtanh.f32 %v2532_v0  ;;  %v11399_v0 = vld [vmem:[#allocation54_spill] sm:$0xff] }
 0x781   :  { %v3347_v35 = vpop.eup %3346 }
 0x782   :  { %v2518_v44 = vmul.f32 0.5, %v3347_v35  ;;  %v11400_v35 = vld [vmem:[#allocation55_spill] sm:$0xff] }
 0x783   :  { %v3349_v25 = vpop.eup %3348 }
 0x784   :  { %v2519_v10 = vadd.f32 0.5, %v2518_v44  ;;  %v2525_v62 = vmul.f32 0.5, %v3349_v25  ;;  %v3351_v39 = vpop.eup %3350  ;;  %v11401_v44 = vld [vmem:[#allocation56_spill] sm:$0xff]  ;;  %v11402_v25 = vld [vmem:[#allocation57_spill] sm:$0xff] }
 0x785   :  { %v3353_v28 = vpop.eup %3352 }
 0x786   :  { %v2526_v53 = vadd.f32 0.5, %v2525_v62  ;;  %v2537_v7 = vmul.f32 %v3351_v39, %v2519_v10  ;;  %v2534_v42 = vmul.f32 0.5, %v3353_v28  ;;  %v11352_v10 = vld [vmem:[#allocation8_spill] sm:$0xff]  ;;  %v11403_v62 = vld [vmem:[#allocation58_spill] sm:$0xff]  ;;  %v11408_v28 = vld [vmem:[#allocation63_spill] sm:$0xff] }
 0x787   :  { %v11405_v39 = vld [vmem:[#allocation60_spill] sm:$0xff] }
 0x788   :  { %v2536_v41 = vmul.f32 %v2526_v53, %v8224_v2  ;;  %v2535_v24 = vadd.f32 0.5, %v2534_v42  ;;  %v11353_v2 = vld [vmem:[#allocation9_spill] sm:$0xff]  ;;  %v11404_v53 = vld [vmem:[#allocation59_spill] sm:$0xff]  ;;  %v11409_v42 = vld [vmem:[#allocation64_spill] sm:$0xff] }
 0x78a   :  { %v9391_v37 = vadd.f32 %v2537_v7, %v2536_v41  ;;  %v11406_v41 = vld [vmem:[#allocation61_spill] sm:$0xff]  ;;  %v11407_v7 = vld [vmem:[#allocation62_spill] sm:$0xff] }
 0x78c   :  { %3354 = vtanh.f32 %v9391_v37 }
 0x799   :  { %v3355_v40 = vpop.eup %3354 }
 0x79a   :  { %v9394_v29 = vmul.f32 %v3355_v40, %v2535_v24  ;;  %v11410_v24 = vld [vmem:[#allocation65_spill] sm:$0xff]  ;;  %v11411_v40 = vld [vmem:[#allocation66_spill] sm:$0xff] }
 0x79c   :  { %2606 = vmatmul.mubr.f32.vlgmr.msra.gmra.mxu0 %v9394_v29  ;;  %2677 = vmatmul.mubr.f32.vlgmr.msra.gmra.mxu1 %v9394_v29 }
 0x79d   :  { %2704 = vmatpush1.msra.mxu0 %v8234_v45  ;;  %2775 = vmatpush1.msra.mxu1 %v8240_v52  ;;  %v11354_v45 = vld [vmem:[#allocation10_spill] sm:$0xff]  ;;  %v11355_v52 = vld [vmem:[#allocation11_spill] sm:$0xff] }
 0x79e   :  { %2705 = vmatprep.subr.mxu0 %v8246_v46  ;;  %2776 = vmatprep.subr.mxu1 %v8252_v47  ;;  %v11356_v46 = vld [vmem:[#allocation12_spill] sm:$0xff]  ;;  %v11357_v47 = vld [vmem:[#allocation13_spill] sm:$0xff] }
 0x79f   :  { %2706 = vmatpush1.msra.mxu0 %v8258_v48  ;;  %2777 = vmatpush1.msra.mxu1 %v8264_v56  ;;  %v11358_v48 = vld [vmem:[#allocation14_spill] sm:$0xff]  ;;  %v11359_v56 = vld [vmem:[#allocation15_spill] sm:$0xff] }
 0x7a0   :  { %2707 = vmatprep.subr.mxu0 %v8270_v60  ;;  %2778 = vmatprep.subr.mxu1 %v8276_v57  ;;  %v11360_v60 = vld [vmem:[#allocation16_spill] sm:$0xff]  ;;  %v11361_v57 = vld [vmem:[#allocation17_spill] sm:$0xff] }
 0x7a1   :  { %2708 = vmatpush1.msra.mxu0 %v8282_v49  ;;  %2779 = vmatpush1.msra.mxu1 %v8288_v50  ;;  %v11362_v49 = vld [vmem:[#allocation18_spill] sm:$0xff]  ;;  %v11363_v50 = vld [vmem:[#allocation19_spill] sm:$0xff] }
 0x7a2   :  { %2709 = vmatprep.subr.mxu0 %v8294_v17  ;;  %2780 = vmatprep.subr.mxu1 %v8300_v3  ;;  %v11364_v17 = vld [vmem:[#allocation20_spill] sm:$0xff]  ;;  %v11365_v3 = vld [vmem:[#allocation21_spill] sm:$0xff] }
 0x7a3   :  { %2710 = vmatpush1.msra.mxu0 %v8306_v61  ;;  %2781 = vmatpush1.msra.mxu1 %v8312_v9  ;;  %v11366_v61 = vld [vmem:[#allocation22_spill] sm:$0xff]  ;;  %v11367_v9 = vld [vmem:[#allocation23_spill] sm:$0xff] }
 0x7a4   :  { %2711 = vmatprep.subr.mxu0 %v8318_v51  ;;  %2782 = vmatprep.subr.mxu1 %v8324_v63  ;;  %v11368_v51 = vld [vmem:[#allocation24_spill] sm:$0xff]  ;;  %v11369_v63 = vld [vmem:[#allocation25_spill] sm:$0xff] }
 0x7a5   :  { %2712 = vmatpush1.msra.mxu0 %v8330_v14  ;;  %2783 = vmatpush1.msra.mxu1 %v8336_v4  ;;  %v11370_v14 = vld [vmem:[#allocation26_spill] sm:$0xff]  ;;  %v11371_v4 = vmov 0.0  }
 0x7a6   :  { %2713 = vmatprep.subr.mxu0 %v8342_v30  ;;  %2784 = vmatprep.subr.mxu1 %v8348_v5  ;;  %v11372_v30 = vld [vmem:[#allocation27_spill] sm:$0xff]  ;;  %v11373_v5 = vld [vmem:[#allocation28_spill] sm:$0xff] }
 0x7a7   :  { %2714 = vmatpush1.msra.mxu0 %v8354_v8  ;;  %2785 = vmatpush1.msra.mxu1 %v8360_v58  ;;  %v11374_v8 = vld [vmem:[#allocation29_spill] sm:$0xff]  ;;  %v11375_v58 = vld [vmem:[#allocation30_spill] sm:$0xff] }
 0x7a8   :  { %2715 = vmatprep.subr.mxu0 %v8366_v6  ;;  %2786 = vmatprep.subr.mxu1 %v8372_v55  ;;  %v11376_v6 = vld [vmem:[#allocation31_spill] sm:$0xff]  ;;  %v11377_v55 = vld [vmem:[#allocation32_spill] sm:$0xff] }
 0x7a9   :  { %2716 = vmatpush1.msra.mxu0 %v8378_v38  ;;  %2787 = vmatpush1.msra.mxu1 %v8384_v59  ;;  %v11378_v38 = vld [vmem:[#allocation33_spill] sm:$0xff]  ;;  %v11379_v59 = vld [vmem:[#allocation34_spill] sm:$0xff] }
 0x7aa   :  { %2717 = vmatprep.subr.mxu0 %v8390_v20  ;;  %2788 = vmatprep.subr.mxu1 %v8396_v11  ;;  %v11380_v20 = vld [vmem:[#allocation35_spill] sm:$0xff]  ;;  %v11381_v11 = vld [vmem:[#allocation36_spill] sm:$0xff] }
 0x7ab   :  { %2718 = vmatpush1.msra.mxu0 %v8402_v1  ;;  %2789 = vmatpush1.msra.mxu1 %v8408_v12  ;;  %v11382_v1 = vld [vmem:[#allocation37_spill] sm:$0xff]  ;;  %v11383_v12 = vld [vmem:[#allocation38_spill] sm:$0xff] }
 0x7ac   :  { %2719 = vmatprep.subr.mxu0 %v8414_v13  ;;  %2790 = vmatprep.subr.mxu1 %v8420_v15  ;;  %v11384_v13 = vld [vmem:[#allocation39_spill] sm:$0xff]  ;;  %v11385_v15 = vld [vmem:[#allocation40_spill] sm:$0xff] }
 0x7ad   :  { %2720 = vmatpush1.msra.mxu0 %v8426_v16  ;;  %2791 = vmatpush1.msra.mxu1 %v8432_v19  ;;  %v11386_v16 = vld [vmem:[#allocation41_spill] sm:$0xff]  ;;  %v11387_v19 = vld [vmem:[#allocation42_spill] sm:$0xff] }
 0x7ae   :  { %2721 = vmatprep.subr.mxu0 %v8438_v27  ;;  %2792 = vmatprep.subr.mxu1 %v8444_v26  ;;  %v11388_v27 = vld [vmem:[#allocation43_spill] sm:$0xff]  ;;  %v11389_v26 = vld [vmem:[#allocation44_spill] sm:$0xff] }
 0x7af   :  { %2722 = vmatpush1.msra.mxu0 %v8450_v43  ;;  %2793 = vmatpush1.msra.mxu1 %v8456_v33  ;;  %v11390_v43 = vld [vmem:[#allocation45_spill] sm:$0xff]  ;;  %v11391_v33 = vld [vmem:[#allocation46_spill] sm:$0xff] }
 0x7b0   :  { %2723 = vmatprep.subr.mxu0 %v8462_v23  ;;  %2794 = vmatprep.subr.mxu1 %v8468_v36  ;;  %v11392_v23 = vld [vmem:[#allocation47_spill] sm:$0xff]  ;;  %v11393_v36 = vld [vmem:[#allocation48_spill] sm:$0xff] }
 0x7b1   :  { %2724 = vmatpush1.msra.mxu0 %v8474_v22  ;;  %2795 = vmatpush1.msra.mxu1 %v8480_v21  ;;  %v11394_v22 = vld [vmem:[#allocation49_spill] sm:$0xff]  ;;  %v11395_v21 = vld [vmem:[#allocation50_spill] sm:$0xff] }
 0x7b2   :  { %2725 = vmatprep.subr.mxu0 %v11352_v10  ;;  %2796 = vmatprep.subr.mxu1 %v11353_v2  ;;  %v11413_v10 = vld [vmem:[#allocation68_spill] sm:$0xff]  ;;  %v11414_v2 = vld [vmem:[#allocation69_spill] sm:$0xff] }
 0x7b3   :  { %2726 = vmatpush1.msra.mxu0 %v11354_v45  ;;  %2797 = vmatpush1.msra.mxu1 %v11355_v52  ;;  %v11415_v45 = vld [vmem:[#allocation70_spill] sm:$0xff]  ;;  %v11416_v52 = vld [vmem:[#allocation71_spill] sm:$0xff] }
 0x7b4   :  { %2727 = vmatprep.subr.mxu0 %v11356_v46  ;;  %2798 = vmatprep.subr.mxu1 %v11357_v47  ;;  %v11417_v46 = vld [vmem:[#allocation72_spill] sm:$0xff]  ;;  %v11418_v47 = vld [vmem:[#allocation73_spill] sm:$0xff] }
 0x7b5   :  { %2728 = vmatpush1.msra.mxu0 %v11358_v48  ;;  %2799 = vmatpush1.msra.mxu1 %v11359_v56  ;;  %v11419_v48 = vld [vmem:[#allocation74_spill] sm:$0xff]  ;;  %v11420_v56 = vld [vmem:[#allocation75_spill] sm:$0xff] }
 0x7b6   :  { %2729 = vmatprep.subr.mxu0 %v11360_v60  ;;  %2800 = vmatprep.subr.mxu1 %v11361_v57  ;;  %v11421_v60 = vld [vmem:[#allocation76_spill] sm:$0xff]  ;;  %v11422_v57 = vld [vmem:[#allocation77_spill] sm:$0xff] }
 0x7b7   :  { %2730 = vmatpush1.msra.mxu0 %v11362_v49  ;;  %2801 = vmatpush1.msra.mxu1 %v11363_v50  ;;  %v11423_v49 = vld [vmem:[#allocation78_spill] sm:$0xff]  ;;  %v11424_v50 = vld [vmem:[#allocation79_spill] sm:$0xff] }
 0x7b8   :  { %2731 = vmatprep.subr.mxu0 %v11364_v17  ;;  %2802 = vmatprep.subr.mxu1 %v11365_v3  ;;  %v11425_v17 = vld [vmem:[#allocation80_spill] sm:$0xff]  ;;  %v11426_v3 = vld [vmem:[#allocation81_spill] sm:$0xff] }
 0x7b9   :  { %2732 = vmatpush1.msra.mxu0 %v11366_v61  ;;  %2803 = vmatpush1.msra.mxu1 %v11367_v9  ;;  %v11427_v61 = vld [vmem:[#allocation82_spill] sm:$0xff]  ;;  %v11428_v9 = vld [vmem:[#allocation83_spill] sm:$0xff] }
 0x7ba   :  { %2733 = vmatprep.subr.mxu0 %v11368_v51  ;;  %2804 = vmatprep.subr.mxu1 %v11369_v63  ;;  %v11429_v51 = vld [vmem:[#allocation84_spill] sm:$0xff]  ;;  %v11430_v63 = vld [vmem:[#allocation85_spill] sm:$0xff] }
 0x7bb   :  { %2734 = vmatpush1.msra.mxu0 %v11370_v14  ;;  %2767 = vmatprep.mubr.f32.mxu0 %v11371_v4  ;;  %v11431_v14 = vld [vmem:[#allocation86_spill] sm:$0xff] }
 0x7bc   :  { %2805 = vmatpush1.msra.mxu1 %v11372_v30  ;;  %2838 = vmatprep.mubr.f32.mxu1 %v11371_v4  ;;  %v11432_v30 = vld [vmem:[#allocation87_spill] sm:$0xff] }
 0x7bd   :  { %2768 = vmatmul.mubr.f32.vlgmr.msra.gmra.mxu0 %v9394_v29  ;;  %2839 = vmatmul.mubr.f32.vlgmr.msra.gmra.mxu1 %v9394_v29  ;;  %v11412_v29 = vld [vmem:[#allocation67_spill] sm:$0xff] }
 0x7be   :  { %2893 = vmatprep.subr.mxu0 %v11373_v5  ;;  %2964 = vmatprep.subr.mxu1 %v11374_v8  ;;  %v11433_v5 = vld [vmem:[#allocation88_spill] sm:$0xff]  ;;  %v11434_v8 = vld [vmem:[#allocation89_spill] sm:$0xff] }
 0x7bf   :  { %2894 = vmatpush1.msra.mxu0 %v11375_v58  ;;  %2965 = vmatpush1.msra.mxu1 %v11376_v6  ;;  %v11435_v58 = vld [vmem:[#allocation90_spill] sm:$0xff]  ;;  %v11436_v6 = vld [vmem:[#allocation91_spill] sm:$0xff] }
 0x7c0   :  { %2895 = vmatprep.subr.mxu0 %v11377_v55  ;;  %2966 = vmatprep.subr.mxu1 %v11378_v38  ;;  %v11437_v55 = vld [vmem:[#allocation92_spill] sm:$0xff]  ;;  %v11438_v38 = vld [vmem:[#allocation93_spill] sm:$0xff] }
 0x7c1   :  { %2896 = vmatpush1.msra.mxu0 %v11379_v59  ;;  %2967 = vmatpush1.msra.mxu1 %v11380_v20  ;;  %v11439_v59 = vld [vmem:[#allocation94_spill] sm:$0xff]  ;;  %v11440_v20 = vld [vmem:[#allocation95_spill] sm:$0xff] }
 0x7c2   :  { %2897 = vmatprep.subr.mxu0 %v11381_v11  ;;  %2968 = vmatprep.subr.mxu1 %v11382_v1  ;;  %v11441_v11 = vld [vmem:[#allocation96_spill] sm:$0xff]  ;;  %v11442_v1 = vld [vmem:[#allocation97_spill] sm:$0xff] }
 0x7c3   :  { %2898 = vmatpush1.msra.mxu0 %v11383_v12  ;;  %2969 = vmatpush1.msra.mxu1 %v11384_v13  ;;  %v11443_v12 = vld [vmem:[#allocation98_spill] sm:$0xff]  ;;  %v11444_v13 = vld [vmem:[#allocation99_spill] sm:$0xff] }
 0x7c4   :  { %2899 = vmatprep.subr.mxu0 %v11385_v15  ;;  %2970 = vmatprep.subr.mxu1 %v11386_v16  ;;  %v11445_v15 = vld [vmem:[#allocation100_spill] sm:$0xff]  ;;  %v11446_v16 = vld [vmem:[#allocation101_spill] sm:$0xff] }
 0x7c5   :  { %2900 = vmatpush1.msra.mxu0 %v11387_v19  ;;  %2971 = vmatpush1.msra.mxu1 %v11388_v27  ;;  %v11447_v19 = vld [vmem:[#allocation102_spill] sm:$0xff]  ;;  %v11448_v27 = vld [vmem:[#allocation103_spill] sm:$0xff] }
 0x7c6   :  { %2901 = vmatprep.subr.mxu0 %v11389_v26  ;;  %2972 = vmatprep.subr.mxu1 %v11390_v43  ;;  %v11449_v26 = vld [vmem:[#allocation104_spill] sm:$0xff]  ;;  %v11450_v43 = vld [vmem:[#allocation105_spill] sm:$0xff] }
 0x7c7   :  { %2902 = vmatpush1.msra.mxu0 %v11391_v33  ;;  %2973 = vmatpush1.msra.mxu1 %v11392_v23  ;;  %v11451_v33 = vld [vmem:[#allocation106_spill] sm:$0xff]  ;;  %v11452_v23 = vld [vmem:[#allocation107_spill] sm:$0xff] }
 0x7c8   :  { %2903 = vmatprep.subr.mxu0 %v11393_v36  ;;  %2974 = vmatprep.subr.mxu1 %v11394_v22  ;;  %v11453_v36 = vld [vmem:[#allocation108_spill] sm:$0xff]  ;;  %v11454_v22 = vld [vmem:[#allocation109_spill] sm:$0xff] }
 0x7c9   :  { %2904 = vmatpush1.msra.mxu0 %v11395_v21  ;;  %2975 = vmatpush1.msra.mxu1 %v11396_v34  ;;  %v11455_v21 = vld [vmem:[#allocation110_spill] sm:$0xff]  ;;  %v11456_v34 = vld [vmem:[#allocation111_spill] sm:$0xff] }
 0x7ca   :  { %2905 = vmatprep.subr.mxu0 %v11397_v18  ;;  %2976 = vmatprep.subr.mxu1 %v11398_v54  ;;  %v11457_v18 = vld [vmem:[#allocation112_spill] sm:$0xff]  ;;  %v11458_v54 = vld [vmem:[#allocation113_spill] sm:$0xff] }
 0x7cb   :  { %2906 = vmatpush1.msra.mxu0 %v11399_v0  ;;  %2977 = vmatpush1.msra.mxu1 %v11400_v35  ;;  %v11459_v0 = vld [vmem:[#allocation114_spill] sm:$0xff]  ;;  %v11460_v35 = vld [vmem:[#allocation115_spill] sm:$0xff] }
 0x7cc   :  { %2907 = vmatprep.subr.mxu0 %v11401_v44  ;;  %2978 = vmatprep.subr.mxu1 %v11402_v25  ;;  %v11461_v44 = vld [vmem:[#allocation116_spill] sm:$0xff]  ;;  %v11462_v25 = vld [vmem:[#allocation117_spill] sm:$0xff] }
 0x7cd   :  { %2908 = vmatpush1.msra.mxu0 %v11403_v62  ;;  %2979 = vmatpush1.msra.mxu1 %v11404_v53  ;;  %v11463_v62 = vld [vmem:[#allocation118_spill] sm:$0xff]  ;;  %v11464_v53 = vld [vmem:[#allocation119_spill] sm:$0xff] }
 0x7ce   :  { %2909 = vmatprep.subr.mxu0 %v11405_v39  ;;  %2980 = vmatprep.subr.mxu1 %v11406_v41  ;;  %v11465_v39 = vld [vmem:[#allocation120_spill] sm:$0xff]  ;;  %v11466_v41 = vld [vmem:[#allocation121_spill] sm:$0xff] }
 0x7cf   :  { %2910 = vmatpush1.msra.mxu0 %v11407_v7  ;;  %2981 = vmatpush1.msra.mxu1 %v11408_v28  ;;  %v11467_v7 = vld [vmem:[#allocation122_spill] sm:$0xff]  ;;  %v11468_v28 = vld [vmem:[#allocation123_spill] sm:$0xff] }
 0x7d0   :  { %2911 = vmatprep.subr.mxu0 %v11409_v42  ;;  %2982 = vmatprep.subr.mxu1 %v11410_v24  ;;  %v11469_v42 = vld [vmem:[#allocation124_spill] sm:$0xff]  ;;  %v11470_v24 = vld [vmem:[#allocation125_spill] sm:$0xff] }
 0x7d1   :  { %2912 = vmatpush1.msra.mxu0 %v11411_v40  ;;  %2983 = vmatpush1.msra.mxu1 %v11412_v29  ;;  %v11471_v40 = vld [vmem:[#allocation126_spill] sm:$0xff]  ;;  %v11472_v29 = vld [vmem:[#allocation127_spill] sm:$0xff] }
 0x7d2   :  { %2913 = vmatprep.subr.mxu0 %v11413_v10  ;;  %2984 = vmatprep.subr.mxu1 %v11414_v2  ;;  %v11473_v10 = vld [vmem:[#allocation128_spill] sm:$0xff]  ;;  %v11474_v2 = vld [vmem:[#allocation129_spill] sm:$0xff] }
 0x7d3   :  { %2914 = vmatpush1.msra.mxu0 %v11415_v45  ;;  %2985 = vmatpush1.msra.mxu1 %v11416_v52  ;;  %v11475_v45 = vld [vmem:[#allocation130_spill] sm:$0xff]  ;;  %v11476_v52 = vld [vmem:[#allocation131_spill] sm:$0xff] }
 0x7d4   :  { %2915 = vmatprep.subr.mxu0 %v11417_v46  ;;  %2986 = vmatprep.subr.mxu1 %v11418_v47  ;;  %v11477_v46 = vld [vmem:[#allocation132_spill] sm:$0xff]  ;;  %v11478_v47 = vld [vmem:[#allocation133_spill] sm:$0xff] }
 0x7d5   :  { %2916 = vmatpush1.msra.mxu0 %v11419_v48  ;;  %2987 = vmatpush1.msra.mxu1 %v11420_v56  ;;  %v11479_v48 = vld [vmem:[#allocation134_spill] sm:$0xff]  ;;  %v11480_v56 = vld [vmem:[#allocation135_spill] sm:$0xff] }
 0x7d6   :  { %2917 = vmatprep.subr.mxu0 %v11421_v60  ;;  %2988 = vmatprep.subr.mxu1 %v11422_v57  ;;  %v11481_v60 = vld [vmem:[#allocation136_spill] sm:$0xff]  ;;  %v11482_v57 = vld [vmem:[#allocation137_spill] sm:$0xff] }
 0x7d7   :  { %2918 = vmatpush1.msra.mxu0 %v11423_v49  ;;  %2989 = vmatpush1.msra.mxu1 %v11424_v50  ;;  %v11483_v49 = vld [vmem:[#allocation138_spill] sm:$0xff]  ;;  %v11484_v50 = vld [vmem:[#allocation139_spill] sm:$0xff] }
 0x7d8   :  { %2919 = vmatprep.subr.mxu0 %v11425_v17  ;;  %2990 = vmatprep.subr.mxu1 %v11426_v3  ;;  %v11485_v17 = vld [vmem:[#allocation140_spill] sm:$0xff]  ;;  %v11486_v3 = vld [vmem:[#allocation141_spill] sm:$0xff] }
 0x7d9   :  { %2920 = vmatpush1.msra.mxu0 %v11427_v61  ;;  %2991 = vmatpush1.msra.mxu1 %v11428_v9  ;;  %v11487_v61 = vld [vmem:[#allocation142_spill] sm:$0xff]  ;;  %v11488_v9 = vld [vmem:[#allocation143_spill] sm:$0xff] }
 0x7da   :  { %2921 = vmatprep.subr.mxu0 %v11429_v51  ;;  %2992 = vmatprep.subr.mxu1 %v11430_v63  ;;  %v11489_v51 = vld [vmem:[#allocation144_spill] sm:$0xff]  ;;  %v11490_v63 = vld [vmem:[#allocation145_spill] sm:$0xff] }
 0x7db   :  { %2922 = vmatpush1.msra.mxu0 %v11431_v14  ;;  %2993 = vmatpush1.msra.mxu1 %v11432_v30  ;;  %v11491_v14 = vld [vmem:[#allocation146_spill] sm:$0xff]  ;;  %v11492_v30 = vld [vmem:[#allocation147_spill] sm:$0xff] }
 0x7dc   :  { %2923 = vmatprep.subr.mxu0 %v11433_v5  ;;  %2994 = vmatprep.subr.mxu1 %v11434_v8  ;;  %v11493_v5 = vld [vmem:[#allocation148_spill] sm:$0xff]  ;;  %v11494_v8 = vld [vmem:[#allocation149_spill] sm:$0xff] }
 0x7dd   :  { %2924 = vmatpush1.msra.mxu0 %v11435_v58  ;;  %2995 = vmatpush1.msra.mxu1 %v11436_v6  ;;  %v11495_v58 = vld [vmem:[#allocation150_spill] sm:$0xff]  ;;  %v11496_v6 = vld [vmem:[#allocation152_spill] sm:$0xff] }
 0x7de   :  { %2925 = vmatprep.subr.mxu0 %v11437_v55  ;;  %2996 = vmatprep.subr.mxu1 %v11438_v38  ;;  %v11497_v55 = vld [vmem:[#allocation153_spill] sm:$0xff]  ;;  %v11498_v38 = vld [vmem:[#allocation154_spill] sm:$0xff] }
 0x7df   :  { %2926 = vmatpush2.msra.mxu0 %v11439_v59  ;;  %2997 = vmatpush2.msra.mxu1 %v11440_v20  ;;  %v11499_v59 = vld [vmem:[#allocation155_spill] sm:$0xff]  ;;  %v11500_v20 = vld [vmem:[#allocation156_spill] sm:$0xff] }
 0x7e0   :  { %2927 = vmatprep.subr.mxu0 %v11441_v11  ;;  %2998 = vmatprep.subr.mxu1 %v11442_v1  ;;  %v11501_v1 = vld [vmem:[#allocation5_spill] sm:$0xff] }
 0x7e1   :  { %2928 = vmatpush2.msra.mxu0 %v11443_v12  ;;  %2999 = vmatpush2.msra.mxu1 %v11444_v13 }
 0x7e2   :  { %2929 = vmatprep.subr.mxu0 %v11445_v15  ;;  %3000 = vmatprep.subr.mxu1 %v11446_v16 }
 0x7e3   :  { %2930 = vmatpush2.msra.mxu0 %v11447_v19  ;;  %3001 = vmatpush2.msra.mxu1 %v11448_v27 }
 0x7e4   :  { %2931 = vmatprep.subr.mxu0 %v11449_v26  ;;  %3002 = vmatprep.subr.mxu1 %v11450_v43  ;;  %v11502_v26 = vld [vmem:[#allocation6_spill] sm:$0xff] }
 0x7e5   :  { %2932 = vmatpush2.msra.mxu0 %v11451_v33  ;;  %3003 = vmatpush2.msra.mxu1 %v11452_v23  ;;  %v11503_v23 = vld [vmem:[#allocation7_spill] sm:$0xff] }
 0x7e6   :  { %2933 = vmatprep.subr.mxu0 %v11453_v36  ;;  %3004 = vmatprep.subr.mxu1 %v11454_v22 }
 0x7e7   :  { %2934 = vmatpush2.msra.mxu0 %v11455_v21  ;;  %3005 = vmatpush2.msra.mxu1 %v11456_v34 }
 0x7e8   :  { %2935 = vmatprep.subr.mxu0 %v11457_v18  ;;  %3006 = vmatprep.subr.mxu1 %v11458_v54 }
 0x7e9   :  { %2936 = vmatpush2.msra.mxu0 %v11459_v0  ;;  %3007 = vmatpush2.msra.mxu1 %v11460_v35 }
 0x7ea   :  { %2937 = vmatprep.subr.mxu0 %v11461_v44  ;;  %3008 = vmatprep.subr.mxu1 %v11462_v25 }
 0x7eb   :  { %2938 = vmatpush2.msra.mxu0 %v11463_v62  ;;  %3009 = vmatpush2.msra.mxu1 %v11464_v53 }
 0x7ec   :  { %2939 = vmatprep.subr.mxu0 %v11465_v39  ;;  %3010 = vmatprep.subr.mxu1 %v11466_v41 }
 0x7ed   :  { %2940 = vmatpush2.msra.mxu0 %v11467_v7  ;;  %3011 = vmatpush2.msra.mxu1 %v11468_v28 }
 0x7ee   :  { %2941 = vmatprep.subr.mxu0 %v11469_v42  ;;  %3012 = vmatprep.subr.mxu1 %v11470_v24 }
 0x7ef   :  { %2942 = vmatpush2.msra.mxu0 %v11471_v40  ;;  %3013 = vmatpush2.msra.mxu1 %v11472_v29 }
 0x7f0   :  { %2943 = vmatprep.subr.mxu0 %v11473_v10  ;;  %3014 = vmatprep.subr.mxu1 %v11474_v2  ;;  %v11504_v10 = vld [vmem:[#allocation151_spill] sm:$0xff] }
 0x7f1   :  { %2944 = vmatpush2.msra.mxu0 %v11475_v45  ;;  %3015 = vmatpush2.msra.mxu1 %v11476_v52 }
 0x7f2   :  { %2945 = vmatprep.subr.mxu0 %v11477_v46  ;;  %3016 = vmatprep.subr.mxu1 %v11478_v47 }
 0x7f3   :  { %2946 = vmatpush2.msra.mxu0 %v11479_v48  ;;  %3017 = vmatpush2.msra.mxu1 %v11480_v56 }
 0x7f4   :  { %2947 = vmatprep.subr.mxu0 %v11481_v60  ;;  %3018 = vmatprep.subr.mxu1 %v11482_v57 }
 0x7f5   :  { %2948 = vmatpush2.msra.mxu0 %v11483_v49  ;;  %3019 = vmatpush2.msra.mxu1 %v11484_v50 }
 0x7f6   :  { %2949 = vmatprep.subr.mxu0 %v11485_v17  ;;  %3020 = vmatprep.subr.mxu1 %v11486_v3 }
 0x7f7   :  { %2950 = vmatpush2.msra.mxu0 %v11487_v61  ;;  %3021 = vmatpush2.msra.mxu1 %v11488_v9 }
 0x7f8   :  { %2951 = vmatprep.subr.mxu0 %v11489_v51  ;;  %3022 = vmatprep.subr.mxu1 %v11490_v63 }
 0x7f9   :  { %2952 = vmatpush2.msra.mxu0 %v11491_v14  ;;  %3023 = vmatpush2.msra.mxu1 %v11492_v30 }
 0x7fa   :  { %2953 = vmatprep.subr.mxu0 %v11493_v5  ;;  %3024 = vmatprep.subr.mxu1 %v11494_v8 }
 0x7fb   :  { %2954 = vmatpush2.msra.mxu0 %v11495_v58  ;;  %3025 = vmatpush2.msra.mxu1 %v11496_v6 }
 0x7fc   :  { %2955 = vmatprep.subr.mxu0 %v11497_v55  ;;  %3026 = vmatprep.subr.mxu1 %v11498_v38 }
 0x7fd   :  { %2956 = vmatpush2.msra.mxu0 %v11499_v59  ;;  %3027 = vmatpush2.msra.mxu1 %v11500_v20 }
 0x7fe   :  { %3187 = vmatprep.subr.mxu0 %v11371_v4 }
 0x85c   :  { %v2607_v11 = vpop.f32.mrf.mxu0  ;;  %v2678_v19 = vpop.f32.mrf.mxu1 }
 0x85d   :  { %v2608_v12 = vadd.f32 %v2607_v11, %v11501_v1  ;;  %v2679_v43 = vadd.f32 %v2678_v19, %v11502_v26  ;;  %v3063_v19 = vld [vmem:[%s9686_s4 + $0x50] sm:$0xff] }
 0x85e   :  { %v2609_v13 = vpop.f32.mrf.mxu0  ;;  %v2680_v33 = vpop.f32.mrf.mxu1 }
 0x85f   :  { %v2683_v15 = vmul.f32 0.5, %v2608_v12  ;;  %v2610_v16 = vadd.f32 %v2609_v13, %v5416_v32  ;;  %v2681_v36 = vadd.f32 %v2680_v33, %v11503_v23  ;;  %v3068_v12 = vld [vmem:[%s9686_s4 + $0x78] sm:$0xff]  ;;  %v3066_v13 = vld [vmem:[%s9686_s4 + $0x68] sm:$0xff] }
 0x860   :  { %v3060_v33 = vld [vmem:[%s9686_s4 + $0x38] sm:$0xff] }
 0x861   :  { %3356 = vtanh.f32 %v2683_v15  ;;  %v2687_v27 = vmul.f32 0.5, %v2610_v16  ;;  %v2692_v22 = vmul.f32 0.5, %v2681_v36  ;;  %v3065_v15 = vld [vmem:[%s9686_s4 + $0x60] sm:$0xff]  ;;  %v3064_v16 = vld [vmem:[%s9686_s4 + $0x58] sm:$0xff]  ;;  %v3059_v36 = vld [vmem:[%s9686_s4 + $0x30] sm:$0xff] }
 0x863   :  { %3358 = vtanh.f32 %v2687_v27  ;;  %v3062_v27 = vld [vmem:[%s9686_s4 + $0x48] sm:$0xff] }
 0x864   :  { %3360 = vtanh.f32 %v2679_v43  ;;  %v3061_v43 = vld [vmem:[%s9686_s4 + $0x40] sm:$0xff] }
 0x865   :  { %3362 = vtanh.f32 %v2692_v22  ;;  %v3058_v22 = vld [vmem:[%s9686_s4 + $0x28] sm:$0xff] }
 0x86e   :  { %v3357_v21 = vpop.eup %3356 }
 0x86f   :  { %v2685_v34 = vmul.f32 0.5, %v3357_v21  ;;  %v3057_v21 = vld [vmem:[%s9686_s4 + $0x20] sm:$0xff] }
 0x870   :  { %v3359_v18 = vpop.eup %3358 }
 0x871   :  { %v2686_v54 = vadd.f32 0.5, %v2685_v34  ;;  %v2689_v0 = vmul.f32 0.5, %v3359_v18  ;;  %v3361_v44 = vpop.eup %3360  ;;  %v3056_v34 = vld [vmem:[%s9686_s4 + $0x18] sm:$0xff]  ;;  %v3055_v18 = vld [vmem:[%s9686_s4 + $0x10] sm:$0xff] }
 0x872   :  { %v3363_v7 = vpop.eup %3362 }
 0x873   :  { %v2690_v35 = vadd.f32 0.5, %v2689_v0  ;;  %v2697_v62 = vmul.f32 %v3361_v44, %v2686_v54  ;;  %v2694_v29 = vmul.f32 0.5, %v3363_v7  ;;  %v3054_v54 = vld [vmem:[%s9686_s4 + $0x8] sm:$0xff]  ;;  %v3053_v0 = vld [vmem:[%s9686_s4] sm:$0xff] }
 0x875   :  { %v2696_v25 = vmul.f32 %v2690_v35, %v9382_v31  ;;  %v3168_v31 = vld [vmem:[%s9682_s0 + $0x38] sm:$0xff]  ;;  %v2695_v46 = vadd.f32 0.5, %v2694_v29 }
 0x877   :  { %v9598_v53 = vadd.f32 %v2697_v62, %v2696_v25 }
 0x879   :  { %3364 = vtanh.f32 %v9598_v53 }
 0x87d   :  { %v2769_v39 = vpop.f32.mrf.mxu0  ;;  %v2840_v41 = vpop.f32.mrf.mxu1 }
 0x87f   :  { %v2771_v28 = vpop.f32.mrf.mxu0  ;;  %v2842_v42 = vpop.f32.mrf.mxu1 }
 0x880   :  { %v2849_v24 = vcombine.low %v2769_v39, %v2771_v28  ;;  %v2850_v40 = vcombine.low %v2840_v41, %v2842_v42 }
 0x882   :  { %v2857_v2 = vrot.slane %v2849_v24, %v11504_v10  ;;  %v2864_v45 = vrot.slane %v2850_v40, %v11504_v10 }
 0x884   :  { %v2865_v52 = vcombine.low %v2857_v2, %v2864_v45 }
 0x886   :  { %v3365_v47 = vpop.eup %3364  ;;  %v2867_v48 = vadd.f32 %v3168_v31, %v2865_v52 }
 0x887   :  { %v2700_v56 = vmul.f32 %v3365_v47, %v2695_v46 }
 0x888   :  { %v2868_v60 = vmul.f32 0.5, %v2867_v48  ;;  %v2873_v57 = vrot.slane %v2867_v48, 2  ;;  %v2879_v50 = vrot.slane %v2867_v48, 4  ;;  %v2882_v17 = vrot.slane %v2867_v48, 6 }
 0x889   :  { %2957 = vmatprep.mubr.f32.mxu0 %v2700_v56  ;;  %3028 = vmatprep.mubr.f32.mxu1 %v2700_v56 }
 0x88a   :  { %3366 = vtanh.f32 %v2868_v60  ;;  %v2875_v49 = vmul.f32 0.5, %v2873_v57  ;;  %v2884_v3 = vmul.f32 0.5, %v2882_v17 }
 0x88c   :  { %3368 = vtanh.f32 %v2875_v49 }
 0x88d   :  { %3370 = vtanh.f32 %v2879_v50 }
 0x88e   :  { %3372 = vtanh.f32 %v2884_v3 }
 0x897   :  { %v3367_v61 = vpop.eup %3366 }
 0x898   :  { %v2870_v9 = vmul.f32 0.5, %v3367_v61 }
 0x899   :  { %v3369_v51 = vpop.eup %3368 }
 0x89a   :  { %v2871_v63 = vadd.f32 0.5, %v2870_v9  ;;  %v2877_v14 = vmul.f32 0.5, %v3369_v51  ;;  %v3371_v5 = vpop.eup %3370 }
 0x89b   :  { %v3373_v55 = vpop.eup %3372 }
 0x89c   :  { %v2878_v30 = vadd.f32 0.5, %v2877_v14  ;;  %v2889_v58 = vmul.f32 %v3371_v5, %v2871_v63  ;;  %v2886_v38 = vmul.f32 0.5, %v3373_v55 }
 0x89e   :  { %v2888_v8 = vmul.f32 %v2878_v30, %v9391_v37  ;;  %v2887_v59 = vadd.f32 0.5, %v2886_v38  ;;  %v3067_v37 = vld [vmem:[%s9686_s4 + $0x70] sm:$0xff] }
 0x8a0   :  { %v2890_v6 = vadd.f32 %v2889_v58, %v2888_v8 }
 0x8a2   :  { %3374 = vtanh.f32 %v2890_v6 }
 0x8af   :  { %v3375_v20 = vpop.eup %3374 }
 0x8b0   :  { %v2892_v11 = vmul.f32 %v3375_v20, %v2887_v59 }
 0x8b2   :  { %2958 = vmatmul.mubr.f32.vlgmr.msra.gmra.mxu0 %v2892_v11  ;;  %3029 = vmatmul.mubr.f32.vlgmr.msra.gmra.mxu1 %v2892_v11 }
 0x8b3   :  { %3188 = vmatpush3.msra.mxu0 %v3068_v12  ;;  %3219 = vmatprep.mubr.msk.f32.mxu0 %vm3988_vm0, %v11371_v4 }
 0x8b4   :  { %3189 = vmatprep.subr.mxu0 %v11371_v4 }
 0x8b5   :  { %3190 = vmatpush3.msra.mxu0 %v3067_v37 }
 0x8b6   :  { %3191 = vmatprep.subr.mxu0 %v11371_v4 }
 0x8b7   :  { %3192 = vmatpush3.msra.mxu0 %v3066_v13 }
 0x8b8   :  { %3193 = vmatprep.subr.mxu0 %v11371_v4 }
 0x8b9   :  { %3194 = vmatpush3.msra.mxu0 %v3065_v15 }
 0x8ba   :  { %3195 = vmatprep.subr.mxu0 %v11371_v4 }
 0x8bb   :  { %3196 = vmatpush3.msra.mxu0 %v3064_v16 }
 0x8bc   :  { %3197 = vmatprep.subr.mxu0 %v11371_v4 }
 0x8bd   :  { %3198 = vmatpush3.msra.mxu0 %v3063_v19 }
 0x8be   :  { %3199 = vmatprep.subr.mxu0 %v11371_v4 }
 0x8bf   :  { %3200 = vmatpush3.msra.mxu0 %v3062_v27 }
 0x8c0   :  { %3201 = vmatprep.subr.mxu0 %v11371_v4 }
 0x8c1   :  { %3202 = vmatpush3.msra.mxu0 %v3061_v43 }
 0x8c2   :  { %3203 = vmatprep.subr.mxu0 %v11371_v4 }
 0x8c3   :  { %3204 = vmatpush3.msra.mxu0 %v3060_v33 }
 0x8c4   :  { %3205 = vmatprep.subr.mxu0 %v11371_v4 }
 0x8c5   :  { %3206 = vmatpush3.msra.mxu0 %v3059_v36 }
 0x8c6   :  { %3207 = vmatprep.subr.mxu0 %v11371_v4 }
 0x8c7   :  { %3208 = vmatpush3.msra.mxu0 %v3058_v22 }
 0x8c8   :  { %3209 = vmatprep.subr.mxu0 %v11371_v4 }
 0x8c9   :  { %3210 = vmatpush3.msra.mxu0 %v3057_v21 }
 0x8ca   :  { %3211 = vmatprep.subr.mxu0 %v11371_v4 }
 0x8cb   :  { %3212 = vmatpush3.msra.mxu0 %v3056_v34 }
 0x8cc   :  { %3213 = vmatprep.subr.mxu0 %v11371_v4 }
 0x8cd   :  { %3214 = vmatpush3.msra.mxu0 %v3055_v18 }
 0x8ce   :  { %3215 = vmatprep.subr.mxu0 %v11371_v4 }
 0x8cf   :  { %3216 = vmatpush3.msra.mxu0 %v3054_v54 }
 0x8d0   :  { %3217 = vmatprep.subr.mxu0 %v11371_v4 }
 0x8d1   :  { %3218 = vmatpush3.msra.mxu0 %v3053_v0 }
 0x972   :  { %v2959_v35 = vpop.f32.mrf.mxu0  ;;  %v3030_v41 = vpop.f32.mrf.mxu1 }
 0x973   :  { %v2960_v44 = vadd.f32 %v2959_v35, %v11501_v1  ;;  %v3031_v28 = vadd.f32 %v3030_v41, %v11502_v26 }
 0x974   :  { %v2961_v25 = vpop.f32.mrf.mxu0  ;;  %v3032_v42 = vpop.f32.mrf.mxu1 }
 0x975   :  { %v3035_v62 = vmul.f32 0.5, %v2960_v44  ;;  %v2962_v39 = vadd.f32 %v2961_v25, %v5416_v32  ;;  %v3033_v24 = vadd.f32 %v3032_v42, %v11503_v23  ;;  %v3169_v23 = vld [vmem:[%s9687_s5] ss:$0 sm:$0xff] }
 0x977   :  { %3376 = vtanh.f32 %v3035_v62  ;;  %v3039_v7 = vmul.f32 0.5, %v2962_v39  ;;  %v3044_v40 = vmul.f32 0.5, %v3033_v24 }
 0x979   :  { %3378 = vtanh.f32 %v3039_v7 }
 0x97a   :  { %3380 = vtanh.f32 %v3031_v28 }
 0x97b   :  { %3382 = vtanh.f32 %v3044_v40 }
 0x984   :  { %v3377_v4 = vpop.eup %3376 }
 0x985   :  { %v3037_v29 = vmul.f32 0.5, %v3377_v4 }
 0x986   :  { %v3379_v10 = vpop.eup %3378 }
 0x987   :  { %v3038_v2 = vadd.f32 0.5, %v3037_v29  ;;  %v3041_v1 = vmul.f32 0.5, %v3379_v10  ;;  %v3381_v31 = vpop.eup %3380 }
 0x988   :  { %v3383_v26 = vpop.eup %3382 }
 0x989   :  { %v3042_v45 = vadd.f32 0.5, %v3041_v1  ;;  %v3049_v52 = vmul.f32 %v3381_v31, %v3038_v2  ;;  %v3046_v47 = vmul.f32 0.5, %v3383_v26 }
 0x98b   :  { %v3048_v32 = vmul.f32 %v3042_v45, %v9598_v53  ;;  %v3047_v48 = vadd.f32 0.5, %v3046_v47 }
 0x98d   :  { %v3050_v46 = vadd.f32 %v3049_v52, %v3048_v32 }
 0x98f   :  { %3384 = vtanh.f32 %v3050_v46 }
 0x99c   :  { %v3385_v56 = vpop.eup %3384 }
 0x99d   :  { %v3052_v60 = vmul.f32 %v3385_v56, %v3047_v48 }
 0x99f   :  { %3220 = vmatmul.mubr.f32.vlgmr.msra.gmra.mxu0 %v3052_v60 }
 0xa5f   :  { %v3142_v57 = vpop.f32.mrf.mxu0 }
 0xa60   :  { %v3143_v49 = vadd.f32 %v3169_v23, %v3142_v57 }
 0xa61   :  { %v3221_v50 = vpop.f32.mrf.mxu0 }
 0xa62   :  { %3386 = vtanh.f32 %v3143_v49 }
 0xa6f   :  { %v3387_v53 = vpop.eup %3386 }
 0xa70   :  { %3147 = vst [vmem:[#allocation2] sm:$0x3] %v3387_v53 }
 0xa71   :  { %3975 = shalt.err (!%p3972_p4)
}
 0xa72   :  { %3157 = dma.vmem_to_hbm [thread:$0]  %s3155_s1, 32, %s9688_s6, [#allocation3]  }
 0xa73   :  { %3984 = dma.done.wait [#allocation3], 32  }
 0xa74   :  { %3985 = vsyncadd [#allocation3], 4294967264 }
 0xa75   :  { %3161 = vsyncpa [#allocation3], 1 }

</bundles_post_ra>
